<compile_context>
chip_gen: v7x
topology: tpu7x:2x2x1
jax: 0.10.0
libtpu: 0.0.40
codegen_flags: <defaults>
</compile_context>

<pallas_src>
import functools

import jax
import jax.numpy as jnp
from jax import lax
from jax.experimental import pallas as pl
from jax.experimental.pallas import tpu as pltpu

_VMEM_LIMIT = 32 * 1024 * 1024   # safe on v5e/v6e (128 MiB) and v7x (64 MiB)
_NEG_SLOPE = 0.2
_BN_EPS = 1e-5


def _compiler_params():
    return pltpu.CompilerParams(
        dimension_semantics=("parallel",),
        vmem_limit_bytes=_VMEM_LIMIT,
    )


def _round_up(x, m):
    return ((x + m - 1) // m) * m


# ------------------------------ Pallas kernels ------------------------------

def _conv_taps(x_ref, w_ref, wq, mout):
    """Implicit-im2col conv as 4 ref-sliced GEMM taps on the s2d row matrix.

    x_ref : (1, Rp, K)   space-to-depth rows (row = i*wq + j), zero padded
    w_ref : (4, K, N)    tap weights, tap index t = dh*2 + dw
    Output row m = oh*wq + ow consumes input rows m + dh*wq + dw.
    """
    offs = (0, 1, wq, wq + 1)
    acc = jnp.dot(x_ref[0, pl.ds(offs[0], mout), :], w_ref[0],
                  preferred_element_type=jnp.float32)
    for t in range(1, 4):
        acc = acc + jnp.dot(x_ref[0, pl.ds(offs[t], mout), :], w_ref[t],
                            preferred_element_type=jnp.float32)
    return acc


def _conv_lrelu_kernel(x_ref, w_ref, o_ref, *, wq, mout, negative_slope):
    """Conv GEMM with fused LeakyReLU (layer 1, no BatchNorm)."""
    acc = _conv_taps(x_ref, w_ref, wq, mout)
    o_ref[0] = jnp.where(acc > 0, acc, negative_slope * acc).astype(o_ref.dtype)


def _conv_stats_kernel(x_ref, w_ref, o_ref, s_ref, ss_ref, *, wq, mout):
    """Conv GEMM (bf16 out) + fused per-channel BN sum / sum-of-squares taken
    from the f32 accumulator.  The garbage column (ow == wq-1) is masked out
    of the statistics; the wrapper drops it from the activation."""
    acc = _conv_taps(x_ref, w_ref, wq, mout)
    o_ref[0] = acc.astype(o_ref.dtype)
    col = lax.broadcasted_iota(jnp.int32, (mout, 1), 0) % wq
    valid = col != (wq - 1)
    yv = jnp.where(valid, acc, 0.0)
    s_ref[0] = jnp.sum(yv, axis=0, keepdims=True)
    ss_ref[0] = jnp.sum(yv * yv, axis=0, keepdims=True)


def _bn_lrelu_kernel(x_ref, scale_ref, shift_ref, o_ref, *, negative_slope):
    """y = x*scale + shift (folded BatchNorm) + LeakyReLU, bf16 in / bf16 out."""
    y = x_ref[0].astype(jnp.float32) * scale_ref[...] + shift_ref[...]
    o_ref[0] = jnp.where(y > 0, y, negative_slope * y).astype(o_ref.dtype)


def _head_kernel(x_ref, scale_ref, shift_ref, w_ref, o_ref, *, negative_slope):
    """Batched final stage: BN + LeakyReLU + Conv(256->1, 4x4 valid) as a VPU
    multiply + reduce over 8 images per grid step; lane-dense (8,128) store."""
    y = x_ref[...].astype(jnp.float32) * scale_ref[...][None] + shift_ref[...][None]
    y = jnp.where(y > 0, y, negative_slope * y)
    prod = y * w_ref[...][None]                 # (8, 20, 256)
    s = jnp.sum(prod, axis=2)                   # (8, 20)
    s = jnp.sum(s, axis=1)                      # (8,)
    o_ref[...] = jnp.broadcast_to(s[:, None], o_ref.shape)


# ------------------------------ kernel wrappers ------------------------------

def conv_s2d(z, wm, *, wq, mout, with_stats):
    """Implicit-im2col conv over the space-to-depth row matrix.

    z  : (B, Rp, K) bf16,  wm : (4, K, N) bf16 (N lane-dense, >=128).
    Grid over batch images ("parallel": both v7x TensorCores get work);
    weights stay resident in VMEM (constant index_map)."""
    b, rp, kp = z.shape
    _, kw, n = wm.shape
    x_spec = pl.BlockSpec((1, rp, kp), lambda i: (i, 0, 0))
    w_spec = pl.BlockSpec((4, kw, n), lambda i: (0, 0, 0))
    y_spec = pl.BlockSpec((1, mout, n), lambda i: (i, 0, 0))
    if with_stats:
        st_spec = pl.BlockSpec((1, 1, n), lambda i: (i, 0, 0))
        return pl.pallas_call(
            functools.partial(_conv_stats_kernel, wq=wq, mout=mout),
            grid=(b,),
            in_specs=[x_spec, w_spec],
            out_specs=(y_spec, st_spec, st_spec),
            out_shape=(jax.ShapeDtypeStruct((b, mout, n), jnp.bfloat16),
                       jax.ShapeDtypeStruct((b, 1, n), jnp.float32),
                       jax.ShapeDtypeStruct((b, 1, n), jnp.float32)),
            compiler_params=_compiler_params(),
        )(z, wm)
    return pl.pallas_call(
        functools.partial(_conv_lrelu_kernel, wq=wq, mout=mout,
                          negative_slope=_NEG_SLOPE),
        grid=(b,),
        in_specs=[x_spec, w_spec],
        out_specs=y_spec,
        out_shape=jax.ShapeDtypeStruct((b, mout, n), jnp.bfloat16),
        compiler_params=_compiler_params(),
    )(z, wm)


def bn_lrelu_apply(y, scale, shift):
    """Lane-dense bf16 BN-apply + LeakyReLU; scale/shift resident in VMEM."""
    b, m, n = y.shape
    return pl.pallas_call(
        functools.partial(_bn_lrelu_kernel, negative_slope=_NEG_SLOPE),
        grid=(b,),
        in_specs=[pl.BlockSpec((1, m, n), lambda i: (i, 0, 0)),
                  pl.BlockSpec((1, n), lambda i: (0, 0)),
                  pl.BlockSpec((1, n), lambda i: (0, 0))],
        out_specs=pl.BlockSpec((1, m, n), lambda i: (i, 0, 0)),
        out_shape=jax.ShapeDtypeStruct((b, m, n), jnp.bfloat16),
        compiler_params=_compiler_params(),
    )(y, scale, shift)


def final_head(y4, scale, shift, w5m, batch):
    """y4: (B, 20, 256) raw conv4 output (rows oh*5+ow, garbage at ow==4).
    Returns (B,) logits.  Processes 8 images per grid step."""
    tb = 8
    bp = _round_up(max(batch, 1), tb)
    if bp > batch:
        y4 = jnp.pad(y4, ((0, bp - batch), (0, 0), (0, 0)))
    m, n = w5m.shape
    out = pl.pallas_call(
        functools.partial(_head_kernel, negative_slope=_NEG_SLOPE),
        grid=(bp // tb,),
        in_specs=[pl.BlockSpec((tb, m, n), lambda g: (g, 0, 0)),
                  pl.BlockSpec((1, n), lambda g: (0, 0)),
                  pl.BlockSpec((1, n), lambda g: (0, 0)),
                  pl.BlockSpec((m, n), lambda g: (0, 0))],
        out_specs=pl.BlockSpec((tb, 128), lambda g: (g, 0)),
        out_shape=jax.ShapeDtypeStruct((bp, 128), jnp.float32),
        compiler_params=_compiler_params(),
    )(y4, scale, shift, w5m)
    return out[:batch, 0]


# ------------------------------- JAX glue ------------------------------------

def conv_input_s2d(x, *, k_pad=None):
    """NHWC activation -> zero-padded space-to-depth row matrix feeding the
    implicit-im2col conv kernel.  Pure layout plumbing (1x traffic) in XLA."""
    b, h, w, c = x.shape
    xp = jnp.pad(x, ((0, 0), (1, 1), (1, 1), (0, 0)))
    hq, wq = (h + 2) // 2, (w + 2) // 2
    z = xp.reshape(b, hq, 2, wq, 2, c).transpose(0, 1, 3, 2, 4, 5)
    z = z.reshape(b, hq * wq, 4 * c)
    rp = _round_up(hq * wq + 1, 16)                       # covers tap (1,1) reads
    pad_c = (k_pad - 4 * c) if (k_pad is not None and k_pad > 4 * c) else 0
    z = jnp.pad(z, ((0, 0), (0, rp - hq * wq), (0, pad_c)))
    return z.astype(jnp.bfloat16), hq, wq


def prep_conv_weight(w, *, k_pad=None, n_pad=None):
    """PyTorch (Cout, Cin, 4, 4) -> (4 taps, 4*Cin, Cout) matching the s2d
    channel order (a, b, c); zero-padded to lane-dense K / N, bf16."""
    cout, cin, kk, _ = w.shape
    assert kk == 4
    w6 = w.reshape(cout, cin, 2, 2, 2, 2)            # (co, c, dh, a, dw, b)
    w6 = jnp.transpose(w6, (2, 4, 3, 5, 1, 0))       # (dh, dw, a, b, c, co)
    wm = w6.reshape(4, 4 * cin, cout)
    kp = k_pad if k_pad is not None else 4 * cin
    npad = n_pad if n_pad is not None else cout
    wm = jnp.pad(wm, ((0, 0), (0, kp - 4 * cin), (0, npad - cout)))
    return wm.astype(jnp.bfloat16)


def prep_head_weight(w5):
    """(1, 256, 4, 4) -> (20, 256): row m = oh*5 + ow; rows at ow == 4 are zero
    so conv4's garbage output column contributes nothing to the logit."""
    w = jnp.transpose(w5.reshape(256, 4, 4), (1, 2, 0))   # (oh, ow, c)
    w = jnp.pad(w, ((0, 0), (0, 1), (0, 0)))              # (4, 5, 256)
    return w.reshape(20, 256).astype(jnp.float32)


def bn_fold(s, ss, gamma, beta, count, eps=_BN_EPS):
    """Finish the fused single-pass BN stats (tiny C-length XLA math) and fold
    into per-channel scale/shift (PyTorch training-mode, biased variance)."""
    n = s.shape[-1]
    c = gamma.shape[0]
    stot = jnp.sum(s[:, 0, :], axis=0)
    sstot = jnp.sum(ss[:, 0, :], axis=0)
    g = jnp.pad(gamma, (0, n - c))        # padded channels -> scale = shift = 0
    bt = jnp.pad(beta, (0, n - c))
    mean = stot / count
    var = jnp.maximum(sstot / count - mean * mean, 0.0)
    inv = lax.rsqrt(var + eps)
    scale = g * inv
    shift = bt - mean * scale
    return (scale.reshape(1, n).astype(jnp.float32),
            shift.reshape(1, n).astype(jnp.float32))


def init_params(key):
    ks = jax.random.split(key, 5)

    def conv_w(k, co, ci, kk=4):
        return 0.02 * jax.random.normal(k, (co, ci, kk, kk), jnp.float32)

    w1 = conv_w(ks[0], 32, 3)
    w2 = conv_w(ks[1], 64, 32)
    w3 = conv_w(ks[2], 128, 64)
    w4 = conv_w(ks[3], 256, 128)
    w5 = conv_w(ks[4], 1, 256)

    return {
        "w1m": prep_conv_weight(w1, k_pad=128, n_pad=128),   # (4, 128, 128), Cout 32
        "w2m": prep_conv_weight(w2, n_pad=128),               # (4, 128, 128), Cout 64
        "w3m": prep_conv_weight(w3),                          # (4, 256, 128)
        "w4m": prep_conv_weight(w4),                          # (4, 512, 256)
        "w5m": prep_head_weight(w5),                          # (20, 256)
        # BatchNorm affine params (PyTorch defaults: weight=1, bias=0).
        "g2": jnp.ones((64,), jnp.float32),  "b2": jnp.zeros((64,), jnp.float32),
        "g3": jnp.ones((128,), jnp.float32), "b3": jnp.zeros((128,), jnp.float32),
        "g4": jnp.ones((256,), jnp.float32), "b4": jnp.zeros((256,), jnp.float32),
    }


def discriminator_forward(params, x_nchw):
    b = x_nchw.shape[0]
    x = jnp.transpose(x_nchw, (0, 2, 3, 1)).astype(jnp.bfloat16)   # NCHW -> NHWC

    # Layer 1: Conv(3->32, 4, 2, 1) + LeakyReLU(0.2), implicit-im2col GEMM.
    z, hq, wq = conv_input_s2d(x, k_pad=128)
    ho, wo = hq - 1, wq - 1
    y = conv_s2d(z, params["w1m"], wq=wq, mout=ho * wq, with_stats=False)
    x = y.reshape(b, ho, wq, 128)[:, :, :wo, :32]      # drop garbage col + pad lanes

    # Layers 2-3: conv (+ fused BN stats) -> folded BN + LeakyReLU (bf16, lane-dense).
    for wname, gname, bname, cout in (("w2m", "g2", "b2", 64),
                                      ("w3m", "g3", "b3", 128)):
        z, hq, wq = conv_input_s2d(x)
        ho, wo = hq - 1, wq - 1
        y, s, ss = conv_s2d(z, params[wname], wq=wq, mout=ho * wq, with_stats=True)
        scale, shift = bn_fold(s, ss, params[gname], params[bname],
                               count=b * ho * wo)
        y = bn_lrelu_apply(y, scale, shift)
        x = y.reshape(b, ho, wq, y.shape[-1])[:, :, :wo, :cout]

    # Layer 4 conv (+ fused BN stats), then BN + LeakyReLU + Conv(256->1, 4x4
    # valid) fused into one batched head kernel.
    z, hq, wq = conv_input_s2d(x)
    ho, wo = hq - 1, wq - 1                             # 4 x 4 valid positions
    y4, s4, ss4 = conv_s2d(z, params["w4m"], wq=wq, mout=ho * wq, with_stats=True)
    scale4, shift4 = bn_fold(s4, ss4, params["g4"], params["b4"],
                             count=b * ho * wo)
    logits = final_head(y4, scale4, shift4, params["w5m"], b)      # (B,)

    # Match the reference module's trailing `.squeeze()` exactly.
    return jnp.squeeze(logits.reshape(b, 1, 1, 1))


if __name__ == "__main__":
    key = jax.random.PRNGKey(0)
    kparam, kx = jax.random.split(key)
    params = init_params(kparam)

    # DCGAN discriminator (4 stride-2 convs + final 4x4 valid conv) => the
    # forward implies a 64x64 spatial input.
    x = jax.random.normal(kx, (2, 3, 64, 64), jnp.float32)

    out = jax.jit(discriminator_forward)(params, x)
    out = jax.block_until_ready(out)
    assert out.shape == (2,), out.shape
    print("KERNEL_OK")
</pallas_src>

<mosaic_0001>
module attributes {stable_mosaic.version = 11 : i64} {
  func.func @_conv_lrelu_kernel(%arg0: i32, %arg1: memref<1x1104x128xbf16, #tpu.memory_space<vmem>>, %arg2: memref<4x128x128xbf16, #tpu.memory_space<vmem>>, %arg3: memref<1x1056x128xbf16, #tpu.memory_space<vmem>>) attributes {dimension_semantics = [#tpu.dimension_semantics<parallel>], iteration_bounds = array<i64: 2>, scalar_prefetch = 0 : i64, scratch_operands = 0 : i64, tpu.core_type = #tpu.core_type<tc>, window_params = [{transform_indices = @transform_0, window_bounds = array<i64: 1, 1104, 128>}, {pipeline_mode = #tpu.pipeline_mode<synchronous>, transform_indices = @transform_1, window_bounds = array<i64: 4, 128, 128>}, {transform_indices = @transform_2, window_bounds = array<i64: 1, 1056, 128>}]} {
    %c0 = arith.constant 0 : index
    %c0_0 = arith.constant 0 : index
    %c0_1 = arith.constant 0 : index
    %0 = vector.load %arg1[%c0, %c0_0, %c0_1] : memref<1x1104x128xbf16, #tpu.memory_space<vmem>>, vector<1x1056x128xbf16>
    %1 = vector.shape_cast %0 : vector<1x1056x128xbf16> to vector<1056x128xbf16>
    %c0_2 = arith.constant 0 : index
    %c0_3 = arith.constant 0 : index
    %c0_4 = arith.constant 0 : index
    %2 = vector.load %arg2[%c0_2, %c0_3, %c0_4] : memref<4x128x128xbf16, #tpu.memory_space<vmem>>, vector<1x128x128xbf16>
    %3 = vector.shape_cast %2 : vector<1x128x128xbf16> to vector<128x128xbf16>
    %cst = arith.constant dense<0.000000e+00> : vector<1056x128xf32>
    %4 = tpu.matmul %1, %3, %cst {dimension_numbers = #tpu.dot_dimension_numbers<[1], [0], [0], [1], [0, 0, 1, 1], [], []>} : vector<1056x128xbf16>, vector<128x128xbf16>, vector<1056x128xf32> -> vector<1056x128xf32>
    %c0_5 = arith.constant 0 : index
    %c1 = arith.constant 1 : index
    %c0_6 = arith.constant 0 : index
    %5 = vector.load %arg1[%c0_5, %c1, %c0_6] : memref<1x1104x128xbf16, #tpu.memory_space<vmem>>, vector<1x1056x128xbf16>
    %6 = vector.shape_cast %5 : vector<1x1056x128xbf16> to vector<1056x128xbf16>
    %c1_7 = arith.constant 1 : index
    %c0_8 = arith.constant 0 : index
    %c0_9 = arith.constant 0 : index
    %7 = vector.load %arg2[%c1_7, %c0_8, %c0_9] : memref<4x128x128xbf16, #tpu.memory_space<vmem>>, vector<1x128x128xbf16>
    %8 = vector.shape_cast %7 : vector<1x128x128xbf16> to vector<128x128xbf16>
    %cst_10 = arith.constant dense<0.000000e+00> : vector<1056x128xf32>
    %9 = tpu.matmul %6, %8, %cst_10 {dimension_numbers = #tpu.dot_dimension_numbers<[1], [0], [0], [1], [0, 0, 1, 1], [], []>} : vector<1056x128xbf16>, vector<128x128xbf16>, vector<1056x128xf32> -> vector<1056x128xf32>
    %10 = arith.addf %4, %9 : vector<1056x128xf32>
    %c0_11 = arith.constant 0 : index
    %c33 = arith.constant 33 : index
    %c0_12 = arith.constant 0 : index
    %11 = vector.load %arg1[%c0_11, %c33, %c0_12] : memref<1x1104x128xbf16, #tpu.memory_space<vmem>>, vector<1x1056x128xbf16>
    %12 = vector.shape_cast %11 : vector<1x1056x128xbf16> to vector<1056x128xbf16>
    %c2 = arith.constant 2 : index
    %c0_13 = arith.constant 0 : index
    %c0_14 = arith.constant 0 : index
    %13 = vector.load %arg2[%c2, %c0_13, %c0_14] : memref<4x128x128xbf16, #tpu.memory_space<vmem>>, vector<1x128x128xbf16>
    %14 = vector.shape_cast %13 : vector<1x128x128xbf16> to vector<128x128xbf16>
    %cst_15 = arith.constant dense<0.000000e+00> : vector<1056x128xf32>
    %15 = tpu.matmul %12, %14, %cst_15 {dimension_numbers = #tpu.dot_dimension_numbers<[1], [0], [0], [1], [0, 0, 1, 1], [], []>} : vector<1056x128xbf16>, vector<128x128xbf16>, vector<1056x128xf32> -> vector<1056x128xf32>
    %16 = arith.addf %10, %15 : vector<1056x128xf32>
    %c0_16 = arith.constant 0 : index
    %c34 = arith.constant 34 : index
    %c0_17 = arith.constant 0 : index
    %17 = vector.load %arg1[%c0_16, %c34, %c0_17] : memref<1x1104x128xbf16, #tpu.memory_space<vmem>>, vector<1x1056x128xbf16>
    %18 = vector.shape_cast %17 : vector<1x1056x128xbf16> to vector<1056x128xbf16>
    %c3 = arith.constant 3 : index
    %c0_18 = arith.constant 0 : index
    %c0_19 = arith.constant 0 : index
    %19 = vector.load %arg2[%c3, %c0_18, %c0_19] : memref<4x128x128xbf16, #tpu.memory_space<vmem>>, vector<1x128x128xbf16>
    %20 = vector.shape_cast %19 : vector<1x128x128xbf16> to vector<128x128xbf16>
    %cst_20 = arith.constant dense<0.000000e+00> : vector<1056x128xf32>
    %21 = tpu.matmul %18, %20, %cst_20 {dimension_numbers = #tpu.dot_dimension_numbers<[1], [0], [0], [1], [0, 0, 1, 1], [], []>} : vector<1056x128xbf16>, vector<128x128xbf16>, vector<1056x128xf32> -> vector<1056x128xf32>
    %22 = arith.addf %16, %21 : vector<1056x128xf32>
    %cst_21 = arith.constant 0.000000e+00 : f32
    %23 = vector.broadcast %cst_21 : f32 to vector<1056x128xf32>
    %24 = arith.cmpf ogt, %22, %23 : vector<1056x128xf32>
    %cst_22 = arith.constant 2.000000e-01 : f32
    %25 = vector.broadcast %cst_22 : f32 to vector<1056x128xf32>
    %26 = arith.mulf %25, %22 : vector<1056x128xf32>
    %27 = arith.select %24, %22, %26 : vector<1056x128xi1>, vector<1056x128xf32>
    %28 = arith.truncf %27 : vector<1056x128xf32> to vector<1056x128xbf16>
    %c0_23 = arith.constant 0 : index
    %c0_24 = arith.constant 0 : index
    %c0_25 = arith.constant 0 : index
    %29 = vector.load %arg3[%c0_23, %c0_24, %c0_25] : memref<1x1056x128xbf16, #tpu.memory_space<vmem>>, vector<1x1056x128xbf16>
    %30 = vector.shape_cast %29 : vector<1x1056x128xbf16> to vector<1056x128xbf16>
    %31 = vector.shape_cast %28 : vector<1056x128xbf16> to vector<1x1056x128xbf16>
    tpu.vector_store %arg3[%c0_23, %c0_24, %c0_25], %31 {strides = array<i32>} : memref<1x1056x128xbf16, #tpu.memory_space<vmem>>, vector<1x1056x128xbf16>,
    return
  }
  func.func @transform_0(%arg0: i32) -> (i32, i32, i32) {
    %c0_i32 = arith.constant 0 : i32
    %c0_i32_0 = arith.constant 0 : i32
    %c0_i32_1 = arith.constant 0 : i32
    return %arg0, %c0_i32, %c0_i32_0 : i32, i32, i32
  }
  func.func @transform_1(%arg0: i32) -> (i32, i32, i32) {
    %c0_i32 = arith.constant 0 : i32
    %c0_i32_0 = arith.constant 0 : i32
    %c0_i32_1 = arith.constant 0 : i32
    %c0_i32_2 = arith.constant 0 : i32
    return %c0_i32, %c0_i32_0, %c0_i32_1 : i32, i32, i32
  }
  func.func @transform_2(%arg0: i32) -> (i32, i32, i32) {
    %c0_i32 = arith.constant 0 : i32
    %c0_i32_0 = arith.constant 0 : i32
    %c0_i32_1 = arith.constant 0 : i32
    return %arg0, %c0_i32, %c0_i32_0 : i32, i32, i32
  }
}

module attributes {stable_mosaic.version = 11 : i64} {
  func.func @_conv_stats_kernel(%arg0: i32, %arg1: memref<1x304x128xbf16, #tpu.memory_space<vmem>>, %arg2: memref<4x128x128xbf16, #tpu.memory_space<vmem>>, %arg3: memref<1x272x128xbf16, #tpu.memory_space<vmem>>, %arg4: memref<1x1x128xf32, #tpu.memory_space<vmem>>, %arg5: memref<1x1x128xf32, #tpu.memory_space<vmem>>) attributes {dimension_semantics = [#tpu.dimension_semantics<parallel>], iteration_bounds = array<i64: 2>, scalar_prefetch = 0 : i64, scratch_operands = 0 : i64, tpu.core_type = #tpu.core_type<tc>, window_params = [{transform_indices = @transform_0, window_bounds = array<i64: 1, 304, 128>}, {pipeline_mode = #tpu.pipeline_mode<synchronous>, transform_indices = @transform_1, window_bounds = array<i64: 4, 128, 128>}, {transform_indices = @transform_2, window_bounds = array<i64: 1, 272, 128>}, {transform_indices = @transform_3, window_bounds = array<i64: 1, 1, 128>}, {transform_indices = @transform_4, window_bounds = array<i64: 1, 1, 128>}]} {
    %c0 = arith.constant 0 : index
    %c0_0 = arith.constant 0 : index
    %c0_1 = arith.constant 0 : index
    %0 = vector.load %arg1[%c0, %c0_0, %c0_1] : memref<1x304x128xbf16, #tpu.memory_space<vmem>>, vector<1x272x128xbf16>
    %1 = vector.shape_cast %0 : vector<1x272x128xbf16> to vector<272x128xbf16>
    %c0_2 = arith.constant 0 : index
    %c0_3 = arith.constant 0 : index
    %c0_4 = arith.constant 0 : index
    %2 = vector.load %arg2[%c0_2, %c0_3, %c0_4] : memref<4x128x128xbf16, #tpu.memory_space<vmem>>, vector<1x128x128xbf16>
    %3 = vector.shape_cast %2 : vector<1x128x128xbf16> to vector<128x128xbf16>
    %cst = arith.constant dense<0.000000e+00> : vector<272x128xf32>
    %4 = tpu.matmul %1, %3, %cst {dimension_numbers = #tpu.dot_dimension_numbers<[1], [0], [0], [1], [0, 0, 1, 1], [], []>} : vector<272x128xbf16>, vector<128x128xbf16>, vector<272x128xf32> -> vector<272x128xf32>
    %c0_5 = arith.constant 0 : index
    %c1 = arith.constant 1 : index
    %c0_6 = arith.constant 0 : index
    %5 = vector.load %arg1[%c0_5, %c1, %c0_6] : memref<1x304x128xbf16, #tpu.memory_space<vmem>>, vector<1x272x128xbf16>
    %6 = vector.shape_cast %5 : vector<1x272x128xbf16> to vector<272x128xbf16>
    %c1_7 = arith.constant 1 : index
    %c0_8 = arith.constant 0 : index
    %c0_9 = arith.constant 0 : index
    %7 = vector.load %arg2[%c1_7, %c0_8, %c0_9] : memref<4x128x128xbf16, #tpu.memory_space<vmem>>, vector<1x128x128xbf16>
    %8 = vector.shape_cast %7 : vector<1x128x128xbf16> to vector<128x128xbf16>
    %cst_10 = arith.constant dense<0.000000e+00> : vector<272x128xf32>
    %9 = tpu.matmul %6, %8, %cst_10 {dimension_numbers = #tpu.dot_dimension_numbers<[1], [0], [0], [1], [0, 0, 1, 1], [], []>} : vector<272x128xbf16>, vector<128x128xbf16>, vector<272x128xf32> -> vector<272x128xf32>
    %10 = arith.addf %4, %9 : vector<272x128xf32>
    %c0_11 = arith.constant 0 : index
    %c17 = arith.constant 17 : index
    %c0_12 = arith.constant 0 : index
    %11 = vector.load %arg1[%c0_11, %c17, %c0_12] : memref<1x304x128xbf16, #tpu.memory_space<vmem>>, vector<1x272x128xbf16>
    %12 = vector.shape_cast %11 : vector<1x272x128xbf16> to vector<272x128xbf16>
    %c2 = arith.constant 2 : index
    %c0_13 = arith.constant 0 : index
    %c0_14 = arith.constant 0 : index
    %13 = vector.load %arg2[%c2, %c0_13, %c0_14] : memref<4x128x128xbf16, #tpu.memory_space<vmem>>, vector<1x128x128xbf16>
    %14 = vector.shape_cast %13 : vector<1x128x128xbf16> to vector<128x128xbf16>
    %cst_15 = arith.constant dense<0.000000e+00> : vector<272x128xf32>
    %15 = tpu.matmul %12, %14, %cst_15 {dimension_numbers = #tpu.dot_dimension_numbers<[1], [0], [0], [1], [0, 0, 1, 1], [], []>} : vector<272x128xbf16>, vector<128x128xbf16>, vector<272x128xf32> -> vector<272x128xf32>
    %16 = arith.addf %10, %15 : vector<272x128xf32>
    %c0_16 = arith.constant 0 : index
    %c18 = arith.constant 18 : index
    %c0_17 = arith.constant 0 : index
    %17 = vector.load %arg1[%c0_16, %c18, %c0_17] : memref<1x304x128xbf16, #tpu.memory_space<vmem>>, vector<1x272x128xbf16>
    %18 = vector.shape_cast %17 : vector<1x272x128xbf16> to vector<272x128xbf16>
    %c3 = arith.constant 3 : index
    %c0_18 = arith.constant 0 : index
    %c0_19 = arith.constant 0 : index
    %19 = vector.load %arg2[%c3, %c0_18, %c0_19] : memref<4x128x128xbf16, #tpu.memory_space<vmem>>, vector<1x128x128xbf16>
    %20 = vector.shape_cast %19 : vector<1x128x128xbf16> to vector<128x128xbf16>
    %cst_20 = arith.constant dense<0.000000e+00> : vector<272x128xf32>
    %21 = tpu.matmul %18, %20, %cst_20 {dimension_numbers = #tpu.dot_dimension_numbers<[1], [0], [0], [1], [0, 0, 1, 1], [], []>} : vector<272x128xbf16>, vector<128x128xbf16>, vector<272x128xf32> -> vector<272x128xf32>
    %22 = arith.addf %16, %21 : vector<272x128xf32>
    %23 = arith.truncf %22 : vector<272x128xf32> to vector<272x128xbf16>
    %c0_21 = arith.constant 0 : index
    %c0_22 = arith.constant 0 : index
    %c0_23 = arith.constant 0 : index
    %24 = vector.load %arg3[%c0_21, %c0_22, %c0_23] : memref<1x272x128xbf16, #tpu.memory_space<vmem>>, vector<1x272x128xbf16>
    %25 = vector.shape_cast %24 : vector<1x272x128xbf16> to vector<272x128xbf16>
    %26 = vector.shape_cast %23 : vector<272x128xbf16> to vector<1x272x128xbf16>
    tpu.vector_store %arg3[%c0_21, %c0_22, %c0_23], %26 {strides = array<i32>} : memref<1x272x128xbf16, #tpu.memory_space<vmem>>, vector<1x272x128xbf16>,
    %27 = tpu.iota {dimensions = array<i32: 0>} : vector<272x1xi32>
    %c17_i32 = arith.constant 17 : i32
    %c0_i32 = arith.constant 0 : i32
    %28 = arith.cmpi eq, %c17_i32, %c0_i32 : i32
    %c1_i32 = arith.constant 1 : i32
    %29 = arith.select %28, %c1_i32, %c17_i32 : i32
    %30 = vector.broadcast %29 : i32 to vector<272x1xi32>
    %31 = arith.remsi %27, %30 : vector<272x1xi32>
    %c0_i32_24 = arith.constant 0 : i32
    %32 = vector.broadcast %c0_i32_24 : i32 to vector<272x1xi32>
    %33 = arith.cmpi ne, %31, %32 : vector<272x1xi32>
    %c0_i32_25 = arith.constant 0 : i32
    %34 = vector.broadcast %c0_i32_25 : i32 to vector<272x1xi32>
    %35 = arith.cmpi slt, %31, %34 : vector<272x1xi32>
    %c0_i32_26 = arith.constant 0 : i32
    %36 = arith.cmpi slt, %29, %c0_i32_26 : i32
    %37 = vector.broadcast %36 : i1 to vector<272x1xi1>
    %38 = vector.broadcast %37 : vector<272x1xi1> to vector<272x1xi1>
    %39 = arith.xori %35, %38 : vector<272x1xi1>
    %40 = arith.andi %39, %33 : vector<272x1xi1>
    %41 = vector.broadcast %29 : i32 to vector<272x1xi32>
    %42 = arith.addi %31, %41 : vector<272x1xi32>
    %43 = arith.select %40, %42, %31 : vector<272x1xi1>, vector<272x1xi32>
    %c16_i32 = arith.constant 16 : i32
    %44 = vector.broadcast %c16_i32 : i32 to vector<272x1xi32>
    %45 = arith.cmpi ne, %43, %44 : vector<272x1xi32>
    %cst_27 = arith.constant 0.000000e+00 : f32
    %46 = vector.shape_cast %45 : vector<272x1xi1> to vector<272x1xi1>
    %47 = vector.broadcast %46 : vector<272x1xi1> to vector<272x128xi1>
    %48 = vector.broadcast %cst_27 : f32 to vector<272x128xf32>
    %49 = arith.select %47, %22, %48 : vector<272x128xi1>, vector<272x128xf32>
    %cst_28 = arith.constant dense<0.000000e+00> : vector<128xf32>
    %50 = vector.multi_reduction <add>, %49, %cst_28 [0] : vector<272x128xf32> to vector<128xf32>
    %51 = vector.shape_cast %50 : vector<128xf32> to vector<1x128xf32>
    %c0_29 = arith.constant 0 : index
    %c0_30 = arith.constant 0 : index
    %c0_31 = arith.constant 0 : index
    %52 = vector.load %arg4[%c0_29, %c0_30, %c0_31] : memref<1x1x128xf32, #tpu.memory_space<vmem>>, vector<1x1x128xf32>
    %53 = vector.shape_cast %52 : vector<1x1x128xf32> to vector<1x128xf32>
    %54 = vector.shape_cast %51 : vector<1x128xf32> to vector<1x1x128xf32>
    tpu.vector_store %arg4[%c0_29, %c0_30, %c0_31], %54 {strides = array<i32>} : memref<1x1x128xf32, #tpu.memory_space<vmem>>, vector<1x1x128xf32>,
    %55 = arith.mulf %49, %49 : vector<272x128xf32>
    %cst_32 = arith.constant dense<0.000000e+00> : vector<128xf32>
    %56 = vector.multi_reduction <add>, %55, %cst_32 [0] : vector<272x128xf32> to vector<128xf32>
    %57 = vector.shape_cast %56 : vector<128xf32> to vector<1x128xf32>
    %c0_33 = arith.constant 0 : index
    %c0_34 = arith.constant 0 : index
    %c0_35 = arith.constant 0 : index
    %58 = vector.load %arg5[%c0_33, %c0_34, %c0_35] : memref<1x1x128xf32, #tpu.memory_space<vmem>>, vector<1x1x128xf32>
    %59 = vector.shape_cast %58 : vector<1x1x128xf32> to vector<1x128xf32>
    %60 = vector.shape_cast %57 : vector<1x128xf32> to vector<1x1x128xf32>
    tpu.vector_store %arg5[%c0_33, %c0_34, %c0_35], %60 {strides = array<i32>} : memref<1x1x128xf32, #tpu.memory_space<vmem>>, vector<1x1x128xf32>,
    return
  }
  func.func @transform_0(%arg0: i32) -> (i32, i32, i32) {
    %c0_i32 = arith.constant 0 : i32
    %c0_i32_0 = arith.constant 0 : i32
    %c0_i32_1 = arith.constant 0 : i32
    return %arg0, %c0_i32, %c0_i32_0 : i32, i32, i32
  }
  func.func @transform_1(%arg0: i32) -> (i32, i32, i32) {
    %c0_i32 = arith.constant 0 : i32
    %c0_i32_0 = arith.constant 0 : i32
    %c0_i32_1 = arith.constant 0 : i32
    %c0_i32_2 = arith.constant 0 : i32
    return %c0_i32, %c0_i32_0, %c0_i32_1 : i32, i32, i32
  }
  func.func @transform_2(%arg0: i32) -> (i32, i32, i32) {
    %c0_i32 = arith.constant 0 : i32
    %c0_i32_0 = arith.constant 0 : i32
    %c0_i32_1 = arith.constant 0 : i32
    return %arg0, %c0_i32, %c0_i32_0 : i32, i32, i32
  }
  func.func @transform_3(%arg0: i32) -> (i32, i32, i32) {
    %c0_i32 = arith.constant 0 : i32
    %c0_i32_0 = arith.constant 0 : i32
    %c0_i32_1 = arith.constant 0 : i32
    return %arg0, %c0_i32, %c0_i32_0 : i32, i32, i32
  }
  func.func @transform_4(%arg0: i32) -> (i32, i32, i32) {
    %c0_i32 = arith.constant 0 : i32
    %c0_i32_0 = arith.constant 0 : i32
    %c0_i32_1 = arith.constant 0 : i32
    return %arg0, %c0_i32, %c0_i32_0 : i32, i32, i32
  }
}

module attributes {stable_mosaic.version = 11 : i64} {
  func.func @_bn_lrelu_kernel(%arg0: i32, %arg1: memref<1x272x128xbf16, #tpu.memory_space<vmem>>, %arg2: memref<1x128xf32, #tpu.memory_space<vmem>>, %arg3: memref<1x128xf32, #tpu.memory_space<vmem>>, %arg4: memref<1x272x128xbf16, #tpu.memory_space<vmem>>) attributes {dimension_semantics = [#tpu.dimension_semantics<parallel>], iteration_bounds = array<i64: 2>, scalar_prefetch = 0 : i64, scratch_operands = 0 : i64, tpu.core_type = #tpu.core_type<tc>, window_params = [{transform_indices = @transform_0, window_bounds = array<i64: 1, 272, 128>}, {pipeline_mode = #tpu.pipeline_mode<synchronous>, transform_indices = @transform_1, window_bounds = array<i64: 1, 128>}, {pipeline_mode = #tpu.pipeline_mode<synchronous>, transform_indices = @transform_2, window_bounds = array<i64: 1, 128>}, {transform_indices = @transform_3, window_bounds = array<i64: 1, 272, 128>}]} {
    %c0 = arith.constant 0 : index
    %c0_0 = arith.constant 0 : index
    %c0_1 = arith.constant 0 : index
    %0 = vector.load %arg1[%c0, %c0_0, %c0_1] : memref<1x272x128xbf16, #tpu.memory_space<vmem>>, vector<1x272x128xbf16>
    %1 = vector.shape_cast %0 : vector<1x272x128xbf16> to vector<272x128xbf16>
    %2 = arith.extf %1 : vector<272x128xbf16> to vector<272x128xf32>
    %c0_2 = arith.constant 0 : index
    %c0_3 = arith.constant 0 : index
    %3 = vector.load %arg2[%c0_2, %c0_3] : memref<1x128xf32, #tpu.memory_space<vmem>>, vector<1x128xf32>
    %4 = vector.broadcast %3 : vector<1x128xf32> to vector<272x128xf32>
    %5 = arith.mulf %2, %4 : vector<272x128xf32>
    %c0_4 = arith.constant 0 : index
    %c0_5 = arith.constant 0 : index
    %6 = vector.load %arg3[%c0_4, %c0_5] : memref<1x128xf32, #tpu.memory_space<vmem>>, vector<1x128xf32>
    %7 = vector.broadcast %6 : vector<1x128xf32> to vector<272x128xf32>
    %8 = arith.addf %5, %7 : vector<272x128xf32>
    %cst = arith.constant 0.000000e+00 : f32
    %9 = vector.broadcast %cst : f32 to vector<272x128xf32>
    %10 = arith.cmpf ogt, %8, %9 : vector<272x128xf32>
    %cst_6 = arith.constant 2.000000e-01 : f32
    %11 = vector.broadcast %cst_6 : f32 to vector<272x128xf32>
    %12 = arith.mulf %11, %8 : vector<272x128xf32>
    %13 = arith.select %10, %8, %12 : vector<272x128xi1>, vector<272x128xf32>
    %14 = arith.truncf %13 : vector<272x128xf32> to vector<272x128xbf16>
    %c0_7 = arith.constant 0 : index
    %c0_8 = arith.constant 0 : index
    %c0_9 = arith.constant 0 : index
    %15 = vector.load %arg4[%c0_7, %c0_8, %c0_9] : memref<1x272x128xbf16, #tpu.memory_space<vmem>>, vector<1x272x128xbf16>
    %16 = vector.shape_cast %15 : vector<1x272x128xbf16> to vector<272x128xbf16>
    %17 = vector.shape_cast %14 : vector<272x128xbf16> to vector<1x272x128xbf16>
    tpu.vector_store %arg4[%c0_7, %c0_8, %c0_9], %17 {strides = array<i32>} : memref<1x272x128xbf16, #tpu.memory_space<vmem>>, vector<1x272x128xbf16>,
    return
  }
  func.func @transform_0(%arg0: i32) -> (i32, i32, i32) {
    %c0_i32 = arith.constant 0 : i32
    %c0_i32_0 = arith.constant 0 : i32
    %c0_i32_1 = arith.constant 0 : i32
    return %arg0, %c0_i32, %c0_i32_0 : i32, i32, i32
  }
  func.func @transform_1(%arg0: i32) -> (i32, i32) {
    %c0_i32 = arith.constant 0 : i32
    %c0_i32_0 = arith.constant 0 : i32
    %c0_i32_1 = arith.constant 0 : i32
    return %c0_i32, %c0_i32_0 : i32, i32
  }
  func.func @transform_2(%arg0: i32) -> (i32, i32) {
    %c0_i32 = arith.constant 0 : i32
    %c0_i32_0 = arith.constant 0 : i32
    %c0_i32_1 = arith.constant 0 : i32
    return %c0_i32, %c0_i32_0 : i32, i32
  }
  func.func @transform_3(%arg0: i32) -> (i32, i32, i32) {
    %c0_i32 = arith.constant 0 : i32
    %c0_i32_0 = arith.constant 0 : i32
    %c0_i32_1 = arith.constant 0 : i32
    return %arg0, %c0_i32, %c0_i32_0 : i32, i32, i32
  }
}

module attributes {stable_mosaic.version = 11 : i64} {
  func.func @_conv_stats_kernel(%arg0: i32, %arg1: memref<1x96x256xbf16, #tpu.memory_space<vmem>>, %arg2: memref<4x256x128xbf16, #tpu.memory_space<vmem>>, %arg3: memref<1x72x128xbf16, #tpu.memory_space<vmem>>, %arg4: memref<1x1x128xf32, #tpu.memory_space<vmem>>, %arg5: memref<1x1x128xf32, #tpu.memory_space<vmem>>) attributes {dimension_semantics = [#tpu.dimension_semantics<parallel>], iteration_bounds = array<i64: 2>, scalar_prefetch = 0 : i64, scratch_operands = 0 : i64, tpu.core_type = #tpu.core_type<tc>, window_params = [{transform_indices = @transform_0, window_bounds = array<i64: 1, 96, 256>}, {pipeline_mode = #tpu.pipeline_mode<synchronous>, transform_indices = @transform_1, window_bounds = array<i64: 4, 256, 128>}, {transform_indices = @transform_2, window_bounds = array<i64: 1, 72, 128>}, {transform_indices = @transform_3, window_bounds = array<i64: 1, 1, 128>}, {transform_indices = @transform_4, window_bounds = array<i64: 1, 1, 128>}]} {
    %c0 = arith.constant 0 : index
    %c0_0 = arith.constant 0 : index
    %c0_1 = arith.constant 0 : index
    %0 = vector.load %arg1[%c0, %c0_0, %c0_1] : memref<1x96x256xbf16, #tpu.memory_space<vmem>>, vector<1x72x256xbf16>
    %1 = vector.shape_cast %0 : vector<1x72x256xbf16> to vector<72x256xbf16>
    %c0_2 = arith.constant 0 : index
    %c0_3 = arith.constant 0 : index
    %c0_4 = arith.constant 0 : index
    %2 = vector.load %arg2[%c0_2, %c0_3, %c0_4] : memref<4x256x128xbf16, #tpu.memory_space<vmem>>, vector<1x256x128xbf16>
    %3 = vector.shape_cast %2 : vector<1x256x128xbf16> to vector<256x128xbf16>
    %cst = arith.constant dense<0.000000e+00> : vector<72x128xf32>
    %4 = tpu.matmul %1, %3, %cst {dimension_numbers = #tpu.dot_dimension_numbers<[1], [0], [0], [1], [0, 0, 1, 1], [], []>} : vector<72x256xbf16>, vector<256x128xbf16>, vector<72x128xf32> -> vector<72x128xf32>
    %c0_5 = arith.constant 0 : index
    %c1 = arith.constant 1 : index
    %c0_6 = arith.constant 0 : index
    %5 = vector.load %arg1[%c0_5, %c1, %c0_6] : memref<1x96x256xbf16, #tpu.memory_space<vmem>>, vector<1x72x256xbf16>
    %6 = vector.shape_cast %5 : vector<1x72x256xbf16> to vector<72x256xbf16>
    %c1_7 = arith.constant 1 : index
    %c0_8 = arith.constant 0 : index
    %c0_9 = arith.constant 0 : index
    %7 = vector.load %arg2[%c1_7, %c0_8, %c0_9] : memref<4x256x128xbf16, #tpu.memory_space<vmem>>, vector<1x256x128xbf16>
    %8 = vector.shape_cast %7 : vector<1x256x128xbf16> to vector<256x128xbf16>
    %cst_10 = arith.constant dense<0.000000e+00> : vector<72x128xf32>
    %9 = tpu.matmul %6, %8, %cst_10 {dimension_numbers = #tpu.dot_dimension_numbers<[1], [0], [0], [1], [0, 0, 1, 1], [], []>} : vector<72x256xbf16>, vector<256x128xbf16>, vector<72x128xf32> -> vector<72x128xf32>
    %10 = arith.addf %4, %9 : vector<72x128xf32>
    %c0_11 = arith.constant 0 : index
    %c9 = arith.constant 9 : index
    %c0_12 = arith.constant 0 : index
    %11 = vector.load %arg1[%c0_11, %c9, %c0_12] : memref<1x96x256xbf16, #tpu.memory_space<vmem>>, vector<1x72x256xbf16>
    %12 = vector.shape_cast %11 : vector<1x72x256xbf16> to vector<72x256xbf16>
    %c2 = arith.constant 2 : index
    %c0_13 = arith.constant 0 : index
    %c0_14 = arith.constant 0 : index
    %13 = vector.load %arg2[%c2, %c0_13, %c0_14] : memref<4x256x128xbf16, #tpu.memory_space<vmem>>, vector<1x256x128xbf16>
    %14 = vector.shape_cast %13 : vector<1x256x128xbf16> to vector<256x128xbf16>
    %cst_15 = arith.constant dense<0.000000e+00> : vector<72x128xf32>
    %15 = tpu.matmul %12, %14, %cst_15 {dimension_numbers = #tpu.dot_dimension_numbers<[1], [0], [0], [1], [0, 0, 1, 1], [], []>} : vector<72x256xbf16>, vector<256x128xbf16>, vector<72x128xf32> -> vector<72x128xf32>
    %16 = arith.addf %10, %15 : vector<72x128xf32>
    %c0_16 = arith.constant 0 : index
    %c10 = arith.constant 10 : index
    %c0_17 = arith.constant 0 : index
    %17 = vector.load %arg1[%c0_16, %c10, %c0_17] : memref<1x96x256xbf16, #tpu.memory_space<vmem>>, vector<1x72x256xbf16>
    %18 = vector.shape_cast %17 : vector<1x72x256xbf16> to vector<72x256xbf16>
    %c3 = arith.constant 3 : index
    %c0_18 = arith.constant 0 : index
    %c0_19 = arith.constant 0 : index
    %19 = vector.load %arg2[%c3, %c0_18, %c0_19] : memref<4x256x128xbf16, #tpu.memory_space<vmem>>, vector<1x256x128xbf16>
    %20 = vector.shape_cast %19 : vector<1x256x128xbf16> to vector<256x128xbf16>
    %cst_20 = arith.constant dense<0.000000e+00> : vector<72x128xf32>
    %21 = tpu.matmul %18, %20, %cst_20 {dimension_numbers = #tpu.dot_dimension_numbers<[1], [0], [0], [1], [0, 0, 1, 1], [], []>} : vector<72x256xbf16>, vector<256x128xbf16>, vector<72x128xf32> -> vector<72x128xf32>
    %22 = arith.addf %16, %21 : vector<72x128xf32>
    %23 = arith.truncf %22 : vector<72x128xf32> to vector<72x128xbf16>
    %c0_21 = arith.constant 0 : index
    %c0_22 = arith.constant 0 : index
    %c0_23 = arith.constant 0 : index
    %24 = vector.load %arg3[%c0_21, %c0_22, %c0_23] : memref<1x72x128xbf16, #tpu.memory_space<vmem>>, vector<1x72x128xbf16>
    %25 = vector.shape_cast %24 : vector<1x72x128xbf16> to vector<72x128xbf16>
    %26 = vector.shape_cast %23 : vector<72x128xbf16> to vector<1x72x128xbf16>
    tpu.vector_store %arg3[%c0_21, %c0_22, %c0_23], %26 {strides = array<i32>} : memref<1x72x128xbf16, #tpu.memory_space<vmem>>, vector<1x72x128xbf16>,
    %27 = tpu.iota {dimensions = array<i32: 0>} : vector<72x1xi32>
    %c9_i32 = arith.constant 9 : i32
    %c0_i32 = arith.constant 0 : i32
    %28 = arith.cmpi eq, %c9_i32, %c0_i32 : i32
    %c1_i32 = arith.constant 1 : i32
    %29 = arith.select %28, %c1_i32, %c9_i32 : i32
    %30 = vector.broadcast %29 : i32 to vector<72x1xi32>
    %31 = arith.remsi %27, %30 : vector<72x1xi32>
    %c0_i32_24 = arith.constant 0 : i32
    %32 = vector.broadcast %c0_i32_24 : i32 to vector<72x1xi32>
    %33 = arith.cmpi ne, %31, %32 : vector<72x1xi32>
    %c0_i32_25 = arith.constant 0 : i32
    %34 = vector.broadcast %c0_i32_25 : i32 to vector<72x1xi32>
    %35 = arith.cmpi slt, %31, %34 : vector<72x1xi32>
    %c0_i32_26 = arith.constant 0 : i32
    %36 = arith.cmpi slt, %29, %c0_i32_26 : i32
    %37 = vector.broadcast %36 : i1 to vector<72x1xi1>
    %38 = vector.broadcast %37 : vector<72x1xi1> to vector<72x1xi1>
    %39 = arith.xori %35, %38 : vector<72x1xi1>
    %40 = arith.andi %39, %33 : vector<72x1xi1>
    %41 = vector.broadcast %29 : i32 to vector<72x1xi32>
    %42 = arith.addi %31, %41 : vector<72x1xi32>
    %43 = arith.select %40, %42, %31 : vector<72x1xi1>, vector<72x1xi32>
    %c8_i32 = arith.constant 8 : i32
    %44 = vector.broadcast %c8_i32 : i32 to vector<72x1xi32>
    %45 = arith.cmpi ne, %43, %44 : vector<72x1xi32>
    %cst_27 = arith.constant 0.000000e+00 : f32
    %46 = vector.shape_cast %45 : vector<72x1xi1> to vector<72x1xi1>
    %47 = vector.broadcast %46 : vector<72x1xi1> to vector<72x128xi1>
    %48 = vector.broadcast %cst_27 : f32 to vector<72x128xf32>
    %49 = arith.select %47, %22, %48 : vector<72x128xi1>, vector<72x128xf32>
    %cst_28 = arith.constant dense<0.000000e+00> : vector<128xf32>
    %50 = vector.multi_reduction <add>, %49, %cst_28 [0] : vector<72x128xf32> to vector<128xf32>
    %51 = vector.shape_cast %50 : vector<128xf32> to vector<1x128xf32>
    %c0_29 = arith.constant 0 : index
    %c0_30 = arith.constant 0 : index
    %c0_31 = arith.constant 0 : index
    %52 = vector.load %arg4[%c0_29, %c0_30, %c0_31] : memref<1x1x128xf32, #tpu.memory_space<vmem>>, vector<1x1x128xf32>
    %53 = vector.shape_cast %52 : vector<1x1x128xf32> to vector<1x128xf32>
    %54 = vector.shape_cast %51 : vector<1x128xf32> to vector<1x1x128xf32>
    tpu.vector_store %arg4[%c0_29, %c0_30, %c0_31], %54 {strides = array<i32>} : memref<1x1x128xf32, #tpu.memory_space<vmem>>, vector<1x1x128xf32>,
    %55 = arith.mulf %49, %49 : vector<72x128xf32>
    %cst_32 = arith.constant dense<0.000000e+00> : vector<128xf32>
    %56 = vector.multi_reduction <add>, %55, %cst_32 [0] : vector<72x128xf32> to vector<128xf32>
    %57 = vector.shape_cast %56 : vector<128xf32> to vector<1x128xf32>
    %c0_33 = arith.constant 0 : index
    %c0_34 = arith.constant 0 : index
    %c0_35 = arith.constant 0 : index
    %58 = vector.load %arg5[%c0_33, %c0_34, %c0_35] : memref<1x1x128xf32, #tpu.memory_space<vmem>>, vector<1x1x128xf32>
    %59 = vector.shape_cast %58 : vector<1x1x128xf32> to vector<1x128xf32>
    %60 = vector.shape_cast %57 : vector<1x128xf32> to vector<1x1x128xf32>
    tpu.vector_store %arg5[%c0_33, %c0_34, %c0_35], %60 {strides = array<i32>} : memref<1x1x128xf32, #tpu.memory_space<vmem>>, vector<1x1x128xf32>,
    return
  }
  func.func @transform_0(%arg0: i32) -> (i32, i32, i32) {
    %c0_i32 = arith.constant 0 : i32
    %c0_i32_0 = arith.constant 0 : i32
    %c0_i32_1 = arith.constant 0 : i32
    return %arg0, %c0_i32, %c0_i32_0 : i32, i32, i32
  }
  func.func @transform_1(%arg0: i32) -> (i32, i32, i32) {
    %c0_i32 = arith.constant 0 : i32
    %c0_i32_0 = arith.constant 0 : i32
    %c0_i32_1 = arith.constant 0 : i32
    %c0_i32_2 = arith.constant 0 : i32
    return %c0_i32, %c0_i32_0, %c0_i32_1 : i32, i32, i32
  }
  func.func @transform_2(%arg0: i32) -> (i32, i32, i32) {
    %c0_i32 = arith.constant 0 : i32
    %c0_i32_0 = arith.constant 0 : i32
    %c0_i32_1 = arith.constant 0 : i32
    return %arg0, %c0_i32, %c0_i32_0 : i32, i32, i32
  }
  func.func @transform_3(%arg0: i32) -> (i32, i32, i32) {
    %c0_i32 = arith.constant 0 : i32
    %c0_i32_0 = arith.constant 0 : i32
    %c0_i32_1 = arith.constant 0 : i32
    return %arg0, %c0_i32, %c0_i32_0 : i32, i32, i32
  }
  func.func @transform_4(%arg0: i32) -> (i32, i32, i32) {
    %c0_i32 = arith.constant 0 : i32
    %c0_i32_0 = arith.constant 0 : i32
    %c0_i32_1 = arith.constant 0 : i32
    return %arg0, %c0_i32, %c0_i32_0 : i32, i32, i32
  }
}

module attributes {stable_mosaic.version = 11 : i64} {
  func.func @_bn_lrelu_kernel(%arg0: i32, %arg1: memref<1x72x128xbf16, #tpu.memory_space<vmem>>, %arg2: memref<1x128xf32, #tpu.memory_space<vmem>>, %arg3: memref<1x128xf32, #tpu.memory_space<vmem>>, %arg4: memref<1x72x128xbf16, #tpu.memory_space<vmem>>) attributes {dimension_semantics = [#tpu.dimension_semantics<parallel>], iteration_bounds = array<i64: 2>, scalar_prefetch = 0 : i64, scratch_operands = 0 : i64, tpu.core_type = #tpu.core_type<tc>, window_params = [{transform_indices = @transform_0, window_bounds = array<i64: 1, 72, 128>}, {pipeline_mode = #tpu.pipeline_mode<synchronous>, transform_indices = @transform_1, window_bounds = array<i64: 1, 128>}, {pipeline_mode = #tpu.pipeline_mode<synchronous>, transform_indices = @transform_2, window_bounds = array<i64: 1, 128>}, {transform_indices = @transform_3, window_bounds = array<i64: 1, 72, 128>}]} {
    %c0 = arith.constant 0 : index
    %c0_0 = arith.constant 0 : index
    %c0_1 = arith.constant 0 : index
    %0 = vector.load %arg1[%c0, %c0_0, %c0_1] : memref<1x72x128xbf16, #tpu.memory_space<vmem>>, vector<1x72x128xbf16>
    %1 = vector.shape_cast %0 : vector<1x72x128xbf16> to vector<72x128xbf16>
    %2 = arith.extf %1 : vector<72x128xbf16> to vector<72x128xf32>
    %c0_2 = arith.constant 0 : index
    %c0_3 = arith.constant 0 : index
    %3 = vector.load %arg2[%c0_2, %c0_3] : memref<1x128xf32, #tpu.memory_space<vmem>>, vector<1x128xf32>
    %4 = vector.broadcast %3 : vector<1x128xf32> to vector<72x128xf32>
    %5 = arith.mulf %2, %4 : vector<72x128xf32>
    %c0_4 = arith.constant 0 : index
    %c0_5 = arith.constant 0 : index
    %6 = vector.load %arg3[%c0_4, %c0_5] : memref<1x128xf32, #tpu.memory_space<vmem>>, vector<1x128xf32>
    %7 = vector.broadcast %6 : vector<1x128xf32> to vector<72x128xf32>
    %8 = arith.addf %5, %7 : vector<72x128xf32>
    %cst = arith.constant 0.000000e+00 : f32
    %9 = vector.broadcast %cst : f32 to vector<72x128xf32>
    %10 = arith.cmpf ogt, %8, %9 : vector<72x128xf32>
    %cst_6 = arith.constant 2.000000e-01 : f32
    %11 = vector.broadcast %cst_6 : f32 to vector<72x128xf32>
    %12 = arith.mulf %11, %8 : vector<72x128xf32>
    %13 = arith.select %10, %8, %12 : vector<72x128xi1>, vector<72x128xf32>
    %14 = arith.truncf %13 : vector<72x128xf32> to vector<72x128xbf16>
    %c0_7 = arith.constant 0 : index
    %c0_8 = arith.constant 0 : index
    %c0_9 = arith.constant 0 : index
    %15 = vector.load %arg4[%c0_7, %c0_8, %c0_9] : memref<1x72x128xbf16, #tpu.memory_space<vmem>>, vector<1x72x128xbf16>
    %16 = vector.shape_cast %15 : vector<1x72x128xbf16> to vector<72x128xbf16>
    %17 = vector.shape_cast %14 : vector<72x128xbf16> to vector<1x72x128xbf16>
    tpu.vector_store %arg4[%c0_7, %c0_8, %c0_9], %17 {strides = array<i32>} : memref<1x72x128xbf16, #tpu.memory_space<vmem>>, vector<1x72x128xbf16>,
    return
  }
  func.func @transform_0(%arg0: i32) -> (i32, i32, i32) {
    %c0_i32 = arith.constant 0 : i32
    %c0_i32_0 = arith.constant 0 : i32
    %c0_i32_1 = arith.constant 0 : i32
    return %arg0, %c0_i32, %c0_i32_0 : i32, i32, i32
  }
  func.func @transform_1(%arg0: i32) -> (i32, i32) {
    %c0_i32 = arith.constant 0 : i32
    %c0_i32_0 = arith.constant 0 : i32
    %c0_i32_1 = arith.constant 0 : i32
    return %c0_i32, %c0_i32_0 : i32, i32
  }
  func.func @transform_2(%arg0: i32) -> (i32, i32) {
    %c0_i32 = arith.constant 0 : i32
    %c0_i32_0 = arith.constant 0 : i32
    %c0_i32_1 = arith.constant 0 : i32
    return %c0_i32, %c0_i32_0 : i32, i32
  }
  func.func @transform_3(%arg0: i32) -> (i32, i32, i32) {
    %c0_i32 = arith.constant 0 : i32
    %c0_i32_0 = arith.constant 0 : i32
    %c0_i32_1 = arith.constant 0 : i32
    return %arg0, %c0_i32, %c0_i32_0 : i32, i32, i32
  }
}

module attributes {stable_mosaic.version = 11 : i64} {
  func.func @_head_kernel(%arg0: i32, %arg1: memref<8x20x256xbf16, #tpu.memory_space<vmem>>, %arg2: memref<1x256xf32, #tpu.memory_space<vmem>>, %arg3: memref<1x256xf32, #tpu.memory_space<vmem>>, %arg4: memref<20x256xf32, #tpu.memory_space<vmem>>, %arg5: memref<8x128xf32, #tpu.memory_space<vmem>>) attributes {dimension_semantics = [#tpu.dimension_semantics<parallel>], iteration_bounds = array<i64: 1>, scalar_prefetch = 0 : i64, scratch_operands = 0 : i64, tpu.core_type = #tpu.core_type<tc>, window_params = [{transform_indices = @transform_0, window_bounds = array<i64: 8, 20, 256>}, {pipeline_mode = #tpu.pipeline_mode<synchronous>, transform_indices = @transform_1, window_bounds = array<i64: 1, 256>}, {pipeline_mode = #tpu.pipeline_mode<synchronous>, transform_indices = @transform_2, window_bounds = array<i64: 1, 256>}, {pipeline_mode = #tpu.pipeline_mode<synchronous>, transform_indices = @transform_3, window_bounds = array<i64: 20, 256>}, {transform_indices = @transform_4, window_bounds = array<i64: 8, 128>}]} {
    %c0 = arith.constant 0 : index
    %c0_0 = arith.constant 0 : index
    %c0_1 = arith.constant 0 : index
    %0 = vector.load %arg1[%c0, %c0_0, %c0_1] : memref<8x20x256xbf16, #tpu.memory_space<vmem>>, vector<8x20x256xbf16>
    %1 = arith.extf %0 : vector<8x20x256xbf16> to vector<8x20x256xf32>
    %c0_2 = arith.constant 0 : index
    %c0_3 = arith.constant 0 : index
    %2 = vector.load %arg2[%c0_2, %c0_3] : memref<1x256xf32, #tpu.memory_space<vmem>>, vector<1x256xf32>
    %3 = vector.shape_cast %2 : vector<1x256xf32> to vector<1x1x256xf32>
    %4 = vector.broadcast %3 : vector<1x1x256xf32> to vector<8x20x256xf32>
    %5 = arith.mulf %1, %4 : vector<8x20x256xf32>
    %c0_4 = arith.constant 0 : index
    %c0_5 = arith.constant 0 : index
    %6 = vector.load %arg3[%c0_4, %c0_5] : memref<1x256xf32, #tpu.memory_space<vmem>>, vector<1x256xf32>
    %7 = vector.shape_cast %6 : vector<1x256xf32> to vector<1x1x256xf32>
    %8 = vector.broadcast %7 : vector<1x1x256xf32> to vector<8x20x256xf32>
    %9 = arith.addf %5, %8 : vector<8x20x256xf32>
    %cst = arith.constant 0.000000e+00 : f32
    %10 = vector.broadcast %cst : f32 to vector<8x20x256xf32>
    %11 = arith.cmpf ogt, %9, %10 : vector<8x20x256xf32>
    %cst_6 = arith.constant 2.000000e-01 : f32
    %12 = vector.broadcast %cst_6 : f32 to vector<8x20x256xf32>
    %13 = arith.mulf %12, %9 : vector<8x20x256xf32>
    %14 = arith.select %11, %9, %13 : vector<8x20x256xi1>, vector<8x20x256xf32>
    %c0_7 = arith.constant 0 : index
    %c0_8 = arith.constant 0 : index
    %15 = vector.load %arg4[%c0_7, %c0_8] : memref<20x256xf32, #tpu.memory_space<vmem>>, vector<20x256xf32>
    %16 = vector.shape_cast %15 : vector<20x256xf32> to vector<1x20x256xf32>
    %17 = vector.broadcast %16 : vector<1x20x256xf32> to vector<8x20x256xf32>
    %18 = arith.mulf %14, %17 : vector<8x20x256xf32>
    %cst_9 = arith.constant dense<0.000000e+00> : vector<8x20xf32>
    %19 = vector.multi_reduction <add>, %18, %cst_9 [2] : vector<8x20x256xf32> to vector<8x20xf32>
    %cst_10 = arith.constant dense<0.000000e+00> : vector<8xf32>
    %20 = vector.multi_reduction <add>, %19, %cst_10 [1] : vector<8x20xf32> to vector<8xf32>
    %21 = vector.shape_cast %20 : vector<8xf32> to vector<8x1xf32>
    %22 = vector.shape_cast %21 : vector<8x1xf32> to vector<8x1xf32>
    %23 = vector.broadcast %22 : vector<8x1xf32> to vector<8x128xf32>
    %c0_11 = arith.constant 0 : index
    %c0_12 = arith.constant 0 : index
    %24 = vector.load %arg5[%c0_11, %c0_12] : memref<8x128xf32, #tpu.memory_space<vmem>>, vector<8x128xf32>
    tpu.vector_store %arg5[%c0_11, %c0_12], %23 {strides = array<i32>} : memref<8x128xf32, #tpu.memory_space<vmem>>, vector<8x128xf32>,
    return
  }
  func.func @transform_0(%arg0: i32) -> (i32, i32, i32) {
    %c0_i32 = arith.constant 0 : i32
    %c0_i32_0 = arith.constant 0 : i32
    %c0_i32_1 = arith.constant 0 : i32
    return %arg0, %c0_i32, %c0_i32_0 : i32, i32, i32
  }
  func.func @transform_1(%arg0: i32) -> (i32, i32) {
    %c0_i32 = arith.constant 0 : i32
    %c0_i32_0 = arith.constant 0 : i32
    %c0_i32_1 = arith.constant 0 : i32
    return %c0_i32, %c0_i32_0 : i32, i32
  }
  func.func @transform_2(%arg0: i32) -> (i32, i32) {
    %c0_i32 = arith.constant 0 : i32
    %c0_i32_0 = arith.constant 0 : i32
    %c0_i32_1 = arith.constant 0 : i32
    return %c0_i32, %c0_i32_0 : i32, i32
  }
  func.func @transform_3(%arg0: i32) -> (i32, i32) {
    %c0_i32 = arith.constant 0 : i32
    %c0_i32_0 = arith.constant 0 : i32
    %c0_i32_1 = arith.constant 0 : i32
    return %c0_i32, %c0_i32_0 : i32, i32
  }
  func.func @transform_4(%arg0: i32) -> (i32, i32) {
    %c0_i32 = arith.constant 0 : i32
    %c0_i32_0 = arith.constant 0 : i32
    return %arg0, %c0_i32 : i32, i32
  }
}

module attributes {stable_mosaic.version = 11 : i64} {
  func.func @_conv_stats_kernel(%arg0: i32, %arg1: memref<1x32x512xbf16, #tpu.memory_space<vmem>>, %arg2: memref<4x512x256xbf16, #tpu.memory_space<vmem>>, %arg3: memref<1x20x256xbf16, #tpu.memory_space<vmem>>, %arg4: memref<1x1x256xf32, #tpu.memory_space<vmem>>, %arg5: memref<1x1x256xf32, #tpu.memory_space<vmem>>) attributes {dimension_semantics = [#tpu.dimension_semantics<parallel>], iteration_bounds = array<i64: 2>, scalar_prefetch = 0 : i64, scratch_operands = 0 : i64, tpu.core_type = #tpu.core_type<tc>, window_params = [{transform_indices = @transform_0, window_bounds = array<i64: 1, 32, 512>}, {pipeline_mode = #tpu.pipeline_mode<synchronous>, transform_indices = @transform_1, window_bounds = array<i64: 4, 512, 256>}, {transform_indices = @transform_2, window_bounds = array<i64: 1, 20, 256>}, {transform_indices = @transform_3, window_bounds = array<i64: 1, 1, 256>}, {transform_indices = @transform_4, window_bounds = array<i64: 1, 1, 256>}]} {
    %c0 = arith.constant 0 : index
    %c0_0 = arith.constant 0 : index
    %c0_1 = arith.constant 0 : index
    %0 = vector.load %arg1[%c0, %c0_0, %c0_1] : memref<1x32x512xbf16, #tpu.memory_space<vmem>>, vector<1x20x512xbf16>
    %1 = vector.shape_cast %0 : vector<1x20x512xbf16> to vector<20x512xbf16>
    %c0_2 = arith.constant 0 : index
    %c0_3 = arith.constant 0 : index
    %c0_4 = arith.constant 0 : index
    %2 = vector.load %arg2[%c0_2, %c0_3, %c0_4] : memref<4x512x256xbf16, #tpu.memory_space<vmem>>, vector<1x512x256xbf16>
    %3 = vector.shape_cast %2 : vector<1x512x256xbf16> to vector<512x256xbf16>
    %cst = arith.constant dense<0.000000e+00> : vector<20x256xf32>
    %4 = tpu.matmul %1, %3, %cst {dimension_numbers = #tpu.dot_dimension_numbers<[1], [0], [0], [1], [0, 0, 1, 1], [], []>} : vector<20x512xbf16>, vector<512x256xbf16>, vector<20x256xf32> -> vector<20x256xf32>
    %c0_5 = arith.constant 0 : index
    %c1 = arith.constant 1 : index
    %c0_6 = arith.constant 0 : index
    %5 = vector.load %arg1[%c0_5, %c1, %c0_6] : memref<1x32x512xbf16, #tpu.memory_space<vmem>>, vector<1x20x512xbf16>
    %6 = vector.shape_cast %5 : vector<1x20x512xbf16> to vector<20x512xbf16>
    %c1_7 = arith.constant 1 : index
    %c0_8 = arith.constant 0 : index
    %c0_9 = arith.constant 0 : index
    %7 = vector.load %arg2[%c1_7, %c0_8, %c0_9] : memref<4x512x256xbf16, #tpu.memory_space<vmem>>, vector<1x512x256xbf16>
    %8 = vector.shape_cast %7 : vector<1x512x256xbf16> to vector<512x256xbf16>
    %cst_10 = arith.constant dense<0.000000e+00> : vector<20x256xf32>
    %9 = tpu.matmul %6, %8, %cst_10 {dimension_numbers = #tpu.dot_dimension_numbers<[1], [0], [0], [1], [0, 0, 1, 1], [], []>} : vector<20x512xbf16>, vector<512x256xbf16>, vector<20x256xf32> -> vector<20x256xf32>
    %10 = arith.addf %4, %9 : vector<20x256xf32>
    %c0_11 = arith.constant 0 : index
    %c5 = arith.constant 5 : index
    %c0_12 = arith.constant 0 : index
    %11 = vector.load %arg1[%c0_11, %c5, %c0_12] : memref<1x32x512xbf16, #tpu.memory_space<vmem>>, vector<1x20x512xbf16>
    %12 = vector.shape_cast %11 : vector<1x20x512xbf16> to vector<20x512xbf16>
    %c2 = arith.constant 2 : index
    %c0_13 = arith.constant 0 : index
    %c0_14 = arith.constant 0 : index
    %13 = vector.load %arg2[%c2, %c0_13, %c0_14] : memref<4x512x256xbf16, #tpu.memory_space<vmem>>, vector<1x512x256xbf16>
    %14 = vector.shape_cast %13 : vector<1x512x256xbf16> to vector<512x256xbf16>
    %cst_15 = arith.constant dense<0.000000e+00> : vector<20x256xf32>
    %15 = tpu.matmul %12, %14, %cst_15 {dimension_numbers = #tpu.dot_dimension_numbers<[1], [0], [0], [1], [0, 0, 1, 1], [], []>} : vector<20x512xbf16>, vector<512x256xbf16>, vector<20x256xf32> -> vector<20x256xf32>
    %16 = arith.addf %10, %15 : vector<20x256xf32>
    %c0_16 = arith.constant 0 : index
    %c6 = arith.constant 6 : index
    %c0_17 = arith.constant 0 : index
    %17 = vector.load %arg1[%c0_16, %c6, %c0_17] : memref<1x32x512xbf16, #tpu.memory_space<vmem>>, vector<1x20x512xbf16>
    %18 = vector.shape_cast %17 : vector<1x20x512xbf16> to vector<20x512xbf16>
    %c3 = arith.constant 3 : index
    %c0_18 = arith.constant 0 : index
    %c0_19 = arith.constant 0 : index
    %19 = vector.load %arg2[%c3, %c0_18, %c0_19] : memref<4x512x256xbf16, #tpu.memory_space<vmem>>, vector<1x512x256xbf16>
    %20 = vector.shape_cast %19 : vector<1x512x256xbf16> to vector<512x256xbf16>
    %cst_20 = arith.constant dense<0.000000e+00> : vector<20x256xf32>
    %21 = tpu.matmul %18, %20, %cst_20 {dimension_numbers = #tpu.dot_dimension_numbers<[1], [0], [0], [1], [0, 0, 1, 1], [], []>} : vector<20x512xbf16>, vector<512x256xbf16>, vector<20x256xf32> -> vector<20x256xf32>
    %22 = arith.addf %16, %21 : vector<20x256xf32>
    %23 = arith.truncf %22 : vector<20x256xf32> to vector<20x256xbf16>
    %c0_21 = arith.constant 0 : index
    %c0_22 = arith.constant 0 : index
    %c0_23 = arith.constant 0 : index
    %24 = vector.load %arg3[%c0_21, %c0_22, %c0_23] : memref<1x20x256xbf16, #tpu.memory_space<vmem>>, vector<1x20x256xbf16>
    %25 = vector.shape_cast %24 : vector<1x20x256xbf16> to vector<20x256xbf16>
    %26 = vector.shape_cast %23 : vector<20x256xbf16> to vector<1x20x256xbf16>
    tpu.vector_store %arg3[%c0_21, %c0_22, %c0_23], %26 {strides = array<i32>} : memref<1x20x256xbf16, #tpu.memory_space<vmem>>, vector<1x20x256xbf16>,
    %27 = tpu.iota {dimensions = array<i32: 0>} : vector<20x1xi32>
    %c5_i32 = arith.constant 5 : i32
    %c0_i32 = arith.constant 0 : i32
    %28 = arith.cmpi eq, %c5_i32, %c0_i32 : i32
    %c1_i32 = arith.constant 1 : i32
    %29 = arith.select %28, %c1_i32, %c5_i32 : i32
    %30 = vector.broadcast %29 : i32 to vector<20x1xi32>
    %31 = arith.remsi %27, %30 : vector<20x1xi32>
    %c0_i32_24 = arith.constant 0 : i32
    %32 = vector.broadcast %c0_i32_24 : i32 to vector<20x1xi32>
    %33 = arith.cmpi ne, %31, %32 : vector<20x1xi32>
    %c0_i32_25 = arith.constant 0 : i32
    %34 = vector.broadcast %c0_i32_25 : i32 to vector<20x1xi32>
    %35 = arith.cmpi slt, %31, %34 : vector<20x1xi32>
    %c0_i32_26 = arith.constant 0 : i32
    %36 = arith.cmpi slt, %29, %c0_i32_26 : i32
    %37 = vector.broadcast %36 : i1 to vector<20x1xi1>
    %38 = vector.broadcast %37 : vector<20x1xi1> to vector<20x1xi1>
    %39 = arith.xori %35, %38 : vector<20x1xi1>
    %40 = arith.andi %39, %33 : vector<20x1xi1>
    %41 = vector.broadcast %29 : i32 to vector<20x1xi32>
    %42 = arith.addi %31, %41 : vector<20x1xi32>
    %43 = arith.select %40, %42, %31 : vector<20x1xi1>, vector<20x1xi32>
    %c4_i32 = arith.constant 4 : i32
    %44 = vector.broadcast %c4_i32 : i32 to vector<20x1xi32>
    %45 = arith.cmpi ne, %43, %44 : vector<20x1xi32>
    %cst_27 = arith.constant 0.000000e+00 : f32
    %46 = vector.shape_cast %45 : vector<20x1xi1> to vector<20x1xi1>
    %47 = vector.broadcast %46 : vector<20x1xi1> to vector<20x256xi1>
    %48 = vector.broadcast %cst_27 : f32 to vector<20x256xf32>
    %49 = arith.select %47, %22, %48 : vector<20x256xi1>, vector<20x256xf32>
    %cst_28 = arith.constant dense<0.000000e+00> : vector<256xf32>
    %50 = vector.multi_reduction <add>, %49, %cst_28 [0] : vector<20x256xf32> to vector<256xf32>
    %51 = vector.shape_cast %50 : vector<256xf32> to vector<1x256xf32>
    %c0_29 = arith.constant 0 : index
    %c0_30 = arith.constant 0 : index
    %c0_31 = arith.constant 0 : index
    %52 = vector.load %arg4[%c0_29, %c0_30, %c0_31] : memref<1x1x256xf32, #tpu.memory_space<vmem>>, vector<1x1x256xf32>
    %53 = vector.shape_cast %52 : vector<1x1x256xf32> to vector<1x256xf32>
    %54 = vector.shape_cast %51 : vector<1x256xf32> to vector<1x1x256xf32>
    tpu.vector_store %arg4[%c0_29, %c0_30, %c0_31], %54 {strides = array<i32>} : memref<1x1x256xf32, #tpu.memory_space<vmem>>, vector<1x1x256xf32>,
    %55 = arith.mulf %49, %49 : vector<20x256xf32>
    %cst_32 = arith.constant dense<0.000000e+00> : vector<256xf32>
    %56 = vector.multi_reduction <add>, %55, %cst_32 [0] : vector<20x256xf32> to vector<256xf32>
    %57 = vector.shape_cast %56 : vector<256xf32> to vector<1x256xf32>
    %c0_33 = arith.constant 0 : index
    %c0_34 = arith.constant 0 : index
    %c0_35 = arith.constant 0 : index
    %58 = vector.load %arg5[%c0_33, %c0_34, %c0_35] : memref<1x1x256xf32, #tpu.memory_space<vmem>>, vector<1x1x256xf32>
    %59 = vector.shape_cast %58 : vector<1x1x256xf32> to vector<1x256xf32>
    %60 = vector.shape_cast %57 : vector<1x256xf32> to vector<1x1x256xf32>
    tpu.vector_store %arg5[%c0_33, %c0_34, %c0_35], %60 {strides = array<i32>} : memref<1x1x256xf32, #tpu.memory_space<vmem>>, vector<1x1x256xf32>,
    return
  }
  func.func @transform_0(%arg0: i32) -> (i32, i32, i32) {
    %c0_i32 = arith.constant 0 : i32
    %c0_i32_0 = arith.constant 0 : i32
    %c0_i32_1 = arith.constant 0 : i32
    return %arg0, %c0_i32, %c0_i32_0 : i32, i32, i32
  }
  func.func @transform_1(%arg0: i32) -> (i32, i32, i32) {
    %c0_i32 = arith.constant 0 : i32
    %c0_i32_0 = arith.constant 0 : i32
    %c0_i32_1 = arith.constant 0 : i32
    %c0_i32_2 = arith.constant 0 : i32
    return %c0_i32, %c0_i32_0, %c0_i32_1 : i32, i32, i32
  }
  func.func @transform_2(%arg0: i32) -> (i32, i32, i32) {
    %c0_i32 = arith.constant 0 : i32
    %c0_i32_0 = arith.constant 0 : i32
    %c0_i32_1 = arith.constant 0 : i32
    return %arg0, %c0_i32, %c0_i32_0 : i32, i32, i32
  }
  func.func @transform_3(%arg0: i32) -> (i32, i32, i32) {
    %c0_i32 = arith.constant 0 : i32
    %c0_i32_0 = arith.constant 0 : i32
    %c0_i32_1 = arith.constant 0 : i32
    return %arg0, %c0_i32, %c0_i32_0 : i32, i32, i32
  }
  func.func @transform_4(%arg0: i32) -> (i32, i32, i32) {
    %c0_i32 = arith.constant 0 : i32
    %c0_i32_0 = arith.constant 0 : i32
    %c0_i32_1 = arith.constant 0 : i32
    return %arg0, %c0_i32, %c0_i32_0 : i32, i32, i32
  }
}

</mosaic_0001>

<bundles_post_ra>
// kernel: discriminator_forward.7
= control target key start
LH: loop header
LB: loop body
LE: loop exit
PB: predicated region body
PF: predicated region fallthrough
CT: control target
= control target key end

     0   :  { %s8883_s9 = smov 0   ;;  %s9696_s0 = inlined_call_operand.vmem [shape: bf16[2,1104,128], index: 0, kind: input, shape index: {}]   ;;  %s9697_s1 = inlined_call_operand.vmem [shape: bf16[4,128,128], index: 1, kind: input, shape index: {}]   ;;  %s9698_s2 = inlined_call_operand.vmem [shape: bf16[2,1056,128], index: 2, kind: output, shape index: {}]  }
   0x1 LB: > { %s6422_s10 = sadd.s32 4294967295, %s8866_s9   ;;  %p6426_p0 = scmp.ge.s32.totalorder %s8866_s9, 1  ;;  %s8866_s9 = sphi %s8883_s9, %s12_s9  }
   0x2   : > { %p112_p1 = scmp.lt.s32.totalorder %s8866_s9, 3 }
   0x4   : > { %p113_p2 = pnand %p6426_p0, %p112_p1 }
   0x5   : > { %v8599_v0 = vld [vmem:[%s9697_s1 + $0x40] sm:$0xff] (!%p113_p2)   ;;  %v8601_v2 = vld [vmem:[%s9697_s1 + $0x48] sm:$0xff] (!%p113_p2)   ;;  %p134_p3 = scmp.lt.s32.totalorder (!%p113_p2), %s6422_s10, 1  ;;  %v8603_v4 = vld [vmem:[%s9697_s1 + $0x50] sm:$0xff] (!%p113_p2)   ;;  %vm644_vm0 = vsmask.f32 (!%p113_p2), 7424 }
   0x6   : > { %116 = sbr.rel (%p113_p2) target bundleno = 782 (0x30e), region = 28  ;;  %v8600_v1 = vld [vmem:[%s9697_s1 + $0x80] sm:$0xff] (!%p113_p2)   ;;  %7601 = vmatprep.subr.bf16.mxu1 (!%p113_p2), %v8599_v0  ;;  %v8602_v3 = vld [vmem:[%s9697_s1 + $0x88] sm:$0xff] (!%p113_p2)   ;;  %v8604_v5 = vld [vmem:[%s9697_s1 + $0x90] sm:$0xff] (!%p113_p2)   ;;  %vm4370_vm1 = vcmask (!%p113_p2), 1046528  }
   0x7   : > { %7897 = vmatprep.subr.bf16.mxu0 (!%p113_p2), %v8600_v1  ;;  %7602 = vmatpush3.bf16.msra.mxu1 (!%p113_p2), %v8599_v0  ;;  %v8605_v6 = vld [vmem:[%s9697_s1 + $0x58] sm:$0xff] (!%p113_p2)   ;;  %v8607_v8 = vld [vmem:[%s9697_s1 + $0x60] sm:$0xff] (!%p113_p2)   ;;  %v8609_v10 = vld [vmem:[%s9697_s1 + $0x68] sm:$0xff] (!%p113_p2)  }
   0x8   : > { %7898 = vmatpush3.bf16.msra.mxu0 (!%p113_p2), %v8600_v1  ;;  %7603 = vmatprep.subr.bf16.mxu1 (!%p113_p2), %v8601_v2  ;;  %v8606_v7 = vld [vmem:[%s9697_s1 + $0x98] sm:$0xff] (!%p113_p2)   ;;  %v8608_v9 = vld [vmem:[%s9697_s1 + $0xa0] sm:$0xff] (!%p113_p2)   ;;  %v8610_v11 = vld [vmem:[%s9697_s1 + $0xa8] sm:$0xff] (!%p113_p2)  }
   0x9   : > { %7899 = vmatprep.subr.bf16.mxu0 (!%p113_p2), %v8602_v3  ;;  %v8611_v14 = vld [vmem:[%s9697_s1 + $0x70] sm:$0xff] (!%p113_p2)   ;;  %v8613_v28 = vld [vmem:[%s9697_s1 + $0x78] sm:$0xff] (!%p113_p2)   ;;  %v8620_v42 = vld [vmem:[%s9697_s1] sm:$0xff] (!%p113_p2)  }
   0xa   : > { %v8612_v17 = vld [vmem:[%s9697_s1 + $0xb0] sm:$0xff] (!%p113_p2)   ;;  %v8614_v32 = vld [vmem:[%s9697_s1 + $0xb8] sm:$0xff] (!%p113_p2)   ;;  %v8622_v54 = vld [vmem:[%s9697_s1 + $0xc0] sm:$0xff] (!%p113_p2)  }
   0xb   : > { %7604 = vmatpush3.bf16.msra.mxu1 (!%p113_p2), %v8601_v2 }
   0xc   : > { %7900 = vmatpush3.bf16.msra.mxu0 (!%p113_p2), %v8602_v3  ;;  %7605 = vmatprep.subr.bf16.mxu1 (!%p113_p2), %v8603_v4 }
   0xd   : > { %s9700_s10 = smov (!%p134_p3, %s6422_s10), 1  ;;  %7901 = vmatprep.subr.bf16.mxu0 %v8604_v5 }
   0xe   : > { %s8589_s27 = smul.u32 552, %s9700_s10 }
   0xf   : > { %7606 = vmatpush3.bf16.msra.mxu1 %v8603_v4 }
  0x10   : > { %7902 = vmatpush3.bf16.msra.mxu0 %v8604_v5  ;;  %7607 = vmatprep.subr.bf16.mxu1 %v8605_v6  ;;  %s8930_s8 = scalar_lea.vmem %s9696_s0, %s8589_s27 }
  0x11   : > { %7903 = vmatprep.subr.bf16.mxu0 %v8606_v7  ;;  %v8615_v12 = vld [vmem:[%s8930_s8] sm:$0xff]   ;;  %v8616_v13 = vld [vmem:[%s8930_s8 + $0x8] sm:$0xff]   ;;  %v2527_v15 = vld [vmem:[%s8930_s8 + $0x10] sm:$0xf] }
  0x12   : > { %v2528_v16 = vld [vmem:[%s8930_s8 + $0x14] sm:$0xf]  ;;  %v646_v18 = vshrl.u32 %v8615_v12, 16  ;;  %v648_v19 = vshll.u32 %v8615_v12, 16  ;;  %v653_v20 = vshll.u32 %v8616_v13, 16  ;;  %v8618_v22 = vld [vmem:[%s8930_s8 + $0x18] sm:$0xff]  }
  0x13   : > { %7608 = vmatpush3.bf16.msra.mxu1 %v8605_v6  ;;  %v6544_v21 = vcombine.low %v2527_v15, %v2528_v16  ;;  %v8619_v23 = vld [vmem:[%s8930_s8 + $0x10] sm:$0xff]   ;;  %v3018_v29 = vshll.u32 %v8618_v22, 16  ;;  %v8621_v31 = vld [vmem:[%s8930_s8 + $0x20] sm:$0xff]   ;;  %v657_v35 = vshrl.u32 %v8616_v13, 16  ;;  %v3022_v38 = vshrl.u32 %v8618_v22, 16  ;;  %v8623_v44 = vld [vmem:[%s8930_s8 + $0x18] sm:$0xff]  }
  0x14   : > { %7904 = vmatpush3.bf16.msra.mxu0 %v8606_v7  ;;  %7609 = vmatprep.subr.bf16.mxu1 %v8607_v8  ;;  %v650_v24 = vrot.slane %v648_v19, 1  ;;  %v655_v25 = vrot.slane %v653_v20, 1  ;;  %v661_v30 = vshll.u32 %v8619_v23, 16  ;;  %v3026_v39 = vshll.u32 %v8621_v31, 16  ;;  %v8624_v46 = vld [vmem:[%s8930_s8 + $0x28] sm:$0xff]   ;;  %v8625_v50 = vld [vmem:[%s8930_s8 + $0x20] sm:$0xff]  }
  0x15   : > { %7905 = vmatprep.subr.bf16.mxu0 %v8608_v9  ;;  %v3011_v26 = vshrl.u32 %v6544_v21, 16  ;;  %v3013_v27 = vshll.u32 %v6544_v21, 16  ;;  %v3020_v36 = vrot.slane %v3018_v29, 1  ;;  %v665_v45 = vshrl.u32 %v8619_v23, 16  ;;  %v8626_v57 = vld [vmem:[%s8930_s8 + $0x30] sm:$0xff]   ;;  %v8627_v1 = vld [vmem:[%s8930_s8 + $0x28] sm:$0xff]  }
  0x16   : > { %v651_v33 = vor.u32 %v650_v24, %v646_v18  ;;  %v663_v37 = vrot.slane %v661_v30, 1  ;;  %v3028_v43 = vrot.slane %v3026_v39, 1  ;;  %v659_v48 = vor.u32 %v657_v35, %v655_v25  ;;  %v8628_v4 = vld [vmem:[%s8930_s8 + $0x38] sm:$0xff]   ;;  %v8632_v21 = vld [vmem:[%s8930_s8 + $0x48] sm:$0xff]   ;;  %v8633_v35 = vld [vmem:[%s8930_s8 + $0x40] sm:$0xff]  }
  0x17   : > { %7610 = vmatpush3.bf16.msra.mxu1 %v8607_v8  ;;  %v3015_v34 = vrot.slane %v3013_v27, 1  ;;  %v3030_v49 = vshrl.u32 %v8621_v31, 16  ;;  %v3024_v51 = vor.u32 %v3022_v38, %v3020_v36  ;;  %v669_v52 = vshll.u32 %v8623_v44, 16  ;;  %v8631_v18 = vld [vmem:[%s8930_s8 + $0x38] sm:$0xff]   ;;  %v8634_v38 = vld [vmem:[%s8930_s8 + $0x50] sm:$0xff]  }
  0x18   : > { %7906 = vmatpush3.bf16.msra.mxu0 %v8608_v9  ;;  %7611 = vmatprep.subr.bf16.mxu1 %v8609_v10  ;;  %v656_v40 = vsel %vm644_vm0, %v651_v33, %v655_v25  ;;  %v3034_v53 = vshll.u32 %v8624_v46, 16  ;;  %v667_v55 = vor.u32 %v665_v45, %v663_v37  ;;  %v677_v56 = vshll.u32 %v8625_v50, 16 }
  0x19   : > { %7907 = vmatprep.subr.bf16.mxu0 %v8610_v11  ;;  %v3016_v41 = vor.u32 %v3015_v34, %v3011_v26  ;;  %7617 = vmatprep.mubr.bf16.mxu1 %v656_v40  ;;  %v671_v58 = vrot.slane %v669_v52, 1  ;;  %v3032_v59 = vor.u32 %v3030_v49, %v3028_v43  ;;  %v664_v61 = vsel %vm644_vm0, %v659_v48, %v663_v37  ;;  %v8640_v49 = vld [vmem:[%s9697_s1 + $0xc8] sm:$0xff]  }
  0x1a   : > { %v3036_v60 = vrot.slane %v3034_v53, 1  ;;  %v673_v62 = vshrl.u32 %v8623_v44, 16  ;;  %v3038_v63 = vshrl.u32 %v8624_v46, 16  ;;  %v3042_v0 = vshll.u32 %v8626_v57, 16  ;;  %v8639_v46 = vld [vmem:[%s9697_s1 + $0x8] sm:$0xff]  }
  0x1b   : > { %7612 = vmatpush3.bf16.msra.mxu1 %v8609_v10  ;;  %v3021_v47 = vsel %vm644_vm0, %v3016_v41, %v3020_v36  ;;  %v3029_v2 = vsel %vm644_vm0, %v3024_v51, %v3028_v43  ;;  %v681_v3 = vshrl.u32 %v8625_v50, 16  ;;  %v672_v5 = vsel %vm644_vm0, %v667_v55, %v671_v58  ;;  %v8636_v43 = vld [vmem:[%s8930_s8 + $0x58] sm:$0xff]  }
  0x1c   : > { %7908 = vmatpush3.bf16.msra.mxu0 %v8610_v11  ;;  %7613 = vmatprep.subr.bf16.mxu1 %v8611_v14  ;;  %v679_v6 = vrot.slane %v677_v56, 1  ;;  %v685_v7 = vshll.u32 %v8627_v1, 16  ;;  %v3046_v8 = vshrl.u32 %v8626_v57, 16  ;;  %v3037_v9 = vsel %vm644_vm0, %v3032_v59, %v3036_v60  ;;  %v8629_v11 = vld [vmem:[%s8930_s8 + $0x30] sm:$0xff]  }
  0x1d   : > { %7909 = vmatprep.subr.bf16.mxu0 %v8612_v17  ;;  %7913 = vmatprep.mubr.bf16.mxu0 %v3021_v47  ;;  %v3050_v10 = vshll.u32 %v8628_v4, 16  ;;  %v675_v12 = vor.u32 %v673_v62, %v671_v58  ;;  %v3044_v13 = vrot.slane %v3042_v0, 1  ;;  %v3040_v15 = vor.u32 %v3038_v63, %v3036_v60  ;;  %v8638_v0 = vld [vmem:[%s8930_s8 + $0x60] sm:$0xff]  }
  0x1e   : > { %v683_v16 = vor.u32 %v681_v3, %v679_v6  ;;  %v693_v22 = vshll.u32 %v8629_v11, 16  ;;  %v689_v24 = vshrl.u32 %v8627_v1, 16  ;;  %v3054_v25 = vshrl.u32 %v8628_v4, 16  ;;  %v8641_v4 = vld [vmem:[%s8930_s8 + $0x58] sm:$0xff]  }
  0x1f   : > { %7614 = vmatpush3.bf16.msra.mxu1 %v8611_v14  ;;  %v8630_v14 = vld [vmem:[%s8930_s8 + $0x40] sm:$0xff]   ;;  %v3048_v19 = vor.u32 %v3046_v8, %v3044_v13  ;;  %v3052_v20 = vrot.slane %v3050_v10, 1  ;;  %v680_v23 = vsel %vm644_vm0, %v675_v12, %v679_v6  ;;  %v3045_v27 = vsel %vm644_vm0, %v3040_v15, %v3044_v13 }
  0x20   : > { %7910 = vmatpush3.bf16.msra.mxu0 %v8612_v17  ;;  %7615 = vmatprep.subr.bf16.mxu1 %v8613_v28  ;;  %v687_v17 = vrot.slane %v685_v7, 1  ;;  %v3058_v26 = vshll.u32 %v8630_v14, 16  ;;  %v697_v29 = vshrl.u32 %v8629_v11, 16  ;;  %v701_v30 = vshll.u32 %v8631_v18, 16  ;;  %v8642_v7 = vld [vmem:[%s8930_s8 + $0x68] sm:$0xff]  }
  0x21   : > { %7911 = vmatprep.subr.bf16.mxu0 %v8614_v32  ;;  %v3053_v31 = vsel %vm644_vm0, %v3048_v19, %v3052_v20  ;;  %v3066_v33 = vshll.u32 %v8632_v21, 16  ;;  %v695_v34 = vrot.slane %v693_v22, 1  ;;  %v3056_v39 = vor.u32 %v3054_v25, %v3052_v20  ;;  %v8644_v25 = vld [vmem:[%s8930_s8 + $0x70] sm:$0xff]  }
  0x22   : > { %v691_v36 = vor.u32 %v689_v24, %v687_v17  ;;  %v3060_v37 = vrot.slane %v3058_v26, 1  ;;  %v703_v41 = vrot.slane %v701_v30, 1  ;;  %v705_v47 = vshrl.u32 %v8631_v18, 16 }
  0x23   : > { %7616 = vmatpush3.bf16.msra.mxu1 %v8613_v28  ;;  %v688_v28 = vsel %vm644_vm0, %v683_v16, %v687_v17  ;;  %v699_v40 = vor.u32 %v697_v29, %v695_v34  ;;  %v3068_v45 = vrot.slane %v3066_v33, 1  ;;  %v709_v48 = vshll.u32 %v8633_v35, 16 }
  0x24   : > { %7912 = vmatpush3.bf16.msra.mxu0 %v8614_v32  ;;  %7749 = vmatprep.subr.bf16.mxu1 %v8620_v42  ;;  %v3062_v32 = vshrl.u32 %v8630_v14, 16  ;;  %v696_v50 = vsel %vm644_vm0, %v691_v36, %v695_v34  ;;  %v3070_v51 = vshrl.u32 %v8632_v21, 16  ;;  %v3074_v52 = vshll.u32 %v8634_v38, 16  ;;  %v8643_v21 = vld [vmem:[%s8930_s8 + $0x60] sm:$0xff]  }
  0x25   : > { %8045 = vmatprep.subr.bf16.mxu0 %v8622_v54  ;;  %v3061_v53 = vsel %vm644_vm0, %v3056_v39, %v3060_v37  ;;  %v713_v55 = vshrl.u32 %v8633_v35, 16  ;;  %v3078_v58 = vshrl.u32 %v8634_v38, 16  ;;  %v3082_v59 = vshll.u32 %v8636_v43, 16 }
  0x26   : > { %7618 = vmatmul.mubr.bf16.vlgmr.msra.gmra.mrb[0].mxu1 %v664_v61  ;;  %v3064_v44 = vor.u32 %v3062_v32, %v3060_v37  ;;  %v711_v60 = vrot.slane %v709_v48, 1  ;;  %v8637_v61 = vld [vmem:[%s8930_s8 + $0x50] sm:$0xff]   ;;  %v707_v62 = vor.u32 %v705_v47, %v703_v41  ;;  %v3076_v63 = vrot.slane %v3074_v52, 1  ;;  %v8648_v48 = vld [vmem:[%s8930_s8 + $0x80] sm:$0xff]  }
  0x27   : > { %7914 = vmatmul.mubr.bf16.vlgmr.msra.gmra.mrb[0].mxu0 %v3029_v2  ;;  %7750 = vmatpush3.bf16.msra.mxu1 %v8620_v42  ;;  %v8635_v42 = vld [vmem:[%s8930_s8 + $0x48] sm:$0xff]   ;;  %v3072_v1 = vor.u32 %v3070_v51, %v3068_v45  ;;  %v3084_v6 = vrot.slane %v3082_v59, 1  ;;  %v3086_v11 = vshrl.u32 %v8636_v43, 16  ;;  %v3090_v12 = vshll.u32 %v8638_v0, 16 }
  0x28   : > { %8046 = vmatpush3.bf16.msra.mxu0 %v8622_v54  ;;  %7621 = vmatprep.mubr.bf16.mxu1 %v672_v5  ;;  %v704_v54 = vsel %vm644_vm0, %v699_v40, %v703_v41  ;;  %v717_v56 = vshll.u32 %v8635_v42, 16  ;;  %v3069_v57 = vsel %vm644_vm0, %v3064_v44, %v3068_v45  ;;  %v715_v2 = vor.u32 %v713_v55, %v711_v60  ;;  %v8647_v45 = vld [vmem:[%s8930_s8 + $0x70] sm:$0xff]  }
  0x29   : > { %7917 = vmatprep.mubr.bf16.mxu0 %v3037_v9  ;;  %7751 = vmatprep.subr.bf16.mxu1 %v8639_v46  ;;  %v3080_v5 = vor.u32 %v3078_v58, %v3076_v63  ;;  %v721_v8 = vshrl.u32 %v8635_v42, 16  ;;  %v725_v9 = vshll.u32 %v8637_v61, 16  ;;  %v712_v10 = vsel %vm644_vm0, %v707_v62, %v711_v60  ;;  %v8658_v62 = vld [vmem:[%s9697_s1 + $0xd0] sm:$0xff]  }
  0x2a   : > { %8047 = vmatprep.subr.bf16.mxu0 %v8640_v49  ;;  %v719_v3 = vrot.slane %v717_v56, 1  ;;  %v3077_v13 = vsel %vm644_vm0, %v3072_v1, %v3076_v63  ;;  %v729_v15 = vshrl.u32 %v8637_v61, 16  ;;  %v733_v16 = vshll.u32 %v8641_v4, 16 }
  0x2b   : > { %7752 = vmatpush3.bf16.msra.mxu1 %v8639_v46  ;;  %v3085_v17 = vsel %vm644_vm0, %v3080_v5, %v3084_v6  ;;  %v3094_v18 = vshrl.u32 %v8638_v0, 16  ;;  %v3098_v19 = vshll.u32 %v8642_v7, 16  ;;  %v727_v20 = vrot.slane %v725_v9, 1 }
  0x2c   : > { %8048 = vmatpush3.bf16.msra.mxu0 %v8640_v49  ;;  %v720_v14 = vsel %vm644_vm0, %v715_v2, %v719_v3  ;;  %v723_v22 = vor.u32 %v721_v8, %v719_v3  ;;  %v3092_v24 = vrot.slane %v3090_v12, 1  ;;  %v741_v32 = vshll.u32 %v8643_v21, 16 }
  0x2d   : > { %v731_v26 = vor.u32 %v729_v15, %v727_v20  ;;  %v3100_v30 = vrot.slane %v3098_v19, 1  ;;  %v737_v35 = vshrl.u32 %v8641_v4, 16  ;;  %v3106_v36 = vshll.u32 %v8644_v25, 16  ;;  %8049 = vmatprep.subr.bf16.mxu0 %v8658_v62 }
  0x2e   : > { %7622 = vmatmul.mubr.bf16.gmra.mrb[4].mxu1 %v680_v23  ;;  %v3088_v23 = vor.u32 %v3086_v11, %v3084_v6  ;;  %v3096_v29 = vor.u32 %v3094_v18, %v3092_v24  ;;  %v728_v33 = vsel %vm644_vm0, %v723_v22, %v727_v20  ;;  %v3102_v38 = vshrl.u32 %v8642_v7, 16  ;;  %v8651_v7 = vld [vmem:[%s8930_s8 + $0x80] sm:$0xff]   ;;  %v8652_v11 = vld [vmem:[%s8930_s8 + $0x90] sm:$0xff]  }
  0x2f   : > { %7918 = vmatmul.mubr.bf16.gmra.mrb[4].mxu0 %v3045_v27  ;;  %7625 = vmatprep.mubr.bf16.mxu1 %v688_v28  ;;  %v735_v27 = vrot.slane %v733_v16, 1  ;;  %v8645_v28 = vld [vmem:[%s8930_s8 + $0x68] sm:$0xff]   ;;  %v745_v39 = vshrl.u32 %v8643_v21, 16  ;;  %v3110_v42 = vshrl.u32 %v8644_v25, 16  ;;  %v743_v44 = vrot.slane %v741_v32, 1 }
  0x30   : > { %7921 = vmatprep.mubr.bf16.mxu0 %v3053_v31  ;;  %v8646_v31 = vld [vmem:[%s8930_s8 + $0x78] sm:$0xff]   ;;  %v3093_v34 = vsel %vm644_vm0, %v3088_v23, %v3092_v24  ;;  %v749_v40 = vshll.u32 %v8645_v28, 16  ;;  %v3101_v41 = vsel %vm644_vm0, %v3096_v29, %v3100_v30  ;;  %v3108_v47 = vrot.slane %v3106_v36, 1  ;;  %8050 = vmatpush3.bf16.msra.mxu0 %v8658_v62 }
  0x31   : > { %v736_v37 = vsel %vm644_vm0, %v731_v26, %v735_v27  ;;  %v3114_v43 = vshll.u32 %v8646_v31, 16  ;;  %v739_v46 = vor.u32 %v737_v35, %v735_v27  ;;  %v3104_v49 = vor.u32 %v3102_v38, %v3100_v30  ;;  %v8659_v38 = vld [vmem:[%s8930_s8 + $0x98] sm:$0xff]  }
  0x32   : > { %v751_v51 = vrot.slane %v749_v40, 1  ;;  %v753_v52 = vshrl.u32 %v8645_v28, 16  ;;  %v3112_v55 = vor.u32 %v3110_v42, %v3108_v47  ;;  %v757_v58 = vshll.u32 %v8647_v45, 16 }
  0x33   : > { %v3116_v56 = vrot.slane %v3114_v43, 1  ;;  %v3118_v59 = vshrl.u32 %v8646_v31, 16  ;;  %v744_v60 = vsel %vm644_vm0, %v739_v46, %v743_v44  ;;  %v3122_v61 = vshll.u32 %v8648_v48, 16  ;;  %v8655_v31 = vld [vmem:[%s8930_s8 + $0x90] sm:$0xff]  }
  0x34   : > { %v3109_v63 = vsel %vm644_vm0, %v3104_v49, %v3108_v47  ;;  %v761_v1 = vshrl.u32 %v8647_v45, 16  ;;  %v3126_v4 = vshrl.u32 %v8648_v48, 16  ;;  %v759_v6 = vrot.slane %v757_v58, 1 }
  0x35   : > { %v3117_v3 = vsel %vm644_vm0, %v3112_v55, %v3116_v56  ;;  %v755_v8 = vor.u32 %v753_v52, %v751_v51  ;;  %v3120_v9 = vor.u32 %v3118_v59, %v3116_v56  ;;  %v773_v18 = vshll.u32 %v8651_v7, 16  ;;  %v8661_v55 = vld [vmem:[%s8930_s8 + $0xa0] sm:$0xff]   ;;  %v8662_v56 = vld [vmem:[%s8930_s8 + $0xb0] sm:$0xff]   ;;  %v8675_v59 = vld [vmem:[%s9697_s1 + $0x18] sm:$0xff]  }
  0x36   : > { %7626 = vmatmul.mubr.bf16.gmra.mrb[8].mxu1 %v696_v50  ;;  %v747_v50 = vor.u32 %v745_v39, %v743_v44  ;;  %v763_v12 = vor.u32 %v761_v1, %v759_v6  ;;  %v3138_v22 = vshll.u32 %v8652_v11, 16  ;;  %v777_v25 = vshrl.u32 %v8651_v7, 16 }
  0x37   : > { %7922 = vmatmul.mubr.bf16.gmra.mrb[8].mxu0 %v3061_v53  ;;  %7629 = vmatprep.mubr.bf16.mxu1 %v704_v54  ;;  %v8649_v53 = vld [vmem:[%s8930_s8 + $0x78] sm:$0xff]   ;;  %v8650_v54 = vld [vmem:[%s8930_s8 + $0x88] sm:$0xff]   ;;  %v760_v19 = vsel %vm644_vm0, %v755_v8, %v759_v6  ;;  %v3142_v28 = vshrl.u32 %v8652_v11, 16  ;;  %v775_v30 = vrot.slane %v773_v18, 1  ;;  %v789_v42 = vshll.u32 %v8655_v31, 16 }
  0x38   : > { %7925 = vmatprep.mubr.bf16.mxu0 %v3069_v57  ;;  %v8657_v57 = vld [vmem:[%s9697_s1 + $0x10] sm:$0xff]   ;;  %v752_v0 = vsel %vm644_vm0, %v747_v50, %v751_v51  ;;  %v765_v2 = vshll.u32 %v8649_v53, 16  ;;  %v3130_v5 = vshll.u32 %v8650_v54, 16  ;;  %v769_v21 = vshrl.u32 %v8649_v53, 16 }
  0x39   : > { %7753 = vmatprep.subr.bf16.mxu1 %v8657_v57  ;;  %v3134_v24 = vshrl.u32 %v8650_v54, 16  ;;  %v779_v36 = vor.u32 %v777_v25, %v775_v30  ;;  %v793_v49 = vshrl.u32 %v8655_v31, 16  ;;  %v797_v50 = vshll.u32 %v8659_v38, 16 }
  0x3a   : > { %7754 = vmatpush3.bf16.msra.mxu1 %v8657_v57  ;;  %v3132_v16 = vrot.slane %v3130_v5, 1  ;;  %v791_v54 = vrot.slane %v789_v42, 1  ;;  %v801_v6 = vshrl.u32 %v8659_v38, 16  ;;  %v3170_v8 = vshll.u32 %v8662_v56, 16 }
  0x3b   : > { %v799_v62 = vrot.slane %v797_v50, 1  ;;  %7755 = vmatprep.subr.bf16.mxu1 %v8675_v59  ;;  %v809_v11 = vshrl.u32 %v8661_v55, 16 }
  0x3c   : > { %v3136_v35 = vor.u32 %v3134_v24, %v3132_v16  ;;  %v8667_v24 = vld [vmem:[%s8930_s8 + $0xb8] sm:$0xff]  }
  0x3d   : > { %v803_v18 = vor.u32 %v801_v6, %v799_v62  ;;  %v8693_v6 = vld [vmem:[%s9697_s1 + $0x20] sm:$0xff]  }
  0x3e   : > { %7630 = vmatmul.mubr.bf16.gmra.mrb[12].mxu1 %v712_v10  ;;  %v3124_v10 = vrot.slane %v3122_v61, 1  ;;  %v795_v61 = vor.u32 %v793_v49, %v791_v54 }
  0x3f   : > { %7926 = vmatmul.mubr.bf16.gmra.mrb[12].mxu0 %v3077_v13  ;;  %7633 = vmatprep.mubr.bf16.mxu1 %v720_v14  ;;  %v767_v13 = vrot.slane %v765_v2, 1  ;;  %v8653_v14 = vld [vmem:[%s8930_s8 + $0x88] sm:$0xff]  }
  0x40   : > { %7929 = vmatprep.mubr.bf16.mxu0 %v3085_v17  ;;  %v3128_v15 = vor.u32 %v3126_v4, %v3124_v10  ;;  %v8654_v17 = vld [vmem:[%s8930_s8 + $0x98] sm:$0xff]   ;;  %v3125_v20 = vsel %vm644_vm0, %v3120_v9, %v3124_v10  ;;  %v781_v26 = vshll.u32 %v8653_v14, 16  ;;  %v785_v44 = vshrl.u32 %v8653_v14, 16  ;;  %7756 = vmatpush3.bf16.msra.mxu1 %v8675_v59 }
  0x41   : > { %v768_v23 = vsel %vm644_vm0, %v763_v12, %v767_v13  ;;  %v3146_v29 = vshll.u32 %v8654_v17, 16  ;;  %v771_v32 = vor.u32 %v769_v21, %v767_v13  ;;  %v3150_v45 = vshrl.u32 %v8654_v17, 16  ;;  %v8665_v17 = vld [vmem:[%s8930_s8 + $0xb0] sm:$0xff]   ;;  %7757 = vmatprep.subr.bf16.mxu1 %v8693_v6 }
  0x42   : > { %v3133_v27 = vsel %vm644_vm0, %v3128_v15, %v3132_v16  ;;  %v805_v4 = vshll.u32 %v8661_v55, 16  ;;  %v800_v10 = vsel %vm644_vm0, %v795_v61, %v799_v62  ;;  %v3174_v14 = vshrl.u32 %v8662_v56, 16 }
  0x43   : > { %v3148_v40 = vrot.slane %v3146_v29, 1  ;;  %v776_v43 = vsel %vm644_vm0, %v771_v32, %v775_v30  ;;  %v821_v29 = vshll.u32 %v8665_v17, 16 }
  0x44   : > { %v807_v16 = vrot.slane %v805_v4, 1  ;;  %7758 = vmatpush3.bf16.msra.mxu1 %v8693_v6 }
  0x46   : > { %7634 = vmatmul.mubr.bf16.gmra.mrb[16].mxu1 %v728_v33  ;;  %v3140_v33 = vrot.slane %v3138_v22, 1  ;;  %v811_v22 = vor.u32 %v809_v11, %v807_v16  ;;  %v808_v30 = vsel %vm644_vm0, %v803_v18, %v807_v16 }
  0x47   : > { %7930 = vmatmul.mubr.bf16.gmra.mrb[16].mxu0 %v3093_v34  ;;  %7637 = vmatprep.mubr.bf16.mxu1 %v736_v37  ;;  %v8656_v34 = vld [vmem:[%s8930_s8 + $0xa0] sm:$0xff]   ;;  %v783_v37 = vrot.slane %v781_v26, 1 }
  0x48   : > { %7933 = vmatprep.mubr.bf16.mxu0 %v3101_v41  ;;  %v3144_v39 = vor.u32 %v3142_v28, %v3140_v33  ;;  %v8660_v41 = vld [vmem:[%s8930_s8 + $0xa8] sm:$0xff]   ;;  %v3154_v46 = vshll.u32 %v8656_v34, 16  ;;  %v3141_v47 = vsel %vm644_vm0, %v3136_v35, %v3140_v33  ;;  %v3158_v52 = vshrl.u32 %v8656_v34, 16 }
  0x49   : > { %v784_v48 = vsel %vm644_vm0, %v779_v36, %v783_v37  ;;  %v3162_v53 = vshll.u32 %v8660_v41, 16  ;;  %v787_v57 = vor.u32 %v785_v44, %v783_v37  ;;  %v3166_v7 = vshrl.u32 %v8660_v41, 16  ;;  %v8669_v41 = vld [vmem:[%s8930_s8 + $0xc0] sm:$0xff]  }
  0x4a   : > { %v3149_v51 = vsel %vm644_vm0, %v3144_v39, %v3148_v40  ;;  %v3156_v58 = vrot.slane %v3154_v46, 1  ;;  %v825_v35 = vshrl.u32 %v8665_v17, 16  ;;  %v829_v36 = vshll.u32 %v8667_v24, 16 }
  0x4b   : > { %v3164_v2 = vrot.slane %v3162_v53, 1  ;;  %v792_v5 = vsel %vm644_vm0, %v787_v57, %v791_v54  ;;  %v837_v53 = vshll.u32 %v8669_v41, 16  ;;  %v841_v59 = vshrl.u32 %v8669_v41, 16 }
  0x4c   : > { %v3160_v1 = vor.u32 %v3158_v52, %v3156_v58  ;;  %v833_v52 = vshrl.u32 %v8667_v24, 16 }
  0x4d   : > { %v3168_v21 = vor.u32 %v3166_v7, %v3164_v2 }
  0x4e   : > { %7638 = vmatmul.mubr.bf16.gmra.mrb[20].mxu1 %v744_v60  ;;  %v3152_v60 = vor.u32 %v3150_v45, %v3148_v40  ;;  %v3165_v13 = vsel %vm644_vm0, %v3160_v1, %v3164_v2  ;;  %v823_v40 = vrot.slane %v821_v29, 1  ;;  %v8670_v45 = vld [vmem:[%s8930_s8 + $0xd0] sm:$0xff]   ;;  %v839_v1 = vrot.slane %v837_v53, 1  ;;  %v8674_v2 = vld [vmem:[%s8930_s8 + $0xe0] sm:$0xff]  }
  0x4f   : > { %7934 = vmatmul.mubr.bf16.gmra.mrb[20].mxu0 %v3109_v63  ;;  %7641 = vmatprep.mubr.bf16.mxu1 %v752_v0  ;;  %v8663_v63 = vld [vmem:[%s8930_s8 + $0xa8] sm:$0xff]   ;;  %v8676_v0 = vld [vmem:[%s9697_s1 + $0xd8] sm:$0xff]   ;;  %v3202_v57 = vshll.u32 %v8670_v45, 16  ;;  %v3206_v61 = vshrl.u32 %v8670_v45, 16  ;;  %v3218_v18 = vshll.u32 %v8674_v2, 16  ;;  %v3222_v24 = vshrl.u32 %v8674_v2, 16 }
  0x50   : > { %7937 = vmatprep.mubr.bf16.mxu0 %v3117_v3  ;;  %v8664_v3 = vld [vmem:[%s8930_s8 + $0xb8] sm:$0xff]   ;;  %8051 = vmatprep.subr.bf16.mxu0 %v8676_v0  ;;  %v3157_v9 = vsel %vm644_vm0, %v3152_v60, %v3156_v58  ;;  %v813_v12 = vshll.u32 %v8663_v63, 16  ;;  %v817_v28 = vshrl.u32 %v8663_v63, 16  ;;  %v827_v46 = vor.u32 %v825_v35, %v823_v40 }
  0x51   : > { %8052 = vmatpush3.bf16.msra.mxu0 %v8676_v0  ;;  %v3178_v15 = vshll.u32 %v8664_v3, 16  ;;  %v3182_v31 = vshrl.u32 %v8664_v3, 16  ;;  %v8673_v0 = vld [vmem:[%s8930_s8 + $0xd0] sm:$0xff]   ;;  %v9073_v3 = vld [vmem:[%s8930_s8 + $0xd8] sm:$0xff]   ;;  %v3220_v29 = vrot.slane %v3218_v18, 1 }
  0x53   : > { %v3180_v26 = vrot.slane %v3178_v15, 1  ;;  %v3224_v35 = vor.u32 %v3222_v24, %v3220_v29 }
  0x56   : > { %7642 = vmatmul.mubr.bf16.gmra.mrb[24].mxu1 %v760_v19  ;;  %v3172_v19 = vrot.slane %v3170_v8, 1  ;;  %v843_v8 = vor.u32 %v841_v59, %v839_v1 }
  0x57   : > { %7938 = vmatmul.mubr.bf16.gmra.mrb[24].mxu0 %v3125_v20  ;;  %7645 = vmatprep.mubr.bf16.mxu1 %v768_v23  ;;  %v8666_v20 = vld [vmem:[%s8930_s8 + $0xc0] sm:$0xff]   ;;  %v815_v23 = vrot.slane %v813_v12, 1 }
  0x58   : > { %7941 = vmatprep.mubr.bf16.mxu0 %v3133_v27  ;;  %v3176_v25 = vor.u32 %v3174_v14, %v3172_v19  ;;  %v8668_v27 = vld [vmem:[%s8930_s8 + $0xc8] sm:$0xff]   ;;  %v3186_v32 = vshll.u32 %v8666_v20, 16  ;;  %v3173_v33 = vsel %vm644_vm0, %v3168_v21, %v3172_v19  ;;  %v3190_v38 = vshrl.u32 %v8666_v20, 16 }
  0x59   : > { %v816_v34 = vsel %vm644_vm0, %v811_v22, %v815_v23  ;;  %v3194_v39 = vshll.u32 %v8668_v27, 16  ;;  %v819_v42 = vor.u32 %v817_v28, %v815_v23  ;;  %v3198_v56 = vshrl.u32 %v8668_v27, 16  ;;  %v8679_v27 = vld [vmem:[%s8930_s8 + $0xe0] sm:$0xff]  }
  0x5a   : > { %v3181_v37 = vsel %vm644_vm0, %v3176_v25, %v3180_v26  ;;  %v3188_v44 = vrot.slane %v3186_v32, 1  ;;  %v853_v14 = vshll.u32 %v8673_v0, 16  ;;  %v857_v21 = vshrl.u32 %v8673_v0, 16 }
  0x5b   : > { %v3196_v50 = vrot.slane %v3194_v39, 1  ;;  %v824_v54 = vsel %vm644_vm0, %v819_v42, %v823_v40  ;;  %v861_v22 = vshll.u32 %v9073_v3, 16  ;;  %v869_v39 = vshll.u32 %v8679_v27, 16 }
  0x5c   : > { %v3192_v49 = vor.u32 %v3190_v38, %v3188_v44  ;;  %v865_v38 = vshrl.u32 %v9073_v3, 16  ;;  %v873_v45 = vshrl.u32 %v8679_v27, 16 }
  0x5d   : > { %v3200_v7 = vor.u32 %v3198_v56, %v3196_v50 }
  0x5e   : > { %7646 = vmatmul.mubr.bf16.gmra.mrb[28].mxu1 %v776_v43  ;;  %v3184_v43 = vor.u32 %v3182_v31, %v3180_v26  ;;  %v3197_v62 = vsel %vm644_vm0, %v3192_v49, %v3196_v50  ;;  %v855_v26 = vrot.slane %v853_v14, 1  ;;  %v871_v50 = vrot.slane %v869_v39, 1 }
  0x5f   : > { %7942 = vmatmul.mubr.bf16.gmra.mrb[28].mxu0 %v3141_v47  ;;  %7649 = vmatprep.mubr.bf16.mxu1 %v784_v48  ;;  %v831_v47 = vrot.slane %v829_v36, 1  ;;  %v8671_v48 = vld [vmem:[%s8930_s8 + $0xc8] sm:$0xff]  }
  0x60   : > { %7945 = vmatprep.mubr.bf16.mxu0 %v3149_v51  ;;  %v8672_v51 = vld [vmem:[%s8930_s8 + $0xd8] sm:$0xff]   ;;  %v3189_v55 = vsel %vm644_vm0, %v3184_v43, %v3188_v44  ;;  %v845_v60 = vshll.u32 %v8671_v48, 16  ;;  %v849_v16 = vshrl.u32 %v8671_v48, 16  ;;  %v859_v32 = vor.u32 %v857_v21, %v855_v26 }
  0x61   : > { %v832_v58 = vsel %vm644_vm0, %v827_v46, %v831_v47  ;;  %v3210_v63 = vshll.u32 %v8672_v51, 16  ;;  %v835_v4 = vor.u32 %v833_v52, %v831_v47  ;;  %v3214_v17 = vshrl.u32 %v8672_v51, 16  ;;  %v8683_v51 = vld [vmem:[%s8930_s8 + $0xf0] sm:$0xff]  }
  0x62   : > { %v875_v56 = vor.u32 %v873_v45, %v871_v50 }
  0x63   : > { %v3212_v12 = vrot.slane %v3210_v63, 1  ;;  %v840_v15 = vsel %vm644_vm0, %v835_v4, %v839_v1  ;;  %v885_v63 = vshll.u32 %v8683_v51, 16 }
  0x65   : > { %v3216_v31 = vor.u32 %v3214_v17, %v3212_v12 }
  0x66   : > { %7650 = vmatmul.mubr.bf16.gmra.mrb[32].mxu1 %v792_v5  ;;  %v3204_v5 = vrot.slane %v3202_v57, 1 }
  0x67   : > { %7946 = vmatmul.mubr.bf16.gmra.mrb[32].mxu0 %v3157_v9  ;;  %7653 = vmatprep.mubr.bf16.mxu1 %v800_v10  ;;  %v847_v9 = vrot.slane %v845_v60, 1  ;;  %v8678_v10 = vld [vmem:[%s8930_s8 + $0xe8] sm:$0xff]   ;;  %v3221_v43 = vsel %vm644_vm0, %v3216_v31, %v3220_v29 }
  0x68   : > { %7949 = vmatprep.mubr.bf16.mxu0 %v3165_v13  ;;  %v3208_v11 = vor.u32 %v3206_v61, %v3204_v5  ;;  %v8694_v13 = vld [vmem:[%s9697_s1 + $0xe0] sm:$0xff]   ;;  %v3205_v19 = vsel %vm644_vm0, %v3200_v7, %v3204_v5  ;;  %v3226_v25 = vshll.u32 %v8678_v10, 16  ;;  %v3230_v41 = vshrl.u32 %v8678_v10, 16  ;;  %v8686_v61 = vld [vmem:[%s8930_s8 + $0x108] sm:$0xff]  }
  0x69   : > { %8053 = vmatprep.subr.bf16.mxu0 %v8694_v13  ;;  %v848_v20 = vsel %vm644_vm0, %v843_v8, %v847_v9  ;;  %v851_v28 = vor.u32 %v849_v16, %v847_v9  ;;  %v889_v5 = vshrl.u32 %v8683_v51, 16  ;;  %v3258_v9 = vshll.u32 %v8686_v61, 16  ;;  %v8711_v10 = vld [vmem:[%s9697_s1 + $0x28] sm:$0xff]   ;;  %v8688_v16 = vld [vmem:[%s8930_s8 + $0x110] sm:$0xff]  }
  0x6a   : > { %8054 = vmatpush3.bf16.msra.mxu0 %v8694_v13  ;;  %v3213_v23 = vsel %vm644_vm0, %v3208_v11, %v3212_v12  ;;  %v3228_v36 = vrot.slane %v3226_v25, 1  ;;  %v887_v11 = vrot.slane %v885_v63, 1  ;;  %v8687_v12 = vld [vmem:[%s8930_s8 + $0x100] sm:$0xff]   ;;  %v8712_v13 = vld [vmem:[%s9697_s1 + $0xe8] sm:$0xff]   ;;  %7759 = vmatprep.subr.bf16.mxu1 %v8711_v10  ;;  %v3262_v27 = vshrl.u32 %v8686_v61, 16 }
  0x6b   : > { %v856_v40 = vsel %vm644_vm0, %v851_v28, %v855_v26  ;;  %8055 = vmatprep.subr.bf16.mxu0 %v8712_v13  ;;  %7760 = vmatpush3.bf16.msra.mxu1 %v8711_v10  ;;  %v901_v25 = vshll.u32 %v8687_v12, 16  ;;  %v3266_v28 = vshll.u32 %v8688_v16, 16  ;;  %v905_v31 = vshrl.u32 %v8687_v12, 16  ;;  %v8697_v61 = vld [vmem:[%s8930_s8 + $0x120] sm:$0xff]  }
  0x6c   : > { %v3229_v47 = vsel %vm644_vm0, %v3224_v35, %v3228_v36  ;;  %v3232_v53 = vor.u32 %v3230_v41, %v3228_v36  ;;  %v891_v18 = vor.u32 %v889_v5, %v887_v11 }
  0x6d   : > { %v903_v36 = vrot.slane %v901_v25, 1  ;;  %v3268_v39 = vrot.slane %v3266_v28, 1 }
  0x6e   : > { %7654 = vmatmul.mubr.bf16.gmra.mrb[36].mxu1 %v808_v30  ;;  %v8680_v30 = vld [vmem:[%s8930_s8 + $0xf0] sm:$0xff]   ;;  %8056 = vmatpush3.bf16.msra.mxu0 %v8712_v13 }
  0x6f   : > { %7950 = vmatmul.mubr.bf16.gmra.mrb[36].mxu0 %v3173_v33  ;;  %7657 = vmatprep.mubr.bf16.mxu1 %v816_v34  ;;  %v863_v33 = vrot.slane %v861_v22, 1  ;;  %v8681_v34 = vld [vmem:[%s8930_s8 + $0xe8] sm:$0xff]   ;;  %v3234_v42 = vshll.u32 %v8680_v30, 16  ;;  %v3238_v48 = vshrl.u32 %v8680_v30, 16  ;;  %v3260_v22 = vrot.slane %v3258_v9, 1 }
  0x70   : > { %7953 = vmatprep.mubr.bf16.mxu0 %v3181_v37  ;;  %v8682_v37 = vld [vmem:[%s8930_s8 + $0xf8] sm:$0xff]   ;;  %v877_v46 = vshll.u32 %v8681_v34, 16  ;;  %v933_v9 = vshll.u32 %v8697_v61, 16 }
  0x71   : > { %v864_v44 = vsel %vm644_vm0, %v859_v32, %v863_v33  ;;  %v3242_v49 = vshll.u32 %v8682_v37, 16  ;;  %v867_v52 = vor.u32 %v865_v38, %v863_v33  ;;  %v3246_v2 = vshrl.u32 %v8682_v37, 16  ;;  %v8691_v37 = vld [vmem:[%s8930_s8 + $0x110] sm:$0xff]  }
  0x72   : > { %v879_v57 = vrot.slane %v877_v46, 1  ;;  %v3264_v41 = vor.u32 %v3262_v27, %v3260_v22 }
  0x73   : > { %v3244_v60 = vrot.slane %v3242_v49, 1  ;;  %v872_v0 = vsel %vm644_vm0, %v867_v52, %v871_v50 }
  0x74   : > { %v880_v4 = vsel %vm644_vm0, %v875_v56, %v879_v57 }
  0x75   : > { %v3248_v17 = vor.u32 %v3246_v2, %v3244_v60 }
  0x76   : > { %7658 = vmatmul.mubr.bf16.gmra.mrb[40].mxu1 %v824_v54  ;;  %v3236_v54 = vrot.slane %v3234_v42, 1  ;;  %v907_v42 = vor.u32 %v905_v31, %v903_v36 }
  0x77   : > { %7954 = vmatmul.mubr.bf16.gmra.mrb[40].mxu0 %v3189_v55  ;;  %7661 = vmatprep.mubr.bf16.mxu1 %v832_v58  ;;  %v8684_v55 = vld [vmem:[%s8930_s8 + $0x100] sm:$0xff]   ;;  %v8685_v58 = vld [vmem:[%s8930_s8 + $0xf8] sm:$0xff]  }
  0x78   : > { %7957 = vmatprep.mubr.bf16.mxu0 %v3197_v62  ;;  %v3240_v59 = vor.u32 %v3238_v48, %v3236_v54  ;;  %v881_v62 = vshrl.u32 %v8681_v34, 16  ;;  %v3237_v1 = vsel %vm644_vm0, %v3232_v53, %v3236_v54  ;;  %v3250_v3 = vshll.u32 %v8684_v55, 16 }
  0x79   : > { %v893_v6 = vshll.u32 %v8685_v58, 16  ;;  %v3254_v7 = vshrl.u32 %v8684_v55, 16  ;;  %v897_v24 = vshrl.u32 %v8685_v58, 16  ;;  %v3270_v34 = vshrl.u32 %v8688_v16, 16 }
  0x7a   : > { %v3245_v8 = vsel %vm644_vm0, %v3240_v59, %v3244_v60  ;;  %v883_v14 = vor.u32 %v881_v62, %v879_v57  ;;  %v917_v48 = vshll.u32 %v8691_v37, 16  ;;  %v3269_v53 = vsel %vm644_vm0, %v3264_v41, %v3268_v39 }
  0x7b   : > { %v3272_v45 = vor.u32 %v3270_v34, %v3268_v39  ;;  %v921_v55 = vshrl.u32 %v8691_v37, 16 }
  0x7c   : > { %v888_v26 = vsel %vm644_vm0, %v883_v14, %v887_v11  ;;  %v919_v60 = vrot.slane %v917_v48, 1 }
  0x7e   : > { %7662 = vmatmul.mubr.bf16.gmra.mrb[44].mxu1 %v840_v15  ;;  %v3252_v15 = vrot.slane %v3250_v3, 1  ;;  %v923_v2 = vor.u32 %v921_v55, %v919_v60 }
  0x7f   : > { %7958 = vmatmul.mubr.bf16.gmra.mrb[44].mxu0 %v3205_v19  ;;  %7665 = vmatprep.mubr.bf16.mxu1 %v848_v20  ;;  %v895_v19 = vrot.slane %v893_v6, 1  ;;  %v8689_v20 = vld [vmem:[%s8930_s8 + $0x108] sm:$0xff]  }
  0x80   : > { %7961 = vmatprep.mubr.bf16.mxu0 %v3213_v23  ;;  %v3256_v21 = vor.u32 %v3254_v7, %v3252_v15  ;;  %v8690_v23 = vld [vmem:[%s8930_s8 + $0x118] sm:$0xff]   ;;  %v3253_v29 = vsel %vm644_vm0, %v3248_v17, %v3252_v15  ;;  %v909_v32 = vshll.u32 %v8689_v20, 16  ;;  %v913_v50 = vshrl.u32 %v8689_v20, 16 }
  0x81   : > { %v896_v30 = vsel %vm644_vm0, %v891_v18, %v895_v19  ;;  %v3274_v35 = vshll.u32 %v8690_v23, 16  ;;  %v899_v38 = vor.u32 %v897_v24, %v895_v19  ;;  %v3278_v51 = vshrl.u32 %v8690_v23, 16  ;;  %v8700_v7 = vld [vmem:[%s8930_s8 + $0x138] sm:$0xff]   ;;  %v8701_v18 = vld [vmem:[%s8930_s8 + $0x130] sm:$0xff]   ;;  %v8702_v23 = vld [vmem:[%s8930_s8 + $0x140] sm:$0xff]  }
  0x82   : > { %v3261_v33 = vsel %vm644_vm0, %v3256_v21, %v3260_v22  ;;  %v937_v15 = vshrl.u32 %v8697_v61, 16  ;;  %v3306_v20 = vshll.u32 %v8700_v7, 16  ;;  %v8729_v21 = vld [vmem:[%s9697_s1 + $0x30] sm:$0xff]   ;;  %v935_v22 = vrot.slane %v933_v9, 1 }
  0x83   : > { %v3276_v46 = vrot.slane %v3274_v35, 1  ;;  %v904_v49 = vsel %vm644_vm0, %v899_v38, %v903_v36  ;;  %7761 = vmatprep.subr.bf16.mxu1 %v8729_v21  ;;  %v949_v34 = vshll.u32 %v8701_v18, 16  ;;  %v3310_v37 = vshrl.u32 %v8700_v7, 16  ;;  %v8709_v7 = vld [vmem:[%s8930_s8 + $0x150] sm:$0xff]  }
  0x84   : > { %v939_v28 = vor.u32 %v937_v15, %v935_v22  ;;  %7762 = vmatpush3.bf16.msra.mxu1 %v8729_v21  ;;  %v3314_v38 = vshll.u32 %v8702_v23, 16  ;;  %v953_v41 = vshrl.u32 %v8701_v18, 16 }
  0x85   : > { %v3277_v57 = vsel %vm644_vm0, %v3272_v45, %v3276_v46  ;;  %v3280_v63 = vor.u32 %v3278_v51, %v3276_v46  ;;  %v951_v46 = vrot.slane %v949_v34, 1 }
  0x86   : > { %7666 = vmatmul.mubr.bf16.gmra.mrb[48].mxu1 %v856_v40  ;;  %v8692_v40 = vld [vmem:[%s8930_s8 + $0x120] sm:$0xff]  }
  0x87   : > { %7962 = vmatmul.mubr.bf16.gmra.mrb[48].mxu0 %v3221_v43  ;;  %7669 = vmatprep.mubr.bf16.mxu1 %v864_v44  ;;  %v911_v43 = vrot.slane %v909_v32, 1  ;;  %v8695_v44 = vld [vmem:[%s8930_s8 + $0x118] sm:$0xff]   ;;  %v3282_v52 = vshll.u32 %v8692_v40, 16  ;;  %v3286_v58 = vshrl.u32 %v8692_v40, 16  ;;  %v3308_v32 = vrot.slane %v3306_v20, 1 }
  0x88   : > { %7965 = vmatprep.mubr.bf16.mxu0 %v3229_v47  ;;  %v8696_v47 = vld [vmem:[%s8930_s8 + $0x128] sm:$0xff]   ;;  %v925_v56 = vshll.u32 %v8695_v44, 16 }
  0x89   : > { %v912_v54 = vsel %vm644_vm0, %v907_v42, %v911_v43  ;;  %v3290_v59 = vshll.u32 %v8696_v47, 16  ;;  %v915_v62 = vor.u32 %v913_v50, %v911_v43  ;;  %v3294_v12 = vshrl.u32 %v8696_v47, 16  ;;  %v8705_v47 = vld [vmem:[%s8930_s8 + $0x140] sm:$0xff]   ;;  %v8706_v50 = vld [vmem:[%s8930_s8 + $0x150] sm:$0xff]  }
  0x8a   : > { %v927_v3 = vrot.slane %v925_v56, 1  ;;  %v3312_v51 = vor.u32 %v3310_v37, %v3308_v32  ;;  %v8716_v37 = vld [vmem:[%s8930_s8 + $0x170] sm:$0xff]  }
  0x8b   : > { %v3292_v6 = vrot.slane %v3290_v59, 1  ;;  %v920_v10 = vsel %vm644_vm0, %v915_v62, %v919_v60  ;;  %v3330_v62 = vshll.u32 %v8706_v50, 16 }
  0x8c   : > { %v928_v14 = vsel %vm644_vm0, %v923_v2, %v927_v3 }
  0x8d   : > { %v3296_v27 = vor.u32 %v3294_v12, %v3292_v6  ;;  %v3332_v9 = vrot.slane %v3330_v62, 1 }
  0x8e   : > { %7670 = vmatmul.mubr.bf16.gmra.mrb[52].mxu1 %v872_v0  ;;  %v3284_v0 = vrot.slane %v3282_v52, 1  ;;  %v955_v52 = vor.u32 %v953_v41, %v951_v46 }
  0x8f   : > { %7966 = vmatmul.mubr.bf16.gmra.mrb[52].mxu0 %v3237_v1  ;;  %7673 = vmatprep.mubr.bf16.mxu1 %v880_v4  ;;  %v8698_v1 = vld [vmem:[%s8930_s8 + $0x130] sm:$0xff]   ;;  %v8699_v4 = vld [vmem:[%s8930_s8 + $0x128] sm:$0xff]  }
  0x90   : > { %7969 = vmatprep.mubr.bf16.mxu0 %v3245_v8  ;;  %v3288_v5 = vor.u32 %v3286_v58, %v3284_v0  ;;  %v929_v8 = vshrl.u32 %v8695_v44, 16  ;;  %v3285_v11 = vsel %vm644_vm0, %v3280_v63, %v3284_v0  ;;  %v3298_v13 = vshll.u32 %v8698_v1, 16 }
  0x91   : > { %v941_v16 = vshll.u32 %v8699_v4, 16  ;;  %v3302_v17 = vshrl.u32 %v8698_v1, 16  ;;  %v945_v36 = vshrl.u32 %v8699_v4, 16  ;;  %v3318_v44 = vshrl.u32 %v8702_v23, 16 }
  0x92   : > { %v3293_v19 = vsel %vm644_vm0, %v3288_v5, %v3292_v6  ;;  %v931_v24 = vor.u32 %v929_v8, %v927_v3  ;;  %v3300_v25 = vrot.slane %v3298_v13, 1  ;;  %v965_v58 = vshll.u32 %v8705_v47, 16 }
  0x93   : > { %v969_v1 = vshrl.u32 %v8705_v47, 16  ;;  %v3334_v4 = vshrl.u32 %v8706_v50, 16 }
  0x94   : > { %v3304_v31 = vor.u32 %v3302_v17, %v3300_v25  ;;  %v936_v35 = vsel %vm644_vm0, %v931_v24, %v935_v22  ;;  %v3301_v39 = vsel %vm644_vm0, %v3296_v27, %v3300_v25  ;;  %v967_v6 = vrot.slane %v965_v58, 1  ;;  %v8714_v17 = vld [vmem:[%s8930_s8 + $0x168] sm:$0xff]   ;;  %v8748_v27 = vld [vmem:[%s9697_s1 + $0x38] sm:$0xff]  }
  0x95   : > { %v3336_v15 = vor.u32 %v3334_v4, %v3332_v9  ;;  %v985_v25 = vshrl.u32 %v8709_v7, 16  ;;  %7763 = vmatprep.subr.bf16.mxu1 %v8748_v27  ;;  %v3358_v50 = vshrl.u32 %v8714_v17, 16 }
  0x96   : > { %7674 = vmatmul.mubr.bf16.gmra.mrb[56].mxu1 %v888_v26  ;;  %v8730_v26 = vld [vmem:[%s9697_s1 + $0xf0] sm:$0xff]   ;;  %v3309_v43 = vsel %vm644_vm0, %v3304_v31, %v3308_v32  ;;  %v971_v12 = vor.u32 %v969_v1, %v967_v6  ;;  %v8715_v31 = vld [vmem:[%s8930_s8 + $0x160] sm:$0xff]  }
  0x97   : > { %7970 = vmatmul.mubr.bf16.gmra.mrb[56].mxu0 %v3253_v29  ;;  %7677 = vmatprep.mubr.bf16.mxu1 %v896_v30  ;;  %v943_v29 = vrot.slane %v941_v16, 1  ;;  %v8703_v30 = vld [vmem:[%s8930_s8 + $0x138] sm:$0xff]  }
  0x98   : > { %7973 = vmatprep.mubr.bf16.mxu0 %v3261_v33  ;;  %v8704_v33 = vld [vmem:[%s8930_s8 + $0x148] sm:$0xff]   ;;  %8057 = vmatprep.subr.bf16.mxu0 %v8730_v26  ;;  %v957_v42 = vshll.u32 %v8703_v30, 16  ;;  %v961_v60 = vshrl.u32 %v8703_v30, 16  ;;  %v3354_v30 = vshll.u32 %v8714_v17, 16  ;;  %v9194_v17 = vld [vmem:[%s8930_s8 + $0x180] sm:$0xff]  }
  0x99   : > { %8058 = vmatpush3.bf16.msra.mxu0 %v8730_v26  ;;  %v944_v40 = vsel %vm644_vm0, %v939_v28, %v943_v29  ;;  %v3322_v45 = vshll.u32 %v8704_v33, 16  ;;  %v947_v48 = vor.u32 %v945_v36, %v943_v29  ;;  %v3326_v61 = vshrl.u32 %v8704_v33, 16  ;;  %v8750_v33 = vld [vmem:[%s9697_s1 + $0xf8] sm:$0xff]   ;;  %7764 = vmatpush3.bf16.msra.mxu1 %v8748_v27 }
  0x9a   : > { %8059 = vmatprep.subr.bf16.mxu0 %v8750_v33  ;;  %v9203_v27 = vld [vmem:[%s8930_s8 + $0x198] sm:$0xff]  }
  0x9b   : > { %v3324_v56 = vrot.slane %v3322_v45, 1  ;;  %v952_v59 = vsel %vm644_vm0, %v947_v48, %v951_v46  ;;  %v3362_v48 = vshll.u32 %v8716_v37, 16 }
  0x9d   : > { %8060 = vmatpush3.bf16.msra.mxu0 %v8750_v33 }
  0x9e   : > { %7678 = vmatmul.mubr.bf16.gmra.mrb[60].mxu1 %v904_v49  ;;  %v3316_v49 = vrot.slane %v3314_v38, 1 }
  0x9f   : > { %7974 = vmatmul.mubr.bf16.gmra.mrb[60].mxu0 %v3269_v53  ;;  %7681 = vmatprep.mubr.bf16.mxu1 %v912_v54  ;;  %v959_v53 = vrot.slane %v957_v42, 1  ;;  %v8707_v54 = vld [vmem:[%s8930_s8 + $0x148] sm:$0xff]   ;;  %v3356_v42 = vrot.slane %v3354_v30, 1 }
  0xa0   : > { %7977 = vmatprep.mubr.bf16.mxu0 %v3277_v57  ;;  %v3320_v55 = vor.u32 %v3318_v44, %v3316_v49  ;;  %v8708_v57 = vld [vmem:[%s8930_s8 + $0x158] sm:$0xff]   ;;  %v3317_v63 = vsel %vm644_vm0, %v3312_v51, %v3316_v49  ;;  %v973_v2 = vshll.u32 %v8707_v54, 16  ;;  %v977_v18 = vshrl.u32 %v8707_v54, 16 }
  0xa1   : > { %v960_v0 = vsel %vm644_vm0, %v955_v52, %v959_v53  ;;  %v3338_v5 = vshll.u32 %v8708_v57, 16  ;;  %v963_v8 = vor.u32 %v961_v60, %v959_v53  ;;  %v3342_v21 = vshrl.u32 %v8708_v57, 16  ;;  %v8719_v57 = vld [vmem:[%s8930_s8 + $0x170] sm:$0xff]   ;;  %v9180_v60 = vld [vmem:[%s8930_s8 + $0x180] sm:$0xff]  }
  0xa2   : > { %v3325_v3 = vsel %vm644_vm0, %v3320_v55, %v3324_v56  ;;  %v975_v13 = vrot.slane %v973_v2, 1  ;;  %v997_v44 = vshll.u32 %v8715_v31, 16  ;;  %v1001_v51 = vshrl.u32 %v8715_v31, 16 }
  0xa3   : > { %v3340_v16 = vrot.slane %v3338_v5, 1  ;;  %v968_v20 = vsel %vm644_vm0, %v963_v8, %v967_v6  ;;  %v3366_v54 = vshrl.u32 %v8716_v37, 16  ;;  %v1013_v4 = vshll.u32 %v8719_v57, 16 }
  0xa4   : > { %v976_v24 = vsel %vm644_vm0, %v971_v12, %v975_v13  ;;  %v979_v34 = vor.u32 %v977_v18, %v975_v13  ;;  %v3378_v8 = vshll.u32 %v9180_v60, 16 }
  0xa5   : > { %v3341_v28 = vsel %vm644_vm0, %v3336_v15, %v3340_v16 }
  0xa6   : > { %7682 = vmatmul.mubr.bf16.gmra.mrb[64].mxu1 %v920_v10  ;;  %v8710_v10 = vld [vmem:[%s8930_s8 + $0x160] sm:$0xff]  }
  0xa7   : > { %7978 = vmatmul.mubr.bf16.gmra.mrb[64].mxu0 %v3285_v11  ;;  %7685 = vmatprep.mubr.bf16.mxu1 %v928_v14  ;;  %v3328_v11 = vor.u32 %v3326_v61, %v3324_v56  ;;  %v8713_v14 = vld [vmem:[%s8930_s8 + $0x158] sm:$0xff]   ;;  %v3346_v22 = vshll.u32 %v8710_v10, 16  ;;  %v3350_v29 = vshrl.u32 %v8710_v10, 16  ;;  %v999_v56 = vrot.slane %v997_v44, 1 }
  0xa8   : > { %7981 = vmatprep.mubr.bf16.mxu0 %v3293_v19  ;;  %v981_v19 = vshll.u32 %v8709_v7, 16  ;;  %v989_v26 = vshll.u32 %v8713_v14, 16  ;;  %v993_v47 = vshrl.u32 %v8713_v14, 16  ;;  %v3360_v61 = vor.u32 %v3358_v50, %v3356_v42 }
  0xa9   : > { %v3333_v23 = vsel %vm644_vm0, %v3328_v11, %v3332_v9  ;;  %v3348_v36 = vrot.slane %v3346_v22, 1  ;;  %v1003_v62 = vor.u32 %v1001_v51, %v999_v56  ;;  %v1017_v11 = vshrl.u32 %v8719_v57, 16  ;;  %v9226_v51 = vld [vmem:[%s8930_s8 + $0x1a8] sm:$0xff]  }
  0xaa   : > { %v983_v32 = vrot.slane %v981_v19, 1  ;;  %v3382_v14 = vshrl.u32 %v9180_v60, 16  ;;  %v3380_v19 = vrot.slane %v3378_v8, 1 }
  0xab   : > { %v3352_v41 = vor.u32 %v3350_v29, %v3348_v36 }
  0xac   : > { %v987_v38 = vor.u32 %v985_v25, %v983_v32  ;;  %v984_v45 = vsel %vm644_vm0, %v979_v34, %v983_v32  ;;  %v3384_v25 = vor.u32 %v3382_v14, %v3380_v19 }
  0xad   : > { %v3357_v53 = vsel %vm644_vm0, %v3352_v41, %v3356_v42  ;;  %v9217_v41 = vld [vmem:[%s8930_s8 + $0x190] sm:$0xff]  }
  0xae   : > { %7686 = vmatmul.mubr.bf16.gmra.mrb[68].mxu1 %v936_v35  ;;  %v3344_v35 = vor.u32 %v3342_v21, %v3340_v16  ;;  %v1015_v16 = vrot.slane %v1013_v4, 1 }
  0xaf   : > { %7982 = vmatmul.mubr.bf16.gmra.mrb[68].mxu0 %v3301_v39  ;;  %7689 = vmatprep.mubr.bf16.mxu1 %v944_v40  ;;  %v991_v39 = vrot.slane %v989_v26, 1  ;;  %v8717_v40 = vld [vmem:[%s8930_s8 + $0x168] sm:$0xff]  }
  0xb0   : > { %7985 = vmatprep.mubr.bf16.mxu0 %v3309_v43  ;;  %v8718_v43 = vld [vmem:[%s8930_s8 + $0x178] sm:$0xff]   ;;  %v3349_v46 = vsel %vm644_vm0, %v3344_v35, %v3348_v36  ;;  %v1005_v52 = vshll.u32 %v8717_v40, 16  ;;  %v1009_v6 = vshrl.u32 %v8717_v40, 16  ;;  %v1019_v22 = vor.u32 %v1017_v11, %v1015_v16 }
  0xb1   : > { %v992_v49 = vsel %vm644_vm0, %v987_v38, %v991_v39  ;;  %v3370_v55 = vshll.u32 %v8718_v43, 16  ;;  %v995_v58 = vor.u32 %v993_v47, %v991_v39  ;;  %v3374_v7 = vshrl.u32 %v8718_v43, 16 }
  0xb2   : > { %v1033_v35 = vshrl.u32 %v9194_v17, 16  ;;  %v3402_v39 = vshll.u32 %v9203_v27, 16 }
  0xb3   : > { %v3372_v2 = vrot.slane %v3370_v55, 1  ;;  %v1000_v5 = vsel %vm644_vm0, %v995_v58, %v999_v56  ;;  %v3406_v58 = vshrl.u32 %v9203_v27, 16 }
  0xb4   : > { %v3404_v50 = vrot.slane %v3402_v39, 1 }
  0xb5   : > { %v3376_v21 = vor.u32 %v3374_v7, %v3372_v2 }
  0xb6   : > { %7690 = vmatmul.mubr.bf16.gmra.mrb[72].mxu1 %v952_v59  ;;  %v3364_v59 = vrot.slane %v3362_v48, 1  ;;  %v9223_v48 = vld [vmem:[%s8930_s8 + $0x198] sm:$0xff]   ;;  %v3408_v7 = vor.u32 %v3406_v58, %v3404_v50 }
  0xb7   : > { %7986 = vmatmul.mubr.bf16.gmra.mrb[72].mxu0 %v3317_v63  ;;  %7693 = vmatprep.mubr.bf16.mxu1 %v960_v0  ;;  %v1007_v63 = vrot.slane %v1005_v52, 1  ;;  %v8721_v0 = vld [vmem:[%s8930_s8 + $0x178] sm:$0xff]   ;;  %v3381_v33 = vsel %vm644_vm0, %v3376_v21, %v3380_v19  ;;  %v1045_v52 = vshll.u32 %v9217_v41, 16 }
  0xb8   : > { %7989 = vmatprep.mubr.bf16.mxu0 %v3325_v3  ;;  %v3368_v1 = vor.u32 %v3366_v54, %v3364_v59  ;;  %v9184_v3 = vld [vmem:[%s8930_s8 + $0x188] sm:$0xff]   ;;  %v3365_v9 = vsel %vm644_vm0, %v3360_v61, %v3364_v59  ;;  %v1021_v12 = vshll.u32 %v8721_v0, 16  ;;  %v1025_v30 = vshrl.u32 %v8721_v0, 16 }
  0xb9   : > { %v1008_v10 = vsel %vm644_vm0, %v1003_v62, %v1007_v63  ;;  %v3386_v15 = vshll.u32 %v9184_v3, 16  ;;  %v1011_v18 = vor.u32 %v1009_v6, %v1007_v63  ;;  %v3390_v31 = vshrl.u32 %v9184_v3, 16  ;;  %v9244_v6 = vld [vmem:[%s8930_s8 + $0x1b0] sm:$0xff]  }
  0xba   : > { %v3373_v13 = vsel %vm644_vm0, %v3368_v1, %v3372_v2  ;;  %v1049_v59 = vshrl.u32 %v9217_v41, 16  ;;  %v1053_v61 = vshll.u32 %v9223_v48, 16  ;;  %v3418_v0 = vshll.u32 %v9226_v51, 16  ;;  %v9241_v2 = vld [vmem:[%s8930_s8 + $0x1a0] sm:$0xff]  }
  0xbb   : > { %v3388_v26 = vrot.slane %v3386_v15, 1  ;;  %v1016_v29 = vsel %vm644_vm0, %v1011_v18, %v1015_v16  ;;  %v1047_v1 = vrot.slane %v1045_v52, 1  ;;  %v1061_v14 = vshll.u32 %v9241_v2, 16 }
  0xbc   : > { %v1057_v16 = vshrl.u32 %v9223_v48, 16  ;;  %v3422_v18 = vshrl.u32 %v9226_v51, 16  ;;  %v3426_v19 = vshll.u32 %v9244_v6, 16 }
  0xbd   : > { %v3389_v37 = vsel %vm644_vm0, %v3384_v25, %v3388_v26  ;;  %v3392_v43 = vor.u32 %v3390_v31, %v3388_v26  ;;  %v1051_v8 = vor.u32 %v1049_v59, %v1047_v1  ;;  %v9265_v31 = vld [vmem:[%s8930_s8 + $0x1b0] sm:$0xff]   ;;  %v9289_v59 = vld [vmem:[%s8930_s8 + $0x1c0] sm:$0xff]  }
  0xbe   : > { %7694 = vmatmul.mubr.bf16.gmra.mrb[76].mxu1 %v968_v20  ;;  %v9197_v20 = vld [vmem:[%s8930_s8 + $0x190] sm:$0xff]  }
  0xbf   : > { %7990 = vmatmul.mubr.bf16.gmra.mrb[76].mxu0 %v3333_v23  ;;  %7697 = vmatprep.mubr.bf16.mxu1 %v976_v24  ;;  %v1023_v23 = vrot.slane %v1021_v12, 1  ;;  %v9200_v24 = vld [vmem:[%s8930_s8 + $0x188] sm:$0xff]   ;;  %v3394_v32 = vshll.u32 %v9197_v20, 16  ;;  %v3398_v38 = vshrl.u32 %v9197_v20, 16  ;;  %v3420_v12 = vrot.slane %v3418_v0, 1 }
  0xc0   : > { %7993 = vmatprep.mubr.bf16.mxu0 %v3341_v28  ;;  %v1029_v28 = vshll.u32 %v9194_v17, 16  ;;  %v1037_v36 = vshll.u32 %v9200_v24, 16  ;;  %v1041_v55 = vshrl.u32 %v9200_v24, 16 }
  0xc1   : > { %v1024_v34 = vsel %vm644_vm0, %v1019_v22, %v1023_v23  ;;  %v1027_v42 = vor.u32 %v1025_v30, %v1023_v23  ;;  %v3396_v44 = vrot.slane %v3394_v32, 1  ;;  %v1065_v23 = vshrl.u32 %v9241_v2, 16 }
  0xc2   : > { %v1031_v40 = vrot.slane %v1029_v28, 1  ;;  %v1039_v47 = vrot.slane %v1037_v36, 1  ;;  %v3430_v28 = vshrl.u32 %v9244_v6, 16  ;;  %v1063_v30 = vrot.slane %v1061_v14, 1 }
  0xc3   : > { %v3397_v54 = vsel %vm644_vm0, %v3392_v43, %v3396_v44  ;;  %v1077_v43 = vshll.u32 %v9265_v31, 16 }
  0xc4   : > { %v1043_v4 = vor.u32 %v1041_v55, %v1039_v47  ;;  %v1067_v36 = vor.u32 %v1065_v23, %v1063_v30 }
  0xc5   : > { %v1079_v58 = vrot.slane %v1077_v43, 1 }
  0xc6   : > { %7698 = vmatmul.mubr.bf16.gmra.mrb[80].mxu1 %v984_v45  ;;  %v9220_v45 = vld [vmem:[%s8930_s8 + $0x1a0] sm:$0xff]   ;;  %v1048_v15 = vsel %vm644_vm0, %v1043_v4, %v1047_v1 }
  0xc7   : > { %7994 = vmatmul.mubr.bf16.gmra.mrb[80].mxu0 %v3349_v46  ;;  %7701 = vmatprep.mubr.bf16.mxu1 %v992_v49  ;;  %v1035_v46 = vor.u32 %v1033_v35, %v1031_v40  ;;  %v3400_v49 = vor.u32 %v3398_v38, %v3396_v44  ;;  %v3410_v56 = vshll.u32 %v9220_v45, 16  ;;  %v3414_v63 = vshrl.u32 %v9220_v45, 16  ;;  %v9268_v35 = vld [vmem:[%s8930_s8 + $0x1c0] sm:$0xff]   ;;  %v9271_v38 = vld [vmem:[%s8930_s8 + $0x1b8] sm:$0xff]  }
  0xc8   : > { %7997 = vmatprep.mubr.bf16.mxu0 %v3357_v53  ;;  %v1032_v53 = vsel %vm644_vm0, %v1027_v42, %v1031_v40  ;;  %v9274_v42 = vld [vmem:[%s8930_s8 + $0x1c8] sm:$0xff]   ;;  %v1089_v14 = vshrl.u32 %v9271_v38, 16 }
  0xc9   : > { %v1040_v57 = vsel %vm644_vm0, %v1035_v46, %v1039_v47  ;;  %v3405_v62 = vsel %vm644_vm0, %v3400_v49, %v3404_v50  ;;  %v3442_v49 = vshll.u32 %v9268_v35, 16 }
  0xce   : > { %7702 = vmatmul.mubr.bf16.gmra.mrb[84].mxu1 %v1000_v5  ;;  %v3412_v5 = vrot.slane %v3410_v56, 1  ;;  %v3446_v56 = vshrl.u32 %v9268_v35, 16 }
  0xcf   : > { %7998 = vmatmul.mubr.bf16.gmra.mrb[84].mxu0 %v3365_v9  ;;  %7705 = vmatprep.mubr.bf16.mxu1 %v1008_v10  ;;  %v1055_v9 = vrot.slane %v1053_v61, 1  ;;  %v9247_v10 = vld [vmem:[%s8930_s8 + $0x1a8] sm:$0xff]  }
  0xd0   : > { %8001 = vmatprep.mubr.bf16.mxu0 %v3373_v13  ;;  %v3416_v11 = vor.u32 %v3414_v63, %v3412_v5  ;;  %v9250_v13 = vld [vmem:[%s8930_s8 + $0x1b8] sm:$0xff]   ;;  %v3413_v21 = vsel %vm644_vm0, %v3408_v7, %v3412_v5  ;;  %v1069_v25 = vshll.u32 %v9247_v10, 16  ;;  %v1073_v47 = vshrl.u32 %v9247_v10, 16  ;;  %v9292_v63 = vld [vmem:[%s8930_s8 + $0x1d0] sm:$0xff]   ;;  %v9295_v5 = vld [vmem:[%s8930_s8 + $0x1c8] sm:$0xff]  }
  0xd1   : > { %v1056_v22 = vsel %vm644_vm0, %v1051_v8, %v1055_v9  ;;  %v1059_v32 = vor.u32 %v1057_v16, %v1055_v9  ;;  %v3438_v52 = vshrl.u32 %v9250_v13, 16  ;;  %v9298_v9 = vld [vmem:[%s8930_s8 + $0x1d8] sm:$0xff]   ;;  %v3458_v16 = vshll.u32 %v9292_v63, 16 }
  0xd2   : > { %v3421_v26 = vsel %vm644_vm0, %v3416_v11, %v3420_v12  ;;  %v1093_v11 = vshll.u32 %v9289_v59, 16 }
  0xd3   : > { %v1064_v44 = vsel %vm644_vm0, %v1059_v32, %v1063_v30 }
  0xd6   : > { %7706 = vmatmul.mubr.bf16.gmra.mrb[88].mxu1 %v1016_v29  ;;  %v3434_v29 = vshll.u32 %v9250_v13, 16 }
  0xd7   : > { %8002 = vmatmul.mubr.bf16.gmra.mrb[88].mxu0 %v3381_v33  ;;  %7709 = vmatprep.mubr.bf16.mxu1 %v1024_v34  ;;  %v3424_v33 = vor.u32 %v3422_v18, %v3420_v12  ;;  %v3428_v34 = vrot.slane %v3426_v19, 1 }
  0xd8   : > { %8005 = vmatprep.mubr.bf16.mxu0 %v3389_v37  ;;  %v1071_v37 = vrot.slane %v1069_v25, 1  ;;  %v3436_v40 = vrot.slane %v3434_v29, 1  ;;  %v3462_v25 = vshrl.u32 %v9292_v63, 16  ;;  %v9313_v29 = vld [vmem:[%s8930_s8 + $0x1d0] sm:$0xff]  }
  0xd9   : > { %v3432_v39 = vor.u32 %v3430_v28, %v3428_v34  ;;  %v3429_v46 = vsel %vm644_vm0, %v3424_v33, %v3428_v34  ;;  %v1095_v28 = vrot.slane %v1093_v11, 1  ;;  %v3460_v33 = vrot.slane %v3458_v16, 1  ;;  %v9316_v34 = vld [vmem:[%s8930_s8 + $0x1e0] sm:$0xff]  }
  0xda   : > { %v1072_v50 = vsel %vm644_vm0, %v1067_v36, %v1071_v37  ;;  %v1075_v61 = vor.u32 %v1073_v47, %v1071_v37  ;;  %v3440_v0 = vor.u32 %v3438_v52, %v3436_v40  ;;  %v3474_v52 = vshll.u32 %v9316_v34, 16 }
  0xdb   : > { %v3437_v55 = vsel %vm644_vm0, %v3432_v39, %v3436_v40  ;;  %v9319_v39 = vld [vmem:[%s8930_s8 + $0x1d8] sm:$0xff]   ;;  %v3464_v40 = vor.u32 %v3462_v25, %v3460_v33 }
  0xdc   : > { %v1080_v12 = vsel %vm644_vm0, %v1075_v61, %v1079_v58 }
  0xde   : > { %7710 = vmatmul.mubr.bf16.gmra.mrb[92].mxu1 %v1032_v53  ;;  %v1081_v53 = vshrl.u32 %v9265_v31, 16 }
  0xdf   : > { %8006 = vmatmul.mubr.bf16.gmra.mrb[92].mxu0 %v3397_v54  ;;  %7713 = vmatprep.mubr.bf16.mxu1 %v1040_v57  ;;  %v1085_v54 = vshll.u32 %v9271_v38, 16  ;;  %v3450_v57 = vshll.u32 %v9274_v42, 16 }
  0xe0   : > { %8009 = vmatprep.mubr.bf16.mxu0 %v3405_v62  ;;  %v3444_v62 = vrot.slane %v3442_v49, 1  ;;  %v1083_v1 = vor.u32 %v1081_v53, %v1079_v58  ;;  %v3478_v58 = vshrl.u32 %v9316_v34, 16 }
  0xe1   : > { %v1087_v4 = vrot.slane %v1085_v54, 1  ;;  %v3452_v8 = vrot.slane %v3450_v57, 1  ;;  %v3470_v54 = vshrl.u32 %v9298_v9, 16 }
  0xe2   : > { %v3448_v7 = vor.u32 %v3446_v56, %v3444_v62  ;;  %v3445_v18 = vsel %vm644_vm0, %v3440_v0, %v3444_v62  ;;  %v1117_v56 = vshll.u32 %v9319_v39, 16  ;;  %v9337_v0 = vld [vmem:[%s8930_s8 + $0x1e0] sm:$0xff]  }
  0xe3   : > { %v1088_v19 = vsel %vm644_vm0, %v1083_v1, %v1087_v4  ;;  %v1091_v30 = vor.u32 %v1089_v14, %v1087_v4  ;;  %v3476_v4 = vrot.slane %v3474_v52, 1  ;;  %v9343_v14 = vld [vmem:[%s8930_s8 + $0x1e8] sm:$0xff]  }
  0xe4   : > { %v3453_v23 = vsel %vm644_vm0, %v3448_v7, %v3452_v8  ;;  %v9340_v7 = vld [vmem:[%s8930_s8 + $0x1f0] sm:$0xff]  }
  0xe5   : > { %v1096_v47 = vsel %vm644_vm0, %v1091_v30, %v1095_v28  ;;  %v3490_v25 = vshll.u32 %v9340_v7, 16  ;;  %v1129_v30 = vshrl.u32 %v9337_v0, 16 }
  0xe6   : > { %7714 = vmatmul.mubr.bf16.gmra.mrb[96].mxu1 %v1048_v15  ;;  %v3454_v15 = vshrl.u32 %v9274_v42, 16 }
  0xe7   : > { %8010 = vmatmul.mubr.bf16.gmra.mrb[96].mxu0 %v3413_v21  ;;  %7717 = vmatprep.mubr.bf16.mxu1 %v1056_v22  ;;  %v1097_v21 = vshrl.u32 %v9289_v59, 16  ;;  %v1101_v22 = vshll.u32 %v9295_v5, 16 }
  0xe8   : > { %8013 = vmatprep.mubr.bf16.mxu0 %v3421_v26  ;;  %v3466_v26 = vshll.u32 %v9298_v9, 16  ;;  %v3456_v32 = vor.u32 %v3454_v15, %v3452_v8  ;;  %v3480_v15 = vor.u32 %v3478_v58, %v3476_v4 }
  0xe9   : > { %v1099_v36 = vor.u32 %v1097_v21, %v1095_v28  ;;  %v1103_v37 = vrot.slane %v1101_v22, 1  ;;  %v1121_v22 = vshrl.u32 %v9319_v39, 16 }
  0xea   : > { %v3468_v43 = vrot.slane %v3466_v26, 1  ;;  %v3461_v49 = vsel %vm644_vm0, %v3456_v32, %v3460_v33  ;;  %v1133_v32 = vshll.u32 %v9343_v14, 16 }
  0xeb   : > { %v1104_v53 = vsel %vm644_vm0, %v1099_v36, %v1103_v37  ;;  %v3494_v36 = vshrl.u32 %v9340_v7, 16 }
  0xec   : > { %v3469_v57 = vsel %vm644_vm0, %v3464_v40, %v3468_v43  ;;  %v3472_v8 = vor.u32 %v3470_v54, %v3468_v43  ;;  %v9361_v43 = vld [vmem:[%s8930_s8 + $0x1f0] sm:$0xff]   ;;  %v9367_v54 = vld [vmem:[%s8930_s8 + $0x1f8] sm:$0xff]  }
  0xed   : > { %v1141_v58 = vshll.u32 %v9361_v43, 16 }
  0xee   : > { %7718 = vmatmul.mubr.bf16.gmra.mrb[100].mxu1 %v1064_v44  ;;  %v9322_v44 = vld [vmem:[%s8930_s8 + $0x1e8] sm:$0xff]   ;;  %v3477_v26 = vsel %vm644_vm0, %v3472_v8, %v3476_v4 }
  0xef   : > { %8014 = vmatmul.mubr.bf16.gmra.mrb[100].mxu0 %v3429_v46  ;;  %7721 = vmatprep.mubr.bf16.mxu1 %v1072_v50  ;;  %v1109_v46 = vshll.u32 %v9313_v29, 16  ;;  %v1105_v50 = vshrl.u32 %v9295_v5, 16  ;;  %v3482_v61 = vshll.u32 %v9322_v44, 16 }
  0xf0   : > { %8017 = vmatprep.mubr.bf16.mxu0 %v3437_v55  ;;  %v1113_v55 = vshrl.u32 %v9313_v29, 16 }
  0xf1   : > { %v1111_v62 = vrot.slane %v1109_v46, 1  ;;  %v1107_v1 = vor.u32 %v1105_v50, %v1103_v37  ;;  %v3484_v16 = vrot.slane %v3482_v61, 1  ;;  %v9364_v50 = vld [vmem:[%s8930_s8 + $0x200] sm:$0xff]  }
  0xf2   : > { %v3506_v4 = vshll.u32 %v9364_v50, 16 }
  0xf3   : > { %v1115_v11 = vor.u32 %v1113_v55, %v1111_v62  ;;  %v1112_v21 = vsel %vm644_vm0, %v1107_v1, %v1111_v62  ;;  %v3485_v33 = vsel %vm644_vm0, %v3480_v15, %v3484_v16  ;;  %v1137_v1 = vshrl.u32 %v9343_v14, 16 }
  0xf4   : > { %v1149_v15 = vshll.u32 %v9367_v54, 16 }
  0xf6   : > { %7722 = vmatmul.mubr.bf16.gmra.mrb[104].mxu1 %v1080_v12  ;;  %v1119_v12 = vrot.slane %v1117_v56, 1 }
  0xf7   : > { %8018 = vmatmul.mubr.bf16.gmra.mrb[104].mxu0 %v3445_v18  ;;  %7725 = vmatprep.mubr.bf16.mxu1 %v1088_v19  ;;  %v9346_v18 = vld [vmem:[%s8930_s8 + $0x1f8] sm:$0xff]   ;;  %v1125_v19 = vshll.u32 %v9337_v0, 16 }
  0xf8   : > { %8021 = vmatprep.mubr.bf16.mxu0 %v3453_v23  ;;  %v3486_v23 = vshrl.u32 %v9322_v44, 16  ;;  %v1120_v28 = vsel %vm644_vm0, %v1115_v11, %v1119_v12  ;;  %v3498_v37 = vshll.u32 %v9346_v18, 16  ;;  %v1123_v46 = vor.u32 %v1121_v22, %v1119_v12 }
  0xf9   : > { %v1127_v40 = vrot.slane %v1125_v19, 1  ;;  %v3502_v11 = vshrl.u32 %v9346_v18, 16  ;;  %v1145_v12 = vshrl.u32 %v9361_v43, 16  ;;  %v3510_v19 = vshrl.u32 %v9364_v50, 16 }
  0xfa   : > { %v3500_v56 = vrot.slane %v3498_v37, 1  ;;  %v1143_v22 = vrot.slane %v1141_v58, 1 }
  0xfb   : > { %v1131_v52 = vor.u32 %v1129_v30, %v1127_v40  ;;  %v1128_v61 = vsel %vm644_vm0, %v1123_v46, %v1127_v40  ;;  %v9394_v46 = vld [vmem:[%s8930_s8 + $0x218] sm:$0xff]  }
  0xfc   : > { %v3504_v30 = vor.u32 %v3502_v11, %v3500_v56 }
  0xfe   : > { %7726 = vmatmul.mubr.bf16.gmra.mrb[108].mxu1 %v1096_v47  ;;  %v3488_v47 = vor.u32 %v3486_v23, %v3484_v16  ;;  %v9385_v23 = vld [vmem:[%s8930_s8 + $0x200] sm:$0xff]  }
  0xff   : > { %8022 = vmatmul.mubr.bf16.gmra.mrb[108].mxu0 %v3461_v49  ;;  %7729 = vmatprep.mubr.bf16.mxu1 %v1104_v53  ;;  %v3492_v49 = vrot.slane %v3490_v25, 1  ;;  %v1135_v53 = vrot.slane %v1133_v32, 1  ;;  %v1147_v32 = vor.u32 %v1145_v12, %v1143_v22 }
 0x100   : > { %8025 = vmatprep.mubr.bf16.mxu0 %v3469_v57  ;;  %v9370_v57 = vld [vmem:[%s8930_s8 + $0x208] sm:$0xff]  }
 0x101   : > { %v3496_v55 = vor.u32 %v3494_v36, %v3492_v49  ;;  %v3493_v62 = vsel %vm644_vm0, %v3488_v47, %v3492_v49  ;;  %v1136_v8 = vsel %vm644_vm0, %v1131_v52, %v1135_v53  ;;  %v1139_v25 = vor.u32 %v1137_v1, %v1135_v53  ;;  %v9391_v36 = vld [vmem:[%s8930_s8 + $0x208] sm:$0xff]  }
 0x102   : > { %v1157_v47 = vshll.u32 %v9385_v23, 16  ;;  %v1153_v52 = vshrl.u32 %v9367_v54, 16  ;;  %v3518_v53 = vshrl.u32 %v9370_v57, 16 }
 0x103   : > { %v3501_v16 = vsel %vm644_vm0, %v3496_v55, %v3500_v56  ;;  %v1144_v49 = vsel %vm644_vm0, %v1139_v25, %v1143_v22  ;;  %v9410_v25 = vld [vmem:[%s8930_s8 + $0x220] ss:$0 sps:$4 sm:$0x11]  }
 0x104   : > { %v1159_v11 = vrot.slane %v1157_v47, 1 }
 0x106   : > { %7730 = vmatmul.mubr.bf16.gmra.mrb[112].mxu1 %v1112_v21  ;;  %v3514_v21 = vshll.u32 %v9370_v57, 16 }
 0x107   : > { %8026 = vmatmul.mubr.bf16.gmra.mrb[112].mxu0 %v3477_v26  ;;  %7733 = vmatprep.mubr.bf16.mxu1 %v1120_v28  ;;  %v3508_v26 = vrot.slane %v3506_v4, 1  ;;  %v9388_v28 = vld [vmem:[%s8930_s8 + $0x210] sm:$0xff]  }
 0x108   : > { %8029 = vmatprep.mubr.bf16.mxu0 %v3485_v33  ;;  %v1151_v33 = vrot.slane %v1149_v15, 1  ;;  %v3516_v40 = vrot.slane %v3514_v21, 1  ;;  %v3522_v55 = vshll.u32 %v9388_v28, 16  ;;  %v3526_v4 = vshrl.u32 %v9388_v28, 16 }
 0x109   : > { %v3512_v37 = vor.u32 %v3510_v19, %v3508_v26  ;;  %v3509_v56 = vsel %vm644_vm0, %v3504_v30, %v3508_v26 }
 0x10a   : > { %v1152_v58 = vsel %vm644_vm0, %v1147_v32, %v1151_v33  ;;  %v1155_v12 = vor.u32 %v1153_v52, %v1151_v33  ;;  %v3524_v15 = vrot.slane %v3522_v55, 1  ;;  %v3520_v19 = vor.u32 %v3518_v53, %v3516_v40  ;;  %v4349_v32 = vld [vmem:[%s8930_s8 + $0x10] sm:$0xe]  ;;  %v8766_v55 = vld [vmem:[%s8930_s8 + $0x14] sm:$0xf] }
 0x10b   : > { %v3517_v1 = vsel %vm644_vm0, %v3512_v37, %v3516_v40  ;;  %v3534_v52 = vshrl.u32 %v9394_v46, 16  ;;  %v3538_v40 = vshll.u32 %v9410_v25, 16 }
 0x10c   : > { %v3528_v26 = vor.u32 %v3526_v4, %v3524_v15  ;;  %v1160_v37 = vsel %vm644_vm0, %v1155_v12, %v1159_v11 }
 0x10d   : > { %v3540_v4 = vrot.slane %v3538_v40, 1  ;;  %v8774_v40 = vld [vmem:[%s8930_s8 + $0x38] sm:$0xff]  }
 0x10e   : > { %7734 = vmatmul.mubr.bf16.gmra.mrb[116].mxu1 %v1128_v61  ;;  %v1161_v61 = vshrl.u32 %v9385_v23, 16 }
 0x10f   : > { %8030 = vmatmul.mubr.bf16.gmra.mrb[116].mxu0 %v3493_v62  ;;  %7737 = vmatprep.mubr.bf16.mxu1 %v1136_v8  ;;  %v1165_v62 = vshll.u32 %v9391_v36, 16  ;;  %v3530_v8 = vshll.u32 %v9394_v46, 16 }
 0x110   : > { %8033 = vmatprep.mubr.bf16.mxu0 %v3501_v16  ;;  %v8763_v16 = vld [vmem:[%s8930_s8 + $0x210] ss:$0 sps:$4 sm:$0x11]   ;;  %v1163_v21 = vor.u32 %v1161_v61, %v1159_v11  ;;  %v8767_v11 = vld [vmem:[%s8930_s8 + $0x18] sm:$0xff]  }
 0x111   : > { %v1167_v22 = vrot.slane %v1165_v62, 1  ;;  %v3532_v30 = vrot.slane %v3530_v8, 1  ;;  %v1173_v47 = vshll.u32 %v8763_v16, 16  ;;  %v4372_v12 = vrot.slane %v8767_v11, 1 }
 0x113   : > { %v1168_v33 = vsel %vm644_vm0, %v1163_v21, %v1167_v22  ;;  %v3533_v53 = vsel %vm644_vm0, %v3528_v26, %v3532_v30  ;;  %v1175_v62 = vrot.slane %v1173_v47, 1  ;;  %v8768_v21 = vld [vmem:[%s8930_s8] sm:$0xff]   ;;  %v8771_v47 = vld [vmem:[%s8930_s8 + $0x8] sm:$0xff]  }
 0x116   : > { %7738 = vmatmul.mubr.bf16.gmra.mrb[120].mxu1 %v1144_v49  ;;  %v1169_v49 = vshrl.u32 %v9391_v36, 16 }
 0x117   : > { %8034 = vmatmul.mubr.bf16.gmra.mrb[120].mxu0 %v3509_v56  ;;  %7741 = vmatprep.mubr.bf16.mxu1 %v1152_v58  ;;  %v3525_v56 = vsel %vm644_vm0, %v3520_v19, %v3524_v15  ;;  %v6635_v58 = vcombine.low %v4349_v32, %v8766_v55 }
 0x118   : > { %8037 = vmatprep.mubr.bf16.mxu0 %v3517_v1  ;;  %v1171_v61 = vor.u32 %v1169_v49, %v1167_v22  ;;  %v3536_v1 = vor.u32 %v3534_v52, %v3532_v30  ;;  %v8769_v22 = vld [vmem:[%s8930_s8 + $0x20] sm:$0xff]   ;;  %v8770_v30 = vld [vmem:[%s8930_s8 + $0x28] sm:$0xff]  }
 0x119   : > { %v4371_v8 = vrot.slane %v6635_v58, 1  ;;  %v4374_v26 = vrot.slane %v8769_v22, 1  ;;  %v4376_v32 = vrot.slane %v8770_v30, 1 }
 0x11a   : > { %v1176_v15 = vsel %vm644_vm0, %v1171_v61, %v1175_v62  ;;  %v3541_v16 = vsel %vm644_vm0, %v3536_v1, %v3540_v4  ;;  %v8775_v61 = vld [vmem:[%s8930_s8 + $0x18] sm:$0xff]   ;;  %v8776_v62 = vld [vmem:[%s8930_s8 + $0x20] sm:$0xff]  }
 0x11b   : > { %v4373_v19 = vsel %vm4370_vm1, %v4371_v8, %v4372_v12  ;;  %v4377_v49 = vsel %vm4370_vm1, %v4374_v26, %v4376_v32  ;;  %v8777_v1 = vld [vmem:[%s8930_s8 + $0x40] sm:$0xff]   ;;  %v8778_v8 = vld [vmem:[%s8930_s8 + $0x48] sm:$0xff]  }
 0x11c   : > { %v4382_v4 = vrot.slane %v8777_v1, 1  ;;  %v4384_v11 = vrot.slane %v8778_v8, 1 }
 0x11e   : > { %7742 = vmatmul.mubr.bf16.gmra.mrb[124].mxu1 %v1160_v37  ;;  %v4375_v37 = vsel %vm4370_vm1, %v4372_v12, %v4374_v26  ;;  %v8782_v26 = vld [vmem:[%s8930_s8 + $0x58] sm:$0xff]  }
 0x11f   : > { %8038 = vmatmul.mubr.bf16.gmra.mrb[124].mxu0 %v3525_v56  ;;  %7745 = vmatprep.mubr.bf16.mxu1 %v1168_v33  ;;  %v8772_v56 = vld [vmem:[%s8930_s8 + $0x10] sm:$0xff]   ;;  %v4388_v30 = vrot.slane %v8782_v26, 1 }
 0x120   : > { %8041 = vmatprep.mubr.bf16.mxu0 %v3533_v53  ;;  %v8773_v33 = vld [vmem:[%s8930_s8 + $0x30] sm:$0xff]   ;;  %v4380_v53 = vrot.slane %v8774_v40, 1 }
 0x121   : > { %v4378_v52 = vrot.slane %v8773_v33, 1 }
 0x122   : > { %v4383_v12 = vsel %vm4370_vm1, %v4380_v53, %v4382_v4 }
 0x123   : > { %v4379_v55 = vsel %vm4370_vm1, %v4376_v32, %v4378_v52  ;;  %v4381_v58 = vsel %vm4370_vm1, %v4378_v52, %v4380_v53  ;;  %v8786_v52 = vld [vmem:[%s8930_s8 + $0x68] sm:$0xff]  }
 0x124   : > { %v4392_v40 = vrot.slane %v8786_v52, 1 }
 0x126   : > { %7746 = vmatmul.mubr.bf16.gmra.mrb[128].mxu1 %v1176_v15  ;;  %v4385_v15 = vsel %vm4370_vm1, %v4382_v4, %v4384_v11  ;;  %v8790_v4 = vld [vmem:[%s8930_s8 + $0x78] sm:$0xff]  }
 0x127   : > { %8042 = vmatmul.mubr.bf16.gmra.mrb[128].mxu0 %v3541_v16  ;;  %7765 = vmatprep.mubr.bf16.mxu1 %v8768_v21  ;;  %v8779_v16 = vld [vmem:[%s8930_s8 + $0x28] sm:$0xff]   ;;  %v8781_v21 = vld [vmem:[%s8930_s8 + $0x50] sm:$0xff]   ;;  %v4396_v8 = vrot.slane %v8790_v4, 1 }
 0x128   : > { %8061 = vmatprep.mubr.bf16.mxu0 %v4373_v19  ;;  %v8780_v19 = vld [vmem:[%s8930_s8 + $0x30] sm:$0xff]   ;;  %v4386_v22 = vrot.slane %v8781_v21, 1 }
 0x12a   : > { %v4387_v32 = vsel %vm4370_vm1, %v4384_v11, %v4386_v22 }
 0x12e   : > { %7766 = vmatmul.mubr.bf16.vlgmr.msra.gmra.mrb[0].mxu1 %v8771_v47  ;;  %v8784_v47 = vld [vmem:[%s8930_s8 + $0x40] sm:$0xff]  }
 0x12f   : > { %8062 = vmatmul.mubr.bf16.vlgmr.msra.gmra.mrb[0].mxu0 %v4375_v37  ;;  %7769 = vmatprep.mubr.bf16.mxu1 %v8772_v56  ;;  %v4389_v37 = vsel %vm4370_vm1, %v4386_v22, %v4388_v30  ;;  %v8785_v56 = vld [vmem:[%s8930_s8 + $0x60] sm:$0xff]   ;;  %v8794_v22 = vld [vmem:[%s8930_s8 + $0x88] sm:$0xff]  }
 0x130   : > { %8065 = vmatprep.mubr.bf16.mxu0 %v4377_v49  ;;  %v8783_v49 = vld [vmem:[%s8930_s8 + $0x38] sm:$0xff]   ;;  %v4390_v33 = vrot.slane %v8785_v56, 1  ;;  %v4400_v26 = vrot.slane %v8794_v22, 1 }
 0x132   : > { %v4391_v53 = vsel %vm4370_vm1, %v4388_v30, %v4390_v33 }
 0x136   : > { %7770 = vmatmul.mubr.bf16.gmra.mrb[4].mxu1 %v8775_v61  ;;  %v8788_v61 = vld [vmem:[%s8930_s8 + $0x50] sm:$0xff]  }
 0x137   : > { %8066 = vmatmul.mubr.bf16.gmra.mrb[4].mxu0 %v4379_v55  ;;  %7773 = vmatprep.mubr.bf16.mxu1 %v8776_v62  ;;  %v4393_v55 = vsel %vm4370_vm1, %v4390_v33, %v4392_v40  ;;  %v8789_v62 = vld [vmem:[%s8930_s8 + $0x70] sm:$0xff]   ;;  %v8798_v33 = vld [vmem:[%s8930_s8 + $0x98] sm:$0xff]  }
 0x138   : > { %8069 = vmatprep.mubr.bf16.mxu0 %v4381_v58  ;;  %v8787_v58 = vld [vmem:[%s8930_s8 + $0x48] sm:$0xff]   ;;  %v4394_v1 = vrot.slane %v8789_v62, 1  ;;  %v4404_v52 = vrot.slane %v8798_v33, 1 }
 0x13a   : > { %v4395_v11 = vsel %vm4370_vm1, %v4392_v40, %v4394_v1 }
 0x13e   : > { %7774 = vmatmul.mubr.bf16.gmra.mrb[8].mxu1 %v8779_v16  ;;  %v8792_v16 = vld [vmem:[%s8930_s8 + $0x60] sm:$0xff]  }
 0x13f   : > { %8070 = vmatmul.mubr.bf16.gmra.mrb[8].mxu0 %v4383_v12  ;;  %7777 = vmatprep.mubr.bf16.mxu1 %v8780_v19  ;;  %v4397_v12 = vsel %vm4370_vm1, %v4394_v1, %v4396_v8  ;;  %v8793_v19 = vld [vmem:[%s8930_s8 + $0x80] sm:$0xff]   ;;  %v8802_v1 = vld [vmem:[%s8930_s8 + $0xa8] sm:$0xff]  }
 0x140   : > { %8073 = vmatprep.mubr.bf16.mxu0 %v4385_v15  ;;  %v8791_v15 = vld [vmem:[%s8930_s8 + $0x58] sm:$0xff]   ;;  %v4398_v21 = vrot.slane %v8793_v19, 1  ;;  %v4408_v4 = vrot.slane %v8802_v1, 1 }
 0x142   : > { %v4399_v30 = vsel %vm4370_vm1, %v4396_v8, %v4398_v21 }
 0x146   : > { %7778 = vmatmul.mubr.bf16.gmra.mrb[12].mxu1 %v8783_v49  ;;  %v8796_v49 = vld [vmem:[%s8930_s8 + $0x70] sm:$0xff]  }
 0x147   : > { %8074 = vmatmul.mubr.bf16.gmra.mrb[12].mxu0 %v4387_v32  ;;  %7781 = vmatprep.mubr.bf16.mxu1 %v8784_v47  ;;  %v4401_v32 = vsel %vm4370_vm1, %v4398_v21, %v4400_v26  ;;  %v8797_v47 = vld [vmem:[%s8930_s8 + $0x90] sm:$0xff]   ;;  %v8806_v21 = vld [vmem:[%s8930_s8 + $0xb8] sm:$0xff]  }
 0x148   : > { %8077 = vmatprep.mubr.bf16.mxu0 %v4389_v37  ;;  %v8795_v37 = vld [vmem:[%s8930_s8 + $0x68] sm:$0xff]   ;;  %v4402_v56 = vrot.slane %v8797_v47, 1  ;;  %v4412_v22 = vrot.slane %v8806_v21, 1 }
 0x14a   : > { %v4403_v40 = vsel %vm4370_vm1, %v4400_v26, %v4402_v56 }
 0x14e   : > { %7782 = vmatmul.mubr.bf16.gmra.mrb[16].mxu1 %v8787_v58  ;;  %v8800_v58 = vld [vmem:[%s8930_s8 + $0x80] sm:$0xff]  }
 0x14f   : > { %8078 = vmatmul.mubr.bf16.gmra.mrb[16].mxu0 %v4391_v53  ;;  %7785 = vmatprep.mubr.bf16.mxu1 %v8788_v61  ;;  %v4405_v53 = vsel %vm4370_vm1, %v4402_v56, %v4404_v52  ;;  %v8801_v61 = vld [vmem:[%s8930_s8 + $0xa0] sm:$0xff]   ;;  %v8810_v56 = vld [vmem:[%s8930_s8 + $0xc8] sm:$0xff]  }
 0x150   : > { %8081 = vmatprep.mubr.bf16.mxu0 %v4393_v55  ;;  %v8799_v55 = vld [vmem:[%s8930_s8 + $0x78] sm:$0xff]   ;;  %v4406_v62 = vrot.slane %v8801_v61, 1  ;;  %v4416_v33 = vrot.slane %v8810_v56, 1 }
 0x152   : > { %v4407_v8 = vsel %vm4370_vm1, %v4404_v52, %v4406_v62 }
 0x156   : > { %7786 = vmatmul.mubr.bf16.gmra.mrb[20].mxu1 %v8791_v15  ;;  %v8804_v15 = vld [vmem:[%s8930_s8 + $0x90] sm:$0xff]  }
 0x157   : > { %8082 = vmatmul.mubr.bf16.gmra.mrb[20].mxu0 %v4395_v11  ;;  %7789 = vmatprep.mubr.bf16.mxu1 %v8792_v16  ;;  %v4409_v11 = vsel %vm4370_vm1, %v4406_v62, %v4408_v4  ;;  %v8805_v16 = vld [vmem:[%s8930_s8 + $0xb0] sm:$0xff]   ;;  %v8814_v62 = vld [vmem:[%s8930_s8 + $0xd8] sm:$0xff]  }
 0x158   : > { %8085 = vmatprep.mubr.bf16.mxu0 %v4397_v12  ;;  %v8803_v12 = vld [vmem:[%s8930_s8 + $0x88] sm:$0xff]   ;;  %v4410_v19 = vrot.slane %v8805_v16, 1  ;;  %v4420_v1 = vrot.slane %v8814_v62, 1 }
 0x15a   : > { %v4411_v26 = vsel %vm4370_vm1, %v4408_v4, %v4410_v19 }
 0x15e   : > { %7790 = vmatmul.mubr.bf16.gmra.mrb[24].mxu1 %v8795_v37  ;;  %v8808_v37 = vld [vmem:[%s8930_s8 + $0xa0] sm:$0xff]  }
 0x15f   : > { %8086 = vmatmul.mubr.bf16.gmra.mrb[24].mxu0 %v4399_v30  ;;  %7793 = vmatprep.mubr.bf16.mxu1 %v8796_v49  ;;  %v4413_v30 = vsel %vm4370_vm1, %v4410_v19, %v4412_v22  ;;  %v8809_v49 = vld [vmem:[%s8930_s8 + $0xc0] sm:$0xff]   ;;  %v8818_v19 = vld [vmem:[%s8930_s8 + $0xe8] sm:$0xff]  }
 0x160   : > { %8089 = vmatprep.mubr.bf16.mxu0 %v4401_v32  ;;  %v8807_v32 = vld [vmem:[%s8930_s8 + $0x98] sm:$0xff]   ;;  %v4414_v47 = vrot.slane %v8809_v49, 1  ;;  %v4424_v21 = vrot.slane %v8818_v19, 1 }
 0x162   : > { %v4415_v52 = vsel %vm4370_vm1, %v4412_v22, %v4414_v47 }
 0x166   : > { %7794 = vmatmul.mubr.bf16.gmra.mrb[28].mxu1 %v8799_v55  ;;  %v8812_v55 = vld [vmem:[%s8930_s8 + $0xb0] sm:$0xff]  }
 0x167   : > { %8090 = vmatmul.mubr.bf16.gmra.mrb[28].mxu0 %v4403_v40  ;;  %7797 = vmatprep.mubr.bf16.mxu1 %v8800_v58  ;;  %v4417_v40 = vsel %vm4370_vm1, %v4414_v47, %v4416_v33  ;;  %v8813_v58 = vld [vmem:[%s8930_s8 + $0xd0] sm:$0xff]   ;;  %v8822_v47 = vld [vmem:[%s8930_s8 + $0xf8] sm:$0xff]  }
 0x168   : > { %8093 = vmatprep.mubr.bf16.mxu0 %v4405_v53  ;;  %v8811_v53 = vld [vmem:[%s8930_s8 + $0xa8] sm:$0xff]   ;;  %v4418_v61 = vrot.slane %v8813_v58, 1  ;;  %v4428_v56 = vrot.slane %v8822_v47, 1 }
 0x16a   : > { %v4419_v4 = vsel %vm4370_vm1, %v4416_v33, %v4418_v61 }
 0x16e   : > { %7798 = vmatmul.mubr.bf16.gmra.mrb[32].mxu1 %v8803_v12  ;;  %v8816_v12 = vld [vmem:[%s8930_s8 + $0xc0] sm:$0xff]  }
 0x16f   : > { %8094 = vmatmul.mubr.bf16.gmra.mrb[32].mxu0 %v4407_v8  ;;  %7801 = vmatprep.mubr.bf16.mxu1 %v8804_v15  ;;  %v4421_v8 = vsel %vm4370_vm1, %v4418_v61, %v4420_v1  ;;  %v8817_v15 = vld [vmem:[%s8930_s8 + $0xe0] sm:$0xff]   ;;  %v8826_v61 = vld [vmem:[%s8930_s8 + $0x108] sm:$0xff]  }
 0x170   : > { %8097 = vmatprep.mubr.bf16.mxu0 %v4409_v11  ;;  %v8815_v11 = vld [vmem:[%s8930_s8 + $0xb8] sm:$0xff]   ;;  %v4422_v16 = vrot.slane %v8817_v15, 1  ;;  %v4432_v62 = vrot.slane %v8826_v61, 1 }
 0x172   : > { %v4423_v22 = vsel %vm4370_vm1, %v4420_v1, %v4422_v16 }
 0x176   : > { %7802 = vmatmul.mubr.bf16.gmra.mrb[36].mxu1 %v8807_v32  ;;  %v8820_v32 = vld [vmem:[%s8930_s8 + $0xd0] sm:$0xff]  }
 0x177   : > { %8098 = vmatmul.mubr.bf16.gmra.mrb[36].mxu0 %v4411_v26  ;;  %7805 = vmatprep.mubr.bf16.mxu1 %v8808_v37  ;;  %v4425_v26 = vsel %vm4370_vm1, %v4422_v16, %v4424_v21  ;;  %v8821_v37 = vld [vmem:[%s8930_s8 + $0xf0] sm:$0xff]   ;;  %v8830_v16 = vld [vmem:[%s8930_s8 + $0x118] sm:$0xff]  }
 0x178   : > { %8101 = vmatprep.mubr.bf16.mxu0 %v4413_v30  ;;  %v8819_v30 = vld [vmem:[%s8930_s8 + $0xc8] sm:$0xff]   ;;  %v4426_v49 = vrot.slane %v8821_v37, 1  ;;  %v4436_v19 = vrot.slane %v8830_v16, 1 }
 0x17a   : > { %v4427_v33 = vsel %vm4370_vm1, %v4424_v21, %v4426_v49 }
 0x17e   : > { %7806 = vmatmul.mubr.bf16.gmra.mrb[40].mxu1 %v8811_v53  ;;  %v8824_v53 = vld [vmem:[%s8930_s8 + $0xe0] sm:$0xff]  }
 0x17f   : > { %8102 = vmatmul.mubr.bf16.gmra.mrb[40].mxu0 %v4415_v52  ;;  %7809 = vmatprep.mubr.bf16.mxu1 %v8812_v55  ;;  %v4429_v52 = vsel %vm4370_vm1, %v4426_v49, %v4428_v56  ;;  %v8825_v55 = vld [vmem:[%s8930_s8 + $0x100] sm:$0xff]   ;;  %v8834_v49 = vld [vmem:[%s8930_s8 + $0x128] sm:$0xff]  }
 0x180   : > { %8105 = vmatprep.mubr.bf16.mxu0 %v4417_v40  ;;  %v8823_v40 = vld [vmem:[%s8930_s8 + $0xd8] sm:$0xff]   ;;  %v4430_v58 = vrot.slane %v8825_v55, 1  ;;  %v4440_v47 = vrot.slane %v8834_v49, 1 }
 0x182   : > { %v4431_v1 = vsel %vm4370_vm1, %v4428_v56, %v4430_v58 }
 0x186   : > { %7810 = vmatmul.mubr.bf16.gmra.mrb[44].mxu1 %v8815_v11  ;;  %v8828_v11 = vld [vmem:[%s8930_s8 + $0xf0] sm:$0xff]  }
 0x187   : > { %8106 = vmatmul.mubr.bf16.gmra.mrb[44].mxu0 %v4419_v4  ;;  %7813 = vmatprep.mubr.bf16.mxu1 %v8816_v12  ;;  %v4433_v4 = vsel %vm4370_vm1, %v4430_v58, %v4432_v62  ;;  %v8829_v12 = vld [vmem:[%s8930_s8 + $0x110] sm:$0xff]   ;;  %v8838_v58 = vld [vmem:[%s8930_s8 + $0x138] sm:$0xff]  }
 0x188   : > { %8109 = vmatprep.mubr.bf16.mxu0 %v4421_v8  ;;  %v8827_v8 = vld [vmem:[%s8930_s8 + $0xe8] sm:$0xff]   ;;  %v4434_v15 = vrot.slane %v8829_v12, 1  ;;  %v4444_v61 = vrot.slane %v8838_v58, 1 }
 0x18a   : > { %v4435_v21 = vsel %vm4370_vm1, %v4432_v62, %v4434_v15 }
 0x18e   : > { %7814 = vmatmul.mubr.bf16.gmra.mrb[48].mxu1 %v8819_v30  ;;  %v8832_v30 = vld [vmem:[%s8930_s8 + $0x100] sm:$0xff]  }
 0x18f   : > { %8110 = vmatmul.mubr.bf16.gmra.mrb[48].mxu0 %v4423_v22  ;;  %7817 = vmatprep.mubr.bf16.mxu1 %v8820_v32  ;;  %v4437_v22 = vsel %vm4370_vm1, %v4434_v15, %v4436_v19  ;;  %v8833_v32 = vld [vmem:[%s8930_s8 + $0x120] sm:$0xff]   ;;  %v8842_v15 = vld [vmem:[%s8930_s8 + $0x148] sm:$0xff]  }
 0x190   : > { %8113 = vmatprep.mubr.bf16.mxu0 %v4425_v26  ;;  %v8831_v26 = vld [vmem:[%s8930_s8 + $0xf8] sm:$0xff]   ;;  %v4438_v37 = vrot.slane %v8833_v32, 1  ;;  %v4448_v16 = vrot.slane %v8842_v15, 1 }
 0x192   : > { %v4439_v56 = vsel %vm4370_vm1, %v4436_v19, %v4438_v37 }
 0x196   : > { %7818 = vmatmul.mubr.bf16.gmra.mrb[52].mxu1 %v8823_v40  ;;  %v8836_v40 = vld [vmem:[%s8930_s8 + $0x110] sm:$0xff]  }
 0x197   : > { %8114 = vmatmul.mubr.bf16.gmra.mrb[52].mxu0 %v4427_v33  ;;  %7821 = vmatprep.mubr.bf16.mxu1 %v8824_v53  ;;  %v4441_v33 = vsel %vm4370_vm1, %v4438_v37, %v4440_v47  ;;  %v8837_v53 = vld [vmem:[%s8930_s8 + $0x130] sm:$0xff]   ;;  %v8846_v37 = vld [vmem:[%s8930_s8 + $0x158] sm:$0xff]  }
 0x198   : > { %8117 = vmatprep.mubr.bf16.mxu0 %v4429_v52  ;;  %v8835_v52 = vld [vmem:[%s8930_s8 + $0x108] sm:$0xff]   ;;  %v4442_v55 = vrot.slane %v8837_v53, 1  ;;  %v4452_v49 = vrot.slane %v8846_v37, 1 }
 0x19a   : > { %v4443_v62 = vsel %vm4370_vm1, %v4440_v47, %v4442_v55 }
 0x19e   : > { %7822 = vmatmul.mubr.bf16.gmra.mrb[56].mxu1 %v8827_v8  ;;  %v8840_v8 = vld [vmem:[%s8930_s8 + $0x120] sm:$0xff]  }
 0x19f   : > { %8118 = vmatmul.mubr.bf16.gmra.mrb[56].mxu0 %v4431_v1  ;;  %7825 = vmatprep.mubr.bf16.mxu1 %v8828_v11  ;;  %v4445_v1 = vsel %vm4370_vm1, %v4442_v55, %v4444_v61  ;;  %v8841_v11 = vld [vmem:[%s8930_s8 + $0x140] sm:$0xff]   ;;  %v8850_v55 = vld [vmem:[%s8930_s8 + $0x168] sm:$0xff]  }
 0x1a0   : > { %8121 = vmatprep.mubr.bf16.mxu0 %v4433_v4  ;;  %v8839_v4 = vld [vmem:[%s8930_s8 + $0x118] sm:$0xff]   ;;  %v4446_v12 = vrot.slane %v8841_v11, 1  ;;  %v4456_v58 = vrot.slane %v8850_v55, 1 }
 0x1a2   : > { %v4447_v19 = vsel %vm4370_vm1, %v4444_v61, %v4446_v12 }
 0x1a6   : > { %7826 = vmatmul.mubr.bf16.gmra.mrb[60].mxu1 %v8831_v26  ;;  %v8844_v26 = vld [vmem:[%s8930_s8 + $0x130] sm:$0xff]  }
 0x1a7   : > { %8122 = vmatmul.mubr.bf16.gmra.mrb[60].mxu0 %v4435_v21  ;;  %7829 = vmatprep.mubr.bf16.mxu1 %v8832_v30  ;;  %v4449_v21 = vsel %vm4370_vm1, %v4446_v12, %v4448_v16  ;;  %v8845_v30 = vld [vmem:[%s8930_s8 + $0x150] sm:$0xff]   ;;  %v8854_v12 = vld [vmem:[%s8930_s8 + $0x178] sm:$0xff]  }
 0x1a8   : > { %8125 = vmatprep.mubr.bf16.mxu0 %v4437_v22  ;;  %v8843_v22 = vld [vmem:[%s8930_s8 + $0x128] sm:$0xff]   ;;  %v4450_v32 = vrot.slane %v8845_v30, 1  ;;  %v4460_v15 = vrot.slane %v8854_v12, 1  ;;  %v4464_v30 = vrot.slane %v9184_v3, 1  ;;  %v4470_v3 = vrot.slane %v9220_v45, 1 }
 0x1aa   : > { %v4451_v47 = vsel %vm4370_vm1, %v4448_v16, %v4450_v32 }
 0x1ae   : > { %7830 = vmatmul.mubr.bf16.gmra.mrb[64].mxu1 %v8835_v52  ;;  %v8848_v52 = vld [vmem:[%s8930_s8 + $0x140] sm:$0xff]  }
 0x1af   : > { %8126 = vmatmul.mubr.bf16.gmra.mrb[64].mxu0 %v4439_v56  ;;  %7833 = vmatprep.mubr.bf16.mxu1 %v8836_v40  ;;  %v4453_v56 = vsel %vm4370_vm1, %v4450_v32, %v4452_v49  ;;  %v8849_v40 = vld [vmem:[%s8930_s8 + $0x160] sm:$0xff]  }
 0x1b0   : > { %8129 = vmatprep.mubr.bf16.mxu0 %v4441_v33  ;;  %v8847_v33 = vld [vmem:[%s8930_s8 + $0x138] sm:$0xff]   ;;  %v4454_v53 = vrot.slane %v8849_v40, 1 }
 0x1b1   : > { %v8859_v40 = vld [vmem:[%s8930_s8 + $0x178] sm:$0xff]  }
 0x1b2   : > { %v4455_v61 = vsel %vm4370_vm1, %v4452_v49, %v4454_v53  ;;  %v8857_v49 = vld [vmem:[%s8930_s8 + $0x168] sm:$0xff]  }
 0x1b6   : > { %7834 = vmatmul.mubr.bf16.gmra.mrb[68].mxu1 %v8839_v4  ;;  %v8852_v4 = vld [vmem:[%s8930_s8 + $0x150] sm:$0xff]  }
 0x1b7   : > { %8130 = vmatmul.mubr.bf16.gmra.mrb[68].mxu0 %v4443_v62  ;;  %7837 = vmatprep.mubr.bf16.mxu1 %v8840_v8  ;;  %v4457_v62 = vsel %vm4370_vm1, %v4454_v53, %v4456_v58  ;;  %v8853_v8 = vld [vmem:[%s8930_s8 + $0x170] sm:$0xff]   ;;  %v4472_v53 = vrot.slane %v9226_v51, 1  ;;  %v4480_v51 = vrot.slane %v9274_v42, 1 }
 0x1b8   : > { %8133 = vmatprep.mubr.bf16.mxu0 %v4445_v1  ;;  %v8851_v1 = vld [vmem:[%s8930_s8 + $0x148] sm:$0xff]   ;;  %v4458_v11 = vrot.slane %v8853_v8, 1 }
 0x1ba   : > { %v4459_v16 = vsel %vm4370_vm1, %v4456_v58, %v4458_v11  ;;  %v4476_v58 = vrot.slane %v9250_v13, 1 }
 0x1be   : > { %7838 = vmatmul.mubr.bf16.gmra.mrb[72].mxu1 %v8843_v22  ;;  %v8856_v22 = vld [vmem:[%s8930_s8 + $0x160] sm:$0xff]  }
 0x1bf   : > { %8134 = vmatmul.mubr.bf16.gmra.mrb[72].mxu0 %v4447_v19  ;;  %7841 = vmatprep.mubr.bf16.mxu1 %v8844_v26  ;;  %v4461_v19 = vsel %vm4370_vm1, %v4458_v11, %v4460_v15  ;;  %v4462_v26 = vrot.slane %v9180_v60, 1 }
 0x1c0   : > { %8137 = vmatprep.mubr.bf16.mxu0 %v4449_v21  ;;  %v8855_v21 = vld [vmem:[%s8930_s8 + $0x158] sm:$0xff]  }
 0x1c1   : > { %v4463_v32 = vsel %vm4370_vm1, %v4460_v15, %v4462_v26  ;;  %v4465_v37 = vsel %vm4370_vm1, %v4462_v26, %v4464_v30 }
 0x1c6   : > { %7842 = vmatmul.mubr.bf16.gmra.mrb[76].mxu1 %v8847_v33  ;;  %v4468_v33 = vrot.slane %v9203_v27, 1  ;;  %v4474_v27 = vrot.slane %v9244_v6, 1 }
 0x1c7   : > { %8138 = vmatmul.mubr.bf16.gmra.mrb[76].mxu0 %v4451_v47  ;;  %7845 = vmatprep.mubr.bf16.mxu1 %v8848_v52  ;;  %v8858_v47 = vld [vmem:[%s8930_s8 + $0x170] sm:$0xff]   ;;  %s8590_s8 = smul.u32 528, %s9700_s10 }
 0x1c8   : > { %8141 = vmatprep.mubr.bf16.mxu0 %v4453_v56  ;;  %v4466_v56 = vrot.slane %v9197_v20, 1  ;;  %v4471_v55 = vsel %vm4370_vm1, %v4468_v33, %v4470_v3  ;;  %v4473_v20 = vsel %vm4370_vm1, %v4470_v3, %v4472_v53  ;;  %v4477_v45 = vsel %vm4370_vm1, %v4474_v27, %v4476_v58 }
 0x1c9   : > { %s9599_s29 = scalar_lea.vmem %s9698_s2, %s8590_s8 }
 0x1ca   : > { %v4467_v52 = vsel %vm4370_vm1, %v4464_v30, %v4466_v56  ;;  %v4469_v60 = vsel %vm4370_vm1, %v4466_v56, %v4468_v33 }
 0x1ce   : > { %7846 = vmatmul.mubr.bf16.gmra.mrb[80].mxu1 %v8851_v1 }
 0x1cf   : > { %8142 = vmatmul.mubr.bf16.gmra.mrb[80].mxu0 %v4455_v61  ;;  %7849 = vmatprep.mubr.bf16.mxu1 %v8852_v4 }
 0x1d0   : > { %8145 = vmatprep.mubr.bf16.mxu0 %v4457_v62 }
 0x1d6   : > { %7850 = vmatmul.mubr.bf16.gmra.mrb[84].mxu1 %v8855_v21 }
 0x1d7   : > { %8146 = vmatmul.mubr.bf16.gmra.mrb[84].mxu0 %v4459_v16  ;;  %7853 = vmatprep.mubr.bf16.mxu1 %v8856_v22  ;;  %v4486_v22 = vrot.slane %v9316_v34, 1 }
 0x1d8   : > { %8149 = vmatprep.mubr.bf16.mxu0 %v4461_v19 }
 0x1de   : > { %7854 = vmatmul.mubr.bf16.gmra.mrb[88].mxu1 %v8857_v49 }
 0x1df   : > { %8150 = vmatmul.mubr.bf16.gmra.mrb[88].mxu0 %v4463_v32  ;;  %7857 = vmatprep.mubr.bf16.mxu1 %v8858_v47  ;;  %v4488_v32 = vrot.slane %v9322_v44, 1 }
 0x1e0   : > { %8153 = vmatprep.mubr.bf16.mxu0 %v4465_v37 }
 0x1e1   : > { %v4489_v44 = vsel %vm4370_vm1, %v4486_v22, %v4488_v32 }
 0x1e6   : > { %7858 = vmatmul.mubr.bf16.gmra.mrb[92].mxu1 %v8859_v40 }
 0x1e7   : > { %8154 = vmatmul.mubr.bf16.gmra.mrb[92].mxu0 %v4467_v52  ;;  %7861 = vmatprep.mubr.bf16.mxu1 %v9194_v17  ;;  %v4475_v17 = vsel %vm4370_vm1, %v4472_v53, %v4474_v27 }
 0x1e8   : > { %8157 = vmatprep.mubr.bf16.mxu0 %v4469_v60 }
 0x1ee   : > { %7862 = vmatmul.mubr.bf16.gmra.mrb[96].mxu1 %v9200_v24  ;;  %v4478_v24 = vrot.slane %v9268_v35, 1 }
 0x1ef   : > { %8158 = vmatmul.mubr.bf16.gmra.mrb[96].mxu0 %v4471_v55  ;;  %7865 = vmatprep.mubr.bf16.mxu1 %v9217_v41 }
 0x1f0   : > { %8161 = vmatprep.mubr.bf16.mxu0 %v4473_v20  ;;  %v4479_v41 = vsel %vm4370_vm1, %v4476_v58, %v4478_v24  ;;  %v4481_v6 = vsel %vm4370_vm1, %v4478_v24, %v4480_v51 }
 0x1f6   : > { %7866 = vmatmul.mubr.bf16.gmra.mrb[100].mxu1 %v9223_v48  ;;  %v4482_v48 = vrot.slane %v9292_v63, 1 }
 0x1f7   : > { %8162 = vmatmul.mubr.bf16.gmra.mrb[100].mxu0 %v4475_v17  ;;  %7869 = vmatprep.mubr.bf16.mxu1 %v9241_v2  ;;  %v4484_v2 = vrot.slane %v9298_v9, 1 }
 0x1f8   : > { %8165 = vmatprep.mubr.bf16.mxu0 %v4477_v45 }
 0x1f9   : > { %v4485_v16 = vsel %vm4370_vm1, %v4482_v48, %v4484_v2  ;;  %v4487_v55 = vsel %vm4370_vm1, %v4484_v2, %v4486_v22  ;;  %v4492_v2 = vrot.slane %v9346_v18, 1  ;;  %v4494_v22 = vrot.slane %v9364_v50, 1 }
 0x1fb   : > { %v4495_v50 = vsel %vm4370_vm1, %v4492_v2, %v4494_v22 }
 0x1fe   : > { %7870 = vmatmul.mubr.bf16.gmra.mrb[104].mxu1 %v9247_v10  ;;  %v4483_v10 = vsel %vm4370_vm1, %v4480_v51, %v4482_v48 }
 0x1ff   : > { %8166 = vmatmul.mubr.bf16.gmra.mrb[104].mxu0 %v4479_v41  ;;  %7873 = vmatprep.mubr.bf16.mxu1 %v9265_v31  ;;  %v4490_v41 = vrot.slane %v9340_v7, 1 }
 0x200   : > { %8169 = vmatprep.mubr.bf16.mxu0 %v4481_v6 }
 0x201   : > { %v7767_v13 = vpop.f32.mrb[0].mxu1  ;;  %v4491_v7 = vsel %vm4370_vm1, %v4488_v32, %v4490_v41  ;;  %v4493_v18 = vsel %vm4370_vm1, %v4490_v41, %v4492_v2  ;;  %v4496_v32 = vrot.slane %v9370_v57, 1  ;;  %v4500_v41 = vrot.slane %v9394_v46, 1 }
 0x202   : > { %v8063_v61 = vpop.f32.mrb[0].mxu0  ;;  %v2000_v35 = vpop.f32.mrb[1].mxu1 }
 0x203   : > { %v8193_v62 = vadd.f32 %v8063_v61, %v7767_v13  ;;  %v4652_v42 = vpop.f32.mrb[1].mxu0  ;;  %v7768_v1 = vpop.f32.mrb[2].mxu1  ;;  %v4497_v57 = vsel %vm4370_vm1, %v4494_v22, %v4496_v32 }
 0x204   : > { %v8194_v4 = vadd.f32 %v4652_v42, %v2000_v35  ;;  %v8064_v8 = vpop.f32.mrb[2].mxu0  ;;  %v2003_v11 = vpop.f32.mrb[3].mxu1 }
 0x205   : > { %v5445_v12 = vmul.f32 0.2, %v8193_v62  ;;  %v8195_v15 = vadd.f32 %v8064_v8, %v7768_v1  ;;  %v4655_v31 = vpop.f32.mrb[3].mxu0  ;;  %vm5313_vm2 = vcmp.gt.f32.partialorder %v8193_v62, 0.0 }
 0x206   : > { %v5443_v63 = vmul.f32 0.2, %v8194_v4  ;;  %v8196_v19 = vadd.f32 %v4655_v31, %v2003_v11  ;;  %7874 = vmatmul.mubr.bf16.gmra.mrb[108].mxu1 %v9271_v38  ;;  %vm5311_vm3 = vcmp.gt.f32.partialorder %v8194_v4, 0.0 }
 0x207   : > { %vm5314_vm4 = vcmp.gt.f32.partialorder %v8195_v15, 0.0  ;;  %v5446_v9 = vmul.f32 0.2, %v8195_v15  ;;  %8170 = vmatmul.mubr.bf16.gmra.mrb[108].mxu0 %v4483_v10  ;;  %7877 = vmatprep.mubr.bf16.mxu1 %v9289_v59  ;;  %v5577_v26 = vsel %vm5313_vm2, %v8193_v62, %v5445_v12 }
 0x208   : > { %vm5312_vm5 = vcmp.gt.f32.partialorder %v8196_v19, 0.0  ;;  %v5444_v21 = vmul.f32 0.2, %v8196_v19  ;;  %8173 = vmatprep.mubr.bf16.mxu0 %v4485_v16  ;;  %v5575_v37 = vsel %vm5311_vm3, %v8194_v4, %v5443_v63 }
 0x209   : > { %v5578_v30 = vsel %vm5314_vm4, %v8195_v15, %v5446_v9  ;;  %v7771_v38 = vpop.f32.mrb[4].mxu1 }
 0x20a   : > { %v6918_v49 = vpack.c.bf16 %v5578_v30, %v5577_v26  ;;  %v5576_v59 = vsel %vm5312_vm5, %v8196_v19, %v5444_v21  ;;  %v8067_v47 = vpop.f32.mrb[4].mxu0  ;;  %v2016_v56 = vpop.f32.mrb[5].mxu1 }
 0x20b   : > { %v6913_v33 = vpack.c.bf16 %v5576_v59, %v5575_v37  ;;  %v8197_v52 = vadd.f32 %v8067_v47, %v7771_v38  ;;  %v4668_v34 = vpop.f32.mrb[5].mxu0  ;;  %v7772_v60 = vpop.f32.mrb[6].mxu1 }
 0x20c   : > { %7240 = vst [vmem:[%s9599_s29 + $0x8] sm:$0xff] %v6918_v49   ;;  %v8198_v40 = vadd.f32 %v4668_v34, %v2016_v56  ;;  %v8068_v3 = vpop.f32.mrb[6].mxu0  ;;  %v2019_v53 = vpop.f32.mrb[7].mxu1 }
 0x20d   : > { %6914 = vst [vmem:[%s9599_s29] sm:$0xff] %v6913_v33   ;;  %v5449_v20 = vmul.f32 0.2, %v8197_v52  ;;  %v8199_v27 = vadd.f32 %v8068_v3, %v7772_v60  ;;  %v4671_v58 = vpop.f32.mrb[7].mxu0  ;;  %vm5317_vm6 = vcmp.gt.f32.partialorder %v8197_v52, 0.0 }
 0x20e   : > { %v5447_v17 = vmul.f32 0.2, %v8198_v40  ;;  %v8200_v45 = vadd.f32 %v4671_v58, %v2019_v53  ;;  %7878 = vmatmul.mubr.bf16.gmra.mrb[112].mxu1 %v9295_v5  ;;  %vm5315_vm7 = vcmp.gt.f32.partialorder %v8198_v40, 0.0 }
 0x20f   : > { %vm5318_vm8 = vcmp.gt.f32.partialorder %v8199_v27, 0.0  ;;  %v5450_v24 = vmul.f32 0.2, %v8199_v27  ;;  %8174 = vmatmul.mubr.bf16.gmra.mrb[112].mxu0 %v4487_v55  ;;  %7881 = vmatprep.mubr.bf16.mxu1 %v9313_v29  ;;  %v5581_v6 = vsel %vm5317_vm6, %v8197_v52, %v5449_v20 }
 0x210   : > { %vm5316_vm9 = vcmp.gt.f32.partialorder %v8200_v45, 0.0  ;;  %v5448_v51 = vmul.f32 0.2, %v8200_v45  ;;  %8177 = vmatprep.mubr.bf16.mxu0 %v4489_v44  ;;  %v5579_v61 = vsel %vm5315_vm7, %v8198_v40, %v5447_v17  ;;  %v4498_v17 = vrot.slane %v9388_v28, 1 }
 0x211   : > { %v5582_v48 = vsel %vm5318_vm8, %v8199_v27, %v5450_v24  ;;  %v7775_v13 = vpop.f32.mrb[8].mxu1 }
 0x212   : > { %v6928_v5 = vpack.c.bf16 %v5582_v48, %v5581_v6  ;;  %v5580_v35 = vsel %vm5316_vm9, %v8200_v45, %v5448_v51  ;;  %v8071_v62 = vpop.f32.mrb[8].mxu0  ;;  %v2032_v42 = vpop.f32.mrb[9].mxu1  ;;  %v4499_v28 = vsel %vm4370_vm1, %v4496_v32, %v4498_v17  ;;  %v4501_v46 = vsel %vm4370_vm1, %v4498_v17, %v4500_v41 }
 0x213   : > { %v6923_v1 = vpack.c.bf16 %v5580_v35, %v5579_v61  ;;  %v8201_v4 = vadd.f32 %v8071_v62, %v7775_v13  ;;  %v4684_v29 = vpop.f32.mrb[9].mxu0  ;;  %v7776_v8 = vpop.f32.mrb[10].mxu1 }
 0x214   : > { %7242 = vst [vmem:[%s9599_s29 + $0x18] sm:$0xff] %v6928_v5   ;;  %v8202_v11 = vadd.f32 %v4684_v29, %v2032_v42  ;;  %v8072_v10 = vpop.f32.mrb[10].mxu0  ;;  %v2035_v12 = vpop.f32.mrb[11].mxu1 }
 0x215   : > { %7241 = vst [vmem:[%s9599_s29 + $0x10] sm:$0xff] %v6923_v1   ;;  %v5453_v15 = vmul.f32 0.2, %v8201_v4  ;;  %v8203_v31 = vadd.f32 %v8072_v10, %v7776_v8  ;;  %v4687_v16 = vpop.f32.mrb[11].mxu0  ;;  %vm5321_vm10 = vcmp.gt.f32.partialorder %v8201_v4, 0.0 }
 0x216   : > { %v5451_v63 = vmul.f32 0.2, %v8202_v11  ;;  %v8204_v19 = vadd.f32 %v4687_v16, %v2035_v12  ;;  %7882 = vmatmul.mubr.bf16.gmra.mrb[116].mxu1 %v9319_v39  ;;  %vm5319_vm11 = vcmp.gt.f32.partialorder %v8202_v11, 0.0 }
 0x217   : > { %vm5322_vm12 = vcmp.gt.f32.partialorder %v8203_v31, 0.0  ;;  %v5454_v9 = vmul.f32 0.2, %v8203_v31  ;;  %8178 = vmatmul.mubr.bf16.gmra.mrb[116].mxu0 %v4491_v7  ;;  %7885 = vmatprep.mubr.bf16.mxu1 %v9337_v0  ;;  %v5585_v26 = vsel %vm5321_vm10, %v8201_v4, %v5453_v15  ;;  %v4502_v15 = vrot.slane %v9410_v25, 1 }
 0x218   : > { %vm5320_vm13 = vcmp.gt.f32.partialorder %v8204_v19, 0.0  ;;  %v5452_v21 = vmul.f32 0.2, %v8204_v19  ;;  %8181 = vmatprep.mubr.bf16.mxu0 %v4493_v18  ;;  %v5583_v37 = vsel %vm5319_vm11, %v8202_v11, %v5451_v63 }
 0x219   : > { %v5586_v30 = vsel %vm5322_vm12, %v8203_v31, %v5454_v9  ;;  %v7779_v38 = vpop.f32.mrb[12].mxu1 }
 0x21a   : > { %v6938_v39 = vpack.c.bf16 %v5586_v30, %v5585_v26  ;;  %v5584_v49 = vsel %vm5320_vm13, %v8204_v19, %v5452_v21  ;;  %v8075_v59 = vpop.f32.mrb[12].mxu0  ;;  %v2048_v47 = vpop.f32.mrb[13].mxu1 }
 0x21b   : > { %v6933_v56 = vpack.c.bf16 %v5584_v49, %v5583_v37  ;;  %v8205_v33 = vadd.f32 %v8075_v59, %v7779_v38  ;;  %v4700_v0 = vpop.f32.mrb[13].mxu0  ;;  %v7780_v52 = vpop.f32.mrb[14].mxu1 }
 0x21c   : > { %7244 = vst [vmem:[%s9599_s29 + $0x28] sm:$0xff] %v6938_v39   ;;  %v8206_v34 = vadd.f32 %v4700_v0, %v2048_v47  ;;  %v8076_v60 = vpop.f32.mrb[14].mxu0  ;;  %v2051_v40 = vpop.f32.mrb[15].mxu1  ;;  %v4503_v39 = vsel %vm4370_vm1, %v4500_v41, %v4502_v15 }
 0x21d   : > { %7243 = vst [vmem:[%s9599_s29 + $0x20] sm:$0xff] %v6933_v56   ;;  %v5457_v3 = vmul.f32 0.2, %v8205_v33  ;;  %v8207_v53 = vadd.f32 %v8076_v60, %v7780_v52  ;;  %v4703_v55 = vpop.f32.mrb[15].mxu0  ;;  %vm5325_vm14 = vcmp.gt.f32.partialorder %v8205_v33, 0.0 }
 0x21e   : > { %v5455_v20 = vmul.f32 0.2, %v8206_v34  ;;  %v8208_v27 = vadd.f32 %v4703_v55, %v2051_v40  ;;  %7886 = vmatmul.mubr.bf16.gmra.mrb[120].mxu1 %v9343_v14  ;;  %vm5323_vm15 = vcmp.gt.f32.partialorder %v8206_v34, 0.0 }
 0x21f   : > { %vm5326_vm0 = vcmp.gt.f32.partialorder %v8207_v53, 0.0  ;;  %v5458_v58 = vmul.f32 0.2, %v8207_v53  ;;  %8182 = vmatmul.mubr.bf16.gmra.mrb[120].mxu0 %v4495_v50  ;;  %7889 = vmatprep.mubr.bf16.mxu1 %v9361_v43  ;;  %v5589_v45 = vsel %vm5325_vm14, %v8205_v33, %v5457_v3 }
 0x220   : > { %vm5324_vm2 = vcmp.gt.f32.partialorder %v8208_v27, 0.0  ;;  %v5456_v44 = vmul.f32 0.2, %v8208_v27  ;;  %8185 = vmatprep.mubr.bf16.mxu0 %v4497_v57  ;;  %v5587_v6 = vsel %vm5323_vm15, %v8206_v34, %v5455_v20 }
 0x221   : > { %v5590_v24 = vsel %vm5326_vm0, %v8207_v53, %v5458_v58  ;;  %v7783_v51 = vpop.f32.mrb[16].mxu1 }
 0x222   : > { %v6948_v14 = vpack.c.bf16 %v5590_v24, %v5589_v45  ;;  %v5588_v48 = vsel %vm5324_vm2, %v8208_v27, %v5456_v44  ;;  %v8079_v13 = vpop.f32.mrb[16].mxu0  ;;  %v2064_v2 = vpop.f32.mrb[17].mxu1 }
 0x223   : > { %v6943_v61 = vpack.c.bf16 %v5588_v48, %v5587_v6  ;;  %v8209_v5 = vadd.f32 %v8079_v13, %v7783_v51  ;;  %v4716_v43 = vpop.f32.mrb[17].mxu0  ;;  %v7784_v35 = vpop.f32.mrb[18].mxu1 }
 0x224   : > { %7246 = vst [vmem:[%s9599_s29 + $0x38] sm:$0xff] %v6948_v14   ;;  %v8210_v62 = vadd.f32 %v4716_v43, %v2064_v2  ;;  %v8080_v42 = vpop.f32.mrb[18].mxu0  ;;  %v2067_v1 = vpop.f32.mrb[19].mxu1 }
 0x225   : > { %7245 = vst [vmem:[%s9599_s29 + $0x30] sm:$0xff] %v6943_v61   ;;  %v5461_v4 = vmul.f32 0.2, %v8209_v5  ;;  %v8211_v29 = vadd.f32 %v8080_v42, %v7784_v35  ;;  %v4719_v8 = vpop.f32.mrb[19].mxu0  ;;  %vm5329_vm3 = vcmp.gt.f32.partialorder %v8209_v5, 0.0 }
 0x226   : > { %v5459_v11 = vmul.f32 0.2, %v8210_v62  ;;  %v8212_v10 = vadd.f32 %v4719_v8, %v2067_v1  ;;  %7890 = vmatmul.mubr.bf16.gmra.mrb[124].mxu1 %v9367_v54  ;;  %vm5327_vm4 = vcmp.gt.f32.partialorder %v8210_v62, 0.0 }
 0x227   : > { %vm5330_vm5 = vcmp.gt.f32.partialorder %v8211_v29, 0.0  ;;  %v5462_v12 = vmul.f32 0.2, %v8211_v29  ;;  %8186 = vmatmul.mubr.bf16.gmra.mrb[124].mxu0 %v4499_v28  ;;  %7893 = vmatprep.mubr.bf16.mxu1 %v9385_v23  ;;  %v5593_v31 = vsel %vm5329_vm3, %v8209_v5, %v5461_v4 }
 0x228   : > { %vm5328_vm6 = vcmp.gt.f32.partialorder %v8212_v10, 0.0  ;;  %v5460_v7 = vmul.f32 0.2, %v8212_v10  ;;  %8189 = vmatprep.mubr.bf16.mxu0 %v4501_v46  ;;  %v5591_v63 = vsel %vm5327_vm4, %v8210_v62, %v5459_v11 }
 0x229   : > { %v5594_v16 = vsel %vm5330_vm5, %v8211_v29, %v5462_v12  ;;  %v7787_v18 = vpop.f32.mrb[20].mxu1 }
 0x22a   : > { %v6958_v19 = vpack.c.bf16 %v5594_v16, %v5593_v31  ;;  %v5592_v9 = vsel %vm5328_vm6, %v8212_v10, %v5460_v7  ;;  %v8083_v54 = vpop.f32.mrb[20].mxu0  ;;  %v2080_v21 = vpop.f32.mrb[21].mxu1 }
 0x22b   : > { %v6953_v22 = vpack.c.bf16 %v5592_v9, %v5591_v63  ;;  %v8213_v26 = vadd.f32 %v8083_v54, %v7787_v18  ;;  %v4732_v30 = vpop.f32.mrb[21].mxu0  ;;  %v7788_v38 = vpop.f32.mrb[22].mxu1 }
 0x22c   : > { %7248 = vst [vmem:[%s9599_s29 + $0x48] sm:$0xff] %v6958_v19   ;;  %v8214_v23 = vadd.f32 %v4732_v30, %v2080_v21  ;;  %v8084_v32 = vpop.f32.mrb[22].mxu0  ;;  %v2083_v37 = vpop.f32.mrb[23].mxu1 }
 0x22d   : > { %7247 = vst [vmem:[%s9599_s29 + $0x40] sm:$0xff] %v6953_v22   ;;  %v5465_v25 = vmul.f32 0.2, %v8213_v26  ;;  %v8215_v49 = vadd.f32 %v8084_v32, %v7788_v38  ;;  %v4735_v59 = vpop.f32.mrb[23].mxu0  ;;  %vm5333_vm7 = vcmp.gt.f32.partialorder %v8213_v26, 0.0 }
 0x22e   : > { %v5463_v47 = vmul.f32 0.2, %v8214_v23  ;;  %v8216_v56 = vadd.f32 %v4735_v59, %v2083_v37  ;;  %7894 = vmatmul.mubr.bf16.gmra.mrb[128].mxu1 %v9391_v36  ;;  %vm5331_vm8 = vcmp.gt.f32.partialorder %v8214_v23, 0.0 }
 0x22f   : > { %vm5334_vm9 = vcmp.gt.f32.partialorder %v8215_v49, 0.0  ;;  %v5466_v33 = vmul.f32 0.2, %v8215_v49  ;;  %8190 = vmatmul.mubr.bf16.gmra.mrb[128].mxu0 %v4503_v39  ;;  %v5597_v52 = vsel %vm5333_vm7, %v8213_v26, %v5465_v25 }
 0x230   : > { %vm5332_vm10 = vcmp.gt.f32.partialorder %v8216_v56, 0.0  ;;  %v5464_v0 = vmul.f32 0.2, %v8216_v56  ;;  %v5595_v40 = vsel %vm5331_vm8, %v8214_v23, %v5463_v47 }
 0x231   : > { %v5598_v34 = vsel %vm5334_vm9, %v8215_v49, %v5466_v33  ;;  %v7791_v60 = vpop.f32.mrb[24].mxu1 }
 0x232   : > { %v6968_v50 = vpack.c.bf16 %v5598_v34, %v5597_v52  ;;  %v5596_v3 = vsel %vm5332_vm10, %v8216_v56, %v5464_v0  ;;  %v8087_v53 = vpop.f32.mrb[24].mxu0  ;;  %v2096_v55 = vpop.f32.mrb[25].mxu1 }
 0x233   : > { %v6963_v57 = vpack.c.bf16 %v5596_v3, %v5595_v40  ;;  %v8217_v20 = vadd.f32 %v8087_v53, %v7791_v60  ;;  %v4748_v27 = vpop.f32.mrb[25].mxu0  ;;  %v7792_v36 = vpop.f32.mrb[26].mxu1 }
 0x234   : > { %7250 = vst [vmem:[%s9599_s29 + $0x58] sm:$0xff] %v6968_v50   ;;  %v8218_v58 = vadd.f32 %v4748_v27, %v2096_v55  ;;  %v8088_v44 = vpop.f32.mrb[26].mxu0  ;;  %v2099_v17 = vpop.f32.mrb[27].mxu1 }
 0x235   : > { %7249 = vst [vmem:[%s9599_s29 + $0x50] sm:$0xff] %v6963_v57   ;;  %v5469_v45 = vmul.f32 0.2, %v8217_v20  ;;  %v8219_v24 = vadd.f32 %v8088_v44, %v7792_v36  ;;  %v4751_v51 = vpop.f32.mrb[27].mxu0  ;;  %vm5337_vm1 = vcmp.gt.f32.partialorder %v8217_v20, 0.0 }
 0x236   : > { %v5467_v41 = vmul.f32 0.2, %v8218_v58  ;;  %v8220_v6 = vadd.f32 %v4751_v51, %v2099_v17  ;;  %vm5335_vm11 = vcmp.gt.f32.partialorder %v8218_v58, 0.0 }
 0x237   : > { %vm5338_vm12 = vcmp.gt.f32.partialorder %v8219_v24, 0.0  ;;  %v5470_v14 = vmul.f32 0.2, %v8219_v24  ;;  %v5601_v13 = vsel %vm5337_vm1, %v8217_v20, %v5469_v45 }
 0x238   : > { %vm5336_vm13 = vcmp.gt.f32.partialorder %v8220_v6, 0.0  ;;  %v5468_v48 = vmul.f32 0.2, %v8220_v6  ;;  %v5599_v5 = vsel %vm5335_vm11, %v8218_v58, %v5467_v41 }
 0x239   : > { %v5602_v2 = vsel %vm5338_vm12, %v8219_v24, %v5470_v14  ;;  %v7795_v61 = vpop.f32.mrb[28].mxu1 }
 0x23a   : > { %v6978_v43 = vpack.c.bf16 %v5602_v2, %v5601_v13  ;;  %v5600_v35 = vsel %vm5336_vm13, %v8220_v6, %v5468_v48  ;;  %v8091_v62 = vpop.f32.mrb[28].mxu0  ;;  %v2112_v42 = vpop.f32.mrb[29].mxu1 }
 0x23b   : > { %v6973_v1 = vpack.c.bf16 %v5600_v35, %v5599_v5  ;;  %v8221_v28 = vadd.f32 %v8091_v62, %v7795_v61  ;;  %v4764_v4 = vpop.f32.mrb[29].mxu0  ;;  %v7796_v29 = vpop.f32.mrb[30].mxu1 }
 0x23c   : > { %7252 = vst [vmem:[%s9599_s29 + $0x68] sm:$0xff] %v6978_v43   ;;  %v8222_v8 = vadd.f32 %v4764_v4, %v2112_v42  ;;  %v8092_v46 = vpop.f32.mrb[30].mxu0  ;;  %v2115_v11 = vpop.f32.mrb[31].mxu1 }
 0x23d   : > { %7251 = vst [vmem:[%s9599_s29 + $0x60] sm:$0xff] %v6973_v1   ;;  %v5473_v10 = vmul.f32 0.2, %v8221_v28  ;;  %v8223_v12 = vadd.f32 %v8092_v46, %v7796_v29  ;;  %v4767_v7 = vpop.f32.mrb[31].mxu0  ;;  %vm5341_vm14 = vcmp.gt.f32.partialorder %v8221_v28, 0.0 }
 0x23e   : > { %v5471_v15 = vmul.f32 0.2, %v8222_v8  ;;  %v8224_v31 = vadd.f32 %v4767_v7, %v2115_v11  ;;  %vm5339_vm15 = vcmp.gt.f32.partialorder %v8222_v8, 0.0 }
 0x23f   : > { %vm5342_vm0 = vcmp.gt.f32.partialorder %v8223_v12, 0.0  ;;  %v5474_v16 = vmul.f32 0.2, %v8223_v12  ;;  %v5605_v63 = vsel %vm5341_vm14, %v8221_v28, %v5473_v10 }
 0x240   : > { %vm5340_vm2 = vcmp.gt.f32.partialorder %v8224_v31, 0.0  ;;  %v5472_v18 = vmul.f32 0.2, %v8224_v31  ;;  %v5603_v54 = vsel %vm5339_vm15, %v8222_v8, %v5471_v15 }
 0x241   : > { %v5606_v19 = vsel %vm5342_vm0, %v8223_v12, %v5474_v16  ;;  %v7799_v9 = vpop.f32.mrb[32].mxu1 }
 0x242   : > { %v6988_v21 = vpack.c.bf16 %v5606_v19, %v5605_v63  ;;  %v5604_v22 = vsel %vm5340_vm2, %v8224_v31, %v5472_v18  ;;  %v8095_v26 = vpop.f32.mrb[32].mxu0  ;;  %v2128_v30 = vpop.f32.mrb[33].mxu1 }
 0x243   : > { %v6983_v38 = vpack.c.bf16 %v5604_v22, %v5603_v54  ;;  %v8225_v23 = vadd.f32 %v8095_v26, %v7799_v9  ;;  %v4780_v32 = vpop.f32.mrb[33].mxu0  ;;  %v7800_v37 = vpop.f32.mrb[34].mxu1 }
 0x244   : > { %7254 = vst [vmem:[%s9599_s29 + $0x78] sm:$0xff] %v6988_v21   ;;  %v8226_v39 = vadd.f32 %v4780_v32, %v2128_v30  ;;  %v8096_v25 = vpop.f32.mrb[34].mxu0  ;;  %v2131_v49 = vpop.f32.mrb[35].mxu1 }
 0x245   : > { %7253 = vst [vmem:[%s9599_s29 + $0x70] sm:$0xff] %v6983_v38   ;;  %v5477_v59 = vmul.f32 0.2, %v8225_v23  ;;  %v8227_v47 = vadd.f32 %v8096_v25, %v7800_v37  ;;  %v4783_v56 = vpop.f32.mrb[35].mxu0  ;;  %vm5345_vm3 = vcmp.gt.f32.partialorder %v8225_v23, 0.0 }
 0x246   : > { %v5475_v33 = vmul.f32 0.2, %v8226_v39  ;;  %v8228_v0 = vadd.f32 %v4783_v56, %v2131_v49  ;;  %vm5343_vm4 = vcmp.gt.f32.partialorder %v8226_v39, 0.0 }
 0x247   : > { %vm5346_vm5 = vcmp.gt.f32.partialorder %v8227_v47, 0.0  ;;  %v5478_v52 = vmul.f32 0.2, %v8227_v47  ;;  %v5609_v60 = vsel %vm5345_vm3, %v8225_v23, %v5477_v59 }
 0x248   : > { %vm5344_vm6 = vcmp.gt.f32.partialorder %v8228_v0, 0.0  ;;  %v5476_v34 = vmul.f32 0.2, %v8228_v0  ;;  %v5607_v3 = vsel %vm5343_vm4, %v8226_v39, %v5475_v33 }
 0x249   : > { %v5610_v40 = vsel %vm5346_vm5, %v8227_v47, %v5478_v52  ;;  %v7803_v50 = vpop.f32.mrb[36].mxu1 }
 0x24a   : > { %v6998_v53 = vpack.c.bf16 %v5610_v40, %v5609_v60  ;;  %v5608_v55 = vsel %vm5344_vm6, %v8228_v0, %v5476_v34  ;;  %v8099_v57 = vpop.f32.mrb[36].mxu0  ;;  %v2144_v20 = vpop.f32.mrb[37].mxu1 }
 0x24b   : > { %v6993_v27 = vpack.c.bf16 %v5608_v55, %v5607_v3  ;;  %v8229_v36 = vadd.f32 %v8099_v57, %v7803_v50  ;;  %v4796_v58 = vpop.f32.mrb[37].mxu0  ;;  %v7804_v44 = vpop.f32.mrb[38].mxu1 }
 0x24c   : > { %7256 = vst [vmem:[%s9599_s29 + $0x88] sm:$0xff] %v6998_v53   ;;  %v8230_v17 = vadd.f32 %v4796_v58, %v2144_v20  ;;  %v8100_v45 = vpop.f32.mrb[38].mxu0  ;;  %v2147_v24 = vpop.f32.mrb[39].mxu1 }
 0x24d   : > { %7255 = vst [vmem:[%s9599_s29 + $0x80] sm:$0xff] %v6993_v27   ;;  %v5481_v51 = vmul.f32 0.2, %v8229_v36  ;;  %v8231_v41 = vadd.f32 %v8100_v45, %v7804_v44  ;;  %v4799_v6 = vpop.f32.mrb[39].mxu0  ;;  %vm5349_vm7 = vcmp.gt.f32.partialorder %v8229_v36, 0.0 }
 0x24e   : > { %v5479_v14 = vmul.f32 0.2, %v8230_v17  ;;  %v8232_v48 = vadd.f32 %v4799_v6, %v2147_v24  ;;  %vm5347_vm8 = vcmp.gt.f32.partialorder %v8230_v17, 0.0 }
 0x24f   : > { %vm5350_vm9 = vcmp.gt.f32.partialorder %v8231_v41, 0.0  ;;  %v5482_v13 = vmul.f32 0.2, %v8231_v41  ;;  %v5613_v61 = vsel %vm5349_vm7, %v8229_v36, %v5481_v51 }
 0x250   : > { %vm5348_vm10 = vcmp.gt.f32.partialorder %v8232_v48, 0.0  ;;  %v5480_v2 = vmul.f32 0.2, %v8232_v48  ;;  %v5611_v35 = vsel %vm5347_vm8, %v8230_v17, %v5479_v14 }
 0x251   : > { %v5614_v5 = vsel %vm5350_vm9, %v8231_v41, %v5482_v13  ;;  %v7807_v43 = vpop.f32.mrb[40].mxu1 }
 0x252   : > { %v7008_v62 = vpack.c.bf16 %v5614_v5, %v5613_v61  ;;  %v5612_v42 = vsel %vm5348_vm10, %v8232_v48, %v5480_v2  ;;  %v8103_v1 = vpop.f32.mrb[40].mxu0  ;;  %v2160_v28 = vpop.f32.mrb[41].mxu1 }
 0x253   : > { %v7003_v4 = vpack.c.bf16 %v5612_v42, %v5611_v35  ;;  %v8233_v29 = vadd.f32 %v8103_v1, %v7807_v43  ;;  %v4812_v8 = vpop.f32.mrb[41].mxu0  ;;  %v7808_v46 = vpop.f32.mrb[42].mxu1 }
 0x254   : > { %7258 = vst [vmem:[%s9599_s29 + $0x98] sm:$0xff] %v7008_v62   ;;  %v8234_v11 = vadd.f32 %v4812_v8, %v2160_v28  ;;  %v8104_v10 = vpop.f32.mrb[42].mxu0  ;;  %v2163_v12 = vpop.f32.mrb[43].mxu1 }
 0x255   : > { %7257 = vst [vmem:[%s9599_s29 + $0x90] sm:$0xff] %v7003_v4   ;;  %v5485_v7 = vmul.f32 0.2, %v8233_v29  ;;  %v8235_v15 = vadd.f32 %v8104_v10, %v7808_v46  ;;  %v4815_v31 = vpop.f32.mrb[43].mxu0  ;;  %vm5353_vm1 = vcmp.gt.f32.partialorder %v8233_v29, 0.0 }
 0x256   : > { %v5483_v16 = vmul.f32 0.2, %v8234_v11  ;;  %v8236_v18 = vadd.f32 %v4815_v31, %v2163_v12  ;;  %vm5351_vm11 = vcmp.gt.f32.partialorder %v8234_v11, 0.0 }
 0x257   : > { %vm5354_vm12 = vcmp.gt.f32.partialorder %v8235_v15, 0.0  ;;  %v5486_v63 = vmul.f32 0.2, %v8235_v15  ;;  %v5617_v9 = vsel %vm5353_vm1, %v8233_v29, %v5485_v7 }
 0x258   : > { %vm5352_vm13 = vcmp.gt.f32.partialorder %v8236_v18, 0.0  ;;  %v5484_v19 = vmul.f32 0.2, %v8236_v18  ;;  %v5615_v22 = vsel %vm5351_vm11, %v8234_v11, %v5483_v16 }
 0x259   : > { %v5618_v54 = vsel %vm5354_vm12, %v8235_v15, %v5486_v63  ;;  %v7811_v21 = vpop.f32.mrb[44].mxu1 }
 0x25a   : > { %v7018_v26 = vpack.c.bf16 %v5618_v54, %v5617_v9  ;;  %v5616_v30 = vsel %vm5352_vm13, %v8236_v18, %v5484_v19  ;;  %v8107_v38 = vpop.f32.mrb[44].mxu0  ;;  %v2176_v23 = vpop.f32.mrb[45].mxu1 }
 0x25b   : > { %v7013_v32 = vpack.c.bf16 %v5616_v30, %v5615_v22  ;;  %v8237_v37 = vadd.f32 %v8107_v38, %v7811_v21  ;;  %v4828_v39 = vpop.f32.mrb[45].mxu0  ;;  %v7812_v25 = vpop.f32.mrb[46].mxu1 }
 0x25c   : > { %7260 = vst [vmem:[%s9599_s29 + $0xa8] sm:$0xff] %v7018_v26   ;;  %v8238_v49 = vadd.f32 %v4828_v39, %v2176_v23  ;;  %v8108_v59 = vpop.f32.mrb[46].mxu0  ;;  %v2179_v47 = vpop.f32.mrb[47].mxu1 }
 0x25d   : > { %7259 = vst [vmem:[%s9599_s29 + $0xa0] sm:$0xff] %v7013_v32   ;;  %v5489_v56 = vmul.f32 0.2, %v8237_v37  ;;  %v8239_v33 = vadd.f32 %v8108_v59, %v7812_v25  ;;  %v4831_v0 = vpop.f32.mrb[47].mxu0  ;;  %vm5357_vm14 = vcmp.gt.f32.partialorder %v8237_v37, 0.0 }
 0x25e   : > { %v5487_v52 = vmul.f32 0.2, %v8238_v49  ;;  %v8240_v34 = vadd.f32 %v4831_v0, %v2179_v47  ;;  %vm5355_vm15 = vcmp.gt.f32.partialorder %v8238_v49, 0.0 }
 0x25f   : > { %vm5358_vm0 = vcmp.gt.f32.partialorder %v8239_v33, 0.0  ;;  %v5490_v60 = vmul.f32 0.2, %v8239_v33  ;;  %v5621_v50 = vsel %vm5357_vm14, %v8237_v37, %v5489_v56 }
 0x260   : > { %vm5356_vm2 = vcmp.gt.f32.partialorder %v8240_v34, 0.0  ;;  %v5488_v40 = vmul.f32 0.2, %v8240_v34  ;;  %v5619_v55 = vsel %vm5355_vm15, %v8238_v49, %v5487_v52 }
 0x261   : > { %v5622_v3 = vsel %vm5358_vm0, %v8239_v33, %v5490_v60  ;;  %v7815_v53 = vpop.f32.mrb[48].mxu1 }
 0x262   : > { %v7028_v57 = vpack.c.bf16 %v5622_v3, %v5621_v50  ;;  %v5620_v20 = vsel %vm5356_vm2, %v8240_v34, %v5488_v40  ;;  %v8111_v27 = vpop.f32.mrb[48].mxu0  ;;  %v2192_v36 = vpop.f32.mrb[49].mxu1 }
 0x263   : > { %v7023_v58 = vpack.c.bf16 %v5620_v20, %v5619_v55  ;;  %v8241_v44 = vadd.f32 %v8111_v27, %v7815_v53  ;;  %v4844_v17 = vpop.f32.mrb[49].mxu0  ;;  %v7816_v45 = vpop.f32.mrb[50].mxu1 }
 0x264   : > { %7262 = vst [vmem:[%s9599_s29 + $0xb8] sm:$0xff] %v7028_v57   ;;  %v8242_v24 = vadd.f32 %v4844_v17, %v2192_v36  ;;  %v8112_v51 = vpop.f32.mrb[50].mxu0  ;;  %v2195_v41 = vpop.f32.mrb[51].mxu1 }
 0x265   : > { %7261 = vst [vmem:[%s9599_s29 + $0xb0] sm:$0xff] %v7023_v58   ;;  %v5493_v6 = vmul.f32 0.2, %v8241_v44  ;;  %v8243_v14 = vadd.f32 %v8112_v51, %v7816_v45  ;;  %v4847_v48 = vpop.f32.mrb[51].mxu0  ;;  %vm5361_vm3 = vcmp.gt.f32.partialorder %v8241_v44, 0.0 }
 0x266   : > { %v5491_v13 = vmul.f32 0.2, %v8242_v24  ;;  %v8244_v2 = vadd.f32 %v4847_v48, %v2195_v41  ;;  %vm5359_vm4 = vcmp.gt.f32.partialorder %v8242_v24, 0.0 }
 0x267   : > { %vm5362_vm5 = vcmp.gt.f32.partialorder %v8243_v14, 0.0  ;;  %v5494_v61 = vmul.f32 0.2, %v8243_v14  ;;  %v5625_v43 = vsel %vm5361_vm3, %v8241_v44, %v5493_v6 }
 0x268   : > { %vm5360_vm6 = vcmp.gt.f32.partialorder %v8244_v2, 0.0  ;;  %v5492_v5 = vmul.f32 0.2, %v8244_v2  ;;  %v5623_v42 = vsel %vm5359_vm4, %v8242_v24, %v5491_v13 }
 0x269   : > { %v5626_v35 = vsel %vm5362_vm5, %v8243_v14, %v5494_v61  ;;  %v7819_v62 = vpop.f32.mrb[52].mxu1 }
 0x26a   : > { %v7038_v1 = vpack.c.bf16 %v5626_v35, %v5625_v43  ;;  %v5624_v28 = vsel %vm5360_vm6, %v8244_v2, %v5492_v5  ;;  %v8115_v4 = vpop.f32.mrb[52].mxu0  ;;  %v2208_v29 = vpop.f32.mrb[53].mxu1 }
 0x26b   : > { %v7033_v8 = vpack.c.bf16 %v5624_v28, %v5623_v42  ;;  %v8245_v46 = vadd.f32 %v8115_v4, %v7819_v62  ;;  %v4860_v11 = vpop.f32.mrb[53].mxu0  ;;  %v7820_v10 = vpop.f32.mrb[54].mxu1 }
 0x26c   : > { %7264 = vst [vmem:[%s9599_s29 + $0xc8] sm:$0xff] %v7038_v1   ;;  %v8246_v12 = vadd.f32 %v4860_v11, %v2208_v29  ;;  %v8116_v7 = vpop.f32.mrb[54].mxu0  ;;  %v2211_v15 = vpop.f32.mrb[55].mxu1 }
 0x26d   : > { %7263 = vst [vmem:[%s9599_s29 + $0xc0] sm:$0xff] %v7033_v8   ;;  %v5497_v31 = vmul.f32 0.2, %v8245_v46  ;;  %v8247_v16 = vadd.f32 %v8116_v7, %v7820_v10  ;;  %v4863_v18 = vpop.f32.mrb[55].mxu0  ;;  %vm5365_vm7 = vcmp.gt.f32.partialorder %v8245_v46, 0.0 }
 0x26e   : > { %v5495_v63 = vmul.f32 0.2, %v8246_v12  ;;  %v8248_v19 = vadd.f32 %v4863_v18, %v2211_v15  ;;  %vm5363_vm8 = vcmp.gt.f32.partialorder %v8246_v12, 0.0 }
 0x26f   : > { %vm5366_vm9 = vcmp.gt.f32.partialorder %v8247_v16, 0.0  ;;  %v5498_v9 = vmul.f32 0.2, %v8247_v16  ;;  %v5629_v21 = vsel %vm5365_vm7, %v8245_v46, %v5497_v31 }
 0x270   : > { %vm5364_vm10 = vcmp.gt.f32.partialorder %v8248_v19, 0.0  ;;  %v5496_v54 = vmul.f32 0.2, %v8248_v19  ;;  %v5627_v30 = vsel %vm5363_vm8, %v8246_v12, %v5495_v63 }
 0x271   : > { %v5630_v22 = vsel %vm5366_vm9, %v8247_v16, %v5498_v9  ;;  %v7823_v26 = vpop.f32.mrb[56].mxu1 }
 0x272   : > { %v7048_v38 = vpack.c.bf16 %v5630_v22, %v5629_v21  ;;  %v5628_v23 = vsel %vm5364_vm10, %v8248_v19, %v5496_v54  ;;  %v8119_v32 = vpop.f32.mrb[56].mxu0  ;;  %v2224_v37 = vpop.f32.mrb[57].mxu1 }
 0x273   : > { %v7043_v39 = vpack.c.bf16 %v5628_v23, %v5627_v30  ;;  %v8249_v25 = vadd.f32 %v8119_v32, %v7823_v26  ;;  %v4876_v49 = vpop.f32.mrb[57].mxu0  ;;  %v7824_v59 = vpop.f32.mrb[58].mxu1 }
 0x274   : > { %7266 = vst [vmem:[%s9599_s29 + $0xd8] sm:$0xff] %v7048_v38   ;;  %v8250_v47 = vadd.f32 %v4876_v49, %v2224_v37  ;;  %v8120_v56 = vpop.f32.mrb[58].mxu0  ;;  %v2227_v33 = vpop.f32.mrb[59].mxu1 }
 0x275   : > { %7265 = vst [vmem:[%s9599_s29 + $0xd0] sm:$0xff] %v7043_v39   ;;  %v5501_v0 = vmul.f32 0.2, %v8249_v25  ;;  %v8251_v52 = vadd.f32 %v8120_v56, %v7824_v59  ;;  %v4879_v34 = vpop.f32.mrb[59].mxu0  ;;  %vm5369_vm1 = vcmp.gt.f32.partialorder %v8249_v25, 0.0 }
 0x276   : > { %v5499_v60 = vmul.f32 0.2, %v8250_v47  ;;  %v8252_v40 = vadd.f32 %v4879_v34, %v2227_v33  ;;  %vm5367_vm11 = vcmp.gt.f32.partialorder %v8250_v47, 0.0 }
 0x277   : > { %vm5370_vm12 = vcmp.gt.f32.partialorder %v8251_v52, 0.0  ;;  %v5502_v50 = vmul.f32 0.2, %v8251_v52  ;;  %v5633_v53 = vsel %vm5369_vm1, %v8249_v25, %v5501_v0 }
 0x278   : > { %vm5368_vm13 = vcmp.gt.f32.partialorder %v8252_v40, 0.0  ;;  %v5500_v3 = vmul.f32 0.2, %v8252_v40  ;;  %v5631_v20 = vsel %vm5367_vm11, %v8250_v47, %v5499_v60 }
 0x279   : > { %v5634_v55 = vsel %vm5370_vm12, %v8251_v52, %v5502_v50  ;;  %v7827_v57 = vpop.f32.mrb[60].mxu1 }
 0x27a   : > { %v7058_v27 = vpack.c.bf16 %v5634_v55, %v5633_v53  ;;  %v5632_v36 = vsel %vm5368_vm13, %v8252_v40, %v5500_v3  ;;  %v8123_v58 = vpop.f32.mrb[60].mxu0  ;;  %v2240_v44 = vpop.f32.mrb[61].mxu1 }
 0x27b   : > { %v7053_v17 = vpack.c.bf16 %v5632_v36, %v5631_v20  ;;  %v8253_v45 = vadd.f32 %v8123_v58, %v7827_v57  ;;  %v4892_v24 = vpop.f32.mrb[61].mxu0  ;;  %v7828_v51 = vpop.f32.mrb[62].mxu1 }
 0x27c   : > { %7268 = vst [vmem:[%s9599_s29 + $0xe8] sm:$0xff] %v7058_v27   ;;  %v8254_v41 = vadd.f32 %v4892_v24, %v2240_v44  ;;  %v8124_v6 = vpop.f32.mrb[62].mxu0  ;;  %v2243_v14 = vpop.f32.mrb[63].mxu1 }
 0x27d   : > { %7267 = vst [vmem:[%s9599_s29 + $0xe0] sm:$0xff] %v7053_v17   ;;  %v5505_v48 = vmul.f32 0.2, %v8253_v45  ;;  %v8255_v13 = vadd.f32 %v8124_v6, %v7828_v51  ;;  %v4895_v2 = vpop.f32.mrb[63].mxu0  ;;  %vm5373_vm14 = vcmp.gt.f32.partialorder %v8253_v45, 0.0 }
 0x27e   : > { %v5503_v61 = vmul.f32 0.2, %v8254_v41  ;;  %v8256_v5 = vadd.f32 %v4895_v2, %v2243_v14  ;;  %vm5371_vm15 = vcmp.gt.f32.partialorder %v8254_v41, 0.0 }
 0x27f   : > { %vm5374_vm0 = vcmp.gt.f32.partialorder %v8255_v13, 0.0  ;;  %v5506_v43 = vmul.f32 0.2, %v8255_v13  ;;  %v5637_v62 = vsel %vm5373_vm14, %v8253_v45, %v5505_v48 }
 0x280   : > { %vm5372_vm2 = vcmp.gt.f32.partialorder %v8256_v5, 0.0  ;;  %v5504_v35 = vmul.f32 0.2, %v8256_v5  ;;  %v5635_v28 = vsel %vm5371_vm15, %v8254_v41, %v5503_v61 }
 0x281   : > { %v5638_v42 = vsel %vm5374_vm0, %v8255_v13, %v5506_v43  ;;  %v7831_v1 = vpop.f32.mrb[64].mxu1 }
 0x282   : > { %v7068_v4 = vpack.c.bf16 %v5638_v42, %v5637_v62  ;;  %v5636_v29 = vsel %vm5372_vm2, %v8256_v5, %v5504_v35  ;;  %v8127_v8 = vpop.f32.mrb[64].mxu0  ;;  %v2256_v46 = vpop.f32.mrb[65].mxu1 }
 0x283   : > { %v7063_v11 = vpack.c.bf16 %v5636_v29, %v5635_v28  ;;  %v8257_v10 = vadd.f32 %v8127_v8, %v7831_v1  ;;  %v4908_v12 = vpop.f32.mrb[65].mxu0  ;;  %v7832_v7 = vpop.f32.mrb[66].mxu1 }
 0x284   : > { %7270 = vst [vmem:[%s9599_s29 + $0xf8] sm:$0xff] %v7068_v4   ;;  %v8258_v15 = vadd.f32 %v4908_v12, %v2256_v46  ;;  %v8128_v31 = vpop.f32.mrb[66].mxu0  ;;  %v2259_v16 = vpop.f32.mrb[67].mxu1 }
 0x285   : > { %7269 = vst [vmem:[%s9599_s29 + $0xf0] sm:$0xff] %v7063_v11   ;;  %v5509_v18 = vmul.f32 0.2, %v8257_v10  ;;  %v8259_v63 = vadd.f32 %v8128_v31, %v7832_v7  ;;  %v4911_v19 = vpop.f32.mrb[67].mxu0  ;;  %vm5377_vm3 = vcmp.gt.f32.partialorder %v8257_v10, 0.0 }
 0x286   : > { %v5507_v9 = vmul.f32 0.2, %v8258_v15  ;;  %v8260_v54 = vadd.f32 %v4911_v19, %v2259_v16  ;;  %vm5375_vm4 = vcmp.gt.f32.partialorder %v8258_v15, 0.0 }
 0x287   : > { %vm5378_vm5 = vcmp.gt.f32.partialorder %v8259_v63, 0.0  ;;  %v5510_v21 = vmul.f32 0.2, %v8259_v63  ;;  %v5641_v26 = vsel %vm5377_vm3, %v8257_v10, %v5509_v18 }
 0x288   : > { %vm5376_vm6 = vcmp.gt.f32.partialorder %v8260_v54, 0.0  ;;  %v5508_v22 = vmul.f32 0.2, %v8260_v54  ;;  %v5639_v23 = vsel %vm5375_vm4, %v8258_v15, %v5507_v9 }
 0x289   : > { %v5642_v30 = vsel %vm5378_vm5, %v8259_v63, %v5510_v21  ;;  %v7835_v38 = vpop.f32.mrb[68].mxu1 }
 0x28a   : > { %v7078_v32 = vpack.c.bf16 %v5642_v30, %v5641_v26  ;;  %v5640_v37 = vsel %vm5376_vm6, %v8260_v54, %v5508_v22  ;;  %v8131_v39 = vpop.f32.mrb[68].mxu0  ;;  %v2272_v25 = vpop.f32.mrb[69].mxu1 }
 0x28b   : > { %v7073_v49 = vpack.c.bf16 %v5640_v37, %v5639_v23  ;;  %v8261_v59 = vadd.f32 %v8131_v39, %v7835_v38  ;;  %v4924_v47 = vpop.f32.mrb[69].mxu0  ;;  %v7836_v56 = vpop.f32.mrb[70].mxu1 }
 0x28c   : > { %7272 = vst [vmem:[%s9599_s29 + $0x108] sm:$0xff] %v7078_v32   ;;  %v8262_v33 = vadd.f32 %v4924_v47, %v2272_v25  ;;  %v8132_v0 = vpop.f32.mrb[70].mxu0  ;;  %v2275_v52 = vpop.f32.mrb[71].mxu1 }
 0x28d   : > { %7271 = vst [vmem:[%s9599_s29 + $0x100] sm:$0xff] %v7073_v49   ;;  %v5513_v34 = vmul.f32 0.2, %v8261_v59  ;;  %v8263_v60 = vadd.f32 %v8132_v0, %v7836_v56  ;;  %v4927_v40 = vpop.f32.mrb[71].mxu0  ;;  %vm5381_vm7 = vcmp.gt.f32.partialorder %v8261_v59, 0.0 }
 0x28e   : > { %v5511_v50 = vmul.f32 0.2, %v8262_v33  ;;  %v8264_v3 = vadd.f32 %v4927_v40, %v2275_v52  ;;  %vm5379_vm8 = vcmp.gt.f32.partialorder %v8262_v33, 0.0 }
 0x28f   : > { %vm5382_vm9 = vcmp.gt.f32.partialorder %v8263_v60, 0.0  ;;  %v5514_v53 = vmul.f32 0.2, %v8263_v60  ;;  %v5645_v57 = vsel %vm5381_vm7, %v8261_v59, %v5513_v34 }
 0x290   : > { %vm5380_vm10 = vcmp.gt.f32.partialorder %v8264_v3, 0.0  ;;  %v5512_v55 = vmul.f32 0.2, %v8264_v3  ;;  %v5643_v36 = vsel %vm5379_vm8, %v8262_v33, %v5511_v50 }
 0x291   : > { %v5646_v20 = vsel %vm5382_vm9, %v8263_v60, %v5514_v53  ;;  %v7839_v27 = vpop.f32.mrb[72].mxu1 }
 0x292   : > { %v7088_v58 = vpack.c.bf16 %v5646_v20, %v5645_v57  ;;  %v5644_v44 = vsel %vm5380_vm10, %v8264_v3, %v5512_v55  ;;  %v8135_v17 = vpop.f32.mrb[72].mxu0  ;;  %v2288_v45 = vpop.f32.mrb[73].mxu1 }
 0x293   : > { %v7083_v24 = vpack.c.bf16 %v5644_v44, %v5643_v36  ;;  %v8265_v51 = vadd.f32 %v8135_v17, %v7839_v27  ;;  %v4940_v41 = vpop.f32.mrb[73].mxu0  ;;  %v7840_v6 = vpop.f32.mrb[74].mxu1 }
 0x294   : > { %7274 = vst [vmem:[%s9599_s29 + $0x118] sm:$0xff] %v7088_v58   ;;  %v8266_v14 = vadd.f32 %v4940_v41, %v2288_v45  ;;  %v8136_v48 = vpop.f32.mrb[74].mxu0  ;;  %v2291_v13 = vpop.f32.mrb[75].mxu1 }
 0x295   : > { %7273 = vst [vmem:[%s9599_s29 + $0x110] sm:$0xff] %v7083_v24   ;;  %v5517_v2 = vmul.f32 0.2, %v8265_v51  ;;  %v8267_v61 = vadd.f32 %v8136_v48, %v7840_v6  ;;  %v4943_v5 = vpop.f32.mrb[75].mxu0  ;;  %vm5385_vm1 = vcmp.gt.f32.partialorder %v8265_v51, 0.0 }
 0x296   : > { %v5515_v43 = vmul.f32 0.2, %v8266_v14  ;;  %v8268_v35 = vadd.f32 %v4943_v5, %v2291_v13  ;;  %vm5383_vm11 = vcmp.gt.f32.partialorder %v8266_v14, 0.0 }
 0x297   : > { %vm5386_vm12 = vcmp.gt.f32.partialorder %v8267_v61, 0.0  ;;  %v5518_v62 = vmul.f32 0.2, %v8267_v61  ;;  %v5649_v1 = vsel %vm5385_vm1, %v8265_v51, %v5517_v2 }
 0x298   : > { %vm5384_vm13 = vcmp.gt.f32.partialorder %v8268_v35, 0.0  ;;  %v5516_v42 = vmul.f32 0.2, %v8268_v35  ;;  %v5647_v29 = vsel %vm5383_vm11, %v8266_v14, %v5515_v43 }
 0x299   : > { %v5650_v28 = vsel %vm5386_vm12, %v8267_v61, %v5518_v62  ;;  %v7843_v4 = vpop.f32.mrb[76].mxu1 }
 0x29a   : > { %v7098_v8 = vpack.c.bf16 %v5650_v28, %v5649_v1  ;;  %v5648_v46 = vsel %vm5384_vm13, %v8268_v35, %v5516_v42  ;;  %v8139_v11 = vpop.f32.mrb[76].mxu0  ;;  %v2304_v10 = vpop.f32.mrb[77].mxu1 }
 0x29b   : > { %v7093_v12 = vpack.c.bf16 %v5648_v46, %v5647_v29  ;;  %v8269_v7 = vadd.f32 %v8139_v11, %v7843_v4  ;;  %v4956_v15 = vpop.f32.mrb[77].mxu0  ;;  %v7844_v31 = vpop.f32.mrb[78].mxu1 }
 0x29c   : > { %7276 = vst [vmem:[%s9599_s29 + $0x128] sm:$0xff] %v7098_v8   ;;  %v8270_v16 = vadd.f32 %v4956_v15, %v2304_v10  ;;  %v8140_v18 = vpop.f32.mrb[78].mxu0  ;;  %v2307_v63 = vpop.f32.mrb[79].mxu1 }
 0x29d   : > { %7275 = vst [vmem:[%s9599_s29 + $0x120] sm:$0xff] %v7093_v12   ;;  %v5521_v19 = vmul.f32 0.2, %v8269_v7  ;;  %v8271_v9 = vadd.f32 %v8140_v18, %v7844_v31  ;;  %v4959_v54 = vpop.f32.mrb[79].mxu0  ;;  %vm5389_vm14 = vcmp.gt.f32.partialorder %v8269_v7, 0.0 }
 0x29e   : > { %v5519_v21 = vmul.f32 0.2, %v8270_v16  ;;  %v8272_v22 = vadd.f32 %v4959_v54, %v2307_v63  ;;  %vm5387_vm15 = vcmp.gt.f32.partialorder %v8270_v16, 0.0 }
 0x29f   : > { %vm5390_vm0 = vcmp.gt.f32.partialorder %v8271_v9, 0.0  ;;  %v5522_v26 = vmul.f32 0.2, %v8271_v9  ;;  %v5653_v38 = vsel %vm5389_vm14, %v8269_v7, %v5521_v19 }
 0x2a0   : > { %vm5388_vm2 = vcmp.gt.f32.partialorder %v8272_v22, 0.0  ;;  %v5520_v30 = vmul.f32 0.2, %v8272_v22  ;;  %v5651_v37 = vsel %vm5387_vm15, %v8270_v16, %v5519_v21 }
 0x2a1   : > { %v5654_v23 = vsel %vm5390_vm0, %v8271_v9, %v5522_v26  ;;  %v7847_v32 = vpop.f32.mrb[80].mxu1 }
 0x2a2   : > { %v7108_v39 = vpack.c.bf16 %v5654_v23, %v5653_v38  ;;  %v5652_v25 = vsel %vm5388_vm2, %v8272_v22, %v5520_v30  ;;  %v8143_v49 = vpop.f32.mrb[80].mxu0  ;;  %v2320_v59 = vpop.f32.mrb[81].mxu1 }
 0x2a3   : > { %v7103_v47 = vpack.c.bf16 %v5652_v25, %v5651_v37  ;;  %v8273_v56 = vadd.f32 %v8143_v49, %v7847_v32  ;;  %v4972_v33 = vpop.f32.mrb[81].mxu0  ;;  %v7848_v0 = vpop.f32.mrb[82].mxu1 }
 0x2a4   : > { %7278 = vst [vmem:[%s9599_s29 + $0x138] sm:$0xff] %v7108_v39   ;;  %v8274_v52 = vadd.f32 %v4972_v33, %v2320_v59  ;;  %v8144_v34 = vpop.f32.mrb[82].mxu0  ;;  %v2323_v60 = vpop.f32.mrb[83].mxu1 }
 0x2a5   : > { %7277 = vst [vmem:[%s9599_s29 + $0x130] sm:$0xff] %v7103_v47   ;;  %v5525_v40 = vmul.f32 0.2, %v8273_v56  ;;  %v8275_v50 = vadd.f32 %v8144_v34, %v7848_v0  ;;  %v4975_v3 = vpop.f32.mrb[83].mxu0  ;;  %vm5393_vm3 = vcmp.gt.f32.partialorder %v8273_v56, 0.0 }
 0x2a6   : > { %v5523_v53 = vmul.f32 0.2, %v8274_v52  ;;  %v8276_v55 = vadd.f32 %v4975_v3, %v2323_v60  ;;  %vm5391_vm4 = vcmp.gt.f32.partialorder %v8274_v52, 0.0 }
 0x2a7   : > { %vm5394_vm5 = vcmp.gt.f32.partialorder %v8275_v50, 0.0  ;;  %v5526_v57 = vmul.f32 0.2, %v8275_v50  ;;  %v5657_v27 = vsel %vm5393_vm3, %v8273_v56, %v5525_v40 }
 0x2a8   : > { %vm5392_vm6 = vcmp.gt.f32.partialorder %v8276_v55, 0.0  ;;  %v5524_v20 = vmul.f32 0.2, %v8276_v55  ;;  %v5655_v44 = vsel %vm5391_vm4, %v8274_v52, %v5523_v53 }
 0x2a9   : > { %v5658_v36 = vsel %vm5394_vm5, %v8275_v50, %v5526_v57  ;;  %v7851_v58 = vpop.f32.mrb[84].mxu1 }
 0x2aa   : > { %v7118_v17 = vpack.c.bf16 %v5658_v36, %v5657_v27  ;;  %v5656_v45 = vsel %vm5392_vm6, %v8276_v55, %v5524_v20  ;;  %v8147_v24 = vpop.f32.mrb[84].mxu0  ;;  %v2336_v51 = vpop.f32.mrb[85].mxu1 }
 0x2ab   : > { %v7113_v41 = vpack.c.bf16 %v5656_v45, %v5655_v44  ;;  %v8277_v6 = vadd.f32 %v8147_v24, %v7851_v58  ;;  %v4988_v14 = vpop.f32.mrb[85].mxu0  ;;  %v7852_v48 = vpop.f32.mrb[86].mxu1 }
 0x2ac   : > { %7280 = vst [vmem:[%s9599_s29 + $0x148] sm:$0xff] %v7118_v17   ;;  %v8278_v13 = vadd.f32 %v4988_v14, %v2336_v51  ;;  %v8148_v2 = vpop.f32.mrb[86].mxu0  ;;  %v2339_v61 = vpop.f32.mrb[87].mxu1 }
 0x2ad   : > { %7279 = vst [vmem:[%s9599_s29 + $0x140] sm:$0xff] %v7113_v41   ;;  %v5529_v5 = vmul.f32 0.2, %v8277_v6  ;;  %v8279_v43 = vadd.f32 %v8148_v2, %v7852_v48  ;;  %v4991_v35 = vpop.f32.mrb[87].mxu0  ;;  %vm5397_vm7 = vcmp.gt.f32.partialorder %v8277_v6, 0.0 }
 0x2ae   : > { %v5527_v62 = vmul.f32 0.2, %v8278_v13  ;;  %v8280_v42 = vadd.f32 %v4991_v35, %v2339_v61  ;;  %vm5395_vm8 = vcmp.gt.f32.partialorder %v8278_v13, 0.0 }
 0x2af   : > { %vm5398_vm9 = vcmp.gt.f32.partialorder %v8279_v43, 0.0  ;;  %v5530_v1 = vmul.f32 0.2, %v8279_v43  ;;  %v5661_v4 = vsel %vm5397_vm7, %v8277_v6, %v5529_v5 }
 0x2b0   : > { %vm5396_vm10 = vcmp.gt.f32.partialorder %v8280_v42, 0.0  ;;  %v5528_v28 = vmul.f32 0.2, %v8280_v42  ;;  %v5659_v46 = vsel %vm5395_vm8, %v8278_v13, %v5527_v62 }
 0x2b1   : > { %v5662_v29 = vsel %vm5398_vm9, %v8279_v43, %v5530_v1  ;;  %v7855_v8 = vpop.f32.mrb[88].mxu1 }
 0x2b2   : > { %v7128_v11 = vpack.c.bf16 %v5662_v29, %v5661_v4  ;;  %v5660_v10 = vsel %vm5396_vm10, %v8280_v42, %v5528_v28  ;;  %v8151_v12 = vpop.f32.mrb[88].mxu0  ;;  %v2352_v7 = vpop.f32.mrb[89].mxu1 }
 0x2b3   : > { %v7123_v15 = vpack.c.bf16 %v5660_v10, %v5659_v46  ;;  %v8281_v31 = vadd.f32 %v8151_v12, %v7855_v8  ;;  %v5004_v16 = vpop.f32.mrb[89].mxu0  ;;  %v7856_v18 = vpop.f32.mrb[90].mxu1 }
 0x2b4   : > { %7282 = vst [vmem:[%s9599_s29 + $0x158] sm:$0xff] %v7128_v11   ;;  %v8282_v63 = vadd.f32 %v5004_v16, %v2352_v7  ;;  %v8152_v19 = vpop.f32.mrb[90].mxu0  ;;  %v2355_v9 = vpop.f32.mrb[91].mxu1 }
 0x2b5   : > { %7281 = vst [vmem:[%s9599_s29 + $0x150] sm:$0xff] %v7123_v15   ;;  %v5533_v54 = vmul.f32 0.2, %v8281_v31  ;;  %v8283_v21 = vadd.f32 %v8152_v19, %v7856_v18  ;;  %v5007_v22 = vpop.f32.mrb[91].mxu0  ;;  %vm5401_vm1 = vcmp.gt.f32.partialorder %v8281_v31, 0.0 }
 0x2b6   : > { %v5531_v26 = vmul.f32 0.2, %v8282_v63  ;;  %v8284_v30 = vadd.f32 %v5007_v22, %v2355_v9  ;;  %vm5399_vm11 = vcmp.gt.f32.partialorder %v8282_v63, 0.0 }
 0x2b7   : > { %vm5402_vm12 = vcmp.gt.f32.partialorder %v8283_v21, 0.0  ;;  %v5534_v38 = vmul.f32 0.2, %v8283_v21  ;;  %v5665_v32 = vsel %vm5401_vm1, %v8281_v31, %v5533_v54 }
 0x2b8   : > { %vm5400_vm13 = vcmp.gt.f32.partialorder %v8284_v30, 0.0  ;;  %v5532_v23 = vmul.f32 0.2, %v8284_v30  ;;  %v5663_v25 = vsel %vm5399_vm11, %v8282_v63, %v5531_v26 }
 0x2b9   : > { %v5666_v37 = vsel %vm5402_vm12, %v8283_v21, %v5534_v38  ;;  %v7859_v39 = vpop.f32.mrb[92].mxu1 }
 0x2ba   : > { %v7138_v49 = vpack.c.bf16 %v5666_v37, %v5665_v32  ;;  %v5664_v59 = vsel %vm5400_vm13, %v8284_v30, %v5532_v23  ;;  %v8155_v47 = vpop.f32.mrb[92].mxu0  ;;  %v2368_v56 = vpop.f32.mrb[93].mxu1 }
 0x2bb   : > { %v7133_v33 = vpack.c.bf16 %v5664_v59, %v5663_v25  ;;  %v8285_v0 = vadd.f32 %v8155_v47, %v7859_v39  ;;  %v5020_v52 = vpop.f32.mrb[93].mxu0  ;;  %v7860_v34 = vpop.f32.mrb[94].mxu1 }
 0x2bc   : > { %7284 = vst [vmem:[%s9599_s29 + $0x168] sm:$0xff] %v7138_v49   ;;  %v8286_v60 = vadd.f32 %v5020_v52, %v2368_v56  ;;  %v8156_v40 = vpop.f32.mrb[94].mxu0  ;;  %v2371_v50 = vpop.f32.mrb[95].mxu1 }
 0x2bd   : > { %7283 = vst [vmem:[%s9599_s29 + $0x160] sm:$0xff] %v7133_v33   ;;  %v5537_v3 = vmul.f32 0.2, %v8285_v0  ;;  %v8287_v53 = vadd.f32 %v8156_v40, %v7860_v34  ;;  %v5023_v55 = vpop.f32.mrb[95].mxu0  ;;  %vm5405_vm14 = vcmp.gt.f32.partialorder %v8285_v0, 0.0 }
 0x2be   : > { %v5535_v57 = vmul.f32 0.2, %v8286_v60  ;;  %v8288_v20 = vadd.f32 %v5023_v55, %v2371_v50  ;;  %vm5403_vm15 = vcmp.gt.f32.partialorder %v8286_v60, 0.0 }
 0x2bf   : > { %vm5406_vm0 = vcmp.gt.f32.partialorder %v8287_v53, 0.0  ;;  %v5538_v27 = vmul.f32 0.2, %v8287_v53  ;;  %v5669_v58 = vsel %vm5405_vm14, %v8285_v0, %v5537_v3 }
 0x2c0   : > { %vm5404_vm2 = vcmp.gt.f32.partialorder %v8288_v20, 0.0  ;;  %v5536_v36 = vmul.f32 0.2, %v8288_v20  ;;  %v5667_v45 = vsel %vm5403_vm15, %v8286_v60, %v5535_v57 }
 0x2c1   : > { %v5670_v44 = vsel %vm5406_vm0, %v8287_v53, %v5538_v27  ;;  %v7863_v17 = vpop.f32.mrb[96].mxu1 }
 0x2c2   : > { %v7148_v24 = vpack.c.bf16 %v5670_v44, %v5669_v58  ;;  %v5668_v51 = vsel %vm5404_vm2, %v8288_v20, %v5536_v36  ;;  %v8159_v41 = vpop.f32.mrb[96].mxu0  ;;  %v2384_v6 = vpop.f32.mrb[97].mxu1 }
 0x2c3   : > { %v7143_v14 = vpack.c.bf16 %v5668_v51, %v5667_v45  ;;  %v8289_v48 = vadd.f32 %v8159_v41, %v7863_v17  ;;  %v5036_v13 = vpop.f32.mrb[97].mxu0  ;;  %v7864_v2 = vpop.f32.mrb[98].mxu1 }
 0x2c4   : > { %7286 = vst [vmem:[%s9599_s29 + $0x178] sm:$0xff] %v7148_v24   ;;  %v8290_v61 = vadd.f32 %v5036_v13, %v2384_v6  ;;  %v8160_v5 = vpop.f32.mrb[98].mxu0  ;;  %v2387_v43 = vpop.f32.mrb[99].mxu1 }
 0x2c5   : > { %7285 = vst [vmem:[%s9599_s29 + $0x170] sm:$0xff] %v7143_v14   ;;  %v5541_v35 = vmul.f32 0.2, %v8289_v48  ;;  %v8291_v62 = vadd.f32 %v8160_v5, %v7864_v2  ;;  %v5039_v42 = vpop.f32.mrb[99].mxu0  ;;  %vm5409_vm3 = vcmp.gt.f32.partialorder %v8289_v48, 0.0 }
 0x2c6   : > { %v5539_v1 = vmul.f32 0.2, %v8290_v61  ;;  %v8292_v28 = vadd.f32 %v5039_v42, %v2387_v43  ;;  %vm5407_vm4 = vcmp.gt.f32.partialorder %v8290_v61, 0.0 }
 0x2c7   : > { %vm5410_vm5 = vcmp.gt.f32.partialorder %v8291_v62, 0.0  ;;  %v5542_v4 = vmul.f32 0.2, %v8291_v62  ;;  %v5673_v8 = vsel %vm5409_vm3, %v8289_v48, %v5541_v35 }
 0x2c8   : > { %vm5408_vm6 = vcmp.gt.f32.partialorder %v8292_v28, 0.0  ;;  %v5540_v29 = vmul.f32 0.2, %v8292_v28  ;;  %v5671_v10 = vsel %vm5407_vm4, %v8290_v61, %v5539_v1 }
 0x2c9   : > { %v5674_v46 = vsel %vm5410_vm5, %v8291_v62, %v5542_v4  ;;  %v7867_v11 = vpop.f32.mrb[100].mxu1 }
 0x2ca   : > { %v7158_v12 = vpack.c.bf16 %v5674_v46, %v5673_v8  ;;  %v5672_v7 = vsel %vm5408_vm6, %v8292_v28, %v5540_v29  ;;  %v8163_v15 = vpop.f32.mrb[100].mxu0  ;;  %v2400_v31 = vpop.f32.mrb[101].mxu1 }
 0x2cb   : > { %v7153_v16 = vpack.c.bf16 %v5672_v7, %v5671_v10  ;;  %v8293_v18 = vadd.f32 %v8163_v15, %v7867_v11  ;;  %v5052_v63 = vpop.f32.mrb[101].mxu0  ;;  %v7868_v19 = vpop.f32.mrb[102].mxu1 }
 0x2cc   : > { %7288 = vst [vmem:[%s9599_s29 + $0x188] sm:$0xff] %v7158_v12   ;;  %v8294_v9 = vadd.f32 %v5052_v63, %v2400_v31  ;;  %v8164_v54 = vpop.f32.mrb[102].mxu0  ;;  %v2403_v21 = vpop.f32.mrb[103].mxu1 }
 0x2cd   : > { %7287 = vst [vmem:[%s9599_s29 + $0x180] sm:$0xff] %v7153_v16   ;;  %v5545_v22 = vmul.f32 0.2, %v8293_v18  ;;  %v8295_v26 = vadd.f32 %v8164_v54, %v7868_v19  ;;  %v5055_v30 = vpop.f32.mrb[103].mxu0  ;;  %vm5413_vm7 = vcmp.gt.f32.partialorder %v8293_v18, 0.0 }
 0x2ce   : > { %v5543_v38 = vmul.f32 0.2, %v8294_v9  ;;  %v8296_v23 = vadd.f32 %v5055_v30, %v2403_v21  ;;  %vm5411_vm8 = vcmp.gt.f32.partialorder %v8294_v9, 0.0 }
 0x2cf   : > { %vm5414_vm9 = vcmp.gt.f32.partialorder %v8295_v26, 0.0  ;;  %v5546_v32 = vmul.f32 0.2, %v8295_v26  ;;  %v5677_v39 = vsel %vm5413_vm7, %v8293_v18, %v5545_v22 }
 0x2d0   : > { %vm5412_vm10 = vcmp.gt.f32.partialorder %v8296_v23, 0.0  ;;  %v5544_v37 = vmul.f32 0.2, %v8296_v23  ;;  %v5675_v59 = vsel %vm5411_vm8, %v8294_v9, %v5543_v38 }
 0x2d1   : > { %v5678_v25 = vsel %vm5414_vm9, %v8295_v26, %v5546_v32  ;;  %v7871_v49 = vpop.f32.mrb[104].mxu1 }
 0x2d2   : > { %v7168_v47 = vpack.c.bf16 %v5678_v25, %v5677_v39  ;;  %v5676_v56 = vsel %vm5412_vm10, %v8296_v23, %v5544_v37  ;;  %v8167_v33 = vpop.f32.mrb[104].mxu0  ;;  %v2416_v0 = vpop.f32.mrb[105].mxu1 }
 0x2d3   : > { %v7163_v52 = vpack.c.bf16 %v5676_v56, %v5675_v59  ;;  %v8297_v34 = vadd.f32 %v8167_v33, %v7871_v49  ;;  %v5068_v60 = vpop.f32.mrb[105].mxu0  ;;  %v7872_v40 = vpop.f32.mrb[106].mxu1 }
 0x2d4   : > { %7290 = vst [vmem:[%s9599_s29 + $0x198] sm:$0xff] %v7168_v47   ;;  %v8298_v50 = vadd.f32 %v5068_v60, %v2416_v0  ;;  %v8168_v3 = vpop.f32.mrb[106].mxu0  ;;  %v2419_v53 = vpop.f32.mrb[107].mxu1 }
 0x2d5   : > { %7289 = vst [vmem:[%s9599_s29 + $0x190] sm:$0xff] %v7163_v52   ;;  %v5549_v55 = vmul.f32 0.2, %v8297_v34  ;;  %v8299_v57 = vadd.f32 %v8168_v3, %v7872_v40  ;;  %v5071_v20 = vpop.f32.mrb[107].mxu0  ;;  %vm5417_vm1 = vcmp.gt.f32.partialorder %v8297_v34, 0.0 }
 0x2d6   : > { %v5547_v27 = vmul.f32 0.2, %v8298_v50  ;;  %v8300_v36 = vadd.f32 %v5071_v20, %v2419_v53  ;;  %vm5415_vm11 = vcmp.gt.f32.partialorder %v8298_v50, 0.0 }
 0x2d7   : > { %vm5418_vm12 = vcmp.gt.f32.partialorder %v8299_v57, 0.0  ;;  %v5550_v58 = vmul.f32 0.2, %v8299_v57  ;;  %v5681_v17 = vsel %vm5417_vm1, %v8297_v34, %v5549_v55 }
 0x2d8   : > { %vm5416_vm13 = vcmp.gt.f32.partialorder %v8300_v36, 0.0  ;;  %v5548_v44 = vmul.f32 0.2, %v8300_v36  ;;  %v5679_v51 = vsel %vm5415_vm11, %v8298_v50, %v5547_v27 }
 0x2d9   : > { %v5682_v45 = vsel %vm5418_vm12, %v8299_v57, %v5550_v58  ;;  %v7875_v24 = vpop.f32.mrb[108].mxu1 }
 0x2da   : > { %v7178_v41 = vpack.c.bf16 %v5682_v45, %v5681_v17  ;;  %v5680_v6 = vsel %vm5416_vm13, %v8300_v36, %v5548_v44  ;;  %v8171_v14 = vpop.f32.mrb[108].mxu0  ;;  %v2432_v48 = vpop.f32.mrb[109].mxu1 }
 0x2db   : > { %v7173_v13 = vpack.c.bf16 %v5680_v6, %v5679_v51  ;;  %v8301_v2 = vadd.f32 %v8171_v14, %v7875_v24  ;;  %v5084_v61 = vpop.f32.mrb[109].mxu0  ;;  %v7876_v5 = vpop.f32.mrb[110].mxu1 }
 0x2dc   : > { %7292 = vst [vmem:[%s9599_s29 + $0x1a8] sm:$0xff] %v7178_v41   ;;  %v8302_v43 = vadd.f32 %v5084_v61, %v2432_v48  ;;  %v8172_v35 = vpop.f32.mrb[110].mxu0  ;;  %v2435_v62 = vpop.f32.mrb[111].mxu1 }
 0x2dd   : > { %7291 = vst [vmem:[%s9599_s29 + $0x1a0] sm:$0xff] %v7173_v13   ;;  %v5553_v42 = vmul.f32 0.2, %v8301_v2  ;;  %v8303_v1 = vadd.f32 %v8172_v35, %v7876_v5  ;;  %v5087_v28 = vpop.f32.mrb[111].mxu0  ;;  %vm5421_vm14 = vcmp.gt.f32.partialorder %v8301_v2, 0.0 }
 0x2de   : > { %v5551_v4 = vmul.f32 0.2, %v8302_v43  ;;  %v8304_v29 = vadd.f32 %v5087_v28, %v2435_v62  ;;  %vm5419_vm15 = vcmp.gt.f32.partialorder %v8302_v43, 0.0 }
 0x2df   : > { %vm5422_vm0 = vcmp.gt.f32.partialorder %v8303_v1, 0.0  ;;  %v5554_v8 = vmul.f32 0.2, %v8303_v1  ;;  %v5685_v11 = vsel %vm5421_vm14, %v8301_v2, %v5553_v42 }
 0x2e0   : > { %vm5420_vm2 = vcmp.gt.f32.partialorder %v8304_v29, 0.0  ;;  %v5552_v46 = vmul.f32 0.2, %v8304_v29  ;;  %v5683_v7 = vsel %vm5419_vm15, %v8302_v43, %v5551_v4 }
 0x2e1   : > { %v5686_v10 = vsel %vm5422_vm0, %v8303_v1, %v5554_v8  ;;  %v7879_v12 = vpop.f32.mrb[112].mxu1 }
 0x2e2   : > { %v7188_v15 = vpack.c.bf16 %v5686_v10, %v5685_v11  ;;  %v5684_v31 = vsel %vm5420_vm2, %v8304_v29, %v5552_v46  ;;  %v8175_v16 = vpop.f32.mrb[112].mxu0  ;;  %v2448_v18 = vpop.f32.mrb[113].mxu1 }
 0x2e3   : > { %v7183_v63 = vpack.c.bf16 %v5684_v31, %v5683_v7  ;;  %v8305_v19 = vadd.f32 %v8175_v16, %v7879_v12  ;;  %v5100_v9 = vpop.f32.mrb[113].mxu0  ;;  %v7880_v54 = vpop.f32.mrb[114].mxu1 }
 0x2e4   : > { %7294 = vst [vmem:[%s9599_s29 + $0x1b8] sm:$0xff] %v7188_v15   ;;  %v8306_v21 = vadd.f32 %v5100_v9, %v2448_v18  ;;  %v8176_v22 = vpop.f32.mrb[114].mxu0  ;;  %v2451_v26 = vpop.f32.mrb[115].mxu1 }
 0x2e5   : > { %7293 = vst [vmem:[%s9599_s29 + $0x1b0] sm:$0xff] %v7183_v63   ;;  %v5557_v30 = vmul.f32 0.2, %v8305_v19  ;;  %v8307_v38 = vadd.f32 %v8176_v22, %v7880_v54  ;;  %v5103_v23 = vpop.f32.mrb[115].mxu0  ;;  %vm5425_vm3 = vcmp.gt.f32.partialorder %v8305_v19, 0.0 }
 0x2e6   : > { %v5555_v32 = vmul.f32 0.2, %v8306_v21  ;;  %v8308_v37 = vadd.f32 %v5103_v23, %v2451_v26  ;;  %vm5423_vm4 = vcmp.gt.f32.partialorder %v8306_v21, 0.0 }
 0x2e7   : > { %vm5426_vm5 = vcmp.gt.f32.partialorder %v8307_v38, 0.0  ;;  %v5558_v39 = vmul.f32 0.2, %v8307_v38  ;;  %v5689_v49 = vsel %vm5425_vm3, %v8305_v19, %v5557_v30 }
 0x2e8   : > { %vm5424_vm6 = vcmp.gt.f32.partialorder %v8308_v37, 0.0  ;;  %v5556_v25 = vmul.f32 0.2, %v8308_v37  ;;  %v5687_v56 = vsel %vm5423_vm4, %v8306_v21, %v5555_v32 }
 0x2e9   : > { %v5690_v59 = vsel %vm5426_vm5, %v8307_v38, %v5558_v39  ;;  %v7883_v47 = vpop.f32.mrb[116].mxu1 }
 0x2ea   : > { %v7198_v33 = vpack.c.bf16 %v5690_v59, %v5689_v49  ;;  %v5688_v0 = vsel %vm5424_vm6, %v8308_v37, %v5556_v25  ;;  %v8179_v52 = vpop.f32.mrb[116].mxu0  ;;  %v2464_v34 = vpop.f32.mrb[117].mxu1 }
 0x2eb   : > { %v7193_v60 = vpack.c.bf16 %v5688_v0, %v5687_v56  ;;  %v8309_v40 = vadd.f32 %v8179_v52, %v7883_v47  ;;  %v5116_v50 = vpop.f32.mrb[117].mxu0  ;;  %v7884_v3 = vpop.f32.mrb[118].mxu1 }
 0x2ec   : > { %7296 = vst [vmem:[%s9599_s29 + $0x1c8] sm:$0xff] %v7198_v33   ;;  %v8310_v53 = vadd.f32 %v5116_v50, %v2464_v34  ;;  %v8180_v55 = vpop.f32.mrb[118].mxu0  ;;  %v2467_v57 = vpop.f32.mrb[119].mxu1 }
 0x2ed   : > { %7295 = vst [vmem:[%s9599_s29 + $0x1c0] sm:$0xff] %v7193_v60   ;;  %v5561_v20 = vmul.f32 0.2, %v8309_v40  ;;  %v8311_v27 = vadd.f32 %v8180_v55, %v7884_v3  ;;  %v5119_v36 = vpop.f32.mrb[119].mxu0  ;;  %vm5429_vm7 = vcmp.gt.f32.partialorder %v8309_v40, 0.0 }
 0x2ee   : > { %v5559_v58 = vmul.f32 0.2, %v8310_v53  ;;  %v8312_v44 = vadd.f32 %v5119_v36, %v2467_v57  ;;  %vm5427_vm8 = vcmp.gt.f32.partialorder %v8310_v53, 0.0 }
 0x2ef   : > { %vm5430_vm9 = vcmp.gt.f32.partialorder %v8311_v27, 0.0  ;;  %v5562_v17 = vmul.f32 0.2, %v8311_v27  ;;  %v5693_v24 = vsel %vm5429_vm7, %v8309_v40, %v5561_v20 }
 0x2f0   : > { %vm5428_vm10 = vcmp.gt.f32.partialorder %v8312_v44, 0.0  ;;  %v5560_v45 = vmul.f32 0.2, %v8312_v44  ;;  %v5691_v6 = vsel %vm5427_vm8, %v8310_v53, %v5559_v58 }
 0x2f1   : > { %v5694_v51 = vsel %vm5430_vm9, %v8311_v27, %v5562_v17  ;;  %v7887_v41 = vpop.f32.mrb[120].mxu1 }
 0x2f2   : > { %v7208_v14 = vpack.c.bf16 %v5694_v51, %v5693_v24  ;;  %v5692_v48 = vsel %vm5428_vm10, %v8312_v44, %v5560_v45  ;;  %v8183_v13 = vpop.f32.mrb[120].mxu0  ;;  %v2480_v2 = vpop.f32.mrb[121].mxu1 }
 0x2f3   : > { %v7203_v61 = vpack.c.bf16 %v5692_v48, %v5691_v6  ;;  %v8313_v5 = vadd.f32 %v8183_v13, %v7887_v41  ;;  %v5132_v43 = vpop.f32.mrb[121].mxu0  ;;  %v7888_v35 = vpop.f32.mrb[122].mxu1 }
 0x2f4   : > { %7298 = vst [vmem:[%s9599_s29 + $0x1d8] sm:$0xff] %v7208_v14   ;;  %v8314_v62 = vadd.f32 %v5132_v43, %v2480_v2  ;;  %v8184_v42 = vpop.f32.mrb[122].mxu0  ;;  %v2483_v1 = vpop.f32.mrb[123].mxu1 }
 0x2f5   : > { %7297 = vst [vmem:[%s9599_s29 + $0x1d0] sm:$0xff] %v7203_v61   ;;  %v5565_v28 = vmul.f32 0.2, %v8313_v5  ;;  %v8315_v4 = vadd.f32 %v8184_v42, %v7888_v35  ;;  %v5135_v29 = vpop.f32.mrb[123].mxu0  ;;  %vm5433_vm1 = vcmp.gt.f32.partialorder %v8313_v5, 0.0 }
 0x2f6   : > { %v5563_v8 = vmul.f32 0.2, %v8314_v62  ;;  %v8316_v46 = vadd.f32 %v5135_v29, %v2483_v1  ;;  %vm5431_vm11 = vcmp.gt.f32.partialorder %v8314_v62, 0.0 }
 0x2f7   : > { %vm5434_vm12 = vcmp.gt.f32.partialorder %v8315_v4, 0.0  ;;  %v5566_v11 = vmul.f32 0.2, %v8315_v4  ;;  %v5697_v12 = vsel %vm5433_vm1, %v8313_v5, %v5565_v28 }
 0x2f8   : > { %vm5432_vm13 = vcmp.gt.f32.partialorder %v8316_v46, 0.0  ;;  %v5564_v10 = vmul.f32 0.2, %v8316_v46  ;;  %v5695_v31 = vsel %vm5431_vm11, %v8314_v62, %v5563_v8 }
 0x2f9   : > { %v5698_v7 = vsel %vm5434_vm12, %v8315_v4, %v5566_v11  ;;  %v7891_v15 = vpop.f32.mrb[124].mxu1 }
 0x2fa   : > { %v7218_v16 = vpack.c.bf16 %v5698_v7, %v5697_v12  ;;  %v5696_v18 = vsel %vm5432_vm13, %v8316_v46, %v5564_v10  ;;  %v8187_v63 = vpop.f32.mrb[124].mxu0  ;;  %v2496_v19 = vpop.f32.mrb[125].mxu1 }
 0x2fb   : > { %v7213_v9 = vpack.c.bf16 %v5696_v18, %v5695_v31  ;;  %v8317_v54 = vadd.f32 %v8187_v63, %v7891_v15  ;;  %v5148_v21 = vpop.f32.mrb[125].mxu0  ;;  %v7892_v22 = vpop.f32.mrb[126].mxu1 }
 0x2fc   : > { %7300 = vst [vmem:[%s9599_s29 + $0x1e8] sm:$0xff] %v7218_v16   ;;  %v8318_v26 = vadd.f32 %v5148_v21, %v2496_v19  ;;  %v8188_v30 = vpop.f32.mrb[126].mxu0  ;;  %v2499_v38 = vpop.f32.mrb[127].mxu1 }
 0x2fd   : > { %7299 = vst [vmem:[%s9599_s29 + $0x1e0] sm:$0xff] %v7213_v9   ;;  %v5569_v23 = vmul.f32 0.2, %v8317_v54  ;;  %v8319_v32 = vadd.f32 %v8188_v30, %v7892_v22  ;;  %v5151_v37 = vpop.f32.mrb[127].mxu0  ;;  %vm5437_vm14 = vcmp.gt.f32.partialorder %v8317_v54, 0.0 }
 0x2fe   : > { %v5567_v39 = vmul.f32 0.2, %v8318_v26  ;;  %v8320_v25 = vadd.f32 %v5151_v37, %v2499_v38  ;;  %vm5435_vm15 = vcmp.gt.f32.partialorder %v8318_v26, 0.0 }
 0x2ff   : > { %vm5438_vm0 = vcmp.gt.f32.partialorder %v8319_v32, 0.0  ;;  %v5570_v49 = vmul.f32 0.2, %v8319_v32  ;;  %v5701_v47 = vsel %vm5437_vm14, %v8317_v54, %v5569_v23 }
 0x300   : > { %vm5436_vm2 = vcmp.gt.f32.partialorder %v8320_v25, 0.0  ;;  %v5568_v59 = vmul.f32 0.2, %v8320_v25  ;;  %v5699_v0 = vsel %vm5435_vm15, %v8318_v26, %v5567_v39 }
 0x301   : > { %v5702_v56 = vsel %vm5438_vm0, %v8319_v32, %v5570_v49  ;;  %v7895_v33 = vpop.f32.mrb[128].mxu1 }
 0x302   : > { %v7228_v52 = vpack.c.bf16 %v5702_v56, %v5701_v47  ;;  %v5700_v34 = vsel %vm5436_vm2, %v8320_v25, %v5568_v59  ;;  %v8191_v60 = vpop.f32.mrb[128].mxu0  ;;  %v2512_v40 = vpop.f32.mrb[129].mxu1 }
 0x303   : > { %v7223_v50 = vpack.c.bf16 %v5700_v34, %v5699_v0  ;;  %v8321_v3 = vadd.f32 %v8191_v60, %v7895_v33  ;;  %v5164_v53 = vpop.f32.mrb[129].mxu0  ;;  %v7896_v55 = vpop.f32.mrb[130].mxu1 }
 0x304   : > { %7302 = vst [vmem:[%s9599_s29 + $0x1f8] sm:$0xff] %v7228_v52   ;;  %v8322_v57 = vadd.f32 %v5164_v53, %v2512_v40  ;;  %v8192_v20 = vpop.f32.mrb[130].mxu0  ;;  %v2515_v27 = vpop.f32.mrb[131].mxu1 }
 0x305   : > { %7301 = vst [vmem:[%s9599_s29 + $0x1f0] sm:$0xff] %v7223_v50   ;;  %v5573_v36 = vmul.f32 0.2, %v8321_v3  ;;  %v8323_v58 = vadd.f32 %v8192_v20, %v7896_v55  ;;  %v5167_v44 = vpop.f32.mrb[131].mxu0  ;;  %vm5441_vm3 = vcmp.gt.f32.partialorder %v8321_v3, 0.0 }
 0x306   : > { %v5571_v17 = vmul.f32 0.2, %v8322_v57  ;;  %v8324_v45 = vadd.f32 %v5167_v44, %v2515_v27  ;;  %vm5439_vm4 = vcmp.gt.f32.partialorder %v8322_v57, 0.0 }
 0x307   : > { %vm5442_vm5 = vcmp.gt.f32.partialorder %v8323_v58, 0.0  ;;  %v5574_v24 = vmul.f32 0.2, %v8323_v58  ;;  %v5705_v41 = vsel %vm5441_vm3, %v8321_v3, %v5573_v36 }
 0x308   : > { %vm5440_vm6 = vcmp.gt.f32.partialorder %v8324_v45, 0.0  ;;  %v5572_v51 = vmul.f32 0.2, %v8324_v45  ;;  %v5703_v14 = vsel %vm5439_vm4, %v8322_v57, %v5571_v17 }
 0x309   : > { %v5706_v6 = vsel %vm5442_vm5, %v8323_v58, %v5574_v24 }
 0x30a   : > { %v7238_v48 = vpack.c.bf16 %v5706_v6, %v5705_v41  ;;  %v5704_v13 = vsel %vm5440_vm6, %v8324_v45, %v5572_v51 }
 0x30b   : > { %v7233_v2 = vpack.c.bf16 %v5704_v13, %v5703_v14 }
 0x30c   : > { %7304 = vst [vmem:[%s9599_s29 + $0x208] sm:$0xff] %v7238_v48  }
 0x30d   : > { %7303 = vst [vmem:[%s9599_s29 + $0x200] sm:$0xff] %v7233_v2  }
 0x30e PF: > { %s12_s9 = sadd.s32 1, %s8866_s9  }
 0x30f   : > { %p9_p4 = scmp.ge.s32.totalorder %s12_s9, 4  }
 0x311   :  { %11 = sbr.rel (!%p9_p4) target bundleno = 1 (0x1), region = 61 }

// kernel: discriminator_forward.8
= control target key start
LH: loop header
LB: loop body
LE: loop exit
PB: predicated region body
PF: predicated region fallthrough
CT: control target
= control target key end

     0   :  { %s4043_s15 = smov 0   ;;  %s5635_s0 = inlined_call_operand.vmem [shape: bf16[2,304,128], index: 0, kind: input, shape index: {}]   ;;  %s5636_s1 = inlined_call_operand.vmem [shape: bf16[4,128,128], index: 1, kind: input, shape index: {}]   ;;  %s5637_s2 = inlined_call_operand.vmem [shape: bf16[2,272,128], index: 2, kind: output, shape index: {0}]   ;;  %s5638_s3 = inlined_call_operand.vmem [shape: f32[2,1,128], index: 3, kind: output, shape index: {1}]   ;;  %s5639_s4 = inlined_call_operand.vmem [shape: f32[2,1,128], index: 4, kind: output, shape index: {2}]  }
   0x1 LB: > { %s2958_s16 = sadd.s32 4294967295, %s4014_s15   ;;  %p2962_p0 = scmp.ge.s32.totalorder %s4014_s15, 1  ;;  %s4014_s15 = sphi %s4043_s15, %s15_s15  }
   0x2   : > { %p167_p1 = scmp.lt.s32.totalorder %s4014_s15, 3 }
   0x4   : > { %p168_p2 = pnand %p2962_p0, %p167_p1 }
   0x5   : > { %v3939_v0 = vld [vmem:[%s5636_s1 + $0x40] sm:$0xff] (!%p168_p2)   ;;  %v4016_v1 = vmov (!%p168_p2), 0.0   ;;  %v3941_v3 = vld [vmem:[%s5636_s1 + $0x48] sm:$0xff] (!%p168_p2)   ;;  %vm4017_vm0 = vmmov (!%p168_p2), 0   ;;  %p199_p3 = scmp.lt.s32.totalorder (!%p168_p2), %s2958_s16, 1  ;;  %v3943_v5 = vld [vmem:[%s5636_s1 + $0x50] sm:$0xff] (!%p168_p2)  }
   0x6   : > { %171 = sbr.rel (%p168_p2) target bundleno = 537 (0x219), region = 28  ;;  %3353 = vmatprep.subr.bf16.mxu1 (!%p168_p2), %v4016_v1  ;;  %3521 = vmatprep.subr.bf16.mxu0 (!%p168_p2), %v4016_v1  ;;  %v3940_v2 = vld [vmem:[%s5636_s1 + $0x80] sm:$0xff] (!%p168_p2)   ;;  %v3942_v4 = vld [vmem:[%s5636_s1 + $0x88] sm:$0xff] (!%p168_p2)   ;;  %v3944_v6 = vld [vmem:[%s5636_s1 + $0x90] sm:$0xff] (!%p168_p2)   ;;  %vm372_vm1 = vsmask.f32 (!%p168_p2), 7424 }
   0x7   : > { %3354 = vmatpush3.bf16.msra.mxu1 (!%p168_p2), %v3939_v0  ;;  %3369 = vmatprep.mubr.msk.bf16.mxu1 (!%p168_p2), %vm4017_vm0, %v4016_v1  ;;  %v3945_v7 = vld [vmem:[%s5636_s1 + $0x58] sm:$0xff] (!%p168_p2)   ;;  %v3947_v9 = vld [vmem:[%s5636_s1 + $0x60] sm:$0xff] (!%p168_p2)   ;;  %v3949_v11 = vld [vmem:[%s5636_s1 + $0x68] sm:$0xff] (!%p168_p2)   ;;  %vm1550_vm2 = vcmask (!%p168_p2), 1046528  }
   0x8   : > { %3522 = vmatpush3.bf16.msra.mxu0 (!%p168_p2), %v3940_v2  ;;  %3355 = vmatprep.subr.bf16.mxu1 (!%p168_p2), %v4016_v1  ;;  %v3946_v8 = vld [vmem:[%s5636_s1 + $0x98] sm:$0xff] (!%p168_p2)   ;;  %v3948_v10 = vld [vmem:[%s5636_s1 + $0xa0] sm:$0xff] (!%p168_p2)   ;;  %v3950_v16 = vld [vmem:[%s5636_s1 + $0xa8] sm:$0xff] (!%p168_p2)  }
   0x9   : > { %3523 = vmatprep.subr.bf16.mxu0 (!%p168_p2), %v4016_v1  ;;  %3537 = vmatprep.mubr.msk.bf16.mxu0 (!%p168_p2), %vm4017_vm0, %v4016_v1  ;;  %v3951_v20 = vld [vmem:[%s5636_s1 + $0x70] sm:$0xff] (!%p168_p2)   ;;  %v3953_v29 = vld [vmem:[%s5636_s1 + $0x78] sm:$0xff] (!%p168_p2)   ;;  %v3959_v37 = vld [vmem:[%s5636_s1] sm:$0xff] (!%p168_p2)  }
   0xa   : > { %v3952_v21 = vld [vmem:[%s5636_s1 + $0xb0] sm:$0xff] (!%p168_p2)   ;;  %v3954_v30 = vld [vmem:[%s5636_s1 + $0xb8] sm:$0xff] (!%p168_p2)   ;;  %v3960_v42 = vld [vmem:[%s5636_s1 + $0xc0] sm:$0xff] (!%p168_p2)  }
   0xb   : > { %3356 = vmatpush3.bf16.msra.mxu1 (!%p168_p2), %v3941_v3  ;;  %v3965_v49 = vld [vmem:[%s5636_s1 + $0x8] sm:$0xff] (!%p168_p2)   ;;  %v3971_v60 = vld [vmem:[%s5636_s1 + $0x10] sm:$0xff] (!%p168_p2)  }
   0xc   : > { %3524 = vmatpush3.bf16.msra.mxu0 (!%p168_p2), %v3942_v4  ;;  %3357 = vmatprep.subr.bf16.mxu1 (!%p168_p2), %v4016_v1  ;;  %v3966_v52 = vld [vmem:[%s5636_s1 + $0xc8] sm:$0xff] (!%p168_p2)   ;;  %v3972_v61 = vld [vmem:[%s5636_s1 + $0xd0] sm:$0xff] (!%p168_p2)   ;;  %v3977_v4 = vld [vmem:[%s5636_s1 + $0x18] sm:$0xff] (!%p168_p2)  }
   0xd   : > { %s5759_s16 = smov (!%p199_p3, %s2958_s16), 1  ;;  %3525 = vmatprep.subr.bf16.mxu0 %v4016_v1 }
   0xe   : > { %s3859_s5 = smul.u32 152, %s5759_s16  ;;  %s211_s20 = scalar_lea.vmem %s5638_s3, %s5759_s16 }
   0xf   : > { %3358 = vmatpush3.bf16.msra.mxu1 %v3943_v5  ;;  %s214_s23 = scalar_lea.vmem %s5639_s4, %s5759_s16 }
  0x10   : > { %3526 = vmatpush3.bf16.msra.mxu0 %v3944_v6  ;;  %3359 = vmatprep.subr.bf16.mxu1 %v4016_v1  ;;  %s4096_s12 = scalar_lea.vmem %s5635_s0, %s3859_s5  ;;  %v3978_v6 = vld [vmem:[%s5636_s1 + $0xd8] sm:$0xff]  }
  0x11   : > { %3527 = vmatprep.subr.bf16.mxu0 %v4016_v1  ;;  %v4107_v12 = vld [vmem:[%s4096_s12] sm:$0xff]   ;;  %v4110_v13 = vld [vmem:[%s4096_s12 + $0x8] sm:$0xff]   ;;  %v4123_v19 = vld [vmem:[%s4096_s12 + $0x10] sm:$0xff]  }
  0x12   : > { %v981_v14 = vld [vmem:[%s4096_s12 + $0x8] sm:$0xf]  ;;  %v4114_v15 = vld [vmem:[%s4096_s12 + $0xc] sm:$0xf]  ;;  %v376_v17 = vshll.u32 %v4107_v12, 16  ;;  %v374_v22 = vshrl.u32 %v4107_v12, 16 }
  0x13   : > { %3360 = vmatpush3.bf16.msra.mxu1 %v3945_v7  ;;  %v3031_v18 = vcombine.low %v981_v14, %v4114_v15  ;;  %v381_v23 = vshll.u32 %v4110_v13, 16  ;;  %v1129_v28 = vshll.u32 %v4123_v19, 16  ;;  %v4144_v33 = vld [vmem:[%s4096_s12 + $0x10] sm:$0xff]   ;;  %v4148_v36 = vld [vmem:[%s4096_s12 + $0x18] sm:$0xff]   ;;  %v385_v39 = vshrl.u32 %v4110_v13, 16  ;;  %v4169_v48 = vld [vmem:[%s4096_s12 + $0x20] sm:$0xff]  }
  0x14   : > { %3528 = vmatpush3.bf16.msra.mxu0 %v3946_v8  ;;  %3361 = vmatprep.subr.bf16.mxu1 %v4016_v1  ;;  %v378_v25 = vrot.slane %v376_v17, 1  ;;  %v389_v40 = vshll.u32 %v4144_v33, 16  ;;  %v1133_v43 = vshrl.u32 %v4123_v19, 16  ;;  %v1137_v44 = vshll.u32 %v4148_v36, 16  ;;  %v4166_v45 = vld [vmem:[%s4096_s12 + $0x18] sm:$0xff]   ;;  %v4188_v57 = vld [vmem:[%s4096_s12 + $0x20] sm:$0xff]  }
  0x15   : > { %3529 = vmatprep.subr.bf16.mxu0 %v4016_v1  ;;  %v1124_v24 = vshll.u32 %v3031_v18, 16  ;;  %v1122_v26 = vshrl.u32 %v3031_v18, 16  ;;  %v383_v32 = vrot.slane %v381_v23, 1  ;;  %v1131_v35 = vrot.slane %v1129_v28, 1  ;;  %v4203_v0 = vld [vmem:[%s4096_s12 + $0x28] sm:$0xff]  }
  0x16   : > { %v379_v31 = vor.u32 %v378_v25, %v374_v22  ;;  %v391_v47 = vrot.slane %v389_v40, 1  ;;  %v1139_v51 = vrot.slane %v1137_v44, 1  ;;  %v393_v54 = vshrl.u32 %v4144_v33, 16  ;;  %v4218_v8 = vld [vmem:[%s4096_s12 + $0x48] sm:$0xff]   ;;  %v3983_v22 = vld [vmem:[%s5636_s1 + $0x20] sm:$0xff]  }
  0x17   : > { %3362 = vmatpush3.bf16.msra.mxu1 %v3947_v9  ;;  %v1126_v27 = vrot.slane %v1124_v24, 1  ;;  %v387_v46 = vor.u32 %v385_v39, %v383_v32  ;;  %v1135_v50 = vor.u32 %v1133_v43, %v1131_v35  ;;  %v397_v55 = vshll.u32 %v4166_v45, 16  ;;  %v4237_v24 = vld [vmem:[%s4096_s12 + $0x30] sm:$0xff]  }
  0x18   : > { %3530 = vmatpush3.bf16.msra.mxu0 %v3948_v10  ;;  %3363 = vmatprep.subr.bf16.mxu1 %v4016_v1  ;;  %v384_v38 = vsel %vm372_vm1, %v379_v31, %v383_v32  ;;  %v1141_v56 = vshrl.u32 %v4148_v36, 16  ;;  %v1145_v59 = vshll.u32 %v4169_v48, 16  ;;  %v395_v62 = vor.u32 %v393_v54, %v391_v47 }
  0x19   : > { %3531 = vmatprep.subr.bf16.mxu0 %v4016_v1  ;;  %v1127_v34 = vor.u32 %v1126_v27, %v1122_v26  ;;  %v392_v53 = vsel %vm372_vm1, %v387_v46, %v391_v47  ;;  %v1140_v58 = vsel %vm372_vm1, %v1135_v50, %v1139_v51  ;;  %v399_v63 = vrot.slane %v397_v55, 1  ;;  %v3984_v27 = vld [vmem:[%s5636_s1 + $0xe0] sm:$0xff]  }
  0x1a   : > { %v1143_v2 = vor.u32 %v1141_v56, %v1139_v51  ;;  %v1147_v3 = vrot.slane %v1145_v59, 1  ;;  %v405_v5 = vshll.u32 %v4188_v57, 16  ;;  %v401_v7 = vshrl.u32 %v4166_v45, 16  ;;  %v4268_v46 = vld [vmem:[%s4096_s12 + $0x60] sm:$0xff]   ;;  %v4281_v56 = vld [vmem:[%s4096_s12 + $0x30] sm:$0xff]  }
  0x1b   : > { %3364 = vmatpush3.bf16.msra.mxu1 %v3949_v11  ;;  %v1132_v41 = vsel %vm372_vm1, %v1127_v34, %v1131_v35  ;;  %v400_v9 = vsel %vm372_vm1, %v395_v62, %v399_v63  ;;  %v1149_v10 = vshrl.u32 %v4169_v48, 16  ;;  %v4223_v11 = vld [vmem:[%s4096_s12 + $0x28] sm:$0xff]   ;;  %v1185_v17 = vshll.u32 %v4218_v8, 16  ;;  %v4253_v34 = vld [vmem:[%s4096_s12 + $0x58] sm:$0xff]  }
  0x1c   : > { %3532 = vmatpush3.bf16.msra.mxu0 %v3950_v16  ;;  %3365 = vmatprep.subr.bf16.mxu1 %v4016_v1  ;;  %v1148_v14 = vsel %vm372_vm1, %v1143_v2, %v1147_v3  ;;  %v1153_v16 = vshll.u32 %v4203_v0, 16  ;;  %v407_v18 = vrot.slane %v405_v5, 1  ;;  %v403_v23 = vor.u32 %v401_v7, %v399_v63  ;;  %v4292_v63 = vld [vmem:[%s4096_s12 + $0x68] sm:$0xff]  }
  0x1d   : > { %3533 = vmatprep.subr.bf16.mxu0 %v4016_v1  ;;  %v4239_v25 = vrot.slane %v1185_v17, 1  ;;  %v1151_v28 = vor.u32 %v1149_v10, %v1147_v3  ;;  %v413_v31 = vshll.u32 %v4223_v11, 16  ;;  %v1161_v39 = vshll.u32 %v4237_v24, 16 }
  0x1e   : > { %v1157_v44 = vshrl.u32 %v4203_v0, 16  ;;  %v1205_v47 = vshrl.u32 %v4253_v34, 16  ;;  %v1213_v2 = vshrl.u32 %v4268_v46, 16  ;;  %v417_v3 = vshrl.u32 %v4223_v11, 16 }
  0x1f   : > { %3366 = vmatpush3.bf16.msra.mxu1 %v3951_v20  ;;  %v4229_v20 = vld [vmem:[%s4096_s12 + $0x50] sm:$0xff]   ;;  %v415_v50 = vrot.slane %v413_v31, 1  ;;  %v1163_v55 = vrot.slane %v1161_v39, 1  ;;  %v1165_v10 = vshrl.u32 %v4237_v24, 16  ;;  %v425_v31 = vshrl.u32 %v4281_v56, 16 }
  0x20   : > { %3534 = vmatpush3.bf16.msra.mxu0 %v3952_v21  ;;  %3367 = vmatprep.subr.bf16.mxu1 %v4016_v1  ;;  %v1189_v21 = vshrl.u32 %v4218_v8, 16  ;;  %v1193_v26 = vshll.u32 %v4229_v20, 16  ;;  %v1197_v35 = vshrl.u32 %v4229_v20, 16 }
  0x21   : > { %3535 = vmatprep.subr.bf16.mxu0 %v4016_v1 }
  0x22   : > { %v1195_v32 = vrot.slane %v1193_v26, 1  ;;  %v419_v26 = vor.u32 %v417_v3, %v415_v50  ;;  %v1529_v3 = vld [vmem:[%s4096_s12 + $0x8] sm:$0xe] }
  0x23   : > { %3368 = vmatpush3.bf16.msra.mxu1 %v3953_v29  ;;  %v1155_v29 = vrot.slane %v1153_v16, 1  ;;  %v3995_v16 = vld [vmem:[%s5636_s1 + $0x30] sm:$0xff]  }
  0x24   : > { %3536 = vmatpush3.bf16.msra.mxu0 %v3954_v30  ;;  %3437 = vmatprep.subr.bf16.mxu1 %v4016_v1  ;;  %v1191_v30 = vor.u32 %v1189_v21, %v4239_v25 }
  0x25   : > { %3605 = vmatprep.subr.bf16.mxu0 %v4016_v1  ;;  %v1156_v43 = vsel %vm372_vm1, %v1151_v28, %v1155_v29  ;;  %v4326_v28 = vld [vmem:[%s4096_s12 + $0x40] sm:$0xff]  }
  0x26   : > { %3370 = vmatmul.mubr.bf16.vlgmr.msra.gmra.mrb[0].mxu1 %v384_v38  ;;  %v409_v38 = vshrl.u32 %v4188_v57, 16  ;;  %v4262_v40 = vsel %vm372_vm1, %v1191_v30, %v1195_v32  ;;  %v1177_v39 = vshll.u32 %v4326_v28, 16 }
  0x27   : > { %3538 = vmatmul.mubr.bf16.vlgmr.msra.gmra.mrb[0].mxu0 %v1132_v41  ;;  %3438 = vmatpush3.bf16.msra.mxu1 %v3959_v37  ;;  %v408_v37 = vsel %vm372_vm1, %v403_v23, %v407_v18  ;;  %v1199_v41 = vor.u32 %v1197_v35, %v1195_v32  ;;  %v4334_v35 = vld [vmem:[%s4096_s12 + $0x80] sm:$0xff]  }
  0x28   : > { %3606 = vmatpush3.bf16.msra.mxu0 %v3960_v42  ;;  %3373 = vmatprep.mubr.msk.bf16.mxu1 %vm4017_vm0, %v4016_v1  ;;  %v1201_v42 = vshll.u32 %v4253_v34, 16  ;;  %v411_v54 = vor.u32 %v409_v38, %v407_v18 }
  0x29   : > { %3541 = vmatprep.mubr.msk.bf16.mxu0 %vm4017_vm0, %v4016_v1  ;;  %3439 = vmatprep.subr.bf16.mxu1 %v4016_v1 }
  0x2a   : > { %3607 = vmatprep.subr.bf16.mxu0 %v4016_v1  ;;  %v1203_v51 = vrot.slane %v1201_v42, 1  ;;  %v416_v7 = vsel %vm372_vm1, %v411_v54, %v415_v50  ;;  %v505_v54 = vshrl.u32 %v4334_v35, 16 }
  0x2b   : > { %3440 = vmatpush3.bf16.msra.mxu1 %v3965_v49  ;;  %v3989_v49 = vld [vmem:[%s5636_s1 + $0x28] sm:$0xff]  }
  0x2c   : > { %3608 = vmatpush3.bf16.msra.mxu0 %v3966_v52  ;;  %3441 = vmatprep.subr.bf16.mxu1 %v4016_v1  ;;  %v1209_v52 = vshll.u32 %v4268_v46, 16  ;;  %v1207_v59 = vor.u32 %v1205_v47, %v1203_v51 }
  0x2d   : > { %3609 = vmatprep.subr.bf16.mxu0 %v4016_v1 }
  0x2e   : > { %3374 = vmatmul.mubr.bf16.gmra.mrb[4].mxu1 %v392_v53  ;;  %v3990_v53 = vld [vmem:[%s5636_s1 + $0xe8] sm:$0xff]   ;;  %v1211_v62 = vrot.slane %v1209_v52, 1 }
  0x2f   : > { %3542 = vmatmul.mubr.bf16.gmra.mrb[4].mxu0 %v1140_v58  ;;  %3377 = vmatprep.mubr.msk.bf16.mxu1 %vm4017_vm0, %v4016_v1  ;;  %v4284_v58 = vsel %vm372_vm1, %v1199_v41, %v1203_v51  ;;  %v4002_v41 = vld [vmem:[%s5636_s1 + $0x38] sm:$0xff]   ;;  %v1179_v51 = vrot.slane %v1177_v39, 1 }
  0x30   : > { %3545 = vmatprep.mubr.msk.bf16.mxu0 %vm4017_vm0, %v4016_v1  ;;  %3442 = vmatpush3.bf16.msra.mxu1 %v3971_v60  ;;  %v1159_v60 = vor.u32 %v1157_v44, %v1155_v29  ;;  %v1215_v5 = vor.u32 %v1213_v2, %v1211_v62  ;;  %v1167_v29 = vor.u32 %v1165_v10, %v1163_v55 }
  0x31   : > { %3610 = vmatpush3.bf16.msra.mxu0 %v3972_v61  ;;  %3443 = vmatprep.subr.bf16.mxu1 %v4016_v1  ;;  %v4289_v61 = vld [vmem:[%s4096_s12 + $0x38] sm:$0xff]  }
  0x32   : > { %3611 = vmatprep.subr.bf16.mxu0 %v4016_v1  ;;  %v1164_v17 = vsel %vm372_vm1, %v1159_v60, %v1163_v55  ;;  %v1169_v18 = vshll.u32 %v4289_v61, 16  ;;  %v1173_v38 = vshrl.u32 %v4289_v61, 16  ;;  %v4005_v55 = vld [vmem:[%s4096_s12 + $0x88] ss:$0 sps:$4 sm:$0x11]  }
  0x34   : > { %3444 = vmatpush3.bf16.msra.mxu1 %v3977_v4  ;;  %v4298_v4 = vsel %vm372_vm1, %v1207_v59, %v1211_v62  ;;  %v1171_v30 = vrot.slane %v1169_v18, 1  ;;  %v1181_v62 = vshrl.u32 %v4326_v28, 16 }
  0x35   : > { %3612 = vmatpush3.bf16.msra.mxu0 %v3978_v6  ;;  %3445 = vmatprep.subr.bf16.mxu1 %v4016_v1  ;;  %v1217_v6 = vshll.u32 %v4292_v63, 16 }
  0x36   : > { %3378 = vmatmul.mubr.bf16.gmra.mrb[8].mxu1 %v400_v9  ;;  %3613 = vmatprep.subr.bf16.mxu0 %v4016_v1  ;;  %v421_v9 = vshll.u32 %v4281_v56, 16  ;;  %v1172_v42 = vsel %vm372_vm1, %v1167_v29, %v1171_v30  ;;  %v1175_v50 = vor.u32 %v1173_v38, %v1171_v30 }
  0x37   : > { %3546 = vmatmul.mubr.bf16.gmra.mrb[8].mxu0 %v1148_v14  ;;  %3381 = vmatprep.mubr.msk.bf16.mxu1 %vm4017_vm0, %v4016_v1  ;;  %v4306_v14 = vld [vmem:[%s4096_s12 + $0x38] sm:$0xff]   ;;  %v4313_v21 = vrot.slane %v1217_v6, 1  ;;  %v3073_v6 = vcombine.low %v1529_v3, %v4114_v15 }
  0x38   : > { %3549 = vmatprep.mubr.msk.bf16.mxu0 %vm4017_vm0, %v4016_v1  ;;  %3446 = vmatpush3.bf16.msra.mxu1 %v3983_v22  ;;  %v3996_v22 = vld [vmem:[%s5636_s1 + $0xf0] sm:$0xff]   ;;  %v429_v32 = vshll.u32 %v4306_v14, 16  ;;  %v433_v60 = vshrl.u32 %v4306_v14, 16  ;;  %v1180_v10 = vsel %vm372_vm1, %v1175_v50, %v1179_v51 }
  0x39   : > { %3614 = vmatpush3.bf16.msra.mxu0 %v3984_v27  ;;  %3447 = vmatprep.subr.bf16.mxu1 %v4016_v1  ;;  %v4320_v23 = vsel %vm372_vm1, %v1215_v5, %v4313_v21  ;;  %v423_v27 = vrot.slane %v421_v9, 1  ;;  %v509_v5 = vshll.u32 %v4005_v55, 16  ;;  %v1554_v9 = vrot.slane %v4148_v36, 1 }
  0x3a   : > { %3615 = vmatprep.subr.bf16.mxu0 %v4016_v1  ;;  %v431_v47 = vrot.slane %v429_v32, 1  ;;  %v1562_v36 = vrot.slane %v4289_v61, 1  ;;  %v4390_v32 = vld [vmem:[%s4096_s12 + $0x48] sm:$0xff]  }
  0x3b   : > { %v427_v44 = vor.u32 %v425_v31, %v423_v27  ;;  %v511_v18 = vrot.slane %v509_v5, 1  ;;  %v1568_v5 = vrot.slane %v4229_v20, 1 }
  0x3c   : > { %3448 = vmatpush3.bf16.msra.mxu1 %v3989_v49  ;;  %v4345_v49 = vld [vmem:[%s4096_s12 + $0x40] sm:$0xff]  }
  0x3d   : > { %3616 = vmatpush3.bf16.msra.mxu0 %v3990_v53  ;;  %3449 = vmatprep.subr.bf16.mxu1 %v4016_v1  ;;  %v4004_v53 = vld [vmem:[%s5636_s1 + $0xf8] sm:$0xff]   ;;  %v432_v59 = vsel %vm372_vm1, %v427_v44, %v431_v47  ;;  %v441_v39 = vshrl.u32 %v4345_v49, 16 }
  0x3e   : > { %3382 = vmatmul.mubr.bf16.gmra.mrb[12].mxu1 %v408_v37  ;;  %3617 = vmatprep.subr.bf16.mxu0 %v4016_v1  ;;  %v424_v37 = vsel %vm372_vm1, %v419_v26, %v423_v27  ;;  %v1558_v27 = vrot.slane %v4203_v0, 1  ;;  %v435_v0 = vor.u32 %v433_v60, %v431_v47 }
  0x3f   : > { %3550 = vmatmul.mubr.bf16.gmra.mrb[12].mxu0 %v1156_v43  ;;  %3385 = vmatprep.mubr.msk.bf16.mxu1 %vm4017_vm0, %v4016_v1  ;;  %v501_v43 = vshll.u32 %v4334_v35, 16 }
  0x40   : > { %3553 = vmatprep.mubr.msk.bf16.mxu0 %vm4017_vm0, %v4016_v1  ;;  %3450 = vmatpush3.bf16.msra.mxu1 %v3995_v16  ;;  %v437_v16 = vshll.u32 %v4345_v49, 16 }
  0x41   : > { %3451 = vmatprep.subr.bf16.mxu1 %v4016_v1  ;;  %3618 = vmatpush3.bf16.msra.mxu0 %v3996_v22  ;;  %v4349_v52 = vrot.slane %v501_v43, 1  ;;  %v1551_v22 = vrot.slane %v3073_v6, 1  ;;  %v1564_v43 = vrot.slane %v4326_v28, 1  ;;  %v449_v28 = vshrl.u32 %v4390_v32, 16 }
  0x42   : > { %3619 = vmatprep.subr.bf16.mxu0 %v4016_v1  ;;  %v439_v31 = vrot.slane %v437_v16, 1 }
  0x43   : > { %v507_v2 = vor.u32 %v505_v54, %v4349_v52  ;;  %v4407_v44 = vsel %vm1550_vm2, %v1562_v36, %v1564_v43  ;;  %v1566_v54 = vrot.slane %v4218_v8, 1 }
  0x44   : > { %3452 = vmatpush3.bf16.msra.mxu1 %v4002_v41  ;;  %v440_v38 = vsel %vm372_vm1, %v435_v0, %v439_v31  ;;  %v445_v41 = vshll.u32 %v4390_v32, 16  ;;  %v443_v47 = vor.u32 %v441_v39, %v439_v31  ;;  %v1221_v0 = vshrl.u32 %v4292_v63, 16 }
  0x45   : > { %3620 = vmatpush3.bf16.msra.mxu0 %v4004_v53  ;;  %v4379_v29 = vsel %vm372_vm1, %v507_v2, %v511_v18  ;;  %v4421_v55 = vsel %vm1550_vm2, %v1564_v43, %v1566_v54 }
  0x46   : > { %3386 = vmatmul.mubr.bf16.gmra.mrb[16].mxu1 %v416_v7  ;;  %v1552_v7 = vrot.slane %v4123_v19, 1  ;;  %v1560_v19 = vrot.slane %v4237_v24, 1  ;;  %v447_v50 = vrot.slane %v445_v41, 1  ;;  %v1223_v43 = vor.u32 %v1221_v0, %v4313_v21 }
  0x47   : > { %3554 = vmatmul.mubr.bf16.gmra.mrb[16].mxu0 %v1164_v17  ;;  %3389 = vmatprep.mubr.msk.bf16.mxu1 %vm4017_vm0, %v4016_v1  ;;  %v1556_v17 = vrot.slane %v4169_v48, 1 }
  0x48   : > { %3557 = vmatprep.mubr.msk.bf16.mxu0 %vm4017_vm0, %v4016_v1  ;;  %v4370_v26 = vsel %vm1550_vm2, %v1552_v7, %v1554_v9  ;;  %v4382_v48 = vsel %vm1550_vm2, %v1551_v22, %v1552_v7  ;;  %v4393_v24 = vsel %vm1550_vm2, %v1558_v27, %v1560_v19  ;;  %v4396_v61 = vsel %vm1550_vm2, %v1560_v19, %v1562_v36  ;;  %v4462_v19 = vld [vmem:[%s4096_s12 + $0x70] sm:$0xff]  }
  0x49   : > { %v4374_v15 = vsel %vm1550_vm2, %v1554_v9, %v1556_v17  ;;  %v4385_v30 = vsel %vm1550_vm2, %v1556_v17, %v1558_v27  ;;  %v4442_v9 = vld [vmem:[%s4096_s12 + $0x60] sm:$0xff]   ;;  %v4457_v27 = vld [vmem:[%s4096_s12 + $0x68] sm:$0xff]   ;;  %v1225_v31 = vshll.u32 %v4462_v19, 16 }
  0x4a   : > { %v469_v16 = vshll.u32 %v4442_v9, 16  ;;  %v473_v36 = vshrl.u32 %v4442_v9, 16 }
  0x4c   : > { %v471_v22 = vrot.slane %v469_v16, 1 }
  0x4e   : > { %3390 = vmatmul.mubr.bf16.gmra.mrb[20].mxu1 %v424_v37  ;;  %v1183_v37 = vor.u32 %v1181_v62, %v1179_v51  ;;  %v4412_v51 = vld [vmem:[%s4096_s12 + $0x50] sm:$0xff]   ;;  %v4427_v62 = vld [vmem:[%s4096_s12 + $0x58] sm:$0xff]   ;;  %v475_v39 = vor.u32 %v473_v36, %v471_v22 }
  0x4f   : > { %3558 = vmatmul.mubr.bf16.gmra.mrb[20].mxu0 %v1172_v42  ;;  %3393 = vmatprep.mubr.msk.bf16.mxu1 %vm4017_vm0, %v4016_v1  ;;  %v453_v53 = vshll.u32 %v4412_v51, 16  ;;  %v457_v8 = vshrl.u32 %v4412_v51, 16  ;;  %v461_v3 = vshll.u32 %v4427_v62, 16 }
  0x50   : > { %3561 = vmatprep.mubr.msk.bf16.mxu0 %vm4017_vm0, %v4016_v1  ;;  %v1188_v42 = vsel %vm372_vm1, %v1183_v37, %v4239_v25  ;;  %v448_v25 = vsel %vm372_vm1, %v443_v47, %v447_v50  ;;  %v1572_v37 = vrot.slane %v4268_v46, 1  ;;  %v1227_v47 = vrot.slane %v1225_v31, 1 }
  0x51   : > { %v455_v60 = vrot.slane %v453_v53, 1  ;;  %v463_v7 = vrot.slane %v461_v3, 1 }
  0x52   : > { %v1228_v53 = vsel %vm372_vm1, %v1223_v43, %v1227_v47 }
  0x53   : > { %v459_v6 = vor.u32 %v457_v8, %v455_v60 }
  0x55   : > { %v464_v20 = vsel %vm372_vm1, %v459_v6, %v463_v7 }
  0x56   : > { %3394 = vmatmul.mubr.bf16.gmra.mrb[24].mxu1 %v432_v59  ;;  %v451_v59 = vor.u32 %v449_v28, %v447_v50  ;;  %v4485_v50 = vld [vmem:[%s4096_s12 + $0x78] sm:$0xff]  }
  0x57   : > { %3562 = vmatmul.mubr.bf16.gmra.mrb[24].mxu0 %v1180_v10  ;;  %3397 = vmatprep.mubr.msk.bf16.mxu1 %vm4017_vm0, %v4016_v1  ;;  %v465_v10 = vshrl.u32 %v4427_v62, 16  ;;  %v1237_v16 = vshrl.u32 %v4485_v50, 16 }
  0x58   : > { %3565 = vmatprep.mubr.msk.bf16.mxu0 %vm4017_vm0, %v4016_v1  ;;  %v456_v2 = vsel %vm372_vm1, %v451_v59, %v455_v60  ;;  %v1233_v59 = vshll.u32 %v4485_v50, 16 }
  0x59   : > { %v467_v18 = vor.u32 %v465_v10, %v463_v7 }
  0x5a   : > { %v1235_v3 = vrot.slane %v1233_v59, 1 }
  0x5e   : > { %3398 = vmatmul.mubr.bf16.gmra.mrb[28].mxu1 %v440_v38 }
  0x5f   : > { %3566 = vmatmul.mubr.bf16.gmra.mrb[28].mxu0 %v1188_v42  ;;  %3401 = vmatprep.mubr.msk.bf16.mxu1 %vm4017_vm0, %v4016_v1  ;;  %v4479_v42 = vld [vmem:[%s4096_s12 + $0x70] sm:$0xff]  }
  0x60   : > { %3569 = vmatprep.mubr.msk.bf16.mxu0 %vm4017_vm0, %v4016_v1  ;;  %v485_v28 = vshll.u32 %v4479_v42, 16  ;;  %v489_v7 = vshrl.u32 %v4479_v42, 16 }
  0x62   : > { %v487_v60 = vrot.slane %v485_v28, 1  ;;  %v4526_v28 = vld [vmem:[%s4096_s12 + $0x90] ss:$0 sps:$4 sm:$0x11]  }
  0x66   : > { %3402 = vmatmul.mubr.bf16.gmra.mrb[32].mxu1 %v448_v25 }
  0x67   : > { %3570 = vmatmul.mubr.bf16.gmra.mrb[32].mxu0 %v4262_v40  ;;  %3405 = vmatprep.mubr.msk.bf16.mxu1 %vm4017_vm0, %v4016_v1  ;;  %v4436_v40 = vsel %vm1550_vm2, %v1566_v54, %v1568_v5  ;;  %v1229_v54 = vshrl.u32 %v4462_v19, 16 }
  0x68   : > { %3573 = vmatprep.mubr.msk.bf16.mxu0 %vm4017_vm0, %v4016_v1 }
  0x69   : > { %v1231_v8 = vor.u32 %v1229_v54, %v1227_v47 }
  0x6b   : > { %v1236_v10 = vsel %vm372_vm1, %v1231_v8, %v1235_v3 }
  0x6e   : > { %3406 = vmatmul.mubr.bf16.gmra.mrb[36].mxu1 %v456_v2  ;;  %v4496_v2 = vld [vmem:[%s4096_s12 + $0x78] sm:$0xff]  }
  0x6f   : > { %3574 = vmatmul.mubr.bf16.gmra.mrb[36].mxu0 %v4284_v58  ;;  %3409 = vmatprep.mubr.msk.bf16.mxu1 %vm4017_vm0, %v4016_v1  ;;  %v1570_v58 = vrot.slane %v4253_v34, 1  ;;  %v472_v34 = vsel %vm372_vm1, %v467_v18, %v471_v22  ;;  %v491_v18 = vor.u32 %v489_v7, %v487_v60  ;;  %v497_v31 = vshrl.u32 %v4496_v2, 16 }
  0x70   : > { %3577 = vmatprep.mubr.msk.bf16.mxu0 %vm4017_vm0, %v4016_v1 }
  0x71   : > { %v4451_v17 = vsel %vm1550_vm2, %v1568_v5, %v1570_v58  ;;  %v4473_v38 = vsel %vm1550_vm2, %v1570_v58, %v1572_v37  ;;  %v4501_v5 = vld [vmem:[%s4096_s12 + $0x80] sm:$0xff]  }
  0x72   : > { %v1241_v58 = vshll.u32 %v4501_v5, 16  ;;  %v1580_v46 = vrot.slane %v4501_v5, 1 }
  0x74   : > { %v1243_v36 = vrot.slane %v1241_v58, 1 }
  0x76   : > { %3410 = vmatmul.mubr.bf16.gmra.mrb[40].mxu1 %v464_v20  ;;  %v493_v20 = vshll.u32 %v4496_v2, 16 }
  0x77   : > { %3578 = vmatmul.mubr.bf16.gmra.mrb[40].mxu0 %v4298_v4  ;;  %3413 = vmatprep.mubr.msk.bf16.mxu1 %vm4017_vm0, %v4016_v1  ;;  %v477_v4 = vshll.u32 %v4457_v27, 16 }
  0x78   : > { %3581 = vmatprep.mubr.msk.bf16.mxu0 %vm4017_vm0, %v4016_v1  ;;  %v495_v22 = vrot.slane %v493_v20, 1 }
  0x79   : > { %v479_v41 = vrot.slane %v477_v4, 1  ;;  %v4514_v4 = vld [vmem:[%s4096_s12 + $0x88] sm:$0xff]   ;;  %s3860_s12 = smul.u32 136, %s5759_s16 }
  0x7a   : > { %v496_v0 = vsel %vm372_vm1, %v491_v18, %v495_v22  ;;  %v1249_v43 = vshll.u32 %v4514_v4, 16  ;;  %v499_v47 = vor.u32 %v497_v31, %v495_v22  ;;  %v1253_v59 = vshrl.u32 %v4514_v4, 16 }
  0x7b   : > { %v480_v25 = vsel %vm372_vm1, %v475_v39, %v479_v41  ;;  %s4802_s17 = scalar_lea.vmem %s5637_s2, %s3860_s12 }
  0x7e   : > { %3414 = vmatmul.mubr.bf16.gmra.mrb[44].mxu1 %v472_v34  ;;  %v1239_v34 = vor.u32 %v1237_v16, %v1235_v3 }
  0x7f   : > { %3582 = vmatmul.mubr.bf16.gmra.mrb[44].mxu0 %v4320_v23  ;;  %3417 = vmatprep.mubr.msk.bf16.mxu1 %vm4017_vm0, %v4016_v1  ;;  %v481_v23 = vshrl.u32 %v4457_v27, 16 }
  0x80   : > { %3585 = vmatprep.mubr.msk.bf16.mxu0 %vm4017_vm0, %v4016_v1  ;;  %v1244_v39 = vsel %vm372_vm1, %v1239_v34, %v1243_v36 }
  0x81   : > { %v483_v21 = vor.u32 %v481_v23, %v479_v41  ;;  %v1245_v41 = vshrl.u32 %v4501_v5, 16  ;;  %v1251_v23 = vrot.slane %v1249_v43, 1 }
  0x83   : > { %v488_v6 = vsel %vm372_vm1, %v483_v21, %v487_v60  ;;  %v1257_v21 = vshll.u32 %v4526_v28, 16  ;;  %v1255_v60 = vor.u32 %v1253_v59, %v1251_v23 }
  0x85   : > { %v1259_v8 = vrot.slane %v1257_v21, 1 }
  0x86   : > { %3418 = vmatmul.mubr.bf16.gmra.mrb[48].mxu1 %v480_v25  ;;  %v1247_v25 = vor.u32 %v1245_v41, %v1243_v36 }
  0x87   : > { %3586 = vmatmul.mubr.bf16.gmra.mrb[48].mxu0 %v1228_v53  ;;  %3421 = vmatprep.mubr.msk.bf16.mxu1 %vm4017_vm0, %v4016_v1  ;;  %v504_v53 = vsel %vm372_vm1, %v499_v47, %v4349_v52  ;;  %v1260_v3 = vsel %vm372_vm1, %v1255_v60, %v1259_v8 }
  0x88   : > { %3589 = vmatprep.mubr.msk.bf16.mxu0 %vm4017_vm0, %v4016_v1  ;;  %v1252_v54 = vsel %vm372_vm1, %v1247_v25, %v1251_v23 }
  0x8e   : > { %3422 = vmatmul.mubr.bf16.gmra.mrb[52].mxu1 %v488_v6 }
  0x8f   : > { %3590 = vmatmul.mubr.bf16.gmra.mrb[52].mxu0 %v1236_v10  ;;  %3425 = vmatprep.mubr.msk.bf16.mxu1 %vm4017_vm0, %v4016_v1 }
  0x90   : > { %3593 = vmatprep.mubr.msk.bf16.mxu0 %vm4017_vm0, %v4016_v1 }
  0x96   : > { %3426 = vmatmul.mubr.bf16.gmra.mrb[56].mxu1 %v496_v0 }
  0x97   : > { %3594 = vmatmul.mubr.bf16.gmra.mrb[56].mxu0 %v1244_v39  ;;  %3429 = vmatprep.mubr.msk.bf16.mxu1 %vm4017_vm0, %v4016_v1 }
  0x98   : > { %3597 = vmatprep.mubr.msk.bf16.mxu0 %vm4017_vm0, %v4016_v1 }
  0x9e   : > { %3430 = vmatmul.mubr.bf16.gmra.mrb[60].mxu1 %v504_v53 }
  0x9f   : > { %3598 = vmatmul.mubr.bf16.gmra.mrb[60].mxu0 %v1252_v54  ;;  %3433 = vmatprep.mubr.msk.bf16.mxu1 %vm4017_vm0, %v4016_v1 }
  0xa0   : > { %3601 = vmatprep.mubr.msk.bf16.mxu0 %vm4017_vm0, %v4016_v1 }
  0xa6   : > { %3434 = vmatmul.mubr.bf16.gmra.mrb[64].mxu1 %v4379_v29 }
  0xa7   : > { %3602 = vmatmul.mubr.bf16.gmra.mrb[64].mxu0 %v1260_v3  ;;  %3453 = vmatprep.mubr.msk.bf16.mxu1 %vm4017_vm0, %v4016_v1 }
  0xa8   : > { %3621 = vmatprep.mubr.msk.bf16.mxu0 %vm4017_vm0, %v4016_v1 }
  0xae   : > { %3454 = vmatmul.mubr.bf16.vlgmr.msra.gmra.mrb[0].mxu1 %v4107_v12  ;;  %v1574_v12 = vrot.slane %v4292_v63, 1  ;;  %v1582_v63 = vrot.slane %v4514_v4, 1 }
  0xaf   : > { %3622 = vmatmul.mubr.bf16.vlgmr.msra.gmra.mrb[0].mxu0 %v4382_v48  ;;  %3457 = vmatprep.mubr.msk.bf16.mxu1 %vm4017_vm0, %v4016_v1 }
  0xb0   : > { %3625 = vmatprep.mubr.msk.bf16.mxu0 %vm4017_vm0, %v4016_v1 }
  0xb6   : > { %3458 = vmatmul.mubr.bf16.gmra.mrb[4].mxu1 %v4110_v13  ;;  %v1575_v13 = vsel %vm1550_vm2, %v1572_v37, %v1574_v12 }
  0xb7   : > { %3626 = vmatmul.mubr.bf16.gmra.mrb[4].mxu0 %v4370_v26  ;;  %3461 = vmatprep.mubr.msk.bf16.mxu1 %vm4017_vm0, %v4016_v1  ;;  %v2024_v26 = vlaneseq }
  0xb8   : > { %3629 = vmatprep.mubr.msk.bf16.mxu0 %vm4017_vm0, %v4016_v1 }
  0xbe   : > { %3462 = vmatmul.mubr.bf16.gmra.mrb[8].mxu1 %v4144_v33  ;;  %v1576_v33 = vrot.slane %v4462_v19, 1 }
  0xbf   : > { %3630 = vmatmul.mubr.bf16.gmra.mrb[8].mxu0 %v4374_v15  ;;  %3465 = vmatprep.mubr.msk.bf16.mxu1 %vm4017_vm0, %v4016_v1  ;;  %v4649_v15 = vshrl.u32 %v2024_v26, 7 }
  0xc0   : > { %3633 = vmatprep.mubr.msk.bf16.mxu0 %vm4017_vm0, %v4016_v1 }
  0xc1   : > { %v2026_v29 = vadd.s32 8, %v4649_v15  ;;  %v4680_v6 = vadd.s32 48, %v4649_v15  ;;  %v4684_v16 = vadd.s32 56, %v4649_v15  ;;  %v4691_v34 = vadd.s32 64, %v4649_v15 }
  0xc2   : > { %v4720_v21 = vadd.s32 72, %v4649_v15  ;;  %v4752_v26 = vadd.s32 80, %v4649_v15  ;;  %v4848_v59 = vadd.s32 104, %v4649_v15 }
  0xc3   : > { %v4687_v18 = vmul.u32.u64.low 4042322161, %v4680_v6  ;;  %v4688_v22 = vmul.u32.u64.high 4042322161, %v4680_v6, %v4687_v18  ;;  %v4700_v39 = vmul.u32.u64.low 4042322161, %v4684_v16  ;;  %v4701_v41 = vmul.u32.u64.high 4042322161, %v4684_v16, %v4700_v39 }
  0xc4   : > { %v4704_v43 = vmul.u32.u64.low 4042322161, %v4691_v34  ;;  %v4705_v47 = vmul.u32.u64.high 4042322161, %v4691_v34, %v4704_v43  ;;  %v4821_v18 = vadd.s32 96, %v4649_v15 }
  0xc5   : > { %v2131_v60 = vshrl.u32 %v4688_v22, 4 }
  0xc6   : > { %3466 = vmatmul.mubr.bf16.gmra.mrb[12].mxu1 %v4166_v45  ;;  %v1577_v45 = vsel %vm1550_vm2, %v1574_v12, %v1576_v33 }
  0xc7   : > { %3634 = vmatmul.mubr.bf16.gmra.mrb[12].mxu0 %v4385_v30  ;;  %3469 = vmatprep.mubr.msk.bf16.mxu1 %vm4017_vm0, %v4016_v1  ;;  %v4653_v48 = vmul.u32.u64.low 4042322161, %v4649_v15  ;;  %v4654_v30 = vmul.u32.u64.high 4042322161, %v4649_v15, %v4653_v48 }
  0xc8   : > { %3637 = vmatprep.mubr.msk.bf16.mxu0 %vm4017_vm0, %v4016_v1 }
  0xce   : > { %3470 = vmatmul.mubr.bf16.gmra.mrb[16].mxu1 %v4188_v57  ;;  %v1578_v57 = vrot.slane %v4485_v50, 1 }
  0xcf   : > { %3638 = vmatmul.mubr.bf16.gmra.mrb[16].mxu0 %v4393_v24  ;;  %3473 = vmatprep.mubr.msk.bf16.mxu1 %vm4017_vm0, %v4016_v1 }
  0xd0   : > { %3641 = vmatprep.mubr.msk.bf16.mxu0 %vm4017_vm0, %v4016_v1 }
  0xd6   : > { %3474 = vmatmul.mubr.bf16.gmra.mrb[20].mxu1 %v4223_v11  ;;  %v1579_v11 = vsel %vm1550_vm2, %v1576_v33, %v1578_v57 }
  0xd7   : > { %3642 = vmatmul.mubr.bf16.gmra.mrb[20].mxu0 %v4396_v61  ;;  %3477 = vmatprep.mubr.msk.bf16.mxu1 %vm4017_vm0, %v4016_v1  ;;  %v4658_v24 = vmul.u32.u64.low 4042322161, %v2026_v29  ;;  %v4659_v61 = vmul.u32.u64.high 4042322161, %v2026_v29, %v4658_v24 }
  0xd8   : > { %3645 = vmatprep.mubr.msk.bf16.mxu0 %vm4017_vm0, %v4016_v1 }
  0xde   : > { %3478 = vmatmul.mubr.bf16.gmra.mrb[24].mxu1 %v4281_v56  ;;  %v1581_v56 = vsel %vm1550_vm2, %v1578_v57, %v1580_v46 }
  0xdf   : > { %3646 = vmatmul.mubr.bf16.gmra.mrb[24].mxu0 %v4407_v44  ;;  %3481 = vmatprep.mubr.msk.bf16.mxu1 %vm4017_vm0, %v4016_v1 }
  0xe0   : > { %3649 = vmatprep.mubr.msk.bf16.mxu0 %vm4017_vm0, %v4016_v1 }
  0xe6   : > { %3482 = vmatmul.mubr.bf16.gmra.mrb[28].mxu1 %v4306_v14  ;;  %v1583_v14 = vsel %vm1550_vm2, %v1580_v46, %v1582_v63  ;;  %v2142_v46 = vshrl.u32 %v4701_v41, 4 }
  0xe7   : > { %3650 = vmatmul.mubr.bf16.gmra.mrb[28].mxu0 %v4421_v55  ;;  %3485 = vmatprep.mubr.msk.bf16.mxu1 %vm4017_vm0, %v4016_v1 }
  0xe8   : > { %3653 = vmatprep.mubr.msk.bf16.mxu0 %vm4017_vm0, %v4016_v1 }
  0xee   : > { %3486 = vmatmul.mubr.bf16.gmra.mrb[32].mxu1 %v4345_v49  ;;  %v1584_v49 = vrot.slane %v4526_v28, 1 }
  0xef   : > { %3654 = vmatmul.mubr.bf16.gmra.mrb[32].mxu0 %v4436_v40  ;;  %3489 = vmatprep.mubr.msk.bf16.mxu1 %vm4017_vm0, %v4016_v1  ;;  %v2029_v40 = vadd.s32 32, %v4649_v15 }
  0xf0   : > { %3657 = vmatprep.mubr.msk.bf16.mxu0 %vm4017_vm0, %v4016_v1  ;;  %v1585_v52 = vsel %vm1550_vm2, %v1582_v63, %v1584_v49  ;;  %v2132_v49 = vmul.u32 17, %v2131_v60 }
  0xf6   : > { %3490 = vmatmul.mubr.bf16.gmra.mrb[36].mxu1 %v4390_v32  ;;  %v2027_v32 = vadd.s32 16, %v4649_v15 }
  0xf7   : > { %3658 = vmatmul.mubr.bf16.gmra.mrb[36].mxu0 %v4451_v17  ;;  %3493 = vmatprep.mubr.msk.bf16.mxu1 %vm4017_vm0, %v4016_v1  ;;  %v2076_v17 = vshrl.u32 %v4659_v61, 4 }
  0xf8   : > { %3661 = vmatprep.mubr.msk.bf16.mxu0 %vm4017_vm0, %v4016_v1 }
  0xf9   : > { %v2077_v5 = vmul.u32 17, %v2076_v17 }
  0xfb   : > { %v2078_v58 = vsub.s32 %v2026_v29, %v2077_v5 }
  0xfd   : > { %vm2434_vm5 = vcmp.ne.s32.totalorder %v2078_v58, 0  ;;  %vm2468_vm6 = vcmp.lt.s32.totalorder %v2078_v58, 0  ;;  %v2536_v23 = vadd.s32 17, %v2078_v58 }
  0xfe   : > { %3494 = vmatmul.mubr.bf16.gmra.mrb[40].mxu1 %v4412_v51  ;;  %v4661_v44 = vmul.u32.u64.low 4042322161, %v2027_v32  ;;  %v4662_v51 = vmul.u32.u64.high 4042322161, %v2027_v32, %v4661_v44  ;;  %vm4713_vm10 = vmand %vm2468_vm6, %vm2434_vm5 }
  0xff   : > { %3662 = vmatmul.mubr.bf16.gmra.mrb[40].mxu0 %v4473_v38  ;;  %3497 = vmatprep.mubr.msk.bf16.mxu1 %vm4017_vm0, %v4016_v1  ;;  %v4672_v37 = vmul.u32.u64.low 4042322161, %v2029_v40  ;;  %v4673_v38 = vmul.u32.u64.high 4042322161, %v2029_v40, %v4672_v37  ;;  %v2570_v33 = vsel %vm4713_vm10, %v2536_v23, %v2078_v58 }
 0x100   : > { %3665 = vmatprep.mubr.msk.bf16.mxu0 %vm4017_vm0, %v4016_v1  ;;  %v2087_v19 = vshrl.u32 %v4662_v51, 4 }
 0x101   : > { %v2109_v4 = vshrl.u32 %v4673_v38, 4  ;;  %v4782_v37 = vmul.u32.u64.low 4042322161, %v4752_v26  ;;  %v4783_v38 = vmul.u32.u64.high 4042322161, %v4752_v26, %v4782_v37 }
 0x102   : > { %v2088_v20 = vmul.u32 17, %v2087_v19 }
 0x103   : > { %v2110_v53 = vmul.u32 17, %v2109_v4 }
 0x104   : > { %v4693_v36 = vsub.s32 %v2027_v32, %v2088_v20 }
 0x105   : > { %v4737_v57 = vsub.s32 %v2029_v40, %v2110_v53  ;;  %v2143_v40 = vmul.u32 17, %v2142_v46 }
 0x106   : > { %3498 = vmatmul.mubr.bf16.gmra.mrb[44].mxu1 %v4427_v62  ;;  %v2065_v62 = vshrl.u32 %v4654_v30, 4  ;;  %vm2435_vm8 = vcmp.ne.s32.totalorder %v4693_v36, 0  ;;  %vm2469_vm9 = vcmp.lt.s32.totalorder %v4693_v36, 0  ;;  %v2537_v12 = vadd.s32 17, %v4693_v36 }
 0x107   : > { %3666 = vmatmul.mubr.bf16.gmra.mrb[44].mxu0 %v1575_v13  ;;  %3501 = vmatprep.mubr.msk.bf16.mxu1 %vm4017_vm0, %v4016_v1  ;;  %vm4725_vm13 = vmand %vm2469_vm9, %vm2435_vm8  ;;  %vm2437_vm1 = vcmp.ne.s32.totalorder %v4737_v57, 0  ;;  %vm2471_vm2 = vcmp.lt.s32.totalorder %v4737_v57, 0  ;;  %v4771_v44 = vadd.s32 17, %v4737_v57  ;;  %v4826_v4 = vsub.s32 %v4684_v16, %v2143_v40 }
 0x108   : > { %3669 = vmatprep.mubr.msk.bf16.mxu0 %vm4017_vm0, %v4016_v1  ;;  %v2571_v30 = vsel %vm4725_vm13, %v2537_v12, %v4693_v36  ;;  %vm4791_vm5 = vmand %vm2471_vm2, %vm2437_vm1  ;;  %v4891_v40 = vadd.s32 112, %v4649_v15 }
 0x109   : > { %vm4804_vm6 = vcmp.ne.s32.totalorder %v2571_v30, 16  ;;  %v4873_v48 = vmul.u32.u64.low 4042322161, %v4848_v59  ;;  %v4874_v30 = vmul.u32.u64.high 4042322161, %v4848_v59, %v4873_v48 }
 0x10e   : > { %3502 = vmatmul.mubr.bf16.gmra.mrb[48].mxu1 %v4442_v9  ;;  %v2030_v9 = vadd.s32 40, %v4649_v15 }
 0x10f   : > { %3670 = vmatmul.mubr.bf16.gmra.mrb[48].mxu0 %v1577_v45  ;;  %3505 = vmatprep.mubr.msk.bf16.mxu1 %vm4017_vm0, %v4016_v1 }
 0x110   : > { %3673 = vmatprep.mubr.msk.bf16.mxu0 %vm4017_vm0, %v4016_v1 }
 0x116   : > { %3506 = vmatmul.mubr.bf16.gmra.mrb[52].mxu1 %v4457_v27  ;;  %v2066_v27 = vmul.u32 17, %v2065_v62 }
 0x117   : > { %3674 = vmatmul.mubr.bf16.gmra.mrb[52].mxu0 %v1579_v11  ;;  %3509 = vmatprep.mubr.msk.bf16.mxu1 %vm4017_vm0, %v4016_v1 }
 0x118   : > { %3677 = vmatprep.mubr.msk.bf16.mxu0 %vm4017_vm0, %v4016_v1  ;;  %v2067_v7 = vsub.s32 %v4649_v15, %v2066_v27  ;;  %v4779_v27 = vsub.s32 %v4680_v6, %v2132_v49 }
 0x11a   : > { %vm2433_vm3 = vcmp.ne.s32.totalorder %v2067_v7, 0  ;;  %vm2467_vm4 = vcmp.lt.s32.totalorder %v2067_v7, 0  ;;  %v2535_v25 = vadd.s32 17, %v2067_v7  ;;  %vm2439_vm9 = vcmp.ne.s32.totalorder %v4779_v27, 0 }
 0x11b   : > { %vm4707_vm7 = vmand %vm2467_vm4, %vm2433_vm3  ;;  %vm2473_vm10 = vcmp.lt.s32.totalorder %v4779_v27, 0  ;;  %v4851_v12 = vadd.s32 17, %v4779_v27 }
 0x11c   : > { %v2569_v8 = vsel %vm4707_vm7, %v2535_v25, %v2067_v7  ;;  %v2573_v25 = vsel %vm4791_vm5, %v4771_v44, %v4737_v57  ;;  %v4856_v57 = vadd.s32 17, %v4826_v4 }
 0x11d   : > { %vm4746_vm15 = vcmp.ne.s32.totalorder %v2569_v8, 16  ;;  %vm4894_vm1 = vcmp.ne.s32.totalorder %v2573_v25, 16 }
 0x11e   : > { %3510 = vmatmul.mubr.bf16.gmra.mrb[56].mxu1 %v4479_v42  ;;  %v4675_v42 = vmul.u32.u64.low 4042322161, %v2030_v9  ;;  %v4676_v50 = vmul.u32.u64.high 4042322161, %v2030_v9, %v4675_v42 }
 0x11f   : > { %3678 = vmatmul.mubr.bf16.gmra.mrb[56].mxu0 %v1581_v56  ;;  %3513 = vmatprep.mubr.msk.bf16.mxu1 %vm4017_vm0, %v4016_v1  ;;  %v4743_v56 = vmul.u32.u64.low 4042322161, %v4720_v21  ;;  %v4744_v63 = vmul.u32.u64.high 4042322161, %v4720_v21, %v4743_v56 }
 0x120   : > { %3681 = vmatprep.mubr.msk.bf16.mxu0 %vm4017_vm0, %v4016_v1  ;;  %v2120_v0 = vshrl.u32 %v4676_v50, 4 }
 0x122   : > { %v2121_v54 = vmul.u32 17, %v2120_v0  ;;  %v2164_v0 = vshrl.u32 %v4744_v63, 4  ;;  %v2175_v63 = vshrl.u32 %v4783_v38, 4 }
 0x124   : > { %v4739_v11 = vsub.s32 %v2030_v9, %v2121_v54  ;;  %v4844_v53 = vmul.u32.u64.low 4042322161, %v4821_v18  ;;  %v4845_v54 = vmul.u32.u64.high 4042322161, %v4821_v18, %v4844_v53  ;;  %v2176_v37 = vmul.u32 17, %v2175_v63 }
 0x126   : > { %3514 = vmatmul.mubr.bf16.gmra.mrb[60].mxu1 %v4496_v2  ;;  %vm2438_vm3 = vcmp.ne.s32.totalorder %v4739_v11, 0  ;;  %vm2472_vm4 = vcmp.lt.s32.totalorder %v4739_v11, 0  ;;  %v4776_v62 = vadd.s32 17, %v4739_v11 }
 0x127   : > { %3682 = vmatmul.mubr.bf16.gmra.mrb[60].mxu0 %v1583_v14  ;;  %3517 = vmatprep.mubr.msk.bf16.mxu1 %vm4017_vm0, %v4016_v1  ;;  %vm4816_vm8 = vmand %vm2472_vm4, %vm2438_vm3 }
 0x128   : > { %3685 = vmatprep.mubr.msk.bf16.mxu0 %vm4017_vm0, %v4016_v1  ;;  %v2028_v1 = vadd.s32 24, %v4649_v15  ;;  %vm4755_vm0 = vcmp.ne.s32.totalorder %v2570_v33, 16  ;;  %v2574_v16 = vsel %vm4816_vm8, %v4776_v62, %v4739_v11 }
 0x129   : > { %vm4898_vm2 = vcmp.ne.s32.totalorder %v2574_v16, 16  ;;  %v4935_v16 = vsub.s32 %v4752_v26, %v2176_v37 }
 0x12e   : > { %3518 = vmatmul.mubr.bf16.gmra.mrb[64].mxu1 %v4334_v35  ;;  %v4664_v35 = vmul.u32.u64.low 4042322161, %v2028_v1  ;;  %v4665_v55 = vmul.u32.u64.high 4042322161, %v2028_v1, %v4664_v35 }
 0x12f   : > { %3686 = vmatmul.mubr.bf16.gmra.mrb[64].mxu0 %v1585_v52  ;;  %v2153_v52 = vshrl.u32 %v4705_v47, 4 }
 0x130   : > { %v2098_v2 = vshrl.u32 %v4665_v55, 4 }
 0x131   : > { %v2154_v19 = vmul.u32 17, %v2153_v52 }
 0x132   : > { %v2099_v10 = vmul.u32 17, %v2098_v2 }
 0x133   : > { %v4830_v43 = vsub.s32 %v4691_v34, %v2154_v19 }
 0x134   : > { %v4697_v31 = vsub.s32 %v2028_v1, %v2099_v10  ;;  %v4766_v1 = vadd.s32 88, %v4649_v15 }
 0x135   : > { %vm2441_vm13 = vcmp.ne.s32.totalorder %v4830_v43, 0  ;;  %v2543_v44 = vadd.s32 17, %v4830_v43 }
 0x136   : > { %vm2436_vm11 = vcmp.ne.s32.totalorder %v4697_v31, 0  ;;  %vm2470_vm12 = vcmp.lt.s32.totalorder %v4697_v31, 0  ;;  %v2538_v13 = vadd.s32 17, %v4697_v31 }
 0x137   : > { %vm4733_vm14 = vmand %vm2470_vm12, %vm2436_vm11  ;;  %v4796_v6 = vmul.u32.u64.low 4042322161, %v4766_v1  ;;  %v4797_v7 = vmul.u32.u64.high 4042322161, %v4766_v1, %v4796_v6  ;;  %vm2440_vm11 = vcmp.ne.s32.totalorder %v4826_v4, 0  ;;  %vm2474_vm12 = vcmp.lt.s32.totalorder %v4826_v4, 0 }
 0x138   : > { %v2572_v32 = vsel %vm4733_vm14, %v2538_v13, %v4697_v31  ;;  %v2165_v13 = vmul.u32 17, %v2164_v0  ;;  %vm2475_vm14 = vcmp.lt.s32.totalorder %v4830_v43, 0 }
 0x139   : > { %vm4808_vm7 = vcmp.ne.s32.totalorder %v2572_v32, 16  ;;  %v2186_v14 = vshrl.u32 %v4797_v7, 4  ;;  %vm4906_vm3 = vmand %vm2475_vm14, %vm2441_vm13  ;;  %v2197_v7 = vshrl.u32 %v4845_v54, 4  ;;  %v2208_v54 = vshrl.u32 %v4874_v30, 4 }
 0x13b   : > { %v2187_v38 = vmul.u32 17, %v2186_v14  ;;  %v2198_v53 = vmul.u32 17, %v2197_v7 }
 0x181   : > { %v846_v29 = vpop.f32.mrb[0].mxu1 }
 0x182   : > { %v1685_v24 = vpop.f32.mrb[0].mxu0  ;;  %v3455_v61 = vpop.f32.mrb[1].mxu1 }
 0x183   : > { %v3689_v51 = vadd.f32 %v1685_v24, %v846_v29  ;;  %v3623_v35 = vpop.f32.mrb[1].mxu0  ;;  %v849_v55 = vpop.f32.mrb[2].mxu1  ;;  %v4978_v29 = vadd.s32 17, %v4935_v16 }
 0x184   : > { %v1688_v9 = vpop.f32.mrb[2].mxu0  ;;  %v3456_v17 = vpop.f32.mrb[3].mxu1 }
 0x185   : > { %v2705_v42 = vsel %vm4746_vm15, %v3689_v51, 0.0  ;;  %v3690_v50 = vadd.f32 %v1688_v9, %v849_v55  ;;  %v3624_v2 = vpop.f32.mrb[3].mxu0  ;;  %vm4868_vm15 = vmand %vm2473_vm10, %vm2439_vm9  ;;  %vm2443_vm10 = vcmp.ne.s32.totalorder %v4935_v16, 0 }
 0x186   : > { %v2779_v31 = vmul.f32 %v2705_v42, %v2705_v42  ;;  %v2575_v5 = vsel %vm4868_vm15, %v4851_v12, %v4779_v27  ;;  %v2577_v27 = vsel %vm4906_vm3, %v2543_v44, %v4830_v43 }
 0x187   : > { %v3155_v22 = vpack.c.bf16 %v3690_v50, %v3689_v51  ;;  %v2706_v36 = vsel %vm4755_vm0, %v3690_v50, 0.0  ;;  %vm4882_vm0 = vmand %vm2474_vm12, %vm2440_vm11  ;;  %v4888_v51 = vsub.s32 %v4720_v21, %v2165_v13  ;;  %vm4971_vm9 = vcmp.ne.s32.totalorder %v2577_v27, 16 }
 0x188   : > { %v2739_v39 = vadd.f32 %v2706_v36, %v2705_v42  ;;  %v2780_v41 = vmul.f32 %v2706_v36, %v2706_v36  ;;  %v2576_v6 = vsel %vm4882_vm0, %v4856_v57, %v4826_v4  ;;  %vm2477_vm11 = vcmp.lt.s32.totalorder %v4935_v16, 0 }
 0x189   : > { %3156 = vst [vmem:[%s4802_s17] sm:$0xff] %v3155_v22   ;;  %v854_v47 = vpop.f32.mrb[4].mxu1  ;;  %vm2442_vm4 = vcmp.ne.s32.totalorder %v4888_v51, 0  ;;  %vm2476_vm5 = vcmp.lt.s32.totalorder %v4888_v51, 0  ;;  %v4922_v22 = vadd.s32 120, %v4649_v15  ;;  %v2544_v4 = vadd.s32 17, %v4888_v51  ;;  %vm5004_vm15 = vmand %vm2477_vm11, %vm2443_vm10 }
 0x18a   : > { %v2813_v23 = vadd.f32 %v2780_v41, %v2779_v31  ;;  %v1693_v28 = vpop.f32.mrb[4].mxu0  ;;  %v3459_v34 = vpop.f32.mrb[5].mxu1  ;;  %vm4961_vm8 = vcmp.ne.s32.totalorder %v2576_v6, 16  ;;  %v5024_v27 = vadd.s32 144, %v4649_v15 }
 0x18b   : > { %v3691_v60 = vadd.f32 %v1693_v28, %v854_v47  ;;  %v3627_v8 = vpop.f32.mrb[5].mxu0  ;;  %v857_v3 = vpop.f32.mrb[6].mxu1 }
 0x18c   : > { %v1696_v33 = vpop.f32.mrb[6].mxu0  ;;  %v3460_v45 = vpop.f32.mrb[7].mxu1 }
 0x18d   : > { %v2707_v11 = vsel %vm4804_vm6, %v3691_v60, 0.0  ;;  %v3692_v46 = vadd.f32 %v1696_v33, %v857_v3  ;;  %v3628_v56 = vpop.f32.mrb[7].mxu0  ;;  %vm4942_vm6 = vmand %vm2476_vm5, %vm2442_vm4  ;;  %v4950_v26 = vmul.u32.u64.low 4042322161, %v4922_v22  ;;  %v4951_v3 = vmul.u32.u64.high 4042322161, %v4922_v22, %v4950_v26 }
 0x18e   : > { %v2740_v49 = vadd.f32 %v2739_v39, %v2707_v11  ;;  %v2781_v52 = vmul.f32 %v2707_v11, %v2707_v11  ;;  %v4929_v31 = vmul.u32.u64.low 4042322161, %v4891_v40  ;;  %v4930_v39 = vmul.u32.u64.high 4042322161, %v4891_v40, %v4929_v31 }
 0x18f   : > { %v3160_v32 = vpack.c.bf16 %v3692_v46, %v3691_v60  ;;  %v2708_v24 = vsel %vm4808_vm7, %v3692_v46, 0.0  ;;  %v4954_v33 = vadd.s32 128, %v4649_v15  ;;  %vm4957_vm7 = vcmp.ne.s32.totalorder %v2575_v5, 16 }
 0x190   : > { %v2814_v35 = vadd.f32 %v2813_v23, %v2781_v52  ;;  %v2741_v55 = vadd.f32 %v2740_v49, %v2708_v24  ;;  %v2782_v62 = vmul.f32 %v2708_v24, %v2708_v24  ;;  %v4938_v23 = vsub.s32 %v4766_v1, %v2187_v38 }
 0x191   : > { %3237 = vst [vmem:[%s4802_s17 + $0x8] sm:$0xff] %v3160_v32   ;;  %v862_v9 = vpop.f32.mrb[8].mxu1  ;;  %v2578_v46 = vsel %vm4942_vm6, %v2544_v4, %v4888_v51  ;;  %v4969_v56 = vadd.s32 136, %v4649_v15  ;;  %v2209_v24 = vmul.u32 17, %v2208_v54  ;;  %v4983_v51 = vsub.s32 %v4821_v18, %v2198_v53 }
 0x192   : > { %v2815_v42 = vadd.f32 %v2814_v35, %v2782_v62  ;;  %v1701_v50 = vpop.f32.mrb[8].mxu0  ;;  %v3463_v2 = vpop.f32.mrb[9].mxu1  ;;  %vm2444_vm12 = vcmp.ne.s32.totalorder %v4938_v23, 0  ;;  %vm2478_vm13 = vcmp.lt.s32.totalorder %v4938_v23, 0  ;;  %v2219_v35 = vshrl.u32 %v4930_v39, 4 }
 0x193   : > { %v3693_v20 = vadd.f32 %v1701_v50, %v862_v9  ;;  %v3631_v10 = vpop.f32.mrb[9].mxu0  ;;  %v865_v58 = vpop.f32.mrb[10].mxu1  ;;  %v4993_v21 = vmul.u32.u64.low 4042322161, %v4969_v56  ;;  %v4994_v37 = vmul.u32.u64.high 4042322161, %v4969_v56, %v4993_v21  ;;  %vm4996_vm14 = vcmp.ne.s32.totalorder %v2578_v46, 16  ;;  %vm5015_vm0 = vmand %vm2478_vm13, %vm2444_vm12 }
 0x194   : > { %v1704_v36 = vpop.f32.mrb[10].mxu0  ;;  %v3464_v0 = vpop.f32.mrb[11].mxu1  ;;  %v2546_v2 = vadd.s32 17, %v4938_v23  ;;  %v2230_v10 = vshrl.u32 %v4951_v3, 4  ;;  %v2579_v31 = vsel %vm5004_vm15, %v4978_v29, %v4935_v16 }
 0x195   : > { %v2709_v41 = vsel %vm4894_vm1, %v3693_v20, 0.0  ;;  %v3694_v47 = vadd.f32 %v1704_v36, %v865_v58  ;;  %v3632_v25 = vpop.f32.mrb[11].mxu0  ;;  %vm2445_vm1 = vcmp.ne.s32.totalorder %v4983_v51, 0  ;;  %v2252_v46 = vshrl.u32 %v4994_v37, 4 }
 0x196   : > { %v2742_v28 = vadd.f32 %v2741_v55, %v2709_v41  ;;  %v2783_v43 = vmul.f32 %v2709_v41, %v2709_v41  ;;  %v4987_v55 = vmul.u32.u64.low 4042322161, %v4954_v33  ;;  %v4988_v62 = vmul.u32.u64.high 4042322161, %v4954_v33, %v4987_v55 }
 0x197   : > { %v3165_v60 = vpack.c.bf16 %v3694_v47, %v3693_v20  ;;  %v2710_v8 = vsel %vm4898_vm2, %v3694_v47, 0.0  ;;  %v5020_v20 = vsub.s32 %v4848_v59, %v2209_v24  ;;  %vm2479_vm2 = vcmp.lt.s32.totalorder %v4983_v51, 0 }
 0x198   : > { %v2816_v1 = vadd.f32 %v2815_v42, %v2783_v43  ;;  %v2743_v12 = vadd.f32 %v2742_v28, %v2710_v8  ;;  %v2784_v13 = vmul.f32 %v2710_v8, %v2710_v8  ;;  %v2220_v59 = vmul.u32 17, %v2219_v35  ;;  %vm5046_vm5 = vmand %vm2479_vm2, %vm2445_vm1 }
 0x199   : > { %3238 = vst [vmem:[%s4802_s17 + $0x10] sm:$0xff] %v3165_v60   ;;  %v870_v45 = vpop.f32.mrb[12].mxu1  ;;  %v2580_v25 = vsel %vm5015_vm0, %v2546_v2, %v4938_v23  ;;  %v2547_v28 = vadd.s32 17, %v4983_v51  ;;  %v5038_v43 = vadd.s32 152, %v4649_v15  ;;  %vm2446_vm3 = vcmp.ne.s32.totalorder %v5020_v20, 0 }
 0x19a   : > { %v2817_v63 = vadd.f32 %v2816_v1, %v2784_v13  ;;  %v1709_v14 = vpop.f32.mrb[12].mxu0  ;;  %v3467_v49 = vpop.f32.mrb[13].mxu1  ;;  %vm2480_vm4 = vcmp.lt.s32.totalorder %v5020_v20, 0  ;;  %v2231_v54 = vmul.u32 17, %v2230_v10  ;;  %v5051_v26 = vadd.s32 17, %v5020_v20 }
 0x19b   : > { %v3695_v48 = vadd.f32 %v1709_v14, %v870_v45  ;;  %v3635_v30 = vpop.f32.mrb[13].mxu0  ;;  %v873_v32 = vpop.f32.mrb[14].mxu1  ;;  %v2241_v3 = vshrl.u32 %v4988_v62, 4  ;;  %v5061_v11 = vsub.s32 %v4891_v40, %v2220_v59  ;;  %vm5068_vm6 = vmand %vm2480_vm4, %vm2446_vm3  ;;  %v5109_v2 = vadd.s32 168, %v4649_v15 }
 0x19c   : > { %v1712_v61 = vpop.f32.mrb[14].mxu0  ;;  %v3468_v44 = vpop.f32.mrb[15].mxu1  ;;  %v5073_v52 = vmul.u32.u64.low 4042322161, %v5038_v43  ;;  %v5074_v29 = vmul.u32.u64.high 4042322161, %v5038_v43, %v5073_v52  ;;  %v2581_v30 = vsel %vm5046_vm5, %v2547_v28, %v4983_v51  ;;  %v5098_v51 = vadd.s32 160, %v4649_v15 }
 0x19d   : > { %v2711_v9 = vsel %vm4957_vm7, %v3695_v48, 0.0  ;;  %v3696_v17 = vadd.f32 %v1712_v61, %v873_v32  ;;  %v3636_v19 = vpop.f32.mrb[15].mxu0  ;;  %v5082_v32 = vsub.s32 %v4922_v22, %v2231_v54  ;;  %v2242_v35 = vmul.u32 17, %v2241_v3 }
 0x19e   : > { %v2744_v38 = vadd.f32 %v2743_v12, %v2711_v9  ;;  %v2785_v42 = vmul.f32 %v2711_v9, %v2711_v9  ;;  %v5055_v1 = vmul.u32.u64.low 4042322161, %v5024_v27  ;;  %v5056_v12 = vmul.u32.u64.high 4042322161, %v5024_v27, %v5055_v1 }
 0x19f   : > { %v3170_v5 = vpack.c.bf16 %v3696_v17, %v3695_v48  ;;  %v2712_v6 = vsel %vm4961_vm8, %v3696_v17, 0.0  ;;  %vm5085_vm7 = vcmp.ne.s32.totalorder %v2579_v31, 16  ;;  %vm5089_vm8 = vcmp.ne.s32.totalorder %v2580_v25, 16 }
 0x1a0   : > { %v2818_v58 = vadd.f32 %v2817_v63, %v2785_v42  ;;  %v2745_v36 = vadd.f32 %v2744_v38, %v2712_v6  ;;  %v2786_v0 = vmul.f32 %v2712_v6, %v2712_v6  ;;  %v2582_v22 = vsel %vm5068_vm6, %v5051_v26, %v5020_v20 }
 0x1a1   : > { %3239 = vst [vmem:[%s4802_s17 + $0x18] sm:$0xff] %v3170_v5   ;;  %v878_v4 = vpop.f32.mrb[16].mxu1  ;;  %vm2447_vm10 = vcmp.ne.s32.totalorder %v5061_v11, 0  ;;  %vm2481_vm11 = vcmp.lt.s32.totalorder %v5061_v11, 0  ;;  %v2253_v38 = vmul.u32 17, %v2252_v46  ;;  %vm2448_vm12 = vcmp.ne.s32.totalorder %v5082_v32, 0 }
 0x1a2   : > { %v2819_v39 = vadd.f32 %v2818_v58, %v2786_v0  ;;  %v1717_v41 = vpop.f32.mrb[16].mxu0  ;;  %v3471_v47 = vpop.f32.mrb[17].mxu1  ;;  %vm2482_vm13 = vcmp.lt.s32.totalorder %v5082_v32, 0  ;;  %v2549_v7 = vadd.s32 17, %v5061_v11  ;;  %v5113_v20 = vadd.s32 17, %v5082_v32 }
 0x1a3   : > { %v3697_v34 = vadd.f32 %v1717_v41, %v878_v4  ;;  %v3639_v53 = vpop.f32.mrb[17].mxu0  ;;  %v881_v16 = vpop.f32.mrb[18].mxu1  ;;  %v5116_v10 = vsub.s32 %v4954_v33, %v2242_v35  ;;  %v2263_v58 = vshrl.u32 %v5056_v12, 4  ;;  %vm5137_vm15 = vmand %vm2482_vm13, %vm2448_vm12  ;;  %v5142_v25 = vsub.s32 %v4969_v56, %v2253_v38 }
 0x1a4   : > { %v1720_v60 = vpop.f32.mrb[18].mxu0  ;;  %v3472_v8 = vpop.f32.mrb[19].mxu1  ;;  %v5130_v59 = vmul.u32.u64.low 4042322161, %v5098_v51  ;;  %v5131_v33 = vmul.u32.u64.high 4042322161, %v5098_v51, %v5130_v59  ;;  %v2274_v28 = vshrl.u32 %v5074_v29, 4  ;;  %v5152_v26 = vadd.s32 176, %v4649_v15 }
 0x1a5   : > { %v2713_v13 = vsel %vm4971_vm9, %v3697_v34, 0.0  ;;  %v3698_v45 = vadd.f32 %v1720_v60, %v881_v16  ;;  %v3640_v57 = vpop.f32.mrb[19].mxu0  ;;  %vm5100_vm9 = vcmp.ne.s32.totalorder %v2581_v30, 16  ;;  %vm5155_vm0 = vcmp.ne.s32.totalorder %v2582_v22, 16 }
 0x1a6   : > { %v2746_v63 = vadd.f32 %v2745_v36, %v2713_v13  ;;  %v2787_v14 = vmul.f32 %v2713_v13, %v2713_v13  ;;  %v5148_v16 = vmul.u32.u64.low 4042322161, %v5109_v2  ;;  %v5149_v54 = vmul.u32.u64.high 4042322161, %v5109_v2, %v5148_v16 }
 0x1a7   : > { %v3175_v48 = vpack.c.bf16 %v3698_v45, %v3697_v34  ;;  %v2714_v40 = vsel %vm4996_vm14, %v3698_v45, 0.0  ;;  %vm5125_vm14 = vmand %vm2481_vm11, %vm2447_vm10  ;;  %v2584_v12 = vsel %vm5137_vm15, %v5113_v20, %v5082_v32  ;;  %v2264_v13 = vmul.u32 17, %v2263_v58 }
 0x1a8   : > { %v2820_v24 = vadd.f32 %v2819_v39, %v2787_v14  ;;  %v2747_v61 = vadd.f32 %v2746_v63, %v2714_v40  ;;  %v2788_v44 = vmul.f32 %v2714_v40, %v2714_v40  ;;  %v2583_v1 = vsel %vm5125_vm14, %v2549_v7, %v5061_v11 }
 0x1a9   : > { %3240 = vst [vmem:[%s4802_s17 + $0x20] sm:$0xff] %v3175_v48   ;;  %v886_v55 = vpop.f32.mrb[20].mxu1  ;;  %vm2449_vm1 = vcmp.ne.s32.totalorder %v5116_v10, 0  ;;  %vm2483_vm2 = vcmp.lt.s32.totalorder %v5116_v10, 0  ;;  %v5169_v63 = vadd.s32 184, %v4649_v15  ;;  %vm2450_vm3 = vcmp.ne.s32.totalorder %v5142_v25, 0 }
 0x1aa   : > { %v2821_v17 = vadd.f32 %v2820_v24, %v2788_v44  ;;  %v1725_v19 = vpop.f32.mrb[20].mxu0  ;;  %v3475_v21 = vpop.f32.mrb[21].mxu1  ;;  %vm2484_vm4 = vcmp.lt.s32.totalorder %v5142_v25, 0  ;;  %v2275_v11 = vmul.u32 17, %v2274_v28  ;;  %v5174_v40 = vadd.s32 17, %v5116_v10  ;;  %vm5189_vm5 = vmand %vm2483_vm2, %vm2449_vm1 }
 0x1ab   : > { %v3699_v42 = vadd.f32 %v1725_v19, %v886_v55  ;;  %v3643_v18 = vpop.f32.mrb[21].mxu0  ;;  %v889_v50 = vpop.f32.mrb[22].mxu1  ;;  %v5177_v30 = vadd.s32 17, %v5142_v25  ;;  %v5180_v32 = vmul.u32.u64.low 4042322161, %v5152_v26  ;;  %v5181_v24 = vmul.u32.u64.high 4042322161, %v5152_v26, %v5180_v32  ;;  %vm5201_vm6 = vmand %vm2484_vm4, %vm2450_vm3 }
 0x1ac   : > { %v1728_v5 = vpop.f32.mrb[22].mxu0  ;;  %v3476_v6 = vpop.f32.mrb[23].mxu1  ;;  %v5194_v62 = vsub.s32 %v5024_v27, %v2264_v13  ;;  %v2285_v9 = vshrl.u32 %v5131_v33, 4  ;;  %v5206_v21 = vmul.u32.u64.low 4042322161, %v5169_v63  ;;  %v5207_v37 = vmul.u32.u64.high 4042322161, %v5169_v63, %v5206_v21 }
 0x1ad   : > { %v2715_v36 = vsel %vm5085_vm7, %v3699_v42, 0.0  ;;  %v3700_v0 = vadd.f32 %v1728_v5, %v889_v50  ;;  %v3644_v4 = vpop.f32.mrb[23].mxu0  ;;  %vm5211_vm7 = vcmp.ne.s32.totalorder %v2583_v1, 16  ;;  %v5216_v18 = vsub.s32 %v5038_v43, %v2275_v11 }
 0x1ae   : > { %v2748_v39 = vadd.f32 %v2747_v61, %v2715_v36  ;;  %v2789_v41 = vmul.f32 %v2715_v36, %v2715_v36  ;;  %v2296_v7 = vshrl.u32 %v5149_v54, 4  ;;  %v2585_v36 = vsel %vm5189_vm5, %v5174_v40, %v5116_v10 }
 0x1af   : > { %v3180_v34 = vpack.c.bf16 %v3700_v0, %v3699_v42  ;;  %v2716_v53 = vsel %vm5089_vm8, %v3700_v0, 0.0  ;;  %vm5220_vm8 = vcmp.ne.s32.totalorder %v2584_v12, 16  ;;  %v2586_v43 = vsel %vm5201_vm6, %v5177_v30, %v5142_v25 }
 0x1b0   : > { %v2822_v60 = vadd.f32 %v2821_v17, %v2789_v41  ;;  %v2749_v8 = vadd.f32 %v2748_v39, %v2716_v53  ;;  %v2790_v23 = vmul.f32 %v2716_v53, %v2716_v53  ;;  %v5233_v0 = vadd.s32 192, %v4649_v15 }
 0x1b1   : > { %3241 = vst [vmem:[%s4802_s17 + $0x28] sm:$0xff] %v3180_v34   ;;  %v894_v3 = vpop.f32.mrb[24].mxu1  ;;  %vm2485_vm10 = vcmp.lt.s32.totalorder %v5194_v62, 0  ;;  %v2286_v33 = vmul.u32 17, %v2285_v9  ;;  %v5238_v10 = vadd.s32 17, %v5194_v62  ;;  %vm2452_vm11 = vcmp.ne.s32.totalorder %v5216_v18, 0 }
 0x1b2   : > { %v2823_v45 = vadd.f32 %v2822_v60, %v2790_v23  ;;  %v1733_v57 = vpop.f32.mrb[24].mxu0  ;;  %v3479_v46 = vpop.f32.mrb[25].mxu1  ;;  %v5242_v25 = vadd.s32 200, %v4649_v15  ;;  %vm2486_vm12 = vcmp.lt.s32.totalorder %v5216_v18, 0  ;;  %v5246_v53 = vadd.s32 17, %v5216_v18 }
 0x1b3   : > { %v3701_v14 = vadd.f32 %v1733_v57, %v894_v3  ;;  %v3647_v49 = vpop.f32.mrb[25].mxu0  ;;  %v897_v52 = vpop.f32.mrb[26].mxu1  ;;  %v2297_v16 = vmul.u32 17, %v2296_v7  ;;  %v2307_v54 = vshrl.u32 %v5181_v24, 4  ;;  %v2318_v57 = vshrl.u32 %v5207_v37, 4  ;;  %vm5273_vm14 = vmand %vm2486_vm12, %vm2452_vm11 }
 0x1b4   : > { %v1736_v29 = vpop.f32.mrb[26].mxu0  ;;  %v3480_v48 = vpop.f32.mrb[27].mxu1  ;;  %v5252_v3 = vmul.u32.u64.low 4042322161, %v5233_v0  ;;  %v5253_v56 = vmul.u32.u64.high 4042322161, %v5233_v0, %v5252_v3  ;;  %vm5285_vm15 = vcmp.ne.s32.totalorder %v2585_v36, 16  ;;  %v2588_v9 = vsel %vm5273_vm14, %v5246_v53, %v5216_v18 }
 0x1b5   : > { %v2717_v61 = vsel %vm5100_vm9, %v3701_v14, 0.0  ;;  %v3702_v44 = vadd.f32 %v1736_v29, %v897_v52  ;;  %v3648_v35 = vpop.f32.mrb[27].mxu0  ;;  %vm2451_vm9 = vcmp.ne.s32.totalorder %v5194_v62, 0  ;;  %v5282_v40 = vsub.s32 %v5109_v2, %v2297_v16 }
 0x1b6   : > { %v2750_v22 = vadd.f32 %v2749_v8, %v2717_v61  ;;  %v2791_v17 = vmul.f32 %v2717_v61, %v2717_v61  ;;  %vm5259_vm13 = vmand %vm2485_vm10, %vm2451_vm9  ;;  %v5278_v52 = vmul.u32.u64.low 4042322161, %v5242_v25  ;;  %v5279_v11 = vmul.u32.u64.high 4042322161, %v5242_v25, %v5278_v52 }
 0x1b7   : > { %v3185_v38 = vpack.c.bf16 %v3702_v44, %v3701_v14  ;;  %v2718_v27 = vsel %vm5155_vm0, %v3702_v44, 0.0  ;;  %vm5289_vm0 = vcmp.ne.s32.totalorder %v2586_v43, 16  ;;  %v2308_v61 = vmul.u32 17, %v2307_v54 }
 0x1b8   : > { %v2824_v50 = vadd.f32 %v2823_v45, %v2791_v17  ;;  %v2751_v5 = vadd.f32 %v2750_v22, %v2718_v27  ;;  %v2792_v6 = vmul.f32 %v2718_v27, %v2718_v27  ;;  %v5264_v45 = vsub.s32 %v5098_v51, %v2286_v33 }
 0x1b9   : > { %3242 = vst [vmem:[%s4802_s17 + $0x30] sm:$0xff] %v3185_v38   ;;  %v902_v20 = vpop.f32.mrb[28].mxu1  ;;  %v2587_v2 = vsel %vm5259_vm13, %v5238_v10, %v5194_v62  ;;  %v5302_v22 = vadd.s32 208, %v4649_v15  ;;  %v2319_v37 = vmul.u32 17, %v2318_v57  ;;  %vm2454_vm3 = vcmp.ne.s32.totalorder %v5282_v40, 0 }
 0x1ba   : > { %v2825_v4 = vadd.f32 %v2824_v50, %v2792_v6  ;;  %v1741_v31 = vpop.f32.mrb[28].mxu0  ;;  %v3483_v59 = vpop.f32.mrb[29].mxu1  ;;  %vm2453_vm1 = vcmp.ne.s32.totalorder %v5264_v45, 0  ;;  %vm2487_vm2 = vcmp.lt.s32.totalorder %v5264_v45, 0  ;;  %v5307_v62 = vadd.s32 17, %v5264_v45 }
 0x1bb   : > { %v3703_v39 = vadd.f32 %v1741_v31, %v902_v20  ;;  %v3651_v41 = vpop.f32.mrb[29].mxu0  ;;  %v905_v47 = vpop.f32.mrb[30].mxu1  ;;  %vm2488_vm4 = vcmp.lt.s32.totalorder %v5282_v40, 0  ;;  %v5312_v42 = vadd.s32 17, %v5282_v40  ;;  %v5317_v6 = vsub.s32 %v5152_v26, %v2308_v61  ;;  %vm5324_vm5 = vmand %vm2487_vm2, %vm2453_vm1 }
 0x1bc   : > { %v1744_v28 = vpop.f32.mrb[30].mxu0  ;;  %v3484_v34 = vpop.f32.mrb[31].mxu1  ;;  %v2329_v7 = vshrl.u32 %v5253_v56, 4  ;;  %vm5336_vm6 = vmand %vm2488_vm4, %vm2454_vm3  ;;  %v5341_v33 = vsub.s32 %v5169_v63, %v2319_v37  ;;  %v2340_v10 = vshrl.u32 %v5279_v11, 4  ;;  %v2589_v63 = vsel %vm5324_vm5, %v5307_v62, %v5264_v45 }
 0x1bd   : > { %v2719_v60 = vsel %vm5211_vm7, %v3703_v39, 0.0  ;;  %v3704_v8 = vadd.f32 %v1744_v28, %v905_v47  ;;  %v3652_v23 = vpop.f32.mrb[31].mxu0  ;;  %vm5345_vm7 = vcmp.ne.s32.totalorder %v2587_v2, 16  ;;  %v5358_v16 = vadd.s32 216, %v4649_v15 }
 0x1be   : > { %v2752_v1 = vadd.f32 %v2751_v5, %v2719_v60  ;;  %v2793_v12 = vmul.f32 %v2719_v60, %v2719_v60  ;;  %v2590_v23 = vsel %vm5336_vm6, %v5312_v42, %v5282_v40  ;;  %vm2455_vm9 = vcmp.ne.s32.totalorder %v5317_v6, 0 }
 0x1bf   : > { %v3190_v46 = vpack.c.bf16 %v3704_v8, %v3703_v39  ;;  %v2720_v14 = vsel %vm5220_vm8, %v3704_v8, 0.0  ;;  %vm5349_vm8 = vcmp.ne.s32.totalorder %v2588_v9, 16  ;;  %v2330_v3 = vmul.u32 17, %v2329_v7 }
 0x1c0   : > { %v2826_v51 = vadd.f32 %v2825_v4, %v2793_v12  ;;  %v2753_v29 = vadd.f32 %v2752_v1, %v2720_v14  ;;  %v2794_v48 = vmul.f32 %v2720_v14, %v2720_v14  ;;  %vm2489_vm10 = vcmp.lt.s32.totalorder %v5317_v6, 0 }
 0x1c1   : > { %3243 = vst [vmem:[%s4802_s17 + $0x38] sm:$0xff] %v3190_v46   ;;  %v910_v30 = vpop.f32.mrb[32].mxu1  ;;  %v5329_v43 = vmul.u32.u64.low 4042322161, %v5302_v22  ;;  %v5330_v4 = vmul.u32.u64.high 4042322161, %v5302_v22, %v5329_v43  ;;  %v5367_v13 = vadd.s32 17, %v5317_v6  ;;  %v5370_v45 = vadd.s32 224, %v4649_v15  ;;  %vm5393_vm13 = vmand %vm2489_vm10, %vm2455_vm9 }
 0x1c2   : > { %v2827_v44 = vadd.f32 %v2826_v51, %v2794_v48  ;;  %v1749_v35 = vpop.f32.mrb[32].mxu0  ;;  %v3487_v55 = vpop.f32.mrb[33].mxu1  ;;  %vm2456_vm11 = vcmp.ne.s32.totalorder %v5341_v33, 0  ;;  %vm2490_vm12 = vcmp.lt.s32.totalorder %v5341_v33, 0  ;;  %v5375_v14 = vadd.s32 17, %v5341_v33 }
 0x1c3   : > { %v3705_v17 = vadd.f32 %v1749_v35, %v910_v30  ;;  %v3655_v19 = vpop.f32.mrb[33].mxu0  ;;  %v913_v21 = vpop.f32.mrb[34].mxu1  ;;  %v2341_v49 = vmul.u32 17, %v2340_v10  ;;  %v5384_v32 = vsub.s32 %v5233_v0, %v2330_v3  ;;  %v2351_v24 = vshrl.u32 %v5330_v4, 4  ;;  %vm5405_vm14 = vmand %vm2490_vm12, %vm2456_vm11 }
 0x1c4   : > { %v1752_v38 = vpop.f32.mrb[34].mxu0  ;;  %v3488_v27 = vpop.f32.mrb[35].mxu1  ;;  %v5398_v55 = vmul.u32.u64.low 4042322161, %v5370_v45  ;;  %v5399_v2 = vmul.u32.u64.high 4042322161, %v5370_v45, %v5398_v55 }
 0x1c5   : > { %v2721_v18 = vsel %vm5285_vm15, %v3705_v17, 0.0  ;;  %v3706_v50 = vadd.f32 %v1752_v38, %v913_v21  ;;  %v3656_v5 = vpop.f32.mrb[35].mxu0  ;;  %v5410_v21 = vsub.s32 %v5242_v25, %v2341_v49  ;;  %v5414_v38 = vadd.s32 232, %v4649_v15 }
 0x1c6   : > { %v2754_v20 = vadd.f32 %v2753_v29, %v2721_v18  ;;  %v2795_v58 = vmul.f32 %v2721_v18, %v2721_v18  ;;  %v5380_v29 = vmul.u32.u64.low 4042322161, %v5358_v16  ;;  %v5381_v48 = vmul.u32.u64.high 4042322161, %v5358_v16, %v5380_v29 }
 0x1c7   : > { %v3195_v31 = vpack.c.bf16 %v3706_v50, %v3705_v17  ;;  %v2722_v26 = vsel %vm5289_vm0, %v3706_v50, 0.0  ;;  %vm5416_vm15 = vcmp.ne.s32.totalorder %v2589_v63, 16  ;;  %vm5420_vm0 = vcmp.ne.s32.totalorder %v2590_v23, 16 }
 0x1c8   : > { %v2828_v39 = vadd.f32 %v2827_v44, %v2795_v58  ;;  %v2755_v41 = vadd.f32 %v2754_v20, %v2722_v26  ;;  %v2796_v47 = vmul.f32 %v2722_v26, %v2722_v26  ;;  %v2591_v25 = vsel %vm5393_vm13, %v5367_v13, %v5317_v6 }
 0x1c9   : > { %3244 = vst [vmem:[%s4802_s17 + $0x40] sm:$0xff] %v3195_v31   ;;  %v918_v28 = vpop.f32.mrb[36].mxu1  ;;  %v2592_v58 = vsel %vm5405_vm14, %v5375_v14, %v5341_v33  ;;  %vm2457_vm1 = vcmp.ne.s32.totalorder %v5384_v32, 0  ;;  %v2352_v36 = vmul.u32 17, %v2351_v24  ;;  %vm2491_vm2 = vcmp.lt.s32.totalorder %v5384_v32, 0 }
 0x1ca   : > { %v2829_v54 = vadd.f32 %v2828_v39, %v2796_v47  ;;  %v1757_v60 = vpop.f32.mrb[36].mxu0  ;;  %v3491_v8 = vpop.f32.mrb[37].mxu1  ;;  %v5435_v31 = vadd.s32 17, %v5384_v32  ;;  %vm2458_vm3 = vcmp.ne.s32.totalorder %v5410_v21, 0  ;;  %vm2492_vm4 = vcmp.lt.s32.totalorder %v5410_v21, 0  ;;  %vm5451_vm5 = vmand %vm2491_vm2, %vm2457_vm1 }
 0x1cb   : > { %v3707_v56 = vadd.f32 %v1757_v60, %v918_v28  ;;  %v3659_v1 = vpop.f32.mrb[37].mxu0  ;;  %v921_v12 = vpop.f32.mrb[38].mxu1  ;;  %v5442_v33 = vmul.u32.u64.low 4042322161, %v5414_v38  ;;  %v5443_v39 = vmul.u32.u64.high 4042322161, %v5414_v38, %v5442_v33  ;;  %v2560_v10 = vadd.s32 17, %v5410_v21  ;;  %vm5463_vm6 = vmand %vm2492_vm4, %vm2458_vm3 }
 0x1cc   : > { %v1760_v57 = vpop.f32.mrb[38].mxu0  ;;  %v3492_v46 = vpop.f32.mrb[39].mxu1  ;;  %v2362_v28 = vshrl.u32 %v5381_v48, 4  ;;  %v2373_v60 = vshrl.u32 %v5399_v2, 4  ;;  %v5468_v1 = vadd.s32 240, %v4649_v15  ;;  %v5476_v14 = vadd.s32 248, %v4649_v15 }
 0x1cd   : > { %v2723_v52 = vsel %vm5345_vm7, %v3707_v56, 0.0  ;;  %v3708_v11 = vadd.f32 %v1760_v57, %v921_v12  ;;  %v3660_v51 = vpop.f32.mrb[39].mxu0  ;;  %vm2625_vm7 = vcmp.ne.s32.totalorder %v2591_v25, 16  ;;  %v2594_v29 = vsel %vm5463_vm6, %v2560_v10, %v5410_v21 }
 0x1ce   : > { %v2756_v40 = vadd.f32 %v2755_v41, %v2723_v52  ;;  %v2797_v30 = vmul.f32 %v2723_v52, %v2723_v52  ;;  %v2593_v51 = vsel %vm5451_vm5, %v5435_v31, %v5384_v32  ;;  %v2363_v48 = vmul.u32 17, %v2362_v28 }
 0x1cf   : > { %v3200_v61 = vpack.c.bf16 %v3708_v11, %v3707_v56  ;;  %v2724_v44 = vsel %vm5349_vm8, %v3708_v11, 0.0  ;;  %vm5471_vm8 = vcmp.ne.s32.totalorder %v2592_v58, 16  ;;  %v2374_v24 = vmul.u32 17, %v2373_v60 }
 0x1d0   : > { %v2830_v0 = vadd.f32 %v2829_v54, %v2797_v30  ;;  %v2757_v9 = vadd.f32 %v2756_v40, %v2724_v44  ;;  %v2798_v17 = vmul.f32 %v2724_v44, %v2724_v44  ;;  %v5456_v54 = vsub.s32 %v5302_v22, %v2352_v36 }
 0x1d1   : > { %3245 = vst [vmem:[%s4802_s17 + $0x48] sm:$0xff] %v3200_v61   ;;  %v926_v37 = vpop.f32.mrb[40].mxu1  ;;  %v5487_v61 = vmul.u32.u64.low 4042322161, %v5468_v1  ;;  %v5488_v44 = vmul.u32.u64.high 4042322161, %v5468_v1, %v5487_v61  ;;  %v2384_v32 = vshrl.u32 %v5443_v39, 4  ;;  %v5503_v25 = vsub.s32 %v5370_v45, %v2374_v24 }
 0x1d2   : > { %v2831_v27 = vadd.f32 %v2830_v0, %v2798_v17  ;;  %v1765_v62 = vpop.f32.mrb[40].mxu0  ;;  %v3495_v18 = vpop.f32.mrb[41].mxu1  ;;  %vm2459_vm9 = vcmp.ne.s32.totalorder %v5456_v54, 0  ;;  %vm2493_vm10 = vcmp.lt.s32.totalorder %v5456_v54, 0  ;;  %vm5517_vm12 = vcmp.ne.s32.totalorder %v2593_v51, 16 }
 0x1d3   : > { %v3709_v5 = vadd.f32 %v1765_v62, %v926_v37  ;;  %v3663_v7 = vpop.f32.mrb[41].mxu0  ;;  %v929_v20 = vpop.f32.mrb[42].mxu1  ;;  %v5493_v17 = vmul.u32.u64.low 4042322161, %v5476_v14  ;;  %v5494_v19 = vmul.u32.u64.high 4042322161, %v5476_v14, %v5493_v17  ;;  %v5500_v62 = vsub.s32 %v5358_v16, %v2363_v48  ;;  %vm5510_vm11 = vmand %vm2493_vm10, %vm2459_vm9 }
 0x1d4   : > { %v1768_v43 = vpop.f32.mrb[42].mxu0  ;;  %v3496_v4 = vpop.f32.mrb[43].mxu1  ;;  %vm5521_vm13 = vcmp.ne.s32.totalorder %v2594_v29, 16  ;;  %v2395_v10 = vshrl.u32 %v5488_v44, 4  ;;  %vm2495_vm2 = vcmp.lt.s32.totalorder %v5503_v25, 0 }
 0x1d5   : > { %v2725_v6 = vsel %vm5416_vm15, %v3709_v5, 0.0  ;;  %v3710_v26 = vadd.f32 %v1768_v43, %v929_v20  ;;  %v3664_v59 = vpop.f32.mrb[43].mxu0  ;;  %v5515_v20 = vadd.s32 256, %v4649_v15  ;;  %v2385_v4 = vmul.u32 17, %v2384_v32 }
 0x1d6   : > { %v2758_v41 = vadd.f32 %v2757_v9, %v2725_v6  ;;  %v2799_v47 = vmul.f32 %v2725_v6, %v2725_v6  ;;  %vm2460_vm14 = vcmp.ne.s32.totalorder %v5500_v62, 0  ;;  %vm2494_vm15 = vcmp.lt.s32.totalorder %v5500_v62, 0 }
 0x1d7   : > { %v3205_v34 = vpack.c.bf16 %v3710_v26, %v3709_v5  ;;  %v2726_v53 = vsel %vm5420_vm0, %v3710_v26, 0.0  ;;  %v5528_v59 = vadd.s32 264, %v4649_v15  ;;  %vm2461_vm0 = vcmp.ne.s32.totalorder %v5503_v25, 0  ;;  %vm5544_vm1 = vmand %vm2494_vm15, %vm2460_vm14 }
 0x1d8   : > { %v2832_v8 = vadd.f32 %v2831_v27, %v2799_v47  ;;  %v2759_v23 = vadd.f32 %v2758_v41, %v2726_v53  ;;  %v2800_v3 = vmul.f32 %v2726_v53, %v2726_v53  ;;  %v2561_v27 = vadd.s32 17, %v5456_v54  ;;  %vm5566_vm4 = vmand %vm2495_vm2, %vm2461_vm0 }
 0x1d9   : > { %3246 = vst [vmem:[%s4802_s17 + $0x50] sm:$0xff] %v3205_v34   ;;  %v934_v12 = vpop.f32.mrb[44].mxu1  ;;  %v2562_v47 = vadd.s32 17, %v5500_v62  ;;  %v5539_v15 = vmul.u32.u64.low 4042322161, %v5515_v20  ;;  %v5540_v63 = vmul.u32.u64.high 4042322161, %v5515_v20, %v5539_v15 }
 0x1da   : > { %v2833_v22 = vadd.f32 %v2832_v8, %v2800_v3  ;;  %v1773_v13 = vpop.f32.mrb[44].mxu0  ;;  %v3499_v57 = vpop.f32.mrb[45].mxu1  ;;  %v2595_v41 = vsel %vm5510_vm11, %v2561_v27, %v5456_v54  ;;  %v2406_v3 = vshrl.u32 %v5494_v19, 4 }
 0x1db   : > { %v3711_v49 = vadd.f32 %v1773_v13, %v934_v12  ;;  %v3667_v52 = vpop.f32.mrb[45].mxu0  ;;  %v937_v11 = vpop.f32.mrb[46].mxu1  ;;  %vm2629_vm3 = vcmp.ne.s32.totalorder %v2595_v41, 16 }
 0x1dc   : > { %v1776_v40 = vpop.f32.mrb[46].mxu0  ;;  %v3500_v30 = vpop.f32.mrb[47].mxu1 }
 0x1dd   : > { %v2727_v35 = vsel %vm2625_vm7, %v3711_v49, 0.0  ;;  %v3712_v55 = vadd.f32 %v1776_v40, %v937_v11  ;;  %v3668_v2 = vpop.f32.mrb[47].mxu0  ;;  %v2396_v11 = vmul.u32 17, %v2395_v10  ;;  %v2563_v40 = vadd.s32 17, %v5503_v25 }
 0x1de   : > { %v2760_v0 = vadd.f32 %v2759_v23, %v2727_v35  ;;  %v2801_v9 = vmul.f32 %v2727_v35, %v2727_v35  ;;  %v5549_v23 = vsub.s32 %v5414_v38, %v2385_v4  ;;  %v2596_v38 = vsel %vm5544_vm1, %v2562_v47, %v5500_v62 }
 0x1df   : > { %v3210_v21 = vpack.c.bf16 %v3712_v55, %v3711_v49  ;;  %v2728_v37 = vsel %vm5471_vm8, %v3712_v55, 0.0  ;;  %v2407_v35 = vmul.u32 17, %v2406_v3  ;;  %vm2630_vm7 = vcmp.ne.s32.totalorder %v2596_v38, 16 }
 0x1e0   : > { %v2834_v42 = vadd.f32 %v2833_v22, %v2801_v9  ;;  %v2761_v18 = vadd.f32 %v2760_v0, %v2728_v37  ;;  %v2802_v50 = vmul.f32 %v2728_v37, %v2728_v37  ;;  %vm2462_vm5 = vcmp.ne.s32.totalorder %v5549_v23, 0 }
 0x1e1   : > { %3247 = vst [vmem:[%s4802_s17 + $0x58] sm:$0xff] %v3210_v21   ;;  %v942_v5 = vpop.f32.mrb[48].mxu1  ;;  %v5555_v22 = vmul.u32.u64.low 4042322161, %v5528_v59  ;;  %v5556_v13 = vmul.u32.u64.high 4042322161, %v5528_v59, %v5555_v22  ;;  %vm2496_vm6 = vcmp.lt.s32.totalorder %v5549_v23, 0  ;;  %v2564_v32 = vadd.s32 17, %v5549_v23 }
 0x1e2   : > { %v2835_v16 = vadd.f32 %v2834_v42, %v2802_v50  ;;  %v1781_v58 = vpop.f32.mrb[48].mxu0  ;;  %v3503_v45 = vpop.f32.mrb[49].mxu1  ;;  %v2397_v19 = vsub.s32 %v5468_v1, %v2396_v11  ;;  %v2417_v21 = vshrl.u32 %v5540_v63, 4  ;;  %v2597_v62 = vsel %vm5566_vm4, %v2563_v40, %v5503_v25  ;;  %vm5582_vm8 = vmand %vm2496_vm6, %vm2462_vm5 }
 0x1e3   : > { %v3713_v31 = vadd.f32 %v1781_v58, %v942_v5  ;;  %v3671_v6 = vpop.f32.mrb[49].mxu0  ;;  %v945_v26 = vpop.f32.mrb[50].mxu1  ;;  %v2408_v1 = vsub.s32 %v5476_v14, %v2407_v35  ;;  %v2428_v5 = vshrl.u32 %v5556_v13, 4  ;;  %v2598_v25 = vsel %vm5582_vm8, %v2564_v32, %v5549_v23 }
 0x1e4   : > { %v1784_v33 = vpop.f32.mrb[50].mxu0  ;;  %v3504_v39 = vpop.f32.mrb[51].mxu1  ;;  %vm2463_vm9 = vcmp.ne.s32.totalorder %v2397_v19, 0  ;;  %vm2497_vm10 = vcmp.lt.s32.totalorder %v2397_v19, 0  ;;  %v2418_v45 = vmul.u32 17, %v2417_v21  ;;  %vm2631_vm11 = vcmp.ne.s32.totalorder %v2597_v62, 16 }
 0x1e5   : > { %v2729_v28 = vsel %vm5517_vm12, %v3713_v31, 0.0  ;;  %v3714_v34 = vadd.f32 %v1784_v33, %v945_v26  ;;  %v3672_v53 = vpop.f32.mrb[51].mxu0  ;;  %v2565_v6 = vadd.s32 17, %v2397_v19  ;;  %vm2464_vm12 = vcmp.ne.s32.totalorder %v2408_v1, 0  ;;  %vm5594_vm15 = vmand %vm2497_vm10, %vm2463_vm9 }
 0x1e6   : > { %v2762_v60 = vadd.f32 %v2761_v18, %v2729_v28  ;;  %v2803_v8 = vmul.f32 %v2729_v28, %v2729_v28  ;;  %v2429_v39 = vmul.u32 17, %v2428_v5  ;;  %vm2632_vm14 = vcmp.ne.s32.totalorder %v2598_v25, 16 }
 0x1e7   : > { %v3215_v56 = vpack.c.bf16 %v3714_v34, %v3713_v31  ;;  %v2730_v12 = vsel %vm5521_vm13, %v3714_v34, 0.0  ;;  %vm2498_vm13 = vcmp.lt.s32.totalorder %v2408_v1, 0  ;;  %v2566_v15 = vadd.s32 17, %v2408_v1 }
 0x1e8   : > { %v2836_v57 = vadd.f32 %v2835_v16, %v2803_v8  ;;  %v2763_v46 = vadd.f32 %v2762_v60, %v2730_v12  ;;  %v2804_v49 = vmul.f32 %v2730_v12, %v2730_v12  ;;  %v2419_v63 = vsub.s32 %v5515_v20, %v2418_v45  ;;  %vm5599_vm0 = vmand %vm2498_vm13, %vm2464_vm12 }
 0x1e9   : > { %3248 = vst [vmem:[%s4802_s17 + $0x60] sm:$0xff] %v3215_v56   ;;  %v950_v52 = vpop.f32.mrb[52].mxu1  ;;  %v2599_v56 = vsel %vm5594_vm15, %v2565_v6, %v2397_v19  ;;  %v2430_v12 = vsub.s32 %v5528_v59, %v2429_v39  ;;  %v2600_v20 = vsel %vm5599_vm0, %v2566_v15, %v2408_v1 }
 0x1ea   : > { %v2837_v51 = vadd.f32 %v2836_v57, %v2804_v49  ;;  %v1789_v29 = vpop.f32.mrb[52].mxu0  ;;  %v3507_v48 = vpop.f32.mrb[53].mxu1  ;;  %vm2465_vm1 = vcmp.ne.s32.totalorder %v2419_v63, 0  ;;  %vm2499_vm2 = vcmp.lt.s32.totalorder %v2419_v63, 0  ;;  %vm2634_vm6 = vcmp.ne.s32.totalorder %v2600_v20, 16 }
 0x1eb   : > { %v3715_v30 = vadd.f32 %v1789_v29, %v950_v52  ;;  %v3675_v24 = vpop.f32.mrb[53].mxu0  ;;  %v953_v61 = vpop.f32.mrb[54].mxu1  ;;  %v2567_v48 = vadd.s32 17, %v2419_v63  ;;  %vm2466_vm4 = vcmp.ne.s32.totalorder %v2430_v12, 0  ;;  %vm2500_vm5 = vcmp.lt.s32.totalorder %v2430_v12, 0 }
 0x1ec   : > { %v1792_v55 = vpop.f32.mrb[54].mxu0  ;;  %v3508_v2 = vpop.f32.mrb[55].mxu1  ;;  %v2568_v35 = vadd.s32 17, %v2430_v12  ;;  %vm5614_vm8 = vmand %vm2500_vm5, %vm2466_vm4 }
 0x1ed   : > { %v2731_v0 = vsel %vm2629_vm3, %v3715_v30, 0.0  ;;  %v3716_v9 = vadd.f32 %v1792_v55, %v953_v61  ;;  %v3676_v17 = vpop.f32.mrb[55].mxu0  ;;  %vm2633_vm3 = vcmp.ne.s32.totalorder %v2599_v56, 16 }
 0x1ee   : > { %v2764_v37 = vadd.f32 %v2763_v46, %v2731_v0  ;;  %v2805_v27 = vmul.f32 %v2731_v0, %v2731_v0  ;;  %v2602_v62 = vsel %vm5614_vm8, %v2568_v35, %v2430_v12 }
 0x1ef   : > { %v3220_v18 = vpack.c.bf16 %v3716_v9, %v3715_v30  ;;  %v2732_v50 = vsel %vm2630_vm7, %v3716_v9, 0.0  ;;  %vm5610_vm7 = vmand %vm2499_vm2, %vm2465_vm1  ;;  %vm2636_vm10 = vcmp.ne.s32.totalorder %v2602_v62, 16 }
 0x1f0   : > { %v2838_v7 = vadd.f32 %v2837_v51, %v2805_v27  ;;  %v2765_v16 = vadd.f32 %v2764_v37, %v2732_v50  ;;  %v2806_v58 = vmul.f32 %v2732_v50, %v2732_v50  ;;  %v2601_v17 = vsel %vm5610_vm7, %v2567_v48, %v2419_v63 }
 0x1f1   : > { %3249 = vst [vmem:[%s4802_s17 + $0x68] sm:$0xff] %v3220_v18   ;;  %v958_v36 = vpop.f32.mrb[56].mxu1  ;;  %vm2635_vm9 = vcmp.ne.s32.totalorder %v2601_v17, 16 }
 0x1f2   : > { %v2839_v43 = vadd.f32 %v2838_v7, %v2806_v58  ;;  %v1797_v4 = vpop.f32.mrb[56].mxu0  ;;  %v3511_v31 = vpop.f32.mrb[57].mxu1 }
 0x1f3   : > { %v3717_v14 = vadd.f32 %v1797_v4, %v958_v36  ;;  %v3679_v26 = vpop.f32.mrb[57].mxu0  ;;  %v961_v33 = vpop.f32.mrb[58].mxu1 }
 0x1f4   : > { %v1800_v41 = vpop.f32.mrb[58].mxu0  ;;  %v3512_v47 = vpop.f32.mrb[59].mxu1 }
 0x1f5   : > { %v2733_v28 = vsel %vm2631_vm11, %v3717_v14, 0.0  ;;  %v3718_v34 = vadd.f32 %v1800_v41, %v961_v33  ;;  %v3680_v53 = vpop.f32.mrb[59].mxu0 }
 0x1f6   : > { %v2766_v60 = vadd.f32 %v2765_v16, %v2733_v28  ;;  %v2807_v8 = vmul.f32 %v2733_v28, %v2733_v28 }
 0x1f7   : > { %v3225_v23 = vpack.c.bf16 %v3718_v34, %v3717_v14  ;;  %v2734_v3 = vsel %vm2632_vm14, %v3718_v34, 0.0 }
 0x1f8   : > { %v2840_v22 = vadd.f32 %v2839_v43, %v2807_v8  ;;  %v2767_v13 = vadd.f32 %v2766_v60, %v2734_v3  ;;  %v2808_v57 = vmul.f32 %v2734_v3, %v2734_v3 }
 0x1f9   : > { %3250 = vst [vmem:[%s4802_s17 + $0x70] sm:$0xff] %v3225_v23   ;;  %v966_v46 = vpop.f32.mrb[60].mxu1 }
 0x1fa   : > { %v2841_v49 = vadd.f32 %v2840_v22, %v2808_v57  ;;  %v1805_v52 = vpop.f32.mrb[60].mxu0  ;;  %v3515_v38 = vpop.f32.mrb[61].mxu1 }
 0x1fb   : > { %v3719_v11 = vadd.f32 %v1805_v52, %v966_v46  ;;  %v3683_v51 = vpop.f32.mrb[61].mxu0  ;;  %v969_v29 = vpop.f32.mrb[62].mxu1 }
 0x1fc   : > { %v1808_v59 = vpop.f32.mrb[62].mxu0  ;;  %v3516_v40 = vpop.f32.mrb[63].mxu1 }
 0x1fd   : > { %v2735_v24 = vsel %vm2633_vm3, %v3719_v11, 0.0  ;;  %v3720_v61 = vadd.f32 %v1808_v59, %v969_v29  ;;  %v3684_v44 = vpop.f32.mrb[63].mxu0 }
 0x1fe   : > { %v2768_v55 = vadd.f32 %v2767_v13, %v2735_v24  ;;  %v2809_v2 = vmul.f32 %v2735_v24, %v2735_v24 }
 0x1ff   : > { %v3230_v0 = vpack.c.bf16 %v3720_v61, %v3719_v11  ;;  %v2736_v9 = vsel %vm2634_vm6, %v3720_v61, 0.0 }
 0x200   : > { %v2842_v19 = vadd.f32 %v2841_v49, %v2809_v2  ;;  %v2769_v21 = vadd.f32 %v2768_v55, %v2736_v9  ;;  %v2810_v37 = vmul.f32 %v2736_v9, %v2736_v9 }
 0x201   : > { %3251 = vst [vmem:[%s4802_s17 + $0x78] sm:$0xff] %v3230_v0   ;;  %v974_v27 = vpop.f32.mrb[64].mxu1 }
 0x202   : > { %v2843_v42 = vadd.f32 %v2842_v19, %v2810_v37  ;;  %v1813_v18 = vpop.f32.mrb[64].mxu0  ;;  %v3519_v50 = vpop.f32.mrb[65].mxu1 }
 0x203   : > { %v3721_v1 = vadd.f32 %v1813_v18, %v974_v27  ;;  %v3687_v5 = vpop.f32.mrb[65].mxu0  ;;  %v977_v7 = vpop.f32.mrb[66].mxu1 }
 0x204   : > { %v1816_v16 = vpop.f32.mrb[66].mxu0  ;;  %v3520_v58 = vpop.f32.mrb[67].mxu1 }
 0x205   : > { %v2737_v36 = vsel %vm2635_vm9, %v3721_v1, 0.0  ;;  %v3722_v25 = vadd.f32 %v1816_v16, %v977_v7  ;;  %v3688_v45 = vpop.f32.mrb[67].mxu0 }
 0x206   : > { %v2770_v43 = vadd.f32 %v2769_v21, %v2737_v36  ;;  %v2811_v4 = vmul.f32 %v2737_v36, %v2737_v36 }
 0x207   : > { %v3235_v31 = vpack.c.bf16 %v3722_v25, %v3721_v1  ;;  %v2738_v6 = vsel %vm2636_vm10, %v3722_v25, 0.0 }
 0x208   : > { %v2844_v14 = vadd.f32 %v2843_v42, %v2811_v4  ;;  %v2771_v26 = vadd.f32 %v2770_v43, %v2738_v6  ;;  %v2812_v33 = vmul.f32 %v2738_v6, %v2738_v6 }
 0x209   : > { %3252 = vst [vmem:[%s4802_s17 + $0x80] sm:$0xff] %v3235_v31  }
 0x20a   : > { %v2772_v39 = vrot.slane %v2771_v26, 4  ;;  %v2845_v41 = vadd.f32 %v2844_v14, %v2812_v33 }
 0x20c   : > { %v2773_v47 = vadd.f32 %v2772_v39, %v2771_v26  ;;  %v2846_v10 = vrot.slane %v2845_v41, 4 }
 0x20e   : > { %v2774_v28 = vrot.slane %v2773_v47, 2  ;;  %v2847_v34 = vadd.f32 %v2846_v10, %v2845_v41 }
 0x210   : > { %v2775_v53 = vadd.f32 %v2774_v28, %v2773_v47  ;;  %v2848_v15 = vrot.slane %v2847_v34, 2 }
 0x212   : > { %v2776_v63 = vrot.slane %v2775_v53, 1  ;;  %v2849_v60 = vadd.f32 %v2848_v15, %v2847_v34 }
 0x214   : > { %v2777_v8 = vadd.f32 %v2776_v63, %v2775_v53  ;;  %v2850_v54 = vrot.slane %v2849_v60, 1 }
 0x216   : > { %2778 = vst [vmem:[%s211_s20] sm:$0x1] %v2777_v8  ;;  %v2851_v23 = vadd.f32 %v2850_v54, %v2849_v60 }
 0x218   : > { %2852 = vst [vmem:[%s214_s23] sm:$0x1] %v2851_v23 }
 0x219 PF: > { %s15_s15 = sadd.s32 1, %s4014_s15  }
 0x21a   : > { %p12_p4 = scmp.ge.s32.totalorder %s15_s15, 4  }
 0x21c   :  { %14 = sbr.rel (!%p12_p4) target bundleno = 1 (0x1), region = 85 }

// kernel: discriminator_forward.9
= control target key start
LH: loop header
LB: loop body
LE: loop exit
PB: predicated region body
PF: predicated region fallthrough
CT: control target
= control target key end

     0   :  { %s949_s12 = smov 0   ;;  %s1090_s0 = inlined_call_operand.vmem [shape: bf16[2,272,128], index: 0, kind: input, shape index: {}]   ;;  %s1091_s1 = inlined_call_operand.vmem [shape: f32[1,128], index: 1, kind: input, shape index: {}]   ;;  %s1092_s2 = inlined_call_operand.vmem [shape: f32[1,128], index: 2, kind: input, shape index: {}]   ;;  %s1093_s3 = inlined_call_operand.vmem [shape: bf16[2,272,128], index: 3, kind: output, shape index: {}]  }
   0x1 LB: > { %s648_s13 = sadd.s32 4294967295, %s927_s12   ;;  %p652_p0 = scmp.ge.s32.totalorder %s927_s12, 1  ;;  %s927_s12 = sphi %s949_s12, %s13_s12  }
   0x2   : > { %p137_p1 = scmp.lt.s32.totalorder %s927_s12, 3 }
   0x4   : > { %p138_p2 = pnand %p652_p0, %p137_p1 }
   0x5   : > { %p161_p3 = scmp.lt.s32.totalorder (!%p138_p2), %s648_s13, 1  ;;  %v970_v0 = vld [vmem:[%s1091_s1] ss:$0 sm:$0xff] (!%p138_p2) }
   0x6   : > { %141 = sbr.rel (%p138_p2) target bundleno = 78 (0x4e), region = 32  ;;  %v979_v9 = vld [vmem:[%s1092_s2] ss:$0 sm:$0xff] (!%p138_p2) }
   0xd   : > { %s1095_s13 = smov (!%p161_p3, %s648_s13), 1 }
   0xe   : > { %s912_s14 = smul.u32 136, %s1095_s13 }
  0x10   : > { %s965_s17 = scalar_lea.vmem %s1090_s0, %s912_s14  ;;  %s1002_s24 = scalar_lea.vmem %s1093_s3, %s912_s14 }
  0x11   : > { %v728_v1 = vld [vmem:[%s965_s17] sm:$0xff]   ;;  %v880_v2 = vld [vmem:[%s965_s17 + $0x8] sm:$0xff]   ;;  %v881_v3 = vld [vmem:[%s965_s17 + $0x10] sm:$0xff]  }
  0x12   : > { %v729_v4 = vunpack.c.l.bf16 %v728_v1  ;;  %v730_v5 = vunpack.c.h.bf16 %v728_v1  ;;  %v733_v6 = vunpack.c.l.bf16 %v880_v2  ;;  %v734_v7 = vunpack.c.h.bf16 %v880_v2  ;;  %v882_v8 = vld [vmem:[%s965_s17 + $0x18] sm:$0xff]   ;;  %v883_v36 = vld [vmem:[%s965_s17 + $0x20] sm:$0xff]   ;;  %v884_v41 = vld [vmem:[%s965_s17 + $0x28] sm:$0xff]  }
  0x13   : > { %v737_v10 = vunpack.c.l.bf16 %v881_v3  ;;  %v738_v11 = vunpack.c.h.bf16 %v881_v3  ;;  %v741_v12 = vunpack.c.l.bf16 %v882_v8  ;;  %v742_v13 = vunpack.c.h.bf16 %v882_v8  ;;  %v885_v52 = vld [vmem:[%s965_s17 + $0x30] sm:$0xff]   ;;  %v886_v53 = vld [vmem:[%s965_s17 + $0x38] sm:$0xff]  }
  0x14   : > { %v246_v14 = vmul.f32 %v729_v4, %v970_v0  ;;  %v247_v15 = vmul.f32 %v730_v5, %v970_v0  ;;  %v248_v16 = vmul.f32 %v733_v6, %v970_v0  ;;  %v249_v17 = vmul.f32 %v734_v7, %v970_v0 }
  0x15   : > { %v250_v18 = vmul.f32 %v737_v10, %v970_v0  ;;  %v251_v19 = vmul.f32 %v738_v11, %v970_v0  ;;  %v252_v20 = vmul.f32 %v741_v12, %v970_v0  ;;  %v253_v21 = vmul.f32 %v742_v13, %v970_v0 }
  0x16   : > { %v287_v22 = vadd.f32 %v979_v9, %v246_v14  ;;  %v288_v23 = vadd.f32 %v979_v9, %v247_v15  ;;  %v289_v24 = vadd.f32 %v979_v9, %v248_v16  ;;  %v290_v25 = vadd.f32 %v979_v9, %v249_v17 }
  0x17   : > { %v291_v26 = vadd.f32 %v979_v9, %v250_v18  ;;  %v292_v27 = vadd.f32 %v979_v9, %v251_v19  ;;  %v293_v28 = vadd.f32 %v979_v9, %v252_v20  ;;  %v294_v29 = vadd.f32 %v979_v9, %v253_v21  ;;  %v887_v20 = vld [vmem:[%s965_s17 + $0x40] sm:$0xff]  }
  0x18   : > { %vm321_vm0 = vcmp.gt.f32.partialorder %v287_v22, 0.0  ;;  %vm322_vm1 = vcmp.gt.f32.partialorder %v288_v23, 0.0  ;;  %v355_v30 = vmul.f32 0.2, %v287_v22  ;;  %v356_v31 = vmul.f32 0.2, %v288_v23 }
  0x19   : > { %vm323_vm2 = vcmp.gt.f32.partialorder %v289_v24, 0.0  ;;  %vm324_vm3 = vcmp.gt.f32.partialorder %v290_v25, 0.0  ;;  %v357_v32 = vmul.f32 0.2, %v289_v24  ;;  %v358_v33 = vmul.f32 0.2, %v290_v25 }
  0x1a   : > { %v389_v34 = vsel %vm321_vm0, %v287_v22, %v355_v30  ;;  %v390_v35 = vsel %vm322_vm1, %v288_v23, %v356_v31  ;;  %vm325_vm4 = vcmp.gt.f32.partialorder %v291_v26, 0.0  ;;  %vm326_vm5 = vcmp.gt.f32.partialorder %v292_v27, 0.0 }
  0x1b   : > { %v798_v37 = vpack.c.bf16 %v390_v35, %v389_v34  ;;  %v391_v38 = vsel %vm323_vm2, %v289_v24, %v357_v32  ;;  %v392_v39 = vsel %vm324_vm3, %v290_v25, %v358_v33  ;;  %v359_v40 = vmul.f32 0.2, %v291_v26  ;;  %v888_v24 = vld [vmem:[%s965_s17 + $0x48] sm:$0xff]  }
  0x1c   : > { %v803_v42 = vpack.c.bf16 %v392_v39, %v391_v38  ;;  %v360_v43 = vmul.f32 0.2, %v292_v27  ;;  %vm327_vm6 = vcmp.gt.f32.partialorder %v293_v28, 0.0  ;;  %vm328_vm7 = vcmp.gt.f32.partialorder %v294_v29, 0.0 }
  0x1d   : > { %799 = vst [vmem:[%s1002_s24] sm:$0xff] %v798_v37   ;;  %v393_v44 = vsel %vm325_vm4, %v291_v26, %v359_v40  ;;  %v361_v45 = vmul.f32 0.2, %v293_v28  ;;  %v362_v46 = vmul.f32 0.2, %v294_v29  ;;  %v745_v47 = vunpack.c.l.bf16 %v883_v36 }
  0x1e   : > { %896 = vst [vmem:[%s1002_s24 + $0x8] sm:$0xff] %v803_v42   ;;  %v394_v48 = vsel %vm326_vm5, %v292_v27, %v360_v43  ;;  %v746_v49 = vunpack.c.h.bf16 %v883_v36  ;;  %v749_v50 = vunpack.c.l.bf16 %v884_v41  ;;  %v750_v51 = vunpack.c.h.bf16 %v884_v41  ;;  %v889_v36 = vld [vmem:[%s965_s17 + $0x50] sm:$0xff]  }
  0x1f   : > { %v808_v54 = vpack.c.bf16 %v394_v48, %v393_v44  ;;  %v395_v55 = vsel %vm327_vm6, %v293_v28, %v361_v45  ;;  %v396_v56 = vsel %vm328_vm7, %v294_v29, %v362_v46  ;;  %v254_v57 = vmul.f32 %v745_v47, %v970_v0 }
  0x20   : > { %v813_v58 = vpack.c.bf16 %v396_v56, %v395_v55  ;;  %v255_v59 = vmul.f32 %v746_v49, %v970_v0  ;;  %v256_v60 = vmul.f32 %v749_v50, %v970_v0  ;;  %v257_v61 = vmul.f32 %v750_v51, %v970_v0  ;;  %v890_v55 = vld [vmem:[%s965_s17 + $0x58] sm:$0xff]  }
  0x21   : > { %897 = vst [vmem:[%s1002_s24 + $0x10] sm:$0xff] %v808_v54   ;;  %v295_v62 = vadd.f32 %v979_v9, %v254_v57  ;;  %v753_v63 = vunpack.c.l.bf16 %v885_v52  ;;  %v754_v1 = vunpack.c.h.bf16 %v885_v52  ;;  %v757_v2 = vunpack.c.l.bf16 %v886_v53 }
  0x22   : > { %898 = vst [vmem:[%s1002_s24 + $0x18] sm:$0xff] %v813_v58   ;;  %v296_v3 = vadd.f32 %v979_v9, %v255_v59  ;;  %v297_v4 = vadd.f32 %v979_v9, %v256_v60  ;;  %v298_v5 = vadd.f32 %v979_v9, %v257_v61  ;;  %v758_v6 = vunpack.c.h.bf16 %v886_v53 }
  0x23   : > { %vm329_vm8 = vcmp.gt.f32.partialorder %v295_v62, 0.0  ;;  %v363_v7 = vmul.f32 0.2, %v295_v62  ;;  %v258_v8 = vmul.f32 %v753_v63, %v970_v0  ;;  %v259_v10 = vmul.f32 %v754_v1, %v970_v0  ;;  %v891_v1 = vld [vmem:[%s965_s17 + $0x60] sm:$0xff]  }
  0x24   : > { %vm330_vm9 = vcmp.gt.f32.partialorder %v296_v3, 0.0  ;;  %v364_v11 = vmul.f32 0.2, %v296_v3  ;;  %vm331_vm10 = vcmp.gt.f32.partialorder %v297_v4, 0.0  ;;  %vm332_vm11 = vcmp.gt.f32.partialorder %v298_v5, 0.0 }
  0x25   : > { %v397_v12 = vsel %vm329_vm8, %v295_v62, %v363_v7  ;;  %v365_v13 = vmul.f32 0.2, %v297_v4  ;;  %v366_v14 = vmul.f32 0.2, %v298_v5  ;;  %v299_v15 = vadd.f32 %v979_v9, %v258_v8 }
  0x26   : > { %v398_v16 = vsel %vm330_vm9, %v296_v3, %v364_v11  ;;  %v300_v17 = vadd.f32 %v979_v9, %v259_v10  ;;  %v260_v18 = vmul.f32 %v757_v2, %v970_v0  ;;  %v261_v19 = vmul.f32 %v758_v6, %v970_v0  ;;  %v892_v6 = vld [vmem:[%s965_s17 + $0x68] sm:$0xff]  }
  0x27   : > { %v818_v21 = vpack.c.bf16 %v398_v16, %v397_v12  ;;  %v399_v22 = vsel %vm331_vm10, %v297_v4, %v365_v13  ;;  %v400_v23 = vsel %vm332_vm11, %v298_v5, %v366_v14  ;;  %vm333_vm12 = vcmp.gt.f32.partialorder %v299_v15, 0.0 }
  0x28   : > { %v823_v25 = vpack.c.bf16 %v400_v23, %v399_v22  ;;  %vm334_vm13 = vcmp.gt.f32.partialorder %v300_v17, 0.0  ;;  %v367_v26 = vmul.f32 0.2, %v299_v15  ;;  %v368_v27 = vmul.f32 0.2, %v300_v17  ;;  %v893_v22 = vld [vmem:[%s965_s17 + $0x70] sm:$0xff]  }
  0x29   : > { %899 = vst [vmem:[%s1002_s24 + $0x20] sm:$0xff] %v818_v21   ;;  %v301_v28 = vadd.f32 %v979_v9, %v260_v18  ;;  %v302_v29 = vadd.f32 %v979_v9, %v261_v19  ;;  %v761_v30 = vunpack.c.l.bf16 %v887_v20  ;;  %v762_v31 = vunpack.c.h.bf16 %v887_v20 }
  0x2a   : > { %900 = vst [vmem:[%s1002_s24 + $0x28] sm:$0xff] %v823_v25   ;;  %v401_v32 = vsel %vm333_vm12, %v299_v15, %v367_v26  ;;  %v402_v33 = vsel %vm334_vm13, %v300_v17, %v368_v27  ;;  %v765_v34 = vunpack.c.l.bf16 %v888_v24  ;;  %v766_v35 = vunpack.c.h.bf16 %v888_v24 }
  0x2b   : > { %v828_v37 = vpack.c.bf16 %v402_v33, %v401_v32  ;;  %vm335_vm14 = vcmp.gt.f32.partialorder %v301_v28, 0.0  ;;  %vm336_vm15 = vcmp.gt.f32.partialorder %v302_v29, 0.0  ;;  %v369_v38 = vmul.f32 0.2, %v301_v28 }
  0x2c   : > { %v370_v39 = vmul.f32 0.2, %v302_v29  ;;  %v262_v40 = vmul.f32 %v761_v30, %v970_v0  ;;  %v263_v41 = vmul.f32 %v762_v31, %v970_v0  ;;  %v264_v42 = vmul.f32 %v765_v34, %v970_v0 }
  0x2d   : > { %901 = vst [vmem:[%s1002_s24 + $0x30] sm:$0xff] %v828_v37   ;;  %v403_v43 = vsel %vm335_vm14, %v301_v28, %v369_v38  ;;  %v265_v44 = vmul.f32 %v766_v35, %v970_v0  ;;  %v769_v45 = vunpack.c.l.bf16 %v889_v36  ;;  %v770_v46 = vunpack.c.h.bf16 %v889_v36 }
  0x2e   : > { %v404_v47 = vsel %vm336_vm15, %v302_v29, %v370_v39  ;;  %v303_v48 = vadd.f32 %v979_v9, %v262_v40  ;;  %v304_v49 = vadd.f32 %v979_v9, %v263_v41  ;;  %v305_v50 = vadd.f32 %v979_v9, %v264_v42  ;;  %v894_v41 = vld [vmem:[%s965_s17 + $0x78] sm:$0xff]  }
  0x2f   : > { %v833_v51 = vpack.c.bf16 %v404_v47, %v403_v43  ;;  %v306_v52 = vadd.f32 %v979_v9, %v265_v44  ;;  %v266_v53 = vmul.f32 %v769_v45, %v970_v0  ;;  %v267_v54 = vmul.f32 %v770_v46, %v970_v0  ;;  %v895_v46 = vld [vmem:[%s965_s17 + $0x80] sm:$0xff]  }
  0x30   : > { %vm337_vm0 = vcmp.gt.f32.partialorder %v303_v48, 0.0  ;;  %vm338_vm1 = vcmp.gt.f32.partialorder %v304_v49, 0.0  ;;  %v371_v56 = vmul.f32 0.2, %v303_v48  ;;  %v372_v57 = vmul.f32 0.2, %v304_v49 }
  0x31   : > { %902 = vst [vmem:[%s1002_s24 + $0x38] sm:$0xff] %v833_v51   ;;  %vm339_vm2 = vcmp.gt.f32.partialorder %v305_v50, 0.0  ;;  %vm340_vm3 = vcmp.gt.f32.partialorder %v306_v52, 0.0  ;;  %v373_v58 = vmul.f32 0.2, %v305_v50  ;;  %v307_v62 = vadd.f32 %v979_v9, %v266_v53 }
  0x32   : > { %v374_v59 = vmul.f32 0.2, %v306_v52  ;;  %v405_v60 = vsel %vm337_vm0, %v303_v48, %v371_v56  ;;  %v406_v61 = vsel %vm338_vm1, %v304_v49, %v372_v57  ;;  %v308_v63 = vadd.f32 %v979_v9, %v267_v54 }
  0x33   : > { %v838_v2 = vpack.c.bf16 %v406_v61, %v405_v60  ;;  %v407_v3 = vsel %vm339_vm2, %v305_v50, %v373_v58  ;;  %v773_v5 = vunpack.c.l.bf16 %v890_v55  ;;  %vm341_vm4 = vcmp.gt.f32.partialorder %v307_v62, 0.0 }
  0x34   : > { %v408_v4 = vsel %vm340_vm3, %v306_v52, %v374_v59  ;;  %vm342_vm5 = vcmp.gt.f32.partialorder %v308_v63, 0.0  ;;  %v375_v8 = vmul.f32 0.2, %v307_v62  ;;  %v376_v10 = vmul.f32 0.2, %v308_v63 }
  0x35   : > { %v843_v7 = vpack.c.bf16 %v408_v4, %v407_v3  ;;  %903 = vst [vmem:[%s1002_s24 + $0x40] sm:$0xff] %v838_v2   ;;  %v774_v11 = vunpack.c.h.bf16 %v890_v55  ;;  %v268_v12 = vmul.f32 %v773_v5, %v970_v0  ;;  %v777_v13 = vunpack.c.l.bf16 %v891_v1 }
  0x36   : > { %v409_v14 = vsel %vm341_vm4, %v307_v62, %v375_v8  ;;  %v778_v15 = vunpack.c.h.bf16 %v891_v1  ;;  %v781_v16 = vunpack.c.l.bf16 %v892_v6  ;;  %v782_v17 = vunpack.c.h.bf16 %v892_v6 }
  0x37   : > { %904 = vst [vmem:[%s1002_s24 + $0x48] sm:$0xff] %v843_v7   ;;  %v410_v18 = vsel %vm342_vm5, %v308_v63, %v376_v10  ;;  %v269_v19 = vmul.f32 %v774_v11, %v970_v0  ;;  %v309_v20 = vadd.f32 %v979_v9, %v268_v12  ;;  %v270_v21 = vmul.f32 %v777_v13, %v970_v0 }
  0x38   : > { %v848_v23 = vpack.c.bf16 %v410_v18, %v409_v14  ;;  %v271_v24 = vmul.f32 %v778_v15, %v970_v0  ;;  %v272_v25 = vmul.f32 %v781_v16, %v970_v0  ;;  %v273_v26 = vmul.f32 %v782_v17, %v970_v0 }
  0x39   : > { %v310_v27 = vadd.f32 %v979_v9, %v269_v19  ;;  %vm343_vm6 = vcmp.gt.f32.partialorder %v309_v20, 0.0  ;;  %v377_v28 = vmul.f32 0.2, %v309_v20  ;;  %v311_v29 = vadd.f32 %v979_v9, %v270_v21 }
  0x3a   : > { %905 = vst [vmem:[%s1002_s24 + $0x50] sm:$0xff] %v848_v23   ;;  %v312_v30 = vadd.f32 %v979_v9, %v271_v24  ;;  %v313_v31 = vadd.f32 %v979_v9, %v272_v25  ;;  %v314_v32 = vadd.f32 %v979_v9, %v273_v26  ;;  %v785_v33 = vunpack.c.l.bf16 %v893_v22 }
  0x3b   : > { %vm344_vm7 = vcmp.gt.f32.partialorder %v310_v27, 0.0  ;;  %v378_v34 = vmul.f32 0.2, %v310_v27  ;;  %v411_v35 = vsel %vm343_vm6, %v309_v20, %v377_v28  ;;  %vm345_vm8 = vcmp.gt.f32.partialorder %v311_v29, 0.0 }
  0x3c   : > { %vm346_vm9 = vcmp.gt.f32.partialorder %v312_v30, 0.0  ;;  %v379_v36 = vmul.f32 0.2, %v311_v29  ;;  %v380_v37 = vmul.f32 0.2, %v312_v30  ;;  %vm347_vm10 = vcmp.gt.f32.partialorder %v313_v31, 0.0 }
  0x3d   : > { %v412_v38 = vsel %vm344_vm7, %v310_v27, %v378_v34  ;;  %vm348_vm11 = vcmp.gt.f32.partialorder %v314_v32, 0.0  ;;  %v381_v39 = vmul.f32 0.2, %v313_v31  ;;  %v382_v40 = vmul.f32 0.2, %v314_v32 }
  0x3e   : > { %v853_v42 = vpack.c.bf16 %v412_v38, %v411_v35  ;;  %v413_v43 = vsel %vm345_vm8, %v311_v29, %v379_v36  ;;  %v414_v44 = vsel %vm346_vm9, %v312_v30, %v380_v37  ;;  %v786_v45 = vunpack.c.h.bf16 %v893_v22 }
  0x3f   : > { %v858_v47 = vpack.c.bf16 %v414_v44, %v413_v43  ;;  %v415_v48 = vsel %vm347_vm10, %v313_v31, %v381_v39  ;;  %v416_v49 = vsel %vm348_vm11, %v314_v32, %v382_v40  ;;  %v274_v50 = vmul.f32 %v785_v33, %v970_v0 }
  0x40   : > { %906 = vst [vmem:[%s1002_s24 + $0x58] sm:$0xff] %v853_v42   ;;  %v863_v51 = vpack.c.bf16 %v416_v49, %v415_v48  ;;  %v275_v52 = vmul.f32 %v786_v45, %v970_v0  ;;  %v789_v53 = vunpack.c.l.bf16 %v894_v41  ;;  %v790_v54 = vunpack.c.h.bf16 %v894_v41 }
  0x41   : > { %907 = vst [vmem:[%s1002_s24 + $0x60] sm:$0xff] %v858_v47   ;;  %v315_v55 = vadd.f32 %v979_v9, %v274_v50  ;;  %v793_v56 = vunpack.c.l.bf16 %v895_v46  ;;  %v794_v57 = vunpack.c.h.bf16 %v895_v46 }
  0x42   : > { %908 = vst [vmem:[%s1002_s24 + $0x68] sm:$0xff] %v863_v51   ;;  %v316_v58 = vadd.f32 %v979_v9, %v275_v52  ;;  %v276_v59 = vmul.f32 %v789_v53, %v970_v0  ;;  %v277_v60 = vmul.f32 %v790_v54, %v970_v0 }
  0x43   : > { %vm349_vm12 = vcmp.gt.f32.partialorder %v315_v55, 0.0  ;;  %v383_v61 = vmul.f32 0.2, %v315_v55  ;;  %v278_v62 = vmul.f32 %v793_v56, %v970_v0  ;;  %v279_v63 = vmul.f32 %v794_v57, %v970_v0 }
  0x44   : > { %vm350_vm13 = vcmp.gt.f32.partialorder %v316_v58, 0.0  ;;  %v384_v1 = vmul.f32 0.2, %v316_v58  ;;  %v317_v2 = vadd.f32 %v979_v9, %v276_v59  ;;  %v318_v3 = vadd.f32 %v979_v9, %v277_v60 }
  0x45   : > { %v417_v4 = vsel %vm349_vm12, %v315_v55, %v383_v61  ;;  %v319_v5 = vadd.f32 %v979_v9, %v278_v62  ;;  %v320_v6 = vadd.f32 %v979_v9, %v279_v63 }
  0x46   : > { %v418_v7 = vsel %vm350_vm13, %v316_v58, %v384_v1  ;;  %vm351_vm14 = vcmp.gt.f32.partialorder %v317_v2, 0.0  ;;  %vm352_vm15 = vcmp.gt.f32.partialorder %v318_v3, 0.0  ;;  %v385_v8 = vmul.f32 0.2, %v317_v2 }
  0x47   : > { %v868_v10 = vpack.c.bf16 %v418_v7, %v417_v4  ;;  %v386_v0 = vmul.f32 0.2, %v318_v3  ;;  %vm353_vm0 = vcmp.gt.f32.partialorder %v319_v5, 0.0  ;;  %vm354_vm1 = vcmp.gt.f32.partialorder %v320_v6, 0.0 }
  0x48   : > { %v419_v11 = vsel %vm351_vm14, %v317_v2, %v385_v8  ;;  %v387_v12 = vmul.f32 0.2, %v319_v5  ;;  %v388_v13 = vmul.f32 0.2, %v320_v6 }
  0x49   : > { %909 = vst [vmem:[%s1002_s24 + $0x70] sm:$0xff] %v868_v10   ;;  %v420_v14 = vsel %vm352_vm15, %v318_v3, %v386_v0 }
  0x4a   : > { %v873_v15 = vpack.c.bf16 %v420_v14, %v419_v11  ;;  %v421_v16 = vsel %vm353_vm0, %v319_v5, %v387_v12  ;;  %v422_v17 = vsel %vm354_vm1, %v320_v6, %v388_v13 }
  0x4b   : > { %v878_v18 = vpack.c.bf16 %v422_v17, %v421_v16 }
  0x4c   : > { %910 = vst [vmem:[%s1002_s24 + $0x78] sm:$0xff] %v873_v15  }
  0x4d   : > { %911 = vst [vmem:[%s1002_s24 + $0x80] sm:$0xff] %v878_v18  }
  0x4e PF: > { %s13_s12 = sadd.s32 1, %s927_s12  }
  0x4f   : > { %p10_p4 = scmp.ge.s32.totalorder %s13_s12, 4  }
  0x51   :  { %12 = sbr.rel (!%p10_p4) target bundleno = 1 (0x1), region = 62 }

// kernel: discriminator_forward.11
= control target key start
LH: loop header
LB: loop body
LE: loop exit
PB: predicated region body
PF: predicated region fallthrough
CT: control target
= control target key end

     0   :  { %s457_s12 = smov 0   ;;  %s513_s0 = inlined_call_operand.vmem [shape: bf16[2,72,128], index: 0, kind: input, shape index: {}]   ;;  %s514_s1 = inlined_call_operand.vmem [shape: f32[1,128], index: 1, kind: input, shape index: {}]   ;;  %s515_s2 = inlined_call_operand.vmem [shape: f32[1,128], index: 2, kind: input, shape index: {}]   ;;  %s516_s3 = inlined_call_operand.vmem [shape: bf16[2,72,128], index: 3, kind: output, shape index: {}]  }
   0x1 LB: > { %s349_s13 = sadd.s32 4294967295, %s435_s12   ;;  %p353_p0 = scmp.ge.s32.totalorder %s435_s12, 1  ;;  %s435_s12 = sphi %s457_s12, %s13_s12  }
   0x2   : > { %p137_p1 = scmp.lt.s32.totalorder %s435_s12, 3 }
   0x4   : > { %p138_p2 = pnand %p353_p0, %p137_p1 }
   0x5   : > { %p161_p3 = scmp.lt.s32.totalorder (!%p138_p2), %s349_s13, 1  ;;  %v478_v0 = vld [vmem:[%s514_s1] ss:$0 sm:$0xff] (!%p138_p2) }
   0x6   : > { %141 = sbr.rel (%p138_p2) target bundleno = 41 (0x29), region = 32  ;;  %v357_v9 = vld [vmem:[%s515_s2] ss:$0 sm:$0xff] (!%p138_p2) }
   0xd   : > { %s518_s13 = smov (!%p161_p3, %s349_s13), 1 }
   0xe   : > { %s420_s14 = smul.u32 36, %s518_s13 }
  0x10   : > { %s473_s17 = scalar_lea.vmem %s513_s0, %s420_s14  ;;  %s500_s24 = scalar_lea.vmem %s516_s3, %s420_s14 }
  0x11   : > { %v379_v1 = vld [vmem:[%s473_s17] sm:$0xff]   ;;  %v414_v2 = vld [vmem:[%s473_s17 + $0x8] sm:$0xff]   ;;  %v415_v3 = vld [vmem:[%s473_s17 + $0x10] sm:$0xff]  }
  0x12   : > { %v380_v4 = vunpack.c.l.bf16 %v379_v1  ;;  %v381_v5 = vunpack.c.h.bf16 %v379_v1  ;;  %v384_v6 = vunpack.c.l.bf16 %v414_v2  ;;  %v385_v7 = vunpack.c.h.bf16 %v414_v2  ;;  %v416_v8 = vld [vmem:[%s473_s17 + $0x18] sm:$0xff]   ;;  %v179_v36 = vld [vmem:[%s473_s17 + $0x20] sm:$0xf] }
  0x13   : > { %v388_v10 = vunpack.c.l.bf16 %v415_v3  ;;  %v389_v11 = vunpack.c.h.bf16 %v415_v3  ;;  %v392_v12 = vunpack.c.l.bf16 %v416_v8  ;;  %v393_v13 = vunpack.c.h.bf16 %v416_v8 }
  0x14   : > { %v196_v14 = vmul.f32 %v380_v4, %v478_v0  ;;  %v197_v15 = vmul.f32 %v381_v5, %v478_v0  ;;  %v198_v16 = vmul.f32 %v384_v6, %v478_v0  ;;  %v199_v17 = vmul.f32 %v385_v7, %v478_v0 }
  0x15   : > { %v200_v18 = vmul.f32 %v388_v10, %v478_v0  ;;  %v201_v19 = vmul.f32 %v389_v11, %v478_v0  ;;  %v202_v20 = vmul.f32 %v392_v12, %v478_v0  ;;  %v203_v21 = vmul.f32 %v393_v13, %v478_v0 }
  0x16   : > { %v212_v22 = vadd.f32 %v357_v9, %v196_v14  ;;  %v213_v23 = vadd.f32 %v357_v9, %v197_v15  ;;  %v214_v24 = vadd.f32 %v357_v9, %v198_v16  ;;  %v215_v25 = vadd.f32 %v357_v9, %v199_v17 }
  0x17   : > { %v216_v26 = vadd.f32 %v357_v9, %v200_v18  ;;  %v217_v27 = vadd.f32 %v357_v9, %v201_v19  ;;  %v218_v28 = vadd.f32 %v357_v9, %v202_v20  ;;  %v219_v29 = vadd.f32 %v357_v9, %v203_v21 }
  0x18   : > { %vm221_vm0 = vcmp.gt.f32.partialorder %v212_v22, 0.0  ;;  %vm222_vm1 = vcmp.gt.f32.partialorder %v213_v23, 0.0  ;;  %v230_v30 = vmul.f32 0.2, %v212_v22  ;;  %v231_v31 = vmul.f32 0.2, %v213_v23 }
  0x19   : > { %vm223_vm2 = vcmp.gt.f32.partialorder %v214_v24, 0.0  ;;  %vm224_vm3 = vcmp.gt.f32.partialorder %v215_v25, 0.0  ;;  %v232_v32 = vmul.f32 0.2, %v214_v24  ;;  %v233_v33 = vmul.f32 0.2, %v215_v25 }
  0x1a   : > { %v239_v34 = vsel %vm221_vm0, %v212_v22, %v230_v30  ;;  %v240_v35 = vsel %vm222_vm1, %v213_v23, %v231_v31  ;;  %vm225_vm4 = vcmp.gt.f32.partialorder %v216_v26, 0.0  ;;  %vm226_vm5 = vcmp.gt.f32.partialorder %v217_v27, 0.0 }
  0x1b   : > { %v397_v37 = vpack.c.bf16 %v240_v35, %v239_v34  ;;  %v241_v38 = vsel %vm223_vm2, %v214_v24, %v232_v32  ;;  %v242_v39 = vsel %vm224_vm3, %v215_v25, %v233_v33  ;;  %v234_v40 = vmul.f32 0.2, %v216_v26 }
  0x1c   : > { %v402_v41 = vpack.c.bf16 %v242_v39, %v241_v38  ;;  %v235_v42 = vmul.f32 0.2, %v217_v27  ;;  %vm227_vm6 = vcmp.gt.f32.partialorder %v218_v28, 0.0  ;;  %vm228_vm7 = vcmp.gt.f32.partialorder %v219_v29, 0.0 }
  0x1d   : > { %398 = vst [vmem:[%s500_s24] sm:$0xff] %v397_v37   ;;  %v243_v43 = vsel %vm225_vm4, %v216_v26, %v234_v40  ;;  %v236_v44 = vmul.f32 0.2, %v218_v28  ;;  %v237_v45 = vmul.f32 0.2, %v219_v29  ;;  %v188_v46 = vunpack.c.l.bf16 %v179_v36 }
  0x1e   : > { %417 = vst [vmem:[%s500_s24 + $0x8] sm:$0xff] %v402_v41   ;;  %v244_v47 = vsel %vm226_vm5, %v217_v27, %v235_v42 }
  0x1f   : > { %v407_v48 = vpack.c.bf16 %v244_v47, %v243_v43  ;;  %v245_v49 = vsel %vm227_vm6, %v218_v28, %v236_v44  ;;  %v246_v50 = vsel %vm228_vm7, %v219_v29, %v237_v45  ;;  %v204_v51 = vmul.f32 %v478_v0, %v188_v46 }
  0x20   : > { %v412_v52 = vpack.c.bf16 %v246_v50, %v245_v49 }
  0x21   : > { %418 = vst [vmem:[%s500_s24 + $0x10] sm:$0xff] %v407_v48   ;;  %v220_v53 = vadd.f32 %v357_v9, %v204_v51 }
  0x22   : > { %419 = vst [vmem:[%s500_s24 + $0x18] sm:$0xff] %v412_v52  }
  0x23   : > { %vm229_vm8 = vcmp.gt.f32.partialorder %v220_v53, 0.0  ;;  %v238_v54 = vmul.f32 0.2, %v220_v53 }
  0x25   : > { %v247_v55 = vsel %vm229_vm8, %v220_v53, %v238_v54 }
  0x26   : > { %v377_v56 = vpack.c.bf16 %v247_v55, %v247_v55 }
  0x28   : > { %293 = vst [vmem:[%s500_s24 + $0x20] sm:$0xf] %v377_v56 }
  0x29 PF: > { %s13_s12 = sadd.s32 1, %s435_s12  }
  0x2a   : > { %p10_p4 = scmp.ge.s32.totalorder %s13_s12, 4  }
  0x2c   :  { %12 = sbr.rel (!%p10_p4) target bundleno = 1 (0x1), region = 62 }

// kernel: discriminator_forward.10
= control target key start
LH: loop header
LB: loop body
LE: loop exit
PB: predicated region body
PF: predicated region fallthrough
CT: control target
= control target key end

     0   :  { %s2309_s15 = smov 0   ;;  %s2887_s0 = inlined_call_operand.vmem [shape: bf16[2,96,256], index: 0, kind: input, shape index: {}]   ;;  %s2888_s1 = inlined_call_operand.vmem [shape: bf16[4,256,128], index: 1, kind: input, shape index: {}]   ;;  %s2889_s2 = inlined_call_operand.vmem [shape: bf16[2,72,128], index: 2, kind: output, shape index: {0}]   ;;  %s2890_s3 = inlined_call_operand.vmem [shape: f32[2,1,128], index: 3, kind: output, shape index: {1}]   ;;  %s2891_s4 = inlined_call_operand.vmem [shape: f32[2,1,128], index: 4, kind: output, shape index: {2}]  }
   0x1 LB: > { %s1741_s16 = sadd.s32 4294967295, %s2282_s15   ;;  %p1745_p0 = scmp.ge.s32.totalorder %s2282_s15, 1  ;;  %s2282_s15 = sphi %s2309_s15, %s15_s15  }
   0x2   : > { %p167_p1 = scmp.lt.s32.totalorder %s2282_s15, 3 }
   0x4   : > { %p168_p2 = pnand %p1745_p0, %p167_p1 }
   0x5   : > { %v2187_v0 = vld [vmem:[%s2888_s1 + $0xc0] sm:$0xff] (!%p168_p2)   ;;  %v2191_v4 = vld [vmem:[%s2888_s1 + $0xc8] sm:$0xff] (!%p168_p2)   ;;  %v2195_v8 = vld [vmem:[%s2888_s1 + $0xd0] sm:$0xff] (!%p168_p2)   ;;  %p199_p3 = scmp.lt.s32.totalorder (!%p168_p2), %s1741_s16, 1  ;;  %vm331_vm0 = vsmask.f32 (!%p168_p2), 7424 }
   0x6   : > { %171 = sbr.rel (%p168_p2) target bundleno = 348 (0x15c), region = 28  ;;  %v2188_v1 = vld [vmem:[%s2888_s1 + $0x40] sm:$0xff] (!%p168_p2)   ;;  %1975 = vmatprep.subr.bf16.mxu0 (!%p168_p2), %v2187_v0  ;;  %v2192_v5 = vld [vmem:[%s2888_s1 + $0x48] sm:$0xff] (!%p168_p2)   ;;  %v2196_v9 = vld [vmem:[%s2888_s1 + $0x50] sm:$0xff] (!%p168_p2)   ;;  %vm1155_vm1 = vcmask (!%p168_p2), 1046528  }
   0x7   : > { %v2189_v2 = vld [vmem:[%s2888_s1 + $0x80] sm:$0xff] (!%p168_p2)   ;;  %2021 = vmatprep.subr.bf16.mxu1 (!%p168_p2), %v2188_v1  ;;  %v2193_v6 = vld [vmem:[%s2888_s1 + $0x88] sm:$0xff] (!%p168_p2)   ;;  %v2197_v10 = vld [vmem:[%s2888_s1 + $0x90] sm:$0xff] (!%p168_p2)  }
   0x8   : > { %v2190_v3 = vld [vmem:[%s2888_s1] sm:$0xff] (!%p168_p2)   ;;  %1976 = vmatpush3.bf16.msra.mxu0 (!%p168_p2), %v2189_v2  ;;  %v2194_v7 = vld [vmem:[%s2888_s1 + $0x8] sm:$0xff] (!%p168_p2)   ;;  %v2198_v11 = vld [vmem:[%s2888_s1 + $0x10] sm:$0xff] (!%p168_p2)  }
   0x9   : > { %2022 = vmatpush3.bf16.msra.mxu1 (!%p168_p2), %v2190_v3  ;;  %1977 = vmatprep.subr.bf16.mxu0 (!%p168_p2), %v2191_v4  ;;  %v2199_v12 = vld [vmem:[%s2888_s1 + $0xd8] sm:$0xff] (!%p168_p2)   ;;  %v2203_v16 = vld [vmem:[%s2888_s1 + $0xe0] sm:$0xff] (!%p168_p2)   ;;  %v2207_v20 = vld [vmem:[%s2888_s1 + $0xe8] sm:$0xff] (!%p168_p2)  }
   0xa   : > { %2023 = vmatprep.subr.bf16.mxu1 (!%p168_p2), %v2192_v5  ;;  %v2200_v13 = vld [vmem:[%s2888_s1 + $0x58] sm:$0xff] (!%p168_p2)   ;;  %v2204_v17 = vld [vmem:[%s2888_s1 + $0x60] sm:$0xff] (!%p168_p2)   ;;  %v2208_v21 = vld [vmem:[%s2888_s1 + $0x68] sm:$0xff] (!%p168_p2)  }
   0xb   : > { %v2201_v14 = vld [vmem:[%s2888_s1 + $0x98] sm:$0xff] (!%p168_p2)   ;;  %v2205_v18 = vld [vmem:[%s2888_s1 + $0xa0] sm:$0xff] (!%p168_p2)   ;;  %v2209_v22 = vld [vmem:[%s2888_s1 + $0xa8] sm:$0xff] (!%p168_p2)  }
   0xc   : > { %1978 = vmatpush3.bf16.msra.mxu0 (!%p168_p2), %v2193_v6  ;;  %v2202_v15 = vld [vmem:[%s2888_s1 + $0x18] sm:$0xff] (!%p168_p2)   ;;  %v2206_v19 = vld [vmem:[%s2888_s1 + $0x20] sm:$0xff] (!%p168_p2)   ;;  %v2210_v23 = vld [vmem:[%s2888_s1 + $0x28] sm:$0xff] (!%p168_p2)  }
   0xd   : > { %2024 = vmatpush3.bf16.msra.mxu1 %v2194_v7  ;;  %1979 = vmatprep.subr.bf16.mxu0 %v2195_v8  ;;  %s2911_s16 = smov (!%p199_p3, %s1741_s16), 1  ;;  %v2211_v24 = vld [vmem:[%s2888_s1 + $0xf0] sm:$0xff]   ;;  %v2215_v28 = vld [vmem:[%s2888_s1 + $0xf8] sm:$0xff]   ;;  %v2223_v40 = vld [vmem:[%s2888_s1 + $0x140] sm:$0xff]  }
   0xe   : > { %2025 = vmatprep.subr.bf16.mxu1 %v2196_v9  ;;  %v2212_v25 = vld [vmem:[%s2888_s1 + $0x70] sm:$0xff]   ;;  %s2159_s21 = smul.u32 96, %s2911_s16  ;;  %v2216_v29 = vld [vmem:[%s2888_s1 + $0x78] sm:$0xff]   ;;  %v2225_v45 = vld [vmem:[%s2888_s1 + $0x1c0] sm:$0xff]   ;;  %s211_s11 = scalar_lea.vmem %s2890_s3, %s2911_s16 }
   0xf   : > { %v2213_v26 = vld [vmem:[%s2888_s1 + $0xb0] sm:$0xff]   ;;  %v2217_v30 = vld [vmem:[%s2888_s1 + $0xb8] sm:$0xff]   ;;  %v2224_v52 = vld [vmem:[%s2888_s1 + $0x100] sm:$0xff]   ;;  %s214_s14 = scalar_lea.vmem %s2891_s4, %s2911_s16 }
  0x10   : > { %1980 = vmatpush3.bf16.msra.mxu0 %v2197_v10  ;;  %v2214_v27 = vld [vmem:[%s2888_s1 + $0x30] sm:$0xff]   ;;  %s2417_s6 = scalar_lea.vmem %s2887_s0, %s2159_s21  ;;  %v2218_v31 = vld [vmem:[%s2888_s1 + $0x38] sm:$0xff]   ;;  %v2226_v53 = vld [vmem:[%s2888_s1 + $0x180] sm:$0xff]  }
  0x11   : > { %2026 = vmatpush3.bf16.msra.mxu1 %v2198_v11  ;;  %1981 = vmatprep.subr.bf16.mxu0 %v2199_v12  ;;  %v216_v32 = vld [vmem:[%s2417_s6] sm:$0xff]  ;;  %v2427_v33 = vld [vmem:[%s2417_s6 + $0x8] sm:$0xff]  ;;  %v2430_v34 = vld [vmem:[%s2417_s6 + $0x10] sm:$0xff] }
  0x12   : > { %2027 = vmatprep.subr.bf16.mxu1 %v2200_v13  ;;  %v2433_v35 = vld [vmem:[%s2417_s6 + $0x18] sm:$0xff]  ;;  %v1781_v36 = vcombine.high %v216_v32, %v2427_v33  ;;  %v1780_v37 = vcombine.low %v216_v32, %v2427_v33  ;;  %v2227_v56 = vld [vmem:[%s2888_s1 + $0x148] sm:$0xff]   ;;  %v2457_v57 = vld [vmem:[%s2417_s6 + $0x20] sm:$0xff] }
  0x13   : > { %v1783_v38 = vcombine.high %v2430_v34, %v2433_v35  ;;  %v1782_v39 = vcombine.low %v2430_v34, %v2433_v35  ;;  %v2460_v58 = vld [vmem:[%s2417_s6 + $0x28] sm:$0xff]  ;;  %v2233_v8 = vld [vmem:[%s2888_s1 + $0x150] sm:$0xff]   ;;  %v2243_v32 = vld [vmem:[%s2888_s1 + $0x160] sm:$0xff]  }
  0x14   : > { %1982 = vmatpush3.bf16.msra.mxu0 %v2201_v14  ;;  %v345_v41 = vshrl.u32 %v1781_v36, 16  ;;  %v347_v42 = vshll.u32 %v1781_v36, 16  ;;  %728 = vmatprep.mubr.bf16.mxu1 %v1781_v36  ;;  %v333_v43 = vshrl.u32 %v1780_v37, 16  ;;  %v335_v44 = vshll.u32 %v1780_v37, 16  ;;  %v2230_v0 = vld [vmem:[%s2888_s1 + $0x1c8] sm:$0xff]   ;;  %v2235_v11 = vld [vmem:[%s2888_s1 + $0x1d0] sm:$0xff]  }
  0x15   : > { %2028 = vmatpush3.bf16.msra.mxu1 %v2202_v15  ;;  %1983 = vmatprep.subr.bf16.mxu0 %v2203_v16  ;;  %v352_v46 = vshll.u32 %v1783_v38, 16  ;;  %v340_v47 = vshll.u32 %v1782_v39, 16  ;;  %v364_v59 = vshrl.u32 %v1783_v38, 16  ;;  %v356_v60 = vshrl.u32 %v1782_v39, 16  ;;  %v2228_v2 = vld [vmem:[%s2888_s1 + $0x108] sm:$0xff]   ;;  %v2236_v14 = vld [vmem:[%s2888_s1 + $0x190] sm:$0xff]  }
  0x16   : > { %2029 = vmatprep.subr.bf16.mxu1 %v2204_v17  ;;  %v349_v48 = vrot.slane %v347_v42, 1  ;;  %v337_v49 = vrot.slane %v335_v44, 1  ;;  %v1785_v63 = vcombine.high %v2457_v57, %v2460_v58  ;;  %v1784_v1 = vcombine.low %v2457_v57, %v2460_v58  ;;  %v2232_v3 = vld [vmem:[%s2888_s1 + $0x188] sm:$0xff]   ;;  %v2488_v15 = vld [vmem:[%s2417_s6 + $0x30] sm:$0xff]  ;;  %v2491_v16 = vld [vmem:[%s2417_s6 + $0x38] sm:$0xff] }
  0x17   : > { %v354_v50 = vrot.slane %v352_v46, 1  ;;  %v342_v51 = vrot.slane %v340_v47, 1  ;;  %v2518_v36 = vcombine.high %v2427_v33, %v2430_v34  ;;  %v257_v42 = vld [vmem:[%s2417_s6 + $0x48] sm:$0x11] }
  0x18   : > { %1984 = vmatpush3.bf16.msra.mxu0 %v2205_v18  ;;  %v350_v54 = vor.u32 %v349_v48, %v345_v41  ;;  %v338_v55 = vor.u32 %v337_v49, %v333_v43  ;;  %v368_v5 = vshll.u32 %v1785_v63, 16  ;;  %v360_v6 = vshll.u32 %v1784_v1, 16  ;;  %v2234_v18 = vld [vmem:[%s2888_s1 + $0x110] sm:$0xff]   ;;  %v2528_v41 = vld [vmem:[%s2417_s6 + $0x40] sm:$0xff]  ;;  %v2249_v48 = vld [vmem:[%s2888_s1 + $0x168] sm:$0xff]  }
  0x19   : > { %2030 = vmatpush3.bf16.msra.mxu1 %v2206_v19  ;;  %1985 = vmatprep.subr.bf16.mxu0 %v2207_v20  ;;  %v366_v4 = vor.u32 %v364_v59, %v354_v50  ;;  %v358_v7 = vor.u32 %v356_v60, %v342_v51  ;;  %v380_v12 = vshrl.u32 %v1785_v63, 16  ;;  %v1787_v19 = vcombine.high %v2488_v15, %v2491_v16 }
  0x1a   : > { %2031 = vmatprep.subr.bf16.mxu1 %v2208_v21  ;;  %v355_v61 = vsel %vm331_vm0, %v350_v54, %v354_v50  ;;  %v343_v62 = vsel %vm331_vm0, %v338_v55, %v342_v51  ;;  %v370_v9 = vrot.slane %v368_v5, 1  ;;  %v362_v10 = vrot.slane %v360_v6, 1  ;;  %v2250_v54 = vld [vmem:[%s2888_s1 + $0x128] sm:$0xff]   ;;  %v2257_v6 = vld [vmem:[%s2888_s1 + $0x1f0] sm:$0xff]  }
  0x1b   : > { %548 = vmatprep.mubr.bf16.mxu0 %v355_v61  ;;  %v1786_v20 = vcombine.low %v2488_v15, %v2491_v16  ;;  %v372_v21 = vshrl.u32 %v1784_v1, 16  ;;  %v1789_v44 = vcombine.high %v2528_v41, %v257_v42  ;;  %v2537_v46 = vcombine.low %v2528_v41, %v257_v42  ;;  %v2251_v61 = vld [vmem:[%s2888_s1 + $0x1e8] sm:$0xff]  }
  0x1c   : > { %1986 = vmatpush3.bf16.msra.mxu0 %v2209_v22  ;;  %v371_v13 = vsel %vm331_vm0, %v366_v4, %v370_v9  ;;  %v363_v17 = vsel %vm331_vm0, %v358_v7, %v362_v10  ;;  %v2238_v22 = vld [vmem:[%s2888_s1 + $0x158] sm:$0xff]   ;;  %v1807_v49 = vcombine.high %v2528_v41, %v2528_v41  ;;  %v866_v50 = vshll.u32 %v2518_v36, 16 }
  0x1d   : > { %2032 = vmatpush3.bf16.msra.mxu1 %v2210_v23  ;;  %1987 = vmatprep.subr.bf16.mxu0 %v2211_v24  ;;  %v382_v23 = vor.u32 %v380_v12, %v370_v9  ;;  %v384_v24 = vshll.u32 %v1787_v19, 16  ;;  %v388_v47 = vshrl.u32 %v1786_v20, 16  ;;  %v407_v55 = vshrl.u32 %v1789_v44, 16  ;;  %v2259_v12 = vld [vmem:[%s2888_s1 + $0x178] sm:$0xff]  }
  0x1e   : > { %2033 = vmatprep.subr.bf16.mxu1 %v2212_v25  ;;  %v376_v25 = vshll.u32 %v1786_v20, 16  ;;  %v1856_v7 = vcombine.low %v2427_v33, %v2430_v34  ;;  %v1806_v9 = vcombine.low %v2528_v41, %v2528_v41  ;;  %v404_v33 = vshrl.u32 %v2537_v46, 16 }
  0x20   : > { %1988 = vmatpush3.bf16.msra.mxu0 %v2213_v26  ;;  %v2240_v26 = vld [vmem:[%s2888_s1 + $0x118] sm:$0xff]  }
  0x21   : > { %2034 = vmatpush3.bf16.msra.mxu1 %v2214_v27  ;;  %1989 = vmatprep.subr.bf16.mxu0 %v2215_v28  ;;  %v2241_v27 = vld [vmem:[%s2888_s1 + $0x1d8] sm:$0xff]   ;;  %v386_v28 = vrot.slane %v384_v24, 1 }
  0x22   : > { %2035 = vmatprep.subr.bf16.mxu1 %v2216_v29  ;;  %v374_v29 = vor.u32 %v372_v21, %v362_v10  ;;  %v2258_v10 = vld [vmem:[%s2888_s1 + $0x1b0] sm:$0xff]  }
  0x24   : > { %1990 = vmatpush3.bf16.msra.mxu0 %v2217_v30  ;;  %v378_v30 = vrot.slane %v376_v25, 1 }
  0x25   : > { %2036 = vmatpush3.bf16.msra.mxu1 %v2218_v31  ;;  %2067 = vmatprep.subr.bf16.mxu0 %v2223_v40  ;;  %v2242_v31 = vld [vmem:[%s2888_s1 + $0x198] sm:$0xff]   ;;  %v2245_v40 = vld [vmem:[%s2888_s1 + $0x1e0] sm:$0xff]  }
  0x26   : > { %2113 = vmatprep.subr.bf16.mxu1 %v2225_v45  ;;  %v379_v43 = vsel %vm331_vm0, %v374_v29, %v378_v30  ;;  %v2247_v45 = vld [vmem:[%s2888_s1 + $0x1a0] sm:$0xff]   ;;  %v390_v59 = vor.u32 %v388_v47, %v378_v30  ;;  %v2605_v29 = vcombine.low %v2491_v16, %v2528_v41 }
  0x27   : > { %549 = vmatmul.mubr.bf16.vlgmr.msra.gmra.mrb[0].mxu0 %v343_v62  ;;  %v2252_v62 = vld [vmem:[%s2888_s1 + $0x1a8] sm:$0xff]  }
  0x28   : > { %729 = vmatmul.mubr.bf16.vlgmr.msra.gmra.mrb[0].mxu1 %v1780_v37  ;;  %2068 = vmatpush3.bf16.msra.mxu0 %v2224_v52  ;;  %v387_v37 = vsel %vm331_vm0, %v382_v23, %v386_v28  ;;  %v400_v52 = vshll.u32 %v1789_v44, 16  ;;  %v1861_v23 = vcombine.high %v2460_v58, %v2488_v15  ;;  %v895_v47 = vshll.u32 %v2605_v29, 16 }
  0x29   : > { %736 = vmatprep.mubr.bf16.mxu1 %v1783_v38  ;;  %2114 = vmatpush3.bf16.msra.mxu1 %v2226_v53  ;;  %v2244_v38 = vld [vmem:[%s2888_s1 + $0x120] sm:$0xff]   ;;  %v392_v53 = vshll.u32 %v2537_v46, 16  ;;  %v1860_v46 = vcombine.low %v2460_v58, %v2488_v15 }
  0x2a   : > { %2115 = vmatprep.subr.bf16.mxu1 %v2230_v0  ;;  %2069 = vmatprep.subr.bf16.mxu0 %v2227_v56  ;;  %v402_v56 = vrot.slane %v400_v52, 1  ;;  %v897_v52 = vrot.slane %v895_v47, 1 }
  0x2b   : > { %556 = vmatprep.mubr.bf16.mxu0 %v371_v13  ;;  %v394_v60 = vrot.slane %v392_v53, 1  ;;  %v2260_v13 = vld [vmem:[%s2888_s1 + $0x138] sm:$0xff]   ;;  %v907_v53 = vshrl.u32 %v2605_v29, 16  ;;  %v879_v15 = vshll.u32 %v1860_v46, 16 }
  0x2c   : > { %2070 = vmatpush3.bf16.msra.mxu0 %v2228_v2  ;;  %v2255_v2 = vld [vmem:[%s2888_s1 + $0x130] sm:$0xff]   ;;  %v409_v5 = vor.u32 %v407_v55, %v402_v56 }
  0x2d   : > { %2116 = vmatpush3.bf16.msra.mxu1 %v2232_v3  ;;  %2071 = vmatprep.subr.bf16.mxu0 %v2233_v8  ;;  %v864_v3 = vshrl.u32 %v2518_v36, 16  ;;  %v395_v4 = vsel %vm331_vm0, %v390_v59, %v394_v60  ;;  %v909_v59 = vor.u32 %v907_v53, %v897_v52 }
  0x2e   : > { %2117 = vmatprep.subr.bf16.mxu1 %v2235_v11  ;;  %v868_v11 = vrot.slane %v866_v50, 1  ;;  %v1863_v50 = vcombine.high %v2491_v16, %v2528_v41 }
  0x2f   : > { %557 = vmatmul.mubr.bf16.gmra.mrb[4].mxu0 %v363_v17  ;;  %v2591_v17 = vcombine.low %v2433_v35, %v2457_v57 }
  0x30   : > { %737 = vmatmul.mubr.bf16.gmra.mrb[4].mxu1 %v1782_v39  ;;  %2072 = vmatpush3.bf16.msra.mxu0 %v2234_v18  ;;  %v396_v39 = vshrl.u32 %v1787_v19, 16  ;;  %v854_v18 = vshll.u32 %v1856_v7, 16 }
  0x31   : > { %744 = vmatprep.mubr.bf16.mxu1 %v1785_v63  ;;  %2118 = vmatpush3.bf16.msra.mxu1 %v2236_v14  ;;  %v2557_v63 = vcombine.high %v2433_v35, %v2457_v57  ;;  %v2261_v14 = vld [vmem:[%s2888_s1 + $0x1f8] sm:$0xff]   ;;  %v1157_v25 = vrot.slane %v2591_v17, 1  ;;  %v859_v36 = vshll.u32 %v2591_v17, 16  ;;  %v875_v58 = vshrl.u32 %v2591_v17, 16 }
  0x32   : > { %2073 = vmatprep.subr.bf16.mxu0 %v2238_v22  ;;  %2119 = vmatprep.subr.bf16.mxu1 %v2241_v27  ;;  %v398_v51 = vor.u32 %v396_v39, %v386_v28  ;;  %v1116_v22 = vld [vmem:[%s2417_s6 + $0x8] sm:$0xee]  ;;  %v852_v27 = vshrl.u32 %v1856_v7, 16  ;;  %v1164_v28 = vrot.slane %v1861_v23, 1 }
  0x33   : > { %564 = vmatprep.mubr.bf16.mxu0 %v387_v37  ;;  %v871_v8 = vshll.u32 %v2557_v63, 16  ;;  %v1914_v24 = vcombine.low %v1116_v22, %v2430_v34  ;;  %v1915_v35 = vcombine.high %v1116_v22, %v2430_v34  ;;  %v1160_v57 = vrot.slane %v2557_v63, 1 }
  0x34   : > { %2074 = vmatpush3.bf16.msra.mxu0 %v2240_v26  ;;  %v403_v0 = vsel %vm331_vm0, %v398_v51, %v402_v56  ;;  %v406_v26 = vor.u32 %v404_v33, %v394_v60  ;;  %v883_v37 = vshrl.u32 %v2557_v63, 16  ;;  %v1162_v51 = vrot.slane %v1860_v46, 1 }
  0x35   : > { %2120 = vmatpush3.bf16.msra.mxu1 %v2242_v31  ;;  %2075 = vmatprep.subr.bf16.mxu0 %v2243_v32  ;;  %v873_v21 = vrot.slane %v871_v8, 1  ;;  %v1156_v30 = vrot.slane %v1914_v24, 1  ;;  %v1159_v31 = vrot.slane %v1915_v35, 1  ;;  %v856_v32 = vrot.slane %v854_v18, 1 }
  0x36   : > { %2121 = vmatprep.subr.bf16.mxu1 %v2245_v40  ;;  %v1165_v42 = vsel %vm1155_vm1, %v1160_v57, %v1164_v28  ;;  %v1163_v41 = vsel %vm1155_vm1, %v1157_v25, %v1162_v51 }
  0x37   : > { %565 = vmatmul.mubr.bf16.gmra.mrb[8].mxu0 %v379_v43  ;;  %v1161_v39 = vsel %vm1155_vm1, %v1159_v31, %v1160_v57  ;;  %v1158_v40 = vsel %vm1155_vm1, %v1156_v30, %v1157_v25  ;;  %v2614_v43 = vld [vmem:[%s2417_s6 + $0x48] ss:$8 sps:$4 sm:$0x1f]   ;;  %v857_v44 = vor.u32 %v856_v32, %v852_v27 }
  0x38   : > { %745 = vmatmul.mubr.bf16.gmra.mrb[8].mxu1 %v1784_v1  ;;  %2076 = vmatpush3.bf16.msra.mxu0 %v2244_v38  ;;  %v2253_v1 = vld [vmem:[%s2888_s1 + $0x170] sm:$0xff]   ;;  %v887_v38 = vshll.u32 %v1861_v23, 16  ;;  %v911_v55 = vshll.u32 %v2614_v43, 16  ;;  %v923_v35 = vshrl.u32 %v2614_v43, 16 }
  0x39   : > { %752 = vmatprep.mubr.bf16.mxu1 %v1787_v19  ;;  %2122 = vmatpush3.bf16.msra.mxu1 %v2247_v45  ;;  %v2262_v19 = vld [vmem:[%s2888_s1 + $0x1b8] sm:$0xff]   ;;  %v861_v45 = vrot.slane %v859_v36, 1 }
  0x3a   : > { %2077 = vmatprep.subr.bf16.mxu0 %v2249_v48  ;;  %2123 = vmatprep.subr.bf16.mxu1 %v2251_v61  ;;  %v885_v48 = vor.u32 %v883_v37, %v873_v21  ;;  %v899_v61 = vshrl.u32 %v1861_v23, 16  ;;  %v913_v16 = vrot.slane %v911_v55, 1 }
  0x3b   : > { %572 = vmatprep.mubr.bf16.mxu0 %v403_v0  ;;  %v862_v56 = vsel %vm331_vm0, %v857_v44, %v861_v45 }
  0x3c   : > { %2078 = vmatpush3.bf16.msra.mxu0 %v2250_v54  ;;  %v1168_v54 = vrot.slane %v1863_v50, 1  ;;  %v914_v0 = vsel %vm331_vm0, %v909_v59, %v913_v16  ;;  %v925_v57 = vor.u32 %v923_v35, %v913_v16 }
  0x3d   : > { %2124 = vmatpush3.bf16.msra.mxu1 %v2252_v62  ;;  %2079 = vmatprep.subr.bf16.mxu0 %v2253_v1  ;;  %v903_v62 = vshll.u32 %v1863_v50, 16  ;;  %v877_v1 = vor.u32 %v875_v58, %v861_v45 }
  0x3e   : > { %2125 = vmatprep.subr.bf16.mxu1 %v2257_v6  ;;  %v1169_v63 = vsel %vm1155_vm1, %v1164_v28, %v1168_v54  ;;  %v1166_v6 = vrot.slane %v2605_v29, 1 }
  0x3f   : > { %573 = vmatmul.mubr.bf16.gmra.mrb[12].mxu0 %v395_v4  ;;  %v905_v4 = vrot.slane %v903_v62, 1 }
  0x40   : > { %753 = vmatmul.mubr.bf16.gmra.mrb[12].mxu1 %v1786_v20  ;;  %580 = vmatprep.mubr.bf16.mxu0 %v409_v5  ;;  %v869_v20 = vor.u32 %v868_v11, %v864_v3  ;;  %v2273_v5 = vld [vmem:[%s2417_s6 + $0x4c] ss:$8 sps:$4 sm:$0x1f]   ;;  %v915_v11 = vshrl.u32 %v1863_v50, 16  ;;  %v1167_v33 = vsel %vm1155_vm1, %v1162_v51, %v1166_v6  ;;  %s2160_s6 = smul.u32 36, %s2911_s16 }
  0x41   : > { %760 = vmatprep.mubr.bf16.mxu1 %v1807_v49  ;;  %2126 = vmatpush3.bf16.msra.mxu1 %v2258_v10  ;;  %v889_v49 = vrot.slane %v887_v38, 1  ;;  %v1172_v7 = vrot.slane %v2273_v5, 1  ;;  %v926_v23 = vshrl.u32 %v2273_v5, 16 }
  0x42   : > { %2080 = vmatpush3.bf16.msra.mxu0 %v2255_v2  ;;  %2127 = vmatprep.subr.bf16.mxu1 %v2261_v14  ;;  %v874_v34 = vsel %vm331_vm0, %v869_v20, %v873_v21  ;;  %v881_v2 = vrot.slane %v879_v15, 1  ;;  %v917_v17 = vor.u32 %v915_v11, %v905_v4  ;;  %s2795_s8 = scalar_lea.vmem %s2889_s2, %s2160_s6 }
  0x43   : > { %2081 = vmatprep.subr.bf16.mxu0 %v2259_v12  ;;  %v890_v60 = vsel %vm331_vm0, %v885_v48, %v889_v49  ;;  %v901_v3 = vor.u32 %v899_v61, %v889_v49  ;;  %v919_v12 = vshll.u32 %v2273_v5, 16 }
  0x44   : > { %v882_v8 = vsel %vm331_vm0, %v877_v1, %v881_v2 }
  0x45   : > { %2128 = vmatpush3.bf16.msra.mxu1 %v2262_v19  ;;  %v906_v10 = vsel %vm331_vm0, %v901_v3, %v905_v4  ;;  %v921_v18 = vrot.slane %v919_v12, 1  ;;  %v1170_v19 = vrot.slane %v2614_v43, 1  ;;  %v1407_v43 = vlaneseq }
  0x46   : > { %2082 = vmatpush3.bf16.msra.mxu0 %v2260_v13  ;;  %v1173_v13 = vsel %vm1155_vm1, %v1168_v54, %v1172_v7 }
  0x47   : > { %581 = vmatmul.mubr.bf16.gmra.mrb[16].mxu0 %v406_v26  ;;  %v922_v21 = vsel %vm331_vm0, %v917_v17, %v921_v18  ;;  %v1171_v22 = vsel %vm1155_vm1, %v1166_v6, %v1170_v19  ;;  %v928_v24 = vor.u32 %v926_v23, %v921_v18  ;;  %v2644_v49 = vshrl.u32 %v1407_v43, 7 }
  0x48   : > { %761 = vmatmul.mubr.bf16.gmra.mrb[16].mxu1 %v1806_v9  ;;  %1067 = vmatprep.mubr.bf16.mxu0 %v874_v34  ;;  %v891_v9 = vshrl.u32 %v1860_v46, 16 }
  0x49   : > { %1312 = vmatprep.mubr.bf16.mxu1 %v1161_v39  ;;  %v1409_v59 = vadd.s32 8, %v2644_v49  ;;  %v2659_v6 = vadd.s32 16, %v2644_v49 }
  0x4a   : > { %v893_v14 = vor.u32 %v891_v9, %v881_v2 }
  0x4b   : > { %v2655_v1 = vmul.u32.u64.low 3817748708, %v1409_v59  ;;  %v2656_v2 = vmul.u32.u64.high 3817748708, %v1409_v59, %v2655_v1 }
  0x4c   : > { %v898_v20 = vsel %vm331_vm0, %v893_v14, %v897_v52 }
  0x4d   : > { %v1434_v35 = vshrl.u32 %v2656_v2, 3 }
  0x4f   : > { %1068 = vmatmul.mubr.bf16.vlgmr.msra.gmra.mrb[20].mxu0 %v862_v56 }
  0x50   : > { %1313 = vmatmul.mubr.bf16.vlgmr.msra.gmra.mrb[20].mxu1 %v1158_v40  ;;  %1075 = vmatprep.mubr.bf16.mxu0 %v890_v60 }
  0x51   : > { %1320 = vmatprep.mubr.bf16.mxu1 %v1165_v42 }
  0x57   : > { %1076 = vmatmul.mubr.bf16.gmra.mrb[24].mxu0 %v882_v8 }
  0x58   : > { %1321 = vmatmul.mubr.bf16.gmra.mrb[24].mxu1 %v1163_v41  ;;  %1083 = vmatprep.mubr.bf16.mxu0 %v906_v10  ;;  %v2662_v10 = vadd.s32 24, %v2644_v49 }
  0x59   : > { %1328 = vmatprep.mubr.bf16.mxu1 %v1169_v63 }
  0x5f   : > { %1084 = vmatmul.mubr.bf16.gmra.mrb[28].mxu0 %v898_v20 }
  0x60   : > { %1329 = vmatmul.mubr.bf16.gmra.mrb[28].mxu1 %v1167_v33  ;;  %1091 = vmatprep.mubr.bf16.mxu0 %v922_v21 }
  0x61   : > { %1336 = vmatprep.mubr.bf16.mxu1 %v1173_v13 }
  0x67   : > { %1092 = vmatmul.mubr.bf16.gmra.mrb[32].mxu0 %v914_v0  ;;  %v2652_v63 = vmul.u32.u64.low 3817748708, %v2644_v49  ;;  %v2653_v0 = vmul.u32.u64.high 3817748708, %v2644_v49, %v2652_v63 }
  0x68   : > { %1337 = vmatmul.mubr.bf16.gmra.mrb[32].mxu1 %v1171_v22  ;;  %1099 = vmatprep.mubr.bf16.mxu0 %v928_v24  ;;  %v2674_v23 = vmul.u32.u64.low 3817748708, %v2662_v10  ;;  %v2675_v24 = vmul.u32.u64.high 3817748708, %v2662_v10, %v2674_v23 }
  0x69   : > { %1344 = vmatprep.mubr.bf16.mxu1 %v1172_v7  ;;  %v1423_v22 = vshrl.u32 %v2653_v0, 3  ;;  %v2705_v0 = vadd.s32 56, %v2644_v49 }
  0x6f   : > { %1100 = vmatmul.mubr.bf16.gmra.mrb[36].mxu0 %v925_v57  ;;  %v2679_v57 = vadd.s32 32, %v2644_v49 }
  0x70   : > { %1345 = vmatmul.mubr.bf16.gmra.mrb[36].mxu1 %v1170_v19  ;;  %v2667_v19 = vmul.u32.u64.low 3817748708, %v2659_v6  ;;  %v2668_v20 = vmul.u32.u64.high 3817748708, %v2659_v6, %v2667_v19 }
  0xfa   : > { %v1991_v31 = vpop.f32.mrb[0].mxu0 }
  0xfb   : > { %v2037_v25 = vpop.f32.mrb[0].mxu1  ;;  %v1992_v32 = vpop.f32.mrb[1].mxu0 }
  0xfc   : > { %v2038_v26 = vpop.f32.mrb[1].mxu1  ;;  %v1993_v34 = vadd.f32 %v1992_v32, %v1991_v31  ;;  %v1994_v37 = vpop.f32.mrb[2].mxu0  ;;  %v1424_v31 = vmul.u32 9, %v1423_v22 }
  0xfd   : > { %v2039_v27 = vadd.f32 %v2038_v26, %v2037_v25  ;;  %v2040_v28 = vpop.f32.mrb[2].mxu1  ;;  %v1995_v39 = vpop.f32.mrb[3].mxu0 }
  0xfe   : > { %v2041_v29 = vpop.f32.mrb[3].mxu1  ;;  %v1996_v45 = vadd.f32 %v1995_v39, %v1994_v37 }
  0xff   : > { %v2042_v30 = vadd.f32 %v2041_v29, %v2040_v28  ;;  %v2640_v44 = vadd.f32 %v2039_v27, %v1993_v34  ;;  %v2682_v27 = vadd.s32 40, %v2644_v49  ;;  %v1435_v34 = vmul.u32 9, %v1434_v35 }
 0x101   : > { %v2642_v48 = vadd.f32 %v2042_v30, %v1996_v45 }
 0x102   : > { %v1997_v50 = vpop.f32.mrb[4].mxu0 }
 0x103   : > { %v2043_v36 = vpop.f32.mrb[4].mxu1  ;;  %v1998_v51 = vpop.f32.mrb[5].mxu0 }
 0x104   : > { %v2044_v38 = vpop.f32.mrb[5].mxu1  ;;  %v1999_v53 = vadd.f32 %v1998_v51, %v1997_v50  ;;  %v2000_v54 = vpop.f32.mrb[6].mxu0 }
 0x105   : > { %v2045_v40 = vadd.f32 %v2044_v38, %v2043_v36  ;;  %v2046_v42 = vpop.f32.mrb[6].mxu1  ;;  %v2001_v56 = vpop.f32.mrb[7].mxu0  ;;  %v2685_v37 = vmul.u32.u64.low 3817748708, %v2679_v57  ;;  %v2686_v38 = vmul.u32.u64.high 3817748708, %v2679_v57, %v2685_v37 }
 0x106   : > { %v2047_v46 = vpop.f32.mrb[7].mxu1  ;;  %v2002_v61 = vadd.f32 %v2001_v56, %v2000_v54  ;;  %v2699_v54 = vsub.s32 %v1409_v59, %v1435_v34  ;;  %v2752_v37 = vadd.s32 64, %v2644_v49 }
 0x107   : > { %v2048_v47 = vadd.f32 %v2047_v46, %v2046_v42  ;;  %v2647_v60 = vadd.f32 %v2045_v40, %v1999_v53  ;;  %v1445_v46 = vshrl.u32 %v2668_v20, 3  ;;  %v1425_v53 = vsub.s32 %v2644_v49, %v1424_v31 }
 0x108   : > { %vm1517_vm4 = vcmp.ne.s32.totalorder %v2699_v54, 0  ;;  %vm1526_vm5 = vcmp.lt.s32.totalorder %v2699_v54, 0 }
 0x109   : > { %v2649_v41 = vadd.f32 %v2048_v47, %v2002_v61  ;;  %v2692_v47 = vmul.u32.u64.low 3817748708, %v2682_v27  ;;  %v2693_v50 = vmul.u32.u64.high 3817748708, %v2682_v27, %v2692_v47  ;;  %vm1516_vm2 = vcmp.ne.s32.totalorder %v1425_v53, 0  ;;  %vm2736_vm7 = vmand %vm1526_vm5, %vm1517_vm4 }
 0x10a   : > { %v2003_v3 = vpop.f32.mrb[8].mxu0  ;;  %vm1525_vm3 = vcmp.lt.s32.totalorder %v1425_v53, 0 }
 0x10b   : > { %v2049_v52 = vpop.f32.mrb[8].mxu1  ;;  %v2004_v4 = vpop.f32.mrb[9].mxu0  ;;  %vm2729_vm6 = vmand %vm1525_vm3, %vm1516_vm2 }
 0x10c   : > { %v2050_v55 = vpop.f32.mrb[9].mxu1  ;;  %v2005_v7 = vadd.f32 %v2004_v4, %v2003_v3  ;;  %v2006_v8 = vpop.f32.mrb[10].mxu0  ;;  %v1543_v3 = vadd.s32 9, %v1425_v53 }
 0x10d   : > { %v2051_v58 = vadd.f32 %v2050_v55, %v2049_v52  ;;  %v2052_v15 = vpop.f32.mrb[10].mxu1  ;;  %v2007_v11 = vpop.f32.mrb[11].mxu0  ;;  %v1456_v52 = vshrl.u32 %v2675_v24, 3 }
 0x10e   : > { %v2053_v62 = vpop.f32.mrb[11].mxu1  ;;  %v2008_v14 = vadd.f32 %v2007_v11, %v2006_v8  ;;  %v1478_v11 = vshrl.u32 %v2693_v50, 3 }
 0x10f   : > { %v2054_v16 = vadd.f32 %v2053_v62, %v2052_v15  ;;  %v2664_v13 = vadd.f32 %v2051_v58, %v2005_v7  ;;  %v1446_v58 = vmul.u32 9, %v1445_v46  ;;  %v2702_v15 = vadd.s32 48, %v2644_v49 }
 0x110   : > { %v1457_v63 = vmul.u32 9, %v1456_v52  ;;  %v1467_v7 = vshrl.u32 %v2686_v38, 3  ;;  %v1479_v35 = vmul.u32 9, %v1478_v11 }
 0x111   : > { %v2670_v21 = vadd.f32 %v2054_v16, %v2008_v14 }
 0x112   : > { %v2009_v25 = vpop.f32.mrb[12].mxu0  ;;  %v2776_v47 = vsub.s32 %v2682_v27, %v1479_v35 }
 0x113   : > { %v2055_v5 = vpop.f32.mrb[12].mxu1  ;;  %v2010_v26 = vpop.f32.mrb[13].mxu0 }
 0x114   : > { %v2056_v9 = vpop.f32.mrb[13].mxu1  ;;  %v2011_v28 = vadd.f32 %v2010_v26, %v2009_v25  ;;  %v2012_v29 = vpop.f32.mrb[14].mxu0  ;;  %v1552_v26 = vsel %vm2729_vm6, %v1543_v3, %v1425_v53  ;;  %vm1521_vm2 = vcmp.ne.s32.totalorder %v2776_v47, 0  ;;  %vm1530_vm3 = vcmp.lt.s32.totalorder %v2776_v47, 0 }
 0x115   : > { %v2057_v12 = vadd.f32 %v2056_v9, %v2055_v5  ;;  %v2058_v33 = vpop.f32.mrb[14].mxu1  ;;  %v2013_v32 = vpop.f32.mrb[15].mxu0  ;;  %v2713_v9 = vsub.s32 %v2659_v6, %v1446_v58  ;;  %v1544_v6 = vadd.s32 9, %v2699_v54  ;;  %vm1561_vm13 = vcmp.ne.s32.totalorder %v1552_v26, 8  ;;  %vm2816_vm6 = vmand %vm1530_vm3, %vm1521_vm2 }
 0x116   : > { %v2059_v17 = vpop.f32.mrb[15].mxu1  ;;  %v2014_v40 = vadd.f32 %v2013_v32, %v2012_v29 }
 0x117   : > { %v2060_v18 = vadd.f32 %v2059_v17, %v2058_v33  ;;  %v2688_v39 = vadd.f32 %v2057_v12, %v2011_v28  ;;  %v2717_v12 = vmul.u32.u64.low 3817748708, %v2702_v15  ;;  %v2718_v33 = vmul.u32.u64.high 3817748708, %v2702_v15, %v2717_v12 }
 0x118   : > { %v2721_v17 = vsub.s32 %v2662_v10, %v1457_v63  ;;  %v1468_v10 = vmul.u32 9, %v1467_v7  ;;  %vm1518_vm8 = vcmp.ne.s32.totalorder %v2713_v9, 0  ;;  %vm1527_vm9 = vcmp.lt.s32.totalorder %v2713_v9, 0 }
 0x119   : > { %v2695_v51 = vadd.f32 %v2060_v18, %v2014_v40  ;;  %v2724_v18 = vmul.u32.u64.low 3817748708, %v2705_v0  ;;  %v2725_v19 = vmul.u32.u64.high 3817748708, %v2705_v0, %v2724_v18  ;;  %v1553_v31 = vsel %vm2736_vm7, %v1544_v6, %v2699_v54  ;;  %vm2759_vm12 = vmand %vm1527_vm9, %vm1518_vm8 }
 0x11a   : > { %v2015_v55 = vpop.f32.mrb[16].mxu0  ;;  %vm1519_vm10 = vcmp.ne.s32.totalorder %v2721_v17, 0  ;;  %vm1528_vm11 = vcmp.lt.s32.totalorder %v2721_v17, 0  ;;  %v1546_v34 = vadd.s32 9, %v2721_v17  ;;  %v2764_v46 = vsub.s32 %v2679_v57, %v1468_v10 }
 0x11b   : > { %v2061_v30 = vpop.f32.mrb[16].mxu1  ;;  %v2016_v56 = vpop.f32.mrb[17].mxu0  ;;  %vm2771_vm14 = vmand %vm1528_vm11, %vm1519_vm10  ;;  %v1489_v50 = vshrl.u32 %v2718_v33, 3  ;;  %v1500_v54 = vshrl.u32 %v2725_v19, 3  ;;  %vm1562_vm15 = vcmp.ne.s32.totalorder %v1553_v31, 8 }
 0x11c   : > { %v2062_v36 = vpop.f32.mrb[17].mxu1  ;;  %v2017_v61 = vadd.f32 %v2016_v56, %v2015_v55  ;;  %v2018_v62 = vpop.f32.mrb[18].mxu0  ;;  %v2785_v56 = vmul.u32.u64.low 3817748708, %v2752_v37  ;;  %v2786_v58 = vmul.u32.u64.high 3817748708, %v2752_v37, %v2785_v56  ;;  %vm1520_vm0 = vcmp.ne.s32.totalorder %v2764_v46, 0 }
 0x11d   : > { %v2063_v42 = vadd.f32 %v2062_v36, %v2061_v30  ;;  %v2064_v43 = vpop.f32.mrb[18].mxu1  ;;  %v2019_v1 = vpop.f32.mrb[19].mxu0  ;;  %v1545_v36 = vadd.s32 9, %v2713_v9  ;;  %vm1529_vm1 = vcmp.lt.s32.totalorder %v2764_v46, 0  ;;  %v1490_v63 = vmul.u32 9, %v1489_v50 }
 0x11e   : > { %v2065_v45 = vpop.f32.mrb[19].mxu1  ;;  %v1501_v7 = vmul.u32 9, %v1500_v54  ;;  %vm2807_vm4 = vmand %vm1529_vm1, %vm1520_vm0 }
 0x11f   : > { %v2708_v59 = vadd.f32 %v2063_v42, %v2017_v61  ;;  %v1554_v55 = vsel %vm2759_vm12, %v1545_v36, %v2713_v9 }
 0x120   : > { %vm1563_vm5 = vcmp.ne.s32.totalorder %v1554_v55, 8 }
 0x122   : > { %v2083_v22 = vpop.f32.mrb[20].mxu0 }
 0x123   : > { %v2129_v16 = vpop.f32.mrb[20].mxu1  ;;  %v2084_v24 = vpop.f32.mrb[21].mxu0 }
 0x124   : > { %v2130_v2 = vpop.f32.mrb[21].mxu1  ;;  %v2085_v25 = vadd.f32 %v2084_v24, %v2083_v22  ;;  %v2086_v28 = vpop.f32.mrb[22].mxu0  ;;  %v1548_v22 = vadd.s32 9, %v2776_v47  ;;  %v2821_v24 = vsub.s32 %v2702_v15, %v1490_v63 }
 0x125   : > { %v2131_v4 = vadd.f32 %v2130_v2, %v2129_v16  ;;  %v2132_v5 = vpop.f32.mrb[22].mxu1  ;;  %v2087_v30 = vpop.f32.mrb[23].mxu0  ;;  %v1555_v16 = vsel %vm2771_vm14, %v1546_v34, %v2721_v17 }
 0x126   : > { %v2133_v8 = vpop.f32.mrb[23].mxu1  ;;  %v1107_v38 = vadd.f32 %v2085_v25, %v2640_v44  ;;  %v2088_v40 = vadd.f32 %v2087_v30, %v2086_v28  ;;  %v2825_v28 = vsub.s32 %v2705_v0, %v1501_v7  ;;  %vm1564_vm7 = vcmp.ne.s32.totalorder %v1555_v16, 8 }
 0x127   : > { %v2134_v14 = vadd.f32 %v2133_v8, %v2132_v5  ;;  %v1557_v15 = vsel %vm2816_vm6, %v1548_v22, %v2776_v47  ;;  %vm1522_vm8 = vcmp.ne.s32.totalorder %v2821_v24, 0  ;;  %vm1531_vm9 = vcmp.lt.s32.totalorder %v2821_v24, 0 }
 0x128   : > { %v1352_v52 = vadd.f32 %v2131_v4, %v1107_v38  ;;  %v1108_v57 = vadd.f32 %v2088_v40, %v2642_v48  ;;  %vm1523_vm10 = vcmp.ne.s32.totalorder %v2825_v28, 0  ;;  %vm1532_vm11 = vcmp.lt.s32.totalorder %v2825_v28, 0 }
 0x129   : > { %vm1566_vm14 = vcmp.ne.s32.totalorder %v1557_v15, 8 }
 0x12a   : > { %v1588_v61 = vsel %vm1561_vm13, %v1352_v52, 0.0  ;;  %v1353_v27 = vadd.f32 %v2134_v14, %v1108_v57  ;;  %v2089_v62 = vpop.f32.mrb[24].mxu0  ;;  %v1547_v14 = vadd.s32 9, %v2764_v46  ;;  %vm2846_vm13 = vmand %vm1531_vm9, %vm1522_vm8 }
 0x12b   : > { %v2135_v29 = vpop.f32.mrb[24].mxu1  ;;  %v2090_v48 = vpop.f32.mrb[25].mxu0  ;;  %v1612_v8 = vmul.f32 %v1588_v61, %v1588_v61 }
 0x12c   : > { %v2136_v32 = vpop.f32.mrb[25].mxu1  ;;  %v1955_v1 = vpack.c.bf16 %v1353_v27, %v1352_v52  ;;  %v1589_v2 = vsel %vm1562_vm15, %v1353_v27, 0.0  ;;  %v2091_v3 = vadd.f32 %v2090_v48, %v2089_v62  ;;  %v2092_v4 = vpop.f32.mrb[26].mxu0  ;;  %v1556_v36 = vsel %vm2807_vm4, %v1547_v14, %v2764_v46  ;;  %vm2853_vm15 = vmand %vm1532_vm11, %vm1523_vm10 }
 0x12d   : > { %v2137_v42 = vadd.f32 %v2136_v32, %v2135_v29  ;;  %v2138_v45 = vpop.f32.mrb[26].mxu1  ;;  %v1597_v9 = vadd.f32 %v1589_v2, %v1588_v61  ;;  %v1613_v11 = vmul.f32 %v1589_v2, %v1589_v2  ;;  %v2093_v12 = vpop.f32.mrb[27].mxu0  ;;  %v1511_v29 = vshrl.u32 %v2786_v58, 3 }
 0x12e   : > { %v2139_v49 = vpop.f32.mrb[27].mxu1  ;;  %1956 = vst [vmem:[%s2795_s8] sm:$0xff] %v1955_v1   ;;  %v1109_v17 = vadd.f32 %v2091_v3, %v2647_v60  ;;  %v2094_v18 = vadd.f32 %v2093_v12, %v2092_v4  ;;  %vm1565_vm12 = vcmp.ne.s32.totalorder %v1556_v36, 8  ;;  %v1549_v58 = vadd.s32 9, %v2821_v24 }
 0x12f   : > { %v2140_v53 = vadd.f32 %v2139_v49, %v2138_v45  ;;  %v1621_v23 = vadd.f32 %v1613_v11, %v1612_v8  ;;  %v1512_v52 = vmul.u32 9, %v1511_v29  ;;  %v1550_v48 = vadd.s32 9, %v2825_v28 }
 0x130   : > { %v1354_v35 = vadd.f32 %v2137_v42, %v1109_v17  ;;  %v1110_v25 = vadd.f32 %v2094_v18, %v2649_v41  ;;  %v1558_v8 = vsel %vm2846_vm13, %v1549_v58, %v2821_v24 }
 0x131   : > { %v1559_v14 = vsel %vm2853_vm15, %v1550_v48, %v2825_v28  ;;  %vm1567_vm2 = vcmp.ne.s32.totalorder %v1558_v8, 8 }
 0x132   : > { %v1590_v30 = vsel %vm1563_vm5, %v1354_v35, 0.0  ;;  %v1355_v31 = vadd.f32 %v2140_v53, %v1110_v25  ;;  %v2095_v32 = vpop.f32.mrb[28].mxu0  ;;  %vm1568_vm3 = vcmp.ne.s32.totalorder %v1559_v14, 8 }
 0x133   : > { %v2141_v5 = vpop.f32.mrb[28].mxu1  ;;  %v1598_v34 = vadd.f32 %v1597_v9, %v1590_v30  ;;  %v1614_v41 = vmul.f32 %v1590_v30, %v1590_v30  ;;  %v2096_v38 = vpop.f32.mrb[29].mxu0 }
 0x134   : > { %v2142_v33 = vpop.f32.mrb[29].mxu1  ;;  %v1960_v0 = vpack.c.bf16 %v1355_v31, %v1354_v35  ;;  %v1591_v40 = vsel %vm1564_vm7, %v1355_v31, 0.0  ;;  %v2097_v42 = vadd.f32 %v2096_v38, %v2095_v32  ;;  %v2098_v43 = vpop.f32.mrb[30].mxu0 }
 0x135   : > { %v2143_v19 = vadd.f32 %v2142_v33, %v2141_v5  ;;  %v2144_v6 = vpop.f32.mrb[30].mxu1  ;;  %v1622_v46 = vadd.f32 %v1621_v23, %v1614_v41  ;;  %v1599_v49 = vadd.f32 %v1598_v34, %v1591_v40  ;;  %v1615_v44 = vmul.f32 %v1591_v40, %v1591_v40  ;;  %v2099_v50 = vpop.f32.mrb[31].mxu0 }
 0x136   : > { %v2145_v10 = vpop.f32.mrb[31].mxu1  ;;  %1972 = vst [vmem:[%s2795_s8 + $0x8] sm:$0xff] %v1960_v0   ;;  %v1111_v57 = vadd.f32 %v2097_v42, %v2664_v13  ;;  %v2100_v53 = vadd.f32 %v2099_v50, %v2098_v43 }
 0x137   : > { %v2146_v26 = vadd.f32 %v2145_v10, %v2144_v6  ;;  %v1623_v56 = vadd.f32 %v1622_v46, %v1615_v44 }
 0x138   : > { %v1356_v27 = vadd.f32 %v2143_v19, %v1111_v57  ;;  %v1112_v62 = vadd.f32 %v2100_v53, %v2670_v21  ;;  %v1513_v21 = vsub.s32 %v2752_v37, %v1512_v52 }
 0x13a   : > { %v1592_v1 = vsel %vm1565_vm12, %v1356_v27, 0.0  ;;  %v1357_v2 = vadd.f32 %v2146_v26, %v1112_v62  ;;  %v2101_v3 = vpop.f32.mrb[32].mxu0  ;;  %vm1524_vm0 = vcmp.ne.s32.totalorder %v1513_v21, 0  ;;  %vm1533_vm1 = vcmp.lt.s32.totalorder %v1513_v21, 0 }
 0x13b   : > { %v2147_v45 = vpop.f32.mrb[32].mxu1  ;;  %v1600_v4 = vadd.f32 %v1599_v49, %v1592_v1  ;;  %v1616_v5 = vmul.f32 %v1592_v1, %v1592_v1  ;;  %v2102_v7 = vpop.f32.mrb[33].mxu0  ;;  %v1551_v28 = vadd.s32 9, %v1513_v21  ;;  %vm2867_vm4 = vmand %vm1533_vm1, %vm1524_vm0 }
 0x13c   : > { %v2148_v47 = vpop.f32.mrb[33].mxu1  ;;  %v1965_v9 = vpack.c.bf16 %v1357_v2, %v1356_v27  ;;  %v1593_v11 = vsel %vm1566_vm14, %v1357_v2, 0.0  ;;  %v2103_v12 = vadd.f32 %v2102_v7, %v2101_v3  ;;  %v2104_v33 = vpop.f32.mrb[34].mxu0 }
 0x13d   : > { %v2149_v54 = vadd.f32 %v2148_v47, %v2147_v45  ;;  %v2150_v55 = vpop.f32.mrb[34].mxu1  ;;  %v1624_v17 = vadd.f32 %v1623_v56, %v1616_v5  ;;  %v1601_v18 = vadd.f32 %v1600_v4, %v1593_v11  ;;  %v1617_v19 = vmul.f32 %v1593_v11, %v1593_v11  ;;  %v2105_v20 = vpop.f32.mrb[35].mxu0 }
 0x13e   : > { %v2151_v61 = vpop.f32.mrb[35].mxu1  ;;  %1973 = vst [vmem:[%s2795_s8 + $0x10] sm:$0xff] %v1965_v9   ;;  %v1113_v22 = vadd.f32 %v2103_v12, %v2688_v39  ;;  %v2106_v23 = vadd.f32 %v2105_v20, %v2104_v33 }
 0x13f   : > { %v2152_v13 = vadd.f32 %v2151_v61, %v2150_v55  ;;  %v1625_v24 = vadd.f32 %v1624_v17, %v1617_v19 }
 0x140   : > { %v1358_v25 = vadd.f32 %v2149_v54, %v1113_v22  ;;  %v1114_v26 = vadd.f32 %v2106_v23, %v2695_v51  ;;  %v1560_v51 = vsel %vm2867_vm4, %v1551_v28, %v1513_v21 }
 0x141   : > { %vm1569_vm5 = vcmp.ne.s32.totalorder %v1560_v51, 8 }
 0x142   : > { %v1594_v30 = vsel %vm1567_vm2, %v1358_v25, 0.0  ;;  %v1359_v31 = vadd.f32 %v2152_v13, %v1114_v26  ;;  %v2107_v39 = vpop.f32.mrb[36].mxu0 }
 0x143   : > { %v2153_v37 = vpop.f32.mrb[36].mxu1  ;;  %v1602_v32 = vadd.f32 %v1601_v18, %v1594_v30  ;;  %v1618_v36 = vmul.f32 %v1594_v30, %v1594_v30  ;;  %v2108_v15 = vpop.f32.mrb[37].mxu0 }
 0x144   : > { %v2154_v6 = vpop.f32.mrb[37].mxu1  ;;  %v1970_v34 = vpack.c.bf16 %v1359_v31, %v1358_v25  ;;  %v1595_v41 = vsel %vm1568_vm3, %v1359_v31, 0.0  ;;  %v2109_v38 = vadd.f32 %v2108_v15, %v2107_v39  ;;  %v2110_v0 = vpop.f32.mrb[38].mxu0 }
 0x145   : > { %v2155_v10 = vadd.f32 %v2154_v6, %v2153_v37  ;;  %v2156_v60 = vpop.f32.mrb[38].mxu1  ;;  %v1626_v40 = vadd.f32 %v1625_v24, %v1618_v36  ;;  %v1603_v42 = vadd.f32 %v1602_v32, %v1595_v41  ;;  %v1619_v43 = vmul.f32 %v1595_v41, %v1595_v41  ;;  %v2111_v45 = vpop.f32.mrb[39].mxu0 }
 0x146   : > { %v2157_v35 = vpop.f32.mrb[39].mxu1  ;;  %1974 = vst [vmem:[%s2795_s8 + $0x18] sm:$0xff] %v1970_v34   ;;  %v1115_v46 = vadd.f32 %v2109_v38, %v2708_v59 }
 0x147   : > { %v1627_v49 = vadd.f32 %v1626_v40, %v1619_v43 }
 0x148   : > { %v1360_v44 = vadd.f32 %v2155_v10, %v1115_v46 }
 0x14a   : > { %v1951_v50 = vpack.c.bf16 %v1360_v44, %v1360_v44  ;;  %v1596_v47 = vsel %vm1569_vm5, %v1360_v44, 0.0 }
 0x14b   : > { %v1604_v52 = vadd.f32 %v1603_v42, %v1596_v47  ;;  %v1620_v57 = vmul.f32 %v1596_v47, %v1596_v47 }
 0x14c   : > { %1406 = vst [vmem:[%s2795_s8 + $0x20] sm:$0xf] %v1951_v50 }
 0x14d   : > { %v1605_v53 = vrot.slane %v1604_v52, 4  ;;  %v1628_v54 = vadd.f32 %v1627_v49, %v1620_v57 }
 0x14f   : > { %v1606_v55 = vadd.f32 %v1605_v53, %v1604_v52  ;;  %v1629_v56 = vrot.slane %v1628_v54, 4 }
 0x151   : > { %v1607_v58 = vrot.slane %v1606_v55, 2  ;;  %v1630_v61 = vadd.f32 %v1629_v56, %v1628_v54 }
 0x153   : > { %v1608_v27 = vadd.f32 %v1607_v58, %v1606_v55  ;;  %v1631_v62 = vrot.slane %v1630_v61, 2 }
 0x155   : > { %v1609_v16 = vrot.slane %v1608_v27, 1  ;;  %v1632_v59 = vadd.f32 %v1631_v62, %v1630_v61 }
 0x157   : > { %v1610_v13 = vadd.f32 %v1609_v16, %v1608_v27  ;;  %v1633_v48 = vrot.slane %v1632_v59, 1 }
 0x159   : > { %1611 = vst [vmem:[%s211_s11] sm:$0x1] %v1610_v13  ;;  %v1634_v63 = vadd.f32 %v1633_v48, %v1632_v59 }
 0x15b   : > { %1635 = vst [vmem:[%s214_s14] sm:$0x1] %v1634_v63 }
 0x15c PF: > { %s15_s15 = sadd.s32 1, %s2282_s15  }
 0x15d   : > { %p12_p4 = scmp.ge.s32.totalorder %s15_s15, 4  }
 0x15f   :  { %14 = sbr.rel (!%p12_p4) target bundleno = 1 (0x1), region = 85 }

// kernel: discriminator_forward.13
= control target key start
LH: loop header
LB: loop body
LE: loop exit
PB: predicated region body
PF: predicated region fallthrough
CT: control target
= control target key end

     0   :  { %v91_v0 = vlaneseq  ;;  %vm413_vm14 = vcmask 1043456   ;;  %s1026_s0 = inlined_call_operand.vmem [shape: bf16[8,20,256], index: 0, kind: input, shape index: {}]   ;;  %s1027_s1 = inlined_call_operand.vmem [shape: f32[1,256], index: 1, kind: input, shape index: {}]   ;;  %s1028_s2 = inlined_call_operand.vmem [shape: f32[1,256], index: 2, kind: input, shape index: {}]   ;;  %s1029_s3 = inlined_call_operand.vmem [shape: f32[20,256], index: 3, kind: input, shape index: {}]   ;;  %s1030_s4 = inlined_call_operand.vmem [shape: f32[8,128], index: 4, kind: output, shape index: {}]  }
   0x1   :  { %v20_v1 = vld [vmem:[%s1026_s0 + $0x18] sm:$0xff]  ;;  %v17_v3 = vld [vmem:[%s1026_s0] sm:$0xff]  ;;  %v18_v15 = vld [vmem:[%s1026_s0 + $0x8] sm:$0xff] }
   0x2   :  { %v691_v2 = vshrl.u32 %v91_v0, 7  ;;  %v47_v4 = vunpack.c.l.bf16 %v20_v1  ;;  %v48_v5 = vunpack.c.h.bf16 %v20_v1  ;;  %v89_v6 = vld [vmem:[%s1027_s1] sm:$0x3]  ;;  %v41_v8 = vunpack.c.l.bf16 %v17_v3  ;;  %v713_v16 = vld [vmem:[%s1026_s0 + $0x38] sm:$0xff]  ;;  %v718_v17 = vld [vmem:[%s1026_s0 + $0x30] sm:$0xff] }
   0x3   :  { %v149_v7 = vld [vmem:[%s1028_s2] sm:$0x3]  ;;  %v42_v9 = vunpack.c.h.bf16 %v17_v3  ;;  %v43_v18 = vunpack.c.l.bf16 %v18_v15  ;;  %v44_v19 = vunpack.c.h.bf16 %v18_v15  ;;  %v55_v20 = vunpack.c.l.bf16 %v713_v16  ;;  %v725_v22 = vld [vmem:[%s1026_s0 + $0x48] sm:$0xff]  ;;  %v772_v63 = vld [vmem:[%s1029_s3 + $0x10] sm:$0xff] }
   0x4   :  { %v21_v10 = vld [vmem:[%s1026_s0 + $0x20] sm:$0xff]  ;;  %v93_v11 = vsub.s32 0, %v691_v2  ;;  %v97_v12 = vsub.s32 1, %v691_v2  ;;  %v56_v21 = vunpack.c.h.bf16 %v713_v16  ;;  %v53_v27 = vunpack.c.l.bf16 %v718_v17  ;;  %v759_v44 = vld [vmem:[%s1029_s3 + $0x8] sm:$0xff]  ;;  %v777_v1 = vld [vmem:[%s1029_s3 + $0x18] sm:$0xff] }
   0x5   :  { %v49_v13 = vunpack.c.l.bf16 %v21_v10  ;;  %v50_v14 = vunpack.c.h.bf16 %v21_v10  ;;  %v54_v28 = vunpack.c.h.bf16 %v718_v17  ;;  %v59_v29 = vunpack.c.l.bf16 %v725_v22  ;;  %v754_v43 = vld [vmem:[%s1029_s3] sm:$0xff] }
   0x6   :  { %v727_v23 = vrot.slane %v89_v6, %v93_v11  ;;  %v729_v24 = vrot.slane %v89_v6, %v97_v12  ;;  %v731_v25 = vrot.slane %v149_v7, %v93_v11  ;;  %v733_v26 = vrot.slane %v149_v7, %v97_v12 }
   0x7   :  { %v60_v30 = vunpack.c.h.bf16 %v725_v22 }
   0x8   :  { %v107_v31 = vmul.f32 %v727_v23, %v47_v4  ;;  %v108_v32 = vmul.f32 %v729_v24, %v48_v5  ;;  %v101_v33 = vmul.f32 %v727_v23, %v41_v8  ;;  %v102_v34 = vmul.f32 %v729_v24, %v42_v9 }
   0x9   :  { %v109_v35 = vmul.f32 %v727_v23, %v49_v13  ;;  %v110_v36 = vmul.f32 %v729_v24, %v50_v14  ;;  %v103_v37 = vmul.f32 %v727_v23, %v43_v18  ;;  %v104_v38 = vmul.f32 %v729_v24, %v44_v19 }
   0xa   :  { %v167_v39 = vadd.f32 %v731_v25, %v107_v31  ;;  %v168_v40 = vadd.f32 %v733_v26, %v108_v32  ;;  %v161_v41 = vadd.f32 %v731_v25, %v101_v33  ;;  %v162_v42 = vadd.f32 %v733_v26, %v102_v34 }
   0xb   :  { %v169_v45 = vadd.f32 %v731_v25, %v109_v35  ;;  %v170_v46 = vadd.f32 %v733_v26, %v110_v36  ;;  %v163_v47 = vadd.f32 %v731_v25, %v103_v37  ;;  %v164_v48 = vadd.f32 %v733_v26, %v104_v38 }
   0xc   :  { %vm215_vm0 = vcmp.gt.f32.partialorder %v167_v39, 0.0  ;;  %vm216_vm1 = vcmp.gt.f32.partialorder %v168_v40, 0.0  ;;  %v263_v49 = vmul.f32 0.2, %v167_v39  ;;  %v264_v50 = vmul.f32 0.2, %v168_v40 }
   0xd   :  { %vm209_vm2 = vcmp.gt.f32.partialorder %v161_v41, 0.0  ;;  %vm210_vm3 = vcmp.gt.f32.partialorder %v162_v42, 0.0  ;;  %v257_v51 = vmul.f32 0.2, %v161_v41  ;;  %v258_v52 = vmul.f32 0.2, %v162_v42 }
   0xe   :  { %v311_v53 = vsel %vm215_vm0, %v167_v39, %v263_v49  ;;  %v312_v54 = vsel %vm216_vm1, %v168_v40, %v264_v50  ;;  %vm217_vm4 = vcmp.gt.f32.partialorder %v169_v45, 0.0  ;;  %vm218_vm5 = vcmp.gt.f32.partialorder %v170_v46, 0.0 }
   0xf   :  { %v365_v55 = vmul.f32 %v754_v43, %v311_v53  ;;  %v366_v56 = vmul.f32 %v759_v44, %v312_v54  ;;  %v305_v57 = vsel %vm209_vm2, %v161_v41, %v257_v51  ;;  %v306_v58 = vsel %vm210_vm3, %v162_v42, %v258_v52  ;;  %v27_v41 = vld [vmem:[%s1026_s0 + $0x50] sm:$0xff]  ;;  %v22_v42 = vld [vmem:[%s1026_s0 + $0x28] sm:$0x33] }
  0x10   :  { %v359_v59 = vmul.f32 %v754_v43, %v305_v57  ;;  %v360_v60 = vmul.f32 %v759_v44, %v306_v58  ;;  %v265_v61 = vmul.f32 0.2, %v169_v45  ;;  %v266_v62 = vmul.f32 0.2, %v170_v46 }
  0x11   :  { %v419_v3 = vadd.f32 %v366_v56, %v365_v55  ;;  %vm211_vm6 = vcmp.gt.f32.partialorder %v163_v47, 0.0  ;;  %vm212_vm7 = vcmp.gt.f32.partialorder %v164_v48, 0.0  ;;  %v259_v4 = vmul.f32 0.2, %v163_v47  ;;  %v19_v55 = vld [vmem:[%s1026_s0 + $0x10] sm:$0x33] }
  0x12   :  { %v407_v5 = vadd.f32 %v360_v60, %v359_v59  ;;  %v313_v6 = vsel %vm217_vm4, %v169_v45, %v265_v61  ;;  %v314_v7 = vsel %vm218_vm5, %v170_v46, %v266_v62  ;;  %v260_v8 = vmul.f32 0.2, %v164_v48  ;;  %v28_v60 = vld [vmem:[%s1026_s0 + $0x58] sm:$0x33] }
  0x13   :  { %420 = vadd.xlane.f32.xlu1 %v419_v3  ;;  %v367_v9 = vmul.f32 %v772_v63, %v313_v6  ;;  %v368_v10 = vmul.f32 %v777_v1, %v314_v7  ;;  %v307_v11 = vsel %vm211_vm6, %v163_v47, %v259_v4  ;;  %v115_v12 = vmul.f32 %v727_v23, %v55_v20 }
  0x14   :  { %408 = vadd.xlane.f32.xlu0 %v407_v5  ;;  %v308_v13 = vsel %vm212_vm7, %v164_v48, %v260_v8  ;;  %v361_v14 = vmul.f32 %v772_v63, %v307_v11  ;;  %v116_v15 = vmul.f32 %v729_v24, %v56_v21  ;;  %v113_v18 = vmul.f32 %v727_v23, %v53_v27 }
  0x15   :  { %v422_v19 = vadd.f32 %v368_v10, %v367_v9  ;;  %v362_v31 = vmul.f32 %v777_v1, %v308_v13  ;;  %v175_v32 = vadd.f32 %v731_v25, %v115_v12  ;;  %v114_v33 = vmul.f32 %v729_v24, %v54_v28 }
  0x16   :  { %v176_v20 = vadd.f32 %v733_v26, %v116_v15  ;;  %v173_v34 = vadd.f32 %v731_v25, %v113_v18  ;;  %v119_v16 = vmul.f32 %v727_v23, %v59_v29  ;;  %v120_v21 = vmul.f32 %v729_v24, %v60_v30  ;;  %v836_v15 = vld [vmem:[%s1029_s3 + $0x20] sm:$0xf]  ;;  %v841_v18 = vld [vmem:[%s1029_s3 + $0x28] sm:$0xf] }
  0x17   :  { %423 = vadd.xlane.f32.xlu1 %v422_v19  ;;  %v410_v27 = vadd.f32 %v362_v31, %v361_v14  ;;  %vm223_vm8 = vcmp.gt.f32.partialorder %v175_v32, 0.0  ;;  %v271_v35 = vmul.f32 0.2, %v175_v32  ;;  %v174_v17 = vadd.f32 %v733_v26, %v114_v33 }
  0x18   :  { %vm224_vm9 = vcmp.gt.f32.partialorder %v176_v20, 0.0  ;;  %v272_v28 = vmul.f32 0.2, %v176_v20  ;;  %vm221_vm10 = vcmp.gt.f32.partialorder %v173_v34, 0.0  ;;  %v269_v36 = vmul.f32 0.2, %v173_v34 }
  0x19   :  { %411 = vadd.xlane.f32.xlu0 %v410_v27  ;;  %v319_v37 = vsel %vm223_vm8, %v175_v32, %v271_v35  ;;  %vm222_vm11 = vcmp.gt.f32.partialorder %v174_v17, 0.0  ;;  %v270_v38 = vmul.f32 0.2, %v174_v17  ;;  %v179_v29 = vadd.f32 %v731_v25, %v119_v16 }
  0x1a   :  { %v320_v39 = vsel %vm224_vm9, %v176_v20, %v272_v28  ;;  %v373_v22 = vmul.f32 %v772_v63, %v319_v37  ;;  %v317_v30 = vsel %vm221_vm10, %v173_v34, %v269_v36  ;;  %v180_v40 = vadd.f32 %v733_v26, %v120_v21 }
  0x1b   :  { %v374_v45 = vmul.f32 %v777_v1, %v320_v39  ;;  %v318_v46 = vsel %vm222_vm11, %v174_v17, %v270_v38  ;;  %v371_v47 = vmul.f32 %v754_v43, %v317_v30  ;;  %vm227_vm12 = vcmp.gt.f32.partialorder %v179_v29, 0.0  ;;  %v25_v38 = vld [vmem:[%s1026_s0 + $0x40] sm:$0x33] }
  0x1c   :  { %v372_v48 = vmul.f32 %v759_v44, %v318_v46  ;;  %vm228_vm13 = vcmp.gt.f32.partialorder %v180_v40, 0.0  ;;  %v275_v49 = vmul.f32 0.2, %v179_v29  ;;  %v276_v50 = vmul.f32 0.2, %v180_v40 }
  0x1d   :  { %v433_v51 = vadd.f32 %v374_v45, %v373_v22  ;;  %v61_v52 = vunpack.c.l.bf16 %v27_v41  ;;  %v62_v53 = vunpack.c.h.bf16 %v27_v41  ;;  %v51_v54 = vunpack.c.l.bf16 %v22_v42 }
  0x1e   :  { %v430_v56 = vadd.f32 %v372_v48, %v371_v47  ;;  %v323_v57 = vsel %vm227_vm12, %v179_v29, %v275_v49  ;;  %v324_v58 = vsel %vm228_vm13, %v180_v40, %v276_v50  ;;  %v52_v59 = vunpack.c.h.bf16 %v22_v42  ;;  %v30_v48 = vld [vmem:[%s1026_s0 + $0x68] sm:$0xff] }
  0x1f   :  { %434 = vadd.xlane.f32.xlu1 %v433_v51  ;;  %v377_v61 = vmul.f32 %v754_v43, %v323_v57  ;;  %v378_v62 = vmul.f32 %v759_v44, %v324_v58  ;;  %v121_v3 = vmul.f32 %v727_v23, %v61_v52  ;;  %v122_v4 = vmul.f32 %v729_v24, %v62_v53 }
  0x20   :  { %431 = vadd.xlane.f32.xlu0 %v430_v56  ;;  %v111_v5 = vmul.f32 %v727_v23, %v51_v54  ;;  %v112_v6 = vmul.f32 %v729_v24, %v52_v59  ;;  %v45_v7 = vunpack.c.l.bf16 %v19_v55  ;;  %v46_v8 = vunpack.c.h.bf16 %v19_v55 }
  0x21   :  { %v441_v9 = vadd.f32 %v378_v62, %v377_v61  ;;  %v181_v10 = vadd.f32 %v731_v25, %v121_v3  ;;  %v182_v11 = vadd.f32 %v733_v26, %v122_v4  ;;  %v63_v12 = vunpack.c.l.bf16 %v28_v60  ;;  %v29_v4 = vld [vmem:[%s1026_s0 + $0x60] sm:$0xff] }
  0x22   :  { %v171_v13 = vadd.f32 %v731_v25, %v111_v5  ;;  %v172_v14 = vadd.f32 %v733_v26, %v112_v6  ;;  %v105_v19 = vmul.f32 %v727_v23, %v45_v7  ;;  %v106_v31 = vmul.f32 %v729_v24, %v46_v8 }
  0x23   :  { %442 = vadd.xlane.f32.xlu1 %v441_v9  ;;  %vm229_vm15 = vcmp.gt.f32.partialorder %v181_v10, 0.0  ;;  %vm230_vm0 = vcmp.gt.f32.partialorder %v182_v11, 0.0  ;;  %v277_v32 = vmul.f32 0.2, %v181_v10  ;;  %v278_v33 = vmul.f32 0.2, %v182_v11 }
  0x24   :  { %vm219_vm1 = vcmp.gt.f32.partialorder %v171_v13, 0.0  ;;  %vm220_vm2 = vcmp.gt.f32.partialorder %v172_v14, 0.0  ;;  %v267_v20 = vmul.f32 0.2, %v171_v13  ;;  %v268_v34 = vmul.f32 0.2, %v172_v14 }
  0x25   :  { %v325_v16 = vsel %vm229_vm15, %v181_v10, %v277_v32  ;;  %v326_v21 = vsel %vm230_vm0, %v182_v11, %v278_v33  ;;  %v165_v27 = vadd.f32 %v731_v25, %v105_v19  ;;  %v166_v35 = vadd.f32 %v733_v26, %v106_v31 }
  0x26   :  { %v379_v17 = vmul.f32 %v772_v63, %v325_v16  ;;  %v380_v28 = vmul.f32 %v777_v1, %v326_v21  ;;  %v315_v36 = vsel %vm219_vm1, %v171_v13, %v267_v20  ;;  %v316_v37 = vsel %vm220_vm2, %v172_v14, %v268_v34 }
  0x27   :  { %v369_v29 = vmul.f32 %v836_v15, %v315_v36  ;;  %v370_v39 = vmul.f32 %v841_v18, %v316_v37  ;;  %vm213_vm3 = vcmp.gt.f32.partialorder %v165_v27, 0.0  ;;  %vm214_vm4 = vcmp.gt.f32.partialorder %v166_v35, 0.0 }
  0x28   :  { %v444_v22 = vadd.f32 %v380_v28, %v379_v17  ;;  %v261_v30 = vmul.f32 0.2, %v165_v27  ;;  %v262_v40 = vmul.f32 0.2, %v166_v35  ;;  %v64_v41 = vunpack.c.h.bf16 %v28_v60  ;;  %v32_v17 = vld [vmem:[%s1026_s0 + $0x78] sm:$0xff] }
  0x29   :  { %v425_v42 = vsel %vm413_vm14, %v369_v29, 0.0  ;;  %v426_v45 = vsel %vm413_vm14, %v370_v39, 0.0  ;;  %v123_v46 = vmul.f32 %v727_v23, %v63_v12  ;;  %v57_v47 = vunpack.c.l.bf16 %v25_v38 }
  0x2a   :  { %445 = vadd.xlane.f32.xlu0 %v444_v22  ;;  %v427_v49 = vadd.f32 %v426_v45, %v425_v42  ;;  %v309_v50 = vsel %vm213_vm3, %v165_v27, %v261_v30  ;;  %v310_v51 = vsel %vm214_vm4, %v166_v35, %v262_v40  ;;  %v124_v52 = vmul.f32 %v729_v24, %v64_v41  ;;  %v31_v45 = vld [vmem:[%s1026_s0 + $0x70] sm:$0x33] }
  0x2b   :  { %v363_v53 = vmul.f32 %v836_v15, %v309_v50  ;;  %v364_v54 = vmul.f32 %v841_v18, %v310_v51  ;;  %v183_v55 = vadd.f32 %v731_v25, %v123_v46  ;;  %v58_v56 = vunpack.c.h.bf16 %v25_v38 }
  0x2c   :  { %428 = vadd.xlane.f32.xlu1 %v427_v49  ;;  %v184_v57 = vadd.f32 %v733_v26, %v124_v52  ;;  %v117_v58 = vmul.f32 %v727_v23, %v57_v47  ;;  %v67_v59 = vunpack.c.l.bf16 %v30_v48  ;;  %v68_v60 = vunpack.c.h.bf16 %v30_v48 }
  0x2d   :  { %v414_v61 = vsel %vm413_vm14, %v363_v53, 0.0  ;;  %v415_v62 = vsel %vm413_vm14, %v364_v54, 0.0  ;;  %vm231_vm5 = vcmp.gt.f32.partialorder %v183_v55, 0.0  ;;  %v279_v3 = vmul.f32 0.2, %v183_v55 }
  0x2e   :  { %v416_v5 = vadd.f32 %v415_v62, %v414_v61  ;;  %vm232_vm6 = vcmp.gt.f32.partialorder %v184_v57, 0.0  ;;  %v280_v6 = vmul.f32 0.2, %v184_v57  ;;  %v118_v7 = vmul.f32 %v729_v24, %v58_v56 }
  0x2f   :  { %v327_v8 = vsel %vm231_vm5, %v183_v55, %v279_v3  ;;  %v177_v9 = vadd.f32 %v731_v25, %v117_v58  ;;  %v127_v10 = vmul.f32 %v727_v23, %v67_v59  ;;  %v128_v11 = vmul.f32 %v729_v24, %v68_v60 }
  0x30   :  { %417 = vadd.xlane.f32.xlu0 %v416_v5  ;;  %v328_v12 = vsel %vm232_vm6, %v184_v57, %v280_v6  ;;  %v381_v13 = vmul.f32 %v836_v15, %v327_v8  ;;  %v178_v14 = vadd.f32 %v733_v26, %v118_v7  ;;  %v65_v19 = vunpack.c.l.bf16 %v29_v4  ;;  %v34_v7 = vld [vmem:[%s1026_s0 + $0x88] sm:$0x33] }
  0x31   :  { %v382_v31 = vmul.f32 %v841_v18, %v328_v12  ;;  %vm225_vm7 = vcmp.gt.f32.partialorder %v177_v9, 0.0  ;;  %v273_v32 = vmul.f32 0.2, %v177_v9  ;;  %v187_v33 = vadd.f32 %v731_v25, %v127_v10 }
  0x32   :  { %v447_v20 = vsel %vm413_vm14, %v381_v13, 0.0  ;;  %vm226_vm8 = vcmp.gt.f32.partialorder %v178_v14, 0.0  ;;  %v274_v34 = vmul.f32 0.2, %v178_v14  ;;  %v188_v16 = vadd.f32 %v733_v26, %v128_v11 }
  0x33   :  { %v448_v21 = vsel %vm413_vm14, %v382_v31, 0.0  ;;  %v321_v27 = vsel %vm225_vm7, %v177_v9, %v273_v32  ;;  %vm235_vm9 = vcmp.gt.f32.partialorder %v187_v33, 0.0  ;;  %v283_v35 = vmul.f32 0.2, %v187_v33 }
  0x34   :  { %v449_v28 = vadd.f32 %v448_v21, %v447_v20  ;;  %v322_v36 = vsel %vm226_vm8, %v178_v14, %v274_v34  ;;  %v375_v37 = vmul.f32 %v836_v15, %v321_v27  ;;  %vm236_vm10 = vcmp.gt.f32.partialorder %v188_v16, 0.0  ;;  %v33_v20 = vld [vmem:[%s1026_s0 + $0x80] sm:$0xff]  ;;  %v36_v34 = vld [vmem:[%s1026_s0 + $0x98] sm:$0xff] }
  0x35   :  { %v376_v38 = vmul.f32 %v841_v18, %v322_v36  ;;  %v284_v29 = vmul.f32 0.2, %v188_v16  ;;  %v331_v39 = vsel %vm235_vm9, %v187_v33, %v283_v35  ;;  %v66_v22 = vunpack.c.h.bf16 %v29_v4 }
  0x36   :  { %450 = vadd.xlane.f32.xlu1 %v449_v28  ;;  %v436_v30 = vsel %vm413_vm14, %v375_v37, 0.0  ;;  %v385_v40 = vmul.f32 %v772_v63, %v331_v39  ;;  %v125_v41 = vmul.f32 %v727_v23, %v65_v19  ;;  %v71_v42 = vunpack.c.l.bf16 %v32_v17 }
  0x37   :  { %v437_v46 = vsel %vm413_vm14, %v376_v38, 0.0  ;;  %v332_v47 = vsel %vm236_vm10, %v188_v16, %v284_v29  ;;  %v126_v48 = vmul.f32 %v729_v24, %v66_v22  ;;  %v72_v49 = vunpack.c.h.bf16 %v32_v17 }
  0x38   :  { %v438_v50 = vadd.f32 %v437_v46, %v436_v30  ;;  %v386_v51 = vmul.f32 %v777_v1, %v332_v47  ;;  %v185_v52 = vadd.f32 %v731_v25, %v125_v41  ;;  %v131_v53 = vmul.f32 %v727_v23, %v71_v42 }
  0x39   :  { %v186_v54 = vadd.f32 %v733_v26, %v126_v48  ;;  %v132_v55 = vmul.f32 %v729_v24, %v72_v49  ;;  %v69_v56 = vunpack.c.l.bf16 %v31_v45  ;;  %v70_v57 = vunpack.c.h.bf16 %v31_v45 }
  0x3a   :  { %439 = vadd.xlane.f32.xlu0 %v438_v50  ;;  %v455_v58 = vadd.f32 %v386_v51, %v385_v40  ;;  %vm233_vm11 = vcmp.gt.f32.partialorder %v185_v52, 0.0  ;;  %v281_v59 = vmul.f32 0.2, %v185_v52  ;;  %v191_v60 = vadd.f32 %v731_v25, %v131_v53 }
  0x3b   :  { %vm234_vm12 = vcmp.gt.f32.partialorder %v186_v54, 0.0  ;;  %v282_v61 = vmul.f32 0.2, %v186_v54  ;;  %v192_v62 = vadd.f32 %v733_v26, %v132_v55  ;;  %v129_v3 = vmul.f32 %v727_v23, %v69_v56 }
  0x3c   :  { %456 = vadd.xlane.f32.xlu1 %v455_v58  ;;  %v329_v4 = vsel %vm233_vm11, %v185_v52, %v281_v59  ;;  %vm239_vm13 = vcmp.gt.f32.partialorder %v191_v60, 0.0  ;;  %v287_v5 = vmul.f32 0.2, %v191_v60  ;;  %v130_v6 = vmul.f32 %v729_v24, %v70_v57  ;;  %v35_v57 = vld [vmem:[%s1026_s0 + $0x90] sm:$0xff] }
  0x3d   :  { %v330_v8 = vsel %vm234_vm12, %v186_v54, %v282_v61  ;;  %v383_v9 = vmul.f32 %v754_v43, %v329_v4  ;;  %vm240_vm15 = vcmp.gt.f32.partialorder %v192_v62, 0.0  ;;  %v288_v10 = vmul.f32 0.2, %v192_v62 }
  0x3e   :  { %v384_v11 = vmul.f32 %v759_v44, %v330_v8  ;;  %v335_v12 = vsel %vm239_vm13, %v191_v60, %v287_v5  ;;  %v189_v13 = vadd.f32 %v731_v25, %v129_v3  ;;  %v190_v14 = vadd.f32 %v733_v26, %v130_v6  ;;  %v37_v8 = vld [vmem:[%s1026_s0 + $0xa0] sm:$0x33] }
  0x3f   :  { %v336_v19 = vsel %vm240_vm15, %v192_v62, %v288_v10  ;;  %v389_v31 = vmul.f32 %v754_v43, %v335_v12  ;;  %v75_v32 = vunpack.c.l.bf16 %v34_v7  ;;  %v76_v33 = vunpack.c.h.bf16 %v34_v7 }
  0x40   :  { %v452_v16 = vadd.f32 %v384_v11, %v383_v9  ;;  %v390_v21 = vmul.f32 %v759_v44, %v336_v19  ;;  %vm237_vm0 = vcmp.gt.f32.partialorder %v189_v13, 0.0  ;;  %vm238_vm1 = vcmp.gt.f32.partialorder %v190_v14, 0.0 }
  0x41   :  { %v285_v27 = vmul.f32 0.2, %v189_v13  ;;  %v286_v35 = vmul.f32 0.2, %v190_v14  ;;  %v135_v17 = vmul.f32 %v727_v23, %v75_v32  ;;  %v136_v28 = vmul.f32 %v729_v24, %v76_v33 }
  0x42   :  { %453 = vadd.xlane.f32.xlu0 %v452_v16  ;;  %v463_v36 = vadd.f32 %v390_v21, %v389_v31  ;;  %v73_v37 = vunpack.c.l.bf16 %v33_v20  ;;  %v74_v38 = vunpack.c.h.bf16 %v33_v20  ;;  %v79_v29 = vunpack.c.l.bf16 %v36_v34 }
  0x43   :  { %v333_v39 = vsel %vm237_vm0, %v189_v13, %v285_v27  ;;  %v334_v22 = vsel %vm238_vm1, %v190_v14, %v286_v35  ;;  %v195_v30 = vadd.f32 %v731_v25, %v135_v17  ;;  %v196_v40 = vadd.f32 %v733_v26, %v136_v28 }
  0x44   :  { %464 = vadd.xlane.f32.xlu1 %v463_v36  ;;  %v387_v41 = vmul.f32 %v836_v15, %v333_v39  ;;  %v388_v42 = vmul.f32 %v841_v18, %v334_v22  ;;  %v133_v45 = vmul.f32 %v727_v23, %v73_v37  ;;  %v134_v46 = vmul.f32 %v729_v24, %v74_v38  ;;  %v38_v36 = vld [vmem:[%s1026_s0 + $0xa8] sm:$0xff] }
  0x45   :  { %vm243_vm2 = vcmp.gt.f32.partialorder %v195_v30, 0.0  ;;  %vm244_vm3 = vcmp.gt.f32.partialorder %v196_v40, 0.0  ;;  %v291_v47 = vmul.f32 0.2, %v195_v30  ;;  %v292_v48 = vmul.f32 0.2, %v196_v40 }
  0x46   :  { %v458_v49 = vsel %vm413_vm14, %v387_v41, 0.0  ;;  %v459_v50 = vsel %vm413_vm14, %v388_v42, 0.0  ;;  %v193_v51 = vadd.f32 %v731_v25, %v133_v45  ;;  %v194_v52 = vadd.f32 %v733_v26, %v134_v46  ;;  %v39_v46 = vld [vmem:[%s1026_s0 + $0xb0] sm:$0xff] }
  0x47   :  { %v460_v53 = vadd.f32 %v459_v50, %v458_v49  ;;  %v339_v54 = vsel %vm243_vm2, %v195_v30, %v291_v47  ;;  %v340_v55 = vsel %vm244_vm3, %v196_v40, %v292_v48  ;;  %v80_v56 = vunpack.c.h.bf16 %v36_v34 }
  0x48   :  { %v393_v58 = vmul.f32 %v836_v15, %v339_v54  ;;  %v394_v59 = vmul.f32 %v841_v18, %v340_v55  ;;  %vm241_vm4 = vcmp.gt.f32.partialorder %v193_v51, 0.0  ;;  %vm242_vm5 = vcmp.gt.f32.partialorder %v194_v52, 0.0 }
  0x49   :  { %461 = vadd.xlane.f32.xlu0 %v460_v53  ;;  %v289_v60 = vmul.f32 0.2, %v193_v51  ;;  %v290_v61 = vmul.f32 0.2, %v194_v52  ;;  %v139_v62 = vmul.f32 %v727_v23, %v79_v29  ;;  %v140_v3 = vmul.f32 %v729_v24, %v80_v56 }
  0x4a   :  { %v469_v4 = vsel %vm413_vm14, %v393_v58, 0.0  ;;  %v470_v5 = vsel %vm413_vm14, %v394_v59, 0.0  ;;  %v77_v6 = vunpack.c.l.bf16 %v35_v57  ;;  %v78_v7 = vunpack.c.h.bf16 %v35_v57 }
  0x4b   :  { %v471_v9 = vadd.f32 %v470_v5, %v469_v4  ;;  %v337_v10 = vsel %vm241_vm4, %v193_v51, %v289_v60  ;;  %v338_v11 = vsel %vm242_vm5, %v194_v52, %v290_v61  ;;  %v199_v12 = vadd.f32 %v731_v25, %v139_v62  ;;  %v40_v5 = vld [vmem:[%s1026_s0 + $0xb8] sm:$0x33] }
  0x4c   :  { %v391_v13 = vmul.f32 %v772_v63, %v337_v10  ;;  %v392_v14 = vmul.f32 %v777_v1, %v338_v11  ;;  %v200_v19 = vadd.f32 %v733_v26, %v140_v3  ;;  %v137_v31 = vmul.f32 %v727_v23, %v77_v6 }
  0x4d   :  { %472 = vadd.xlane.f32.xlu1 %v471_v9  ;;  %vm247_vm6 = vcmp.gt.f32.partialorder %v199_v12, 0.0  ;;  %v295_v32 = vmul.f32 0.2, %v199_v12  ;;  %v138_v33 = vmul.f32 %v729_v24, %v78_v7  ;;  %v81_v20 = vunpack.c.l.bf16 %v37_v8 }
  0x4e   :  { %v466_v34 = vadd.f32 %v392_v14, %v391_v13  ;;  %vm248_vm7 = vcmp.gt.f32.partialorder %v200_v19, 0.0  ;;  %v296_v16 = vmul.f32 0.2, %v200_v19  ;;  %v197_v21 = vadd.f32 %v731_v25, %v137_v31 }
  0x4f   :  { %v343_v27 = vsel %vm247_vm6, %v199_v12, %v295_v32  ;;  %v198_v35 = vadd.f32 %v733_v26, %v138_v33  ;;  %v82_v17 = vunpack.c.h.bf16 %v37_v8  ;;  %v141_v28 = vmul.f32 %v727_v23, %v81_v20 }
  0x50   :  { %467 = vadd.xlane.f32.xlu0 %v466_v34  ;;  %v344_v37 = vsel %vm248_vm7, %v200_v19, %v296_v16  ;;  %v397_v38 = vmul.f32 %v772_v63, %v343_v27  ;;  %vm245_vm8 = vcmp.gt.f32.partialorder %v197_v21, 0.0  ;;  %v293_v29 = vmul.f32 0.2, %v197_v21 }
  0x51   :  { %v398_v39 = vmul.f32 %v777_v1, %v344_v37  ;;  %vm246_vm9 = vcmp.gt.f32.partialorder %v198_v35, 0.0  ;;  %v294_v22 = vmul.f32 0.2, %v198_v35  ;;  %v142_v30 = vmul.f32 %v729_v24, %v82_v17 }
  0x52   :  { %v341_v40 = vsel %vm245_vm8, %v197_v21, %v293_v29  ;;  %v201_v41 = vadd.f32 %v731_v25, %v141_v28  ;;  %v83_v42 = vunpack.c.l.bf16 %v38_v36  ;;  %v84_v45 = vunpack.c.h.bf16 %v38_v36 }
  0x53   :  { %v477_v47 = vadd.f32 %v398_v39, %v397_v38  ;;  %v342_v48 = vsel %vm246_vm9, %v198_v35, %v294_v22  ;;  %v395_v49 = vmul.f32 %v754_v43, %v341_v40  ;;  %v202_v50 = vadd.f32 %v733_v26, %v142_v30 }
  0x54   :  { %v396_v51 = vmul.f32 %v759_v44, %v342_v48  ;;  %vm249_vm10 = vcmp.gt.f32.partialorder %v201_v41, 0.0  ;;  %v297_v52 = vmul.f32 0.2, %v201_v41  ;;  %v143_v53 = vmul.f32 %v727_v23, %v83_v42 }
  0x55   :  { %478 = vadd.xlane.f32.xlu1 %v477_v47  ;;  %vm250_vm11 = vcmp.gt.f32.partialorder %v202_v50, 0.0  ;;  %v298_v54 = vmul.f32 0.2, %v202_v50  ;;  %v144_v55 = vmul.f32 %v729_v24, %v84_v45  ;;  %v85_v56 = vunpack.c.l.bf16 %v39_v46 }
  0x56   :  { %v474_v57 = vadd.f32 %v396_v51, %v395_v49  ;;  %v345_v58 = vsel %vm249_vm10, %v201_v41, %v297_v52  ;;  %v203_v59 = vadd.f32 %v731_v25, %v143_v53  ;;  %v86_v60 = vunpack.c.h.bf16 %v39_v46 }
  0x57   :  { %v346_v61 = vsel %vm250_vm11, %v202_v50, %v298_v54  ;;  %v399_v62 = vmul.f32 %v836_v15, %v345_v58  ;;  %v204_v3 = vadd.f32 %v733_v26, %v144_v55  ;;  %v145_v4 = vmul.f32 %v727_v23, %v85_v56 }
  0x58   :  { %475 = vadd.xlane.f32.xlu0 %v474_v57  ;;  %v400_v6 = vmul.f32 %v841_v18, %v346_v61  ;;  %vm251_vm12 = vcmp.gt.f32.partialorder %v203_v59, 0.0  ;;  %v299_v7 = vmul.f32 0.2, %v203_v59  ;;  %v146_v8 = vmul.f32 %v729_v24, %v86_v60 }
  0x59   :  { %v480_v9 = vsel %vm413_vm14, %v399_v62, 0.0  ;;  %vm252_vm13 = vcmp.gt.f32.partialorder %v204_v3, 0.0  ;;  %v300_v10 = vmul.f32 0.2, %v204_v3  ;;  %v205_v11 = vadd.f32 %v731_v25, %v145_v4 }
  0x5a   :  { %v481_v12 = vsel %vm413_vm14, %v400_v6, 0.0  ;;  %v347_v13 = vsel %vm251_vm12, %v203_v59, %v299_v7  ;;  %v206_v14 = vadd.f32 %v733_v26, %v146_v8  ;;  %v87_v19 = vunpack.c.l.bf16 %v40_v5 }
  0x5b   :  { %v482_v31 = vadd.f32 %v481_v12, %v480_v9  ;;  %v348_v32 = vsel %vm252_vm13, %v204_v3, %v300_v10  ;;  %v401_v33 = vmul.f32 %v754_v43, %v347_v13  ;;  %vm253_vm15 = vcmp.gt.f32.partialorder %v205_v11, 0.0 }
  0x5c   :  { %v402_v20 = vmul.f32 %v759_v44, %v348_v32  ;;  %vm254_vm0 = vcmp.gt.f32.partialorder %v206_v14, 0.0  ;;  %v301_v34 = vmul.f32 0.2, %v205_v11  ;;  %v302_v16 = vmul.f32 0.2, %v206_v14 }
  0x5d   :  { %483 = vadd.xlane.f32.xlu0 %v482_v31  ;;  %v88_v21 = vunpack.c.h.bf16 %v40_v5  ;;  %v147_v27 = vmul.f32 %v727_v23, %v87_v19  ;;  %v521_v57 = vand.u32 127, %v91_v0  ;;  %vm538_vm3 = vcmask 195712  }
  0x5e   :  { %v485_v35 = vadd.f32 %v402_v20, %v401_v33  ;;  %v349_v17 = vsel %vm253_vm15, %v205_v11, %v301_v34  ;;  %v350_v28 = vsel %vm254_vm0, %v206_v14, %v302_v16  ;;  %vm638_vm4 = vcmask 1041409  }
  0x5f   :  { %v403_v36 = vmul.f32 %v772_v63, %v349_v17  ;;  %v404_v37 = vmul.f32 %v777_v1, %v350_v28  ;;  %v148_v38 = vmul.f32 %v729_v24, %v88_v21  ;;  %v207_v43 = vadd.f32 %v731_v25, %v147_v27 }
  0x60   :  { %486 = vadd.xlane.f32.xlu1 %v485_v35  ;;  %v526_v58 = vadd.s32 4294967288, %v521_v57  ;;  %v533_v59 = vadd.s32 4294967280, %v521_v57  ;;  %v524_v4 = vsub.s32 %v521_v57, %v691_v2  ;;  %vm640_vm5 = vcmask 1042434  }
  0x61   :  { %v488_v44 = vadd.f32 %v404_v37, %v403_v36  ;;  %v208_v29 = vadd.f32 %v733_v26, %v148_v38  ;;  %vm255_vm1 = vcmp.gt.f32.partialorder %v207_v43, 0.0  ;;  %v303_v39 = vmul.f32 0.2, %v207_v43 }
  0x62   :  { %v529_v62 = vsub.s32 %v526_v58, %v691_v2  ;;  %v995_v3 = vsub.s32 %v533_v59, %v691_v2  ;;  %vm642_vm6 = vcmask 1043459   ;;  %vm644_vm7 = vcmask 1044484  }
  0x63   :  { %489 = vadd.xlane.f32.xlu0 %v488_v44  ;;  %vm256_vm2 = vcmp.gt.f32.partialorder %v208_v29, 0.0  ;;  %v304_v23 = vmul.f32 0.2, %v208_v29  ;;  %v351_v22 = vsel %vm255_vm1, %v207_v43, %v303_v39  ;;  %vm646_vm8 = vcmask 1045509  }
  0x64   :  { %v405_v30 = vmul.f32 %v836_v15, %v351_v22  ;;  %vm648_vm9 = vcmask 1046534   ;;  %vm650_vm10 = vcmask 1047559   ;;  %vm653_vm11 = vcmask 162816  }
  0x65   :  { %v352_v40 = vsel %vm256_vm2, %v208_v29, %v304_v23 }
  0x66   :  { %v406_v63 = vmul.f32 %v841_v18, %v352_v40  ;;  %v491_v1 = vsel %vm413_vm14, %v405_v30, 0.0 }
  0x68   :  { %v492_v24 = vsel %vm413_vm14, %v406_v63, 0.0  ;;  %vm531_vm14 = vcmask 130112  }
  0x69   :  { %v493_v25 = vadd.f32 %v492_v24, %v491_v1 }
  0x6b   :  { %494 = vadd.xlane.f32.xlu1 %v493_v25 }
  0xa0   :  { %v421_v26 = vpop.xlane.xlu1 %420 }
  0xa1   :  { %v409_v41 = vpop.xlane.xlu0 %408  ;;  %v543_v11 = vrot.slane %v421_v26, %v524_v4 }
  0xa2   :  { %v525_v13 = vrot.slane %v409_v41, %v524_v4 }
  0xa4   :  { %v424_v46 = vpop.xlane.xlu1 %423 }
  0xa5   :  { %v547_v5 = vrot.slane %v424_v46, %v529_v62 }
  0xa6   :  { %v412_v42 = vpop.xlane.xlu0 %411 }
  0xa7   :  { %v530_v7 = vrot.slane %v412_v42, %v529_v62  ;;  %v548_v19 = vsel %vm531_vm14, %v547_v5, %v543_v11 }
  0xa9   :  { %v532_v32 = vsel %vm531_vm14, %v530_v7, %v525_v13 }
  0xac   :  { %v435_v48 = vpop.xlane.xlu1 %434 }
  0xad   :  { %v432_v45 = vpop.xlane.xlu0 %431  ;;  %v561_v8 = vrot.slane %v435_v48, %v529_v62 }
  0xae   :  { %v557_v9 = vrot.slane %v432_v45, %v524_v4 }
  0xb0   :  { %v443_v50 = vpop.xlane.xlu1 %442  ;;  %v562_v33 = vsel %vm531_vm14, %v561_v8, %v557_v9 }
  0xb1   :  { %v571_v31 = vrot.slane %v443_v50, %v524_v4 }
  0xb7   :  { %v446_v47 = vpop.xlane.xlu0 %445 }
  0xb8   :  { %v575_v2 = vrot.slane %v446_v47, %v529_v62 }
  0xb9   :  { %v429_v15 = vpop.xlane.xlu1 %428 }
  0xba   :  { %v552_v10 = vrot.slane %v429_v15, %v995_v3  ;;  %v576_v43 = vsel %vm531_vm14, %v575_v2, %v571_v31 }
  0xbc   :  { %v553_v20 = vsel %vm538_vm3, %v552_v10, %v548_v19 }
  0xbd   :  { %v418_v49 = vpop.xlane.xlu0 %417 }
  0xbe   :  { %v537_v12 = vrot.slane %v418_v49, %v995_v3 }
  0xc0   :  { %v539_v16 = vsel %vm538_vm3, %v537_v12, %v532_v32 }
  0xc1   :  { %v639_v23 = vsel %vm638_vm4, %v553_v20, %v539_v16 }
  0xc3   :  { %v451_v53 = vpop.xlane.xlu1 %450 }
  0xc4   :  { %v580_v21 = vrot.slane %v451_v53, %v995_v3 }
  0xc6   :  { %v581_v63 = vsel %vm538_vm3, %v580_v21, %v576_v43 }
  0xc7   :  { %v440_v51 = vpop.xlane.xlu0 %439 }
  0xc8   :  { %v566_v14 = vrot.slane %v440_v51, %v995_v3 }
  0xc9   :  { %v457_v54 = vpop.xlane.xlu1 %456 }
  0xca   :  { %v589_v27 = vrot.slane %v457_v54, %v529_v62  ;;  %v567_v28 = vsel %vm538_vm3, %v566_v14, %v562_v33 }
  0xcb   :  { %v641_v1 = vsel %vm640_vm5, %v567_v28, %v639_v23 }
  0xcc   :  { %v643_v45 = vsel %vm642_vm6, %v581_v63, %v641_v1 }
  0xcf   :  { %v454_v52 = vpop.xlane.xlu0 %453 }
  0xd0   :  { %v585_v35 = vrot.slane %v454_v52, %v524_v4 }
  0xd1   :  { %v465_v56 = vpop.xlane.xlu1 %464 }
  0xd2   :  { %v599_v36 = vrot.slane %v465_v56, %v524_v4  ;;  %v590_v24 = vsel %vm531_vm14, %v589_v27, %v585_v35 }
  0xd6   :  { %v462_v18 = vpop.xlane.xlu0 %461 }
  0xd7   :  { %v594_v37 = vrot.slane %v462_v18, %v995_v3 }
  0xd9   :  { %v595_v25 = vsel %vm538_vm3, %v594_v37, %v590_v24 }
  0xda   :  { %v473_v61 = vpop.xlane.xlu1 %472  ;;  %v645_v49 = vsel %vm644_vm7, %v595_v25, %v643_v45 }
  0xdb   :  { %v608_v44 = vrot.slane %v473_v61, %v995_v3 }
  0xdd   :  { %v468_v55 = vpop.xlane.xlu0 %467 }
  0xde   :  { %v603_v34 = vrot.slane %v468_v55, %v529_v62 }
  0xe0   :  { %v604_v22 = vsel %vm531_vm14, %v603_v34, %v599_v36 }
  0xe1   :  { %v609_v42 = vsel %vm538_vm3, %v608_v44, %v604_v22 }
  0xe2   :  { %v479_v0 = vpop.xlane.xlu1 %478  ;;  %v647_v51 = vsel %vm646_vm8, %v609_v42, %v645_v49 }
  0xe3   :  { %v617_v29 = vrot.slane %v479_v0, %v529_v62 }
  0xe5   :  { %v476_v60 = vpop.xlane.xlu0 %475 }
  0xe6   :  { %v613_v39 = vrot.slane %v476_v60, %v524_v4 }
  0xe8   :  { %v618_v26 = vsel %vm531_vm14, %v617_v29, %v613_v39 }
  0xea   :  { %v484_v6 = vpop.xlane.xlu0 %483 }
  0xeb   :  { %v622_v30 = vrot.slane %v484_v6, %v995_v3 }
  0xed   :  { %v487_v38 = vpop.xlane.xlu1 %486  ;;  %v623_v46 = vsel %vm538_vm3, %v622_v30, %v618_v26 }
  0xee   :  { %v627_v41 = vrot.slane %v487_v38, %v524_v4  ;;  %v649_v52 = vsel %vm648_vm9, %v623_v46, %v647_v51 }
  0xf0   :  { %v490_v17 = vpop.xlane.xlu0 %489 }
  0xf1   :  { %v631_v40 = vrot.slane %v490_v17, %v529_v62 }
  0xf3   :  { %v632_v47 = vsel %vm531_vm14, %v631_v40, %v627_v41 }
  0xf8   :  { %v495_v48 = vpop.xlane.xlu1 %494 }
  0xf9   :  { %v636_v50 = vrot.slane %v495_v48, %v995_v3 }
  0xfb   :  { %v637_v15 = vsel %vm538_vm3, %v636_v50, %v632_v47 }
  0xfc   :  { %v651_v53 = vsel %vm650_vm10, %v637_v15, %v649_v52 }
  0xfd   :  { %v654_v18 = vsel %vm653_vm11, %v651_v53, 0.0 }
  0xfe   :  { %655 = vadd.xlane.f32.xlu0 %v654_v18 }
 0x18b   :  { %v656_v54 = vpop.xlane.xlu0 %655 }
 0x18c   :  { %657 = vst [vmem:[%s1030_s4] sm:$0xff] %v656_v54 }

// kernel: discriminator_forward.12
= control target key start
LH: loop header
LB: loop body
LE: loop exit
PB: predicated region body
PF: predicated region fallthrough
CT: control target
= control target key end

     0   :  { %s3748_s15 = smov 0   ;;  %s4745_s0 = inlined_call_operand.vmem [shape: bf16[2,32,512], index: 0, kind: input, shape index: {}]   ;;  %s4746_s1 = inlined_call_operand.vmem [shape: bf16[4,512,256], index: 1, kind: input, shape index: {}]   ;;  %s4747_s2 = inlined_call_operand.vmem [shape: bf16[2,20,256], index: 2, kind: output, shape index: {0}]   ;;  %s4748_s3 = inlined_call_operand.vmem [shape: f32[2,1,256], index: 3, kind: output, shape index: {1}]   ;;  %s4749_s4 = inlined_call_operand.vmem [shape: f32[2,1,256], index: 4, kind: output, shape index: {2}]  }
   0x1 LB: > { %s2741_s16 = sadd.s32 4294967295, %s3720_s15   ;;  %p2745_p0 = scmp.ge.s32.totalorder %s3720_s15, 1  ;;  %s3720_s15 = sphi %s3748_s15, %s15_s15  }
   0x2   : > { %p167_p1 = scmp.lt.s32.totalorder %s3720_s15, 3 }
   0x4   : > { %p168_p2 = pnand %p2745_p0, %p167_p1 }
   0x5   : > { %v3302_v0 = vld [vmem:[%s4746_s1 + $0x204] ss:$8 sps:$4 sm:$0xff] (!%p168_p2)   ;;  %v3306_v2 = vld [vmem:[%s4746_s1 + $0x200] ss:$8 sps:$4 sm:$0xff] (!%p168_p2)   ;;  %v3308_v4 = vld [vmem:[%s4746_s1 + $0x214] ss:$8 sps:$4 sm:$0xff] (!%p168_p2)  }
   0x6   : > { %171 = sbr.rel (%p168_p2) target bundleno = 511 (0x1ff), region = 28  ;;  %v3304_v1 = vld [vmem:[%s4746_s1 + $0x404] ss:$8 sps:$4 sm:$0xff] (!%p168_p2)   ;;  %771 = vmatprep.subr.bf16.mxu1 (!%p168_p2), %v3302_v0  ;;  %v3307_v3 = vld [vmem:[%s4746_s1 + $0x400] ss:$8 sps:$4 sm:$0xff] (!%p168_p2)   ;;  %p201_p3 = scmp.lt.s32.totalorder (!%p168_p2), %s2741_s16, 1 }
   0x7   : > { %1815 = vmatprep.subr.bf16.mxu0 (!%p168_p2), %v3304_v1  ;;  %772 = vmatpush1.bf16.msra.mxu1 (!%p168_p2), %v3306_v2  ;;  %v3310_v5 = vld [vmem:[%s4746_s1 + $0x414] ss:$8 sps:$4 sm:$0xff] (!%p168_p2)   ;;  %v3312_v6 = vld [vmem:[%s4746_s1 + $0x210] ss:$8 sps:$4 sm:$0xff] (!%p168_p2)   ;;  %v3314_v8 = vld [vmem:[%s4746_s1 + $0x224] ss:$8 sps:$4 sm:$0xff] (!%p168_p2)  }
   0x8   : > { %1816 = vmatpush1.bf16.msra.mxu0 (!%p168_p2), %v3307_v3  ;;  %773 = vmatprep.subr.bf16.mxu1 (!%p168_p2), %v3308_v4  ;;  %v3313_v7 = vld [vmem:[%s4746_s1 + $0x410] ss:$8 sps:$4 sm:$0xff] (!%p168_p2)   ;;  %v3316_v9 = vld [vmem:[%s4746_s1 + $0x424] ss:$8 sps:$4 sm:$0xff] (!%p168_p2)   ;;  %v3318_v10 = vld [vmem:[%s4746_s1 + $0x220] ss:$8 sps:$4 sm:$0xff] (!%p168_p2)  }
   0x9   : > { %1817 = vmatprep.subr.bf16.mxu0 (!%p168_p2), %v3310_v5  ;;  %v3319_v11 = vld [vmem:[%s4746_s1 + $0x420] ss:$8 sps:$4 sm:$0xff] (!%p168_p2)   ;;  %v3320_v12 = vld [vmem:[%s4746_s1 + $0x234] ss:$8 sps:$4 sm:$0xff] (!%p168_p2)   ;;  %v3324_v14 = vld [vmem:[%s4746_s1 + $0x230] ss:$8 sps:$4 sm:$0xff] (!%p168_p2)  }
   0xa   : > { %v3322_v13 = vld [vmem:[%s4746_s1 + $0x434] ss:$8 sps:$4 sm:$0xff] (!%p168_p2)   ;;  %v3325_v15 = vld [vmem:[%s4746_s1 + $0x430] ss:$8 sps:$4 sm:$0xff] (!%p168_p2)   ;;  %v3326_v16 = vld [vmem:[%s4746_s1 + $0x244] ss:$8 sps:$4 sm:$0xff] (!%p168_p2)  }
   0xb   : > { %774 = vmatpush1.bf16.msra.mxu1 (!%p168_p2), %v3312_v6  ;;  %v3328_v17 = vld [vmem:[%s4746_s1 + $0x444] ss:$8 sps:$4 sm:$0xff] (!%p168_p2)   ;;  %v3330_v18 = vld [vmem:[%s4746_s1 + $0x240] ss:$8 sps:$4 sm:$0xff] (!%p168_p2)   ;;  %v3332_v20 = vld [vmem:[%s4746_s1 + $0x254] ss:$8 sps:$4 sm:$0xff] (!%p168_p2)  }
   0xc   : > { %1818 = vmatpush1.bf16.msra.mxu0 (!%p168_p2), %v3313_v7  ;;  %775 = vmatprep.subr.bf16.mxu1 (!%p168_p2), %v3314_v8  ;;  %v3331_v19 = vld [vmem:[%s4746_s1 + $0x440] ss:$8 sps:$4 sm:$0xff] (!%p168_p2)   ;;  %v3334_v21 = vld [vmem:[%s4746_s1 + $0x454] ss:$8 sps:$4 sm:$0xff] (!%p168_p2)   ;;  %v3336_v22 = vld [vmem:[%s4746_s1 + $0x250] ss:$8 sps:$4 sm:$0xff] (!%p168_p2)  }
   0xd   : > { %1819 = vmatprep.subr.bf16.mxu0 %v3316_v9  ;;  %v3337_v23 = vld [vmem:[%s4746_s1 + $0x450] ss:$8 sps:$4 sm:$0xff]   ;;  %v3338_v24 = vld [vmem:[%s4746_s1 + $0x264] ss:$8 sps:$4 sm:$0xff]   ;;  %v3342_v26 = vld [vmem:[%s4746_s1 + $0x260] ss:$8 sps:$4 sm:$0xff]  }
   0xe   : > { %v3340_v25 = vld [vmem:[%s4746_s1 + $0x464] ss:$8 sps:$4 sm:$0xff]   ;;  %v3343_v27 = vld [vmem:[%s4746_s1 + $0x460] ss:$8 sps:$4 sm:$0xff]   ;;  %v3344_v28 = vld [vmem:[%s4746_s1 + $0x274] ss:$8 sps:$4 sm:$0xff]  }
   0xf   : > { %776 = vmatpush1.bf16.msra.mxu1 %v3318_v10  ;;  %v3346_v29 = vld [vmem:[%s4746_s1 + $0x474] ss:$8 sps:$4 sm:$0xff]   ;;  %v3348_v30 = vld [vmem:[%s4746_s1 + $0x270] ss:$8 sps:$4 sm:$0xff]   ;;  %v3350_v32 = vld [vmem:[%s4746_s1 + $0x284] ss:$8 sps:$4 sm:$0xff]  }
  0x10   : > { %1820 = vmatpush1.bf16.msra.mxu0 %v3319_v11  ;;  %777 = vmatprep.subr.bf16.mxu1 %v3320_v12  ;;  %v3349_v31 = vld [vmem:[%s4746_s1 + $0x470] ss:$8 sps:$4 sm:$0xff]   ;;  %v3352_v33 = vld [vmem:[%s4746_s1 + $0x484] ss:$8 sps:$4 sm:$0xff]   ;;  %v3354_v34 = vld [vmem:[%s4746_s1 + $0x280] ss:$8 sps:$4 sm:$0xff]  }
  0x11   : > { %1821 = vmatprep.subr.bf16.mxu0 %v3322_v13  ;;  %v3355_v35 = vld [vmem:[%s4746_s1 + $0x480] ss:$8 sps:$4 sm:$0xff]   ;;  %v3356_v36 = vld [vmem:[%s4746_s1 + $0x294] ss:$8 sps:$4 sm:$0xff]   ;;  %s4759_s16 = smov (!%p201_p3, %s2741_s16), 1  ;;  %vm2000_vm2 = vcmask 1044480  }
  0x12   : > { %v3358_v37 = vld [vmem:[%s4746_s1 + $0x494] ss:$8 sps:$4 sm:$0xff]   ;;  %v3360_v38 = vld [vmem:[%s4746_s1 + $0x290] ss:$8 sps:$4 sm:$0xff]   ;;  %v3362_v40 = vld [vmem:[%s4746_s1 + $0x2a4] ss:$8 sps:$4 sm:$0xff]  }
  0x13   : > { %778 = vmatpush1.bf16.msra.mxu1 %v3324_v14  ;;  %v3361_v39 = vld [vmem:[%s4746_s1 + $0x490] ss:$8 sps:$4 sm:$0xff]   ;;  %s3228_s27 = sshll.u32 %s4759_s16, 6  ;;  %v3364_v41 = vld [vmem:[%s4746_s1 + $0x4a4] ss:$8 sps:$4 sm:$0xff]   ;;  %vm2540_vm15 = vcmask 1043456  }
  0x14   : > { %1822 = vmatpush1.bf16.msra.mxu0 %v3325_v15  ;;  %779 = vmatprep.subr.bf16.mxu1 %v3326_v16  ;;  %v3366_v42 = vld [vmem:[%s4746_s1 + $0x2a0] ss:$8 sps:$4 sm:$0xff]   ;;  %s3898_s10 = scalar_lea.vmem %s4745_s0, %s3228_s27  ;;  %v3368_v44 = vld [vmem:[%s4746_s1 + $0x2b4] ss:$8 sps:$4 sm:$0xff]   ;;  %v3372_v46 = vld [vmem:[%s4746_s1 + $0x2b0] ss:$8 sps:$4 sm:$0xff]  }
  0x15   : > { %1823 = vmatprep.subr.bf16.mxu0 %v3328_v17  ;;  %v3367_v43 = vld [vmem:[%s4746_s1 + $0x4a0] ss:$8 sps:$4 sm:$0xff]   ;;  %v3370_v45 = vld [vmem:[%s4746_s1 + $0x4b4] ss:$8 sps:$4 sm:$0xff]   ;;  %v3373_v47 = vld [vmem:[%s4746_s1 + $0x4b0] ss:$8 sps:$4 sm:$0xff]  }
  0x16   : > { %v219_v48 = vld [vmem:[%s3898_s10] sm:$0xff]  ;;  %v3914_v49 = vld [vmem:[%s3898_s10 + $0x10] sm:$0xff]  ;;  %vm382_vm0 = vsmask.f32 7424  ;;  %vm1418_vm1 = vsmask.f32 5376 }
  0x17   : > { %780 = vmatpush1.bf16.msra.mxu1 %v3330_v18  ;;  %v289_v50 = vld [vmem:[%s3898_s10 + $0x20] sm:$0x77]  ;;  %v3924_v53 = vcombine.high %v219_v48, %v3914_v49  ;;  %v3943_v63 = vcombine.low %v219_v48, %v3914_v49  ;;  %v3380_v1 = vld [vmem:[%s4746_s1 + $0x2d4] ss:$8 sps:$4 sm:$0xff]   ;;  %v3384_v13 = vld [vmem:[%s4746_s1 + $0x2d0] ss:$8 sps:$4 sm:$0xff]  }
  0x18   : > { %1824 = vmatpush1.bf16.msra.mxu0 %v3331_v19  ;;  %781 = vmatprep.subr.bf16.mxu1 %v3332_v20  ;;  %v3374_v51 = vld [vmem:[%s4746_s1 + $0x2c4] ss:$8 sps:$4 sm:$0xff]   ;;  %v3926_v54 = vcombine.high %v289_v50, %v289_v50  ;;  %v3378_v56 = vld [vmem:[%s4746_s1 + $0x2c0] ss:$8 sps:$4 sm:$0xff]   ;;  %v3382_v6 = vld [vmem:[%s4746_s1 + $0x4d4] ss:$8 sps:$4 sm:$0xff]   ;;  %v3960_v16 = vcombine.low %v289_v50, %v289_v50 }
  0x19   : > { %1825 = vmatprep.subr.bf16.mxu0 %v3334_v21  ;;  %v3376_v52 = vld [vmem:[%s4746_s1 + $0x4c4] ss:$8 sps:$4 sm:$0xff]   ;;  %v396_v57 = vshrl.u32 %v3924_v53, 16  ;;  %v398_v58 = vshll.u32 %v3924_v53, 16  ;;  %v3379_v62 = vld [vmem:[%s4746_s1 + $0x4c0] ss:$8 sps:$4 sm:$0xff]  }
  0x1a   : > { %v1313_v55 = vld [vmem:[%s3898_s10] sm:$0xcc]  ;;  %v403_v59 = vshll.u32 %v3926_v54, 16  ;;  %v386_v17 = vshll.u32 %v3943_v63, 16  ;;  %v3385_v18 = vld [vmem:[%s4746_s1 + $0x4d0] ss:$8 sps:$4 sm:$0xff]  }
  0x1b   : > { %782 = vmatpush1.bf16.msra.mxu1 %v3336_v22  ;;  %v3020_v60 = vcombine.high %v1313_v55, %v3914_v49  ;;  %v3937_v61 = vld [vmem:[%s3898_s10 + $0x24] ss:$16 sps:$4 sm:$0x1f]   ;;  %v3019_v0 = vcombine.low %v1313_v55, %v3914_v49  ;;  %v400_v2 = vrot.slane %v398_v58, 1  ;;  %v434_v48 = vshrl.u32 %v3926_v54, 16  ;;  %s2749_s26 = sshll.u32 %s4759_s16, 1 }
  0x1c   : > { %1826 = vmatpush1.bf16.msra.mxu0 %v3337_v23  ;;  %783 = vmatprep.subr.bf16.mxu1 %v3338_v24  ;;  %v3949_v3 = vrot.slane %v403_v59, 1  ;;  %v1445_v7 = vshrl.u32 %v3937_v61, 16  ;;  %v1448_v8 = vshll.u32 %v3937_v61, 16  ;;  %v3412_v12 = vld [vmem:[%s3898_s10 + $0x20] ss:$16 sps:$4 sm:$0x1f]   ;;  %s214_s29 = scalar_lea.vmem %s4748_s3, %s2749_s26  ;;  %s218_s6 = scalar_lea.vmem %s4749_s4, %s2749_s26 }
  0x1d   : > { %1827 = vmatprep.subr.bf16.mxu0 %v3340_v25  ;;  %v1437_v4 = vshrl.u32 %v3020_v60, 16  ;;  %v1440_v5 = vshll.u32 %v3020_v60, 16  ;;  %v401_v9 = vor.u32 %v400_v2, %v396_v57  ;;  %v1420_v21 = vshrl.u32 %v3019_v0, 16  ;;  %v3386_v23 = vld [vmem:[%s4746_s1 + $0x2e4] ss:$8 sps:$4 sm:$0xff]  }
  0x1e   : > { %v1447_v14 = vrot.slane %v1445_v7, 2  ;;  %v1450_v15 = vrot.slane %v1448_v8, 3  ;;  %v1423_v22 = vshll.u32 %v3019_v0, 16  ;;  %v3388_v24 = vld [vmem:[%s4746_s1 + $0x4e4] ss:$8 sps:$4 sm:$0xff]   ;;  %v436_v57 = vor.u32 %v434_v48, %v3949_v3 }
  0x1f   : > { %784 = vmatpush1.bf16.msra.mxu1 %v3342_v26  ;;  %v1439_v10 = vrot.slane %v1437_v4, 2  ;;  %v1442_v11 = vrot.slane %v1440_v5, 3  ;;  %v406_v19 = vsel %vm382_vm0, %v401_v9, %v3949_v3  ;;  %v1428_v26 = vshrl.u32 %v3412_v12, 16  ;;  %v3400_v50 = vld [vmem:[%s4746_s1 + $0x300] ss:$8 sps:$4 sm:$0xff]  }
  0x20   : > { %1828 = vmatpush1.bf16.msra.mxu0 %v3343_v27  ;;  %785 = vmatprep.subr.bf16.mxu1 %v3344_v28  ;;  %v1451_v25 = vor.u32 %v1450_v15, %v1447_v14  ;;  %v1431_v27 = vshll.u32 %v3412_v12, 16  ;;  %v3390_v28 = vld [vmem:[%s4746_s1 + $0x2e0] ss:$8 sps:$4 sm:$0xff]   ;;  %v3415_v54 = vld [vmem:[%s4746_s1 + $0x314] ss:$8 sps:$4 sm:$0xff]   ;;  %v431_v59 = vshrl.u32 %v3960_v16, 16 }
  0x21   : > { %1829 = vmatprep.subr.bf16.mxu0 %v3346_v29  ;;  %v1443_v20 = vor.u32 %v1442_v11, %v1439_v10  ;;  %v3391_v29 = vld [vmem:[%s4746_s1 + $0x4e0] ss:$8 sps:$4 sm:$0xff]   ;;  %803 = vmatprep.mubr.bf16.mxu1 %v406_v19  ;;  %v3413_v58 = vld [vmem:[%s4746_s1 + $0x310] ss:$8 sps:$4 sm:$0xff]   ;;  %v3424_v0 = vld [vmem:[%s4746_s1 + $0x524] ss:$8 sps:$4 sm:$0xff]  }
  0x22   : > { %v3416_v60 = vld [vmem:[%s4746_s1 + $0x510] ss:$8 sps:$4 sm:$0xff]   ;;  %v3422_v3 = vld [vmem:[%s4746_s1 + $0x520] ss:$8 sps:$4 sm:$0xff]   ;;  %v3427_v4 = vld [vmem:[%s4746_s1 + $0x334] ss:$8 sps:$4 sm:$0xff]  }
  0x23   : > { %786 = vmatpush1.bf16.msra.mxu1 %v3348_v30  ;;  %v1452_v30 = vsel %vm1418_vm1, %v1443_v20, %v1451_v25  ;;  %v3430_v5 = vld [vmem:[%s4746_s1 + $0x534] ss:$8 sps:$4 sm:$0xff]   ;;  %v3428_v7 = vld [vmem:[%s4746_s1 + $0x530] ss:$8 sps:$4 sm:$0xff]   ;;  %v3433_v8 = vld [vmem:[%s4746_s1 + $0x344] ss:$8 sps:$4 sm:$0xff]  }
  0x24   : > { %1830 = vmatpush1.bf16.msra.mxu0 %v3349_v31  ;;  %787 = vmatprep.subr.bf16.mxu1 %v3350_v32  ;;  %v384_v31 = vshrl.u32 %v3943_v63, 16  ;;  %v388_v32 = vrot.slane %v386_v17, 1  ;;  %v3436_v9 = vld [vmem:[%s4746_s1 + $0x544] ss:$8 sps:$4 sm:$0xff]   ;;  %v3431_v10 = vld [vmem:[%s4746_s1 + $0x340] ss:$8 sps:$4 sm:$0xff]  }
  0x25   : > { %1831 = vmatprep.subr.bf16.mxu0 %v3352_v33  ;;  %v391_v33 = vshll.u32 %v3960_v16, 16  ;;  %1847 = vmatprep.mubr.bf16.mxu0 %v1452_v30  ;;  %v3434_v11 = vld [vmem:[%s4746_s1 + $0x540] ss:$8 sps:$4 sm:$0xff]   ;;  %v3439_v12 = vld [vmem:[%s4746_s1 + $0x354] ss:$8 sps:$4 sm:$0xff]  }
  0x26   : > { %v3437_v14 = vld [vmem:[%s4746_s1 + $0x350] ss:$8 sps:$4 sm:$0xff]   ;;  %v3445_v16 = vld [vmem:[%s4746_s1 + $0x364] ss:$8 sps:$4 sm:$0xff]   ;;  %v3446_v19 = vld [vmem:[%s4746_s1 + $0x560] ss:$8 sps:$4 sm:$0xff]  }
  0x27   : > { %788 = vmatpush1.bf16.msra.mxu1 %v3354_v34  ;;  %v1422_v34 = vrot.slane %v1420_v21, 2  ;;  %v3440_v15 = vld [vmem:[%s4746_s1 + $0x550] ss:$8 sps:$4 sm:$0xff]   ;;  %v3448_v17 = vld [vmem:[%s4746_s1 + $0x564] ss:$8 sps:$4 sm:$0xff]  }
  0x28   : > { %1832 = vmatpush1.bf16.msra.mxu0 %v3355_v35  ;;  %789 = vmatprep.subr.bf16.mxu1 %v3356_v36  ;;  %v1425_v35 = vrot.slane %v1423_v22, 3  ;;  %v1430_v36 = vrot.slane %v1428_v26, 2  ;;  %v3451_v20 = vld [vmem:[%s4746_s1 + $0x374] ss:$8 sps:$4 sm:$0xff]   ;;  %v3449_v22 = vld [vmem:[%s4746_s1 + $0x370] ss:$8 sps:$4 sm:$0xff]  }
  0x29   : > { %1833 = vmatprep.subr.bf16.mxu0 %v3358_v37  ;;  %v1433_v37 = vrot.slane %v1431_v27, 3  ;;  %v3454_v21 = vld [vmem:[%s4746_s1 + $0x574] ss:$8 sps:$4 sm:$0xff]   ;;  %v4103_v26 = vld [vmem:[%s3898_s10 + $0x28] sm:$0x77] }
  0x2a   : > { %v3457_v27 = vld [vmem:[%s4746_s1 + $0x384] ss:$8 sps:$4 sm:$0xff]   ;;  %v4117_v30 = vcombine.high %v4103_v26, %v4103_v26 }
  0x2b   : > { %790 = vmatpush1.bf16.msra.mxu1 %v3360_v38  ;;  %v3392_v38 = vld [vmem:[%s4746_s1 + $0x2f4] ss:$8 sps:$4 sm:$0xff]  }
  0x2c   : > { %1834 = vmatpush1.bf16.msra.mxu0 %v3361_v39  ;;  %791 = vmatprep.subr.bf16.mxu1 %v3362_v40  ;;  %v3394_v39 = vld [vmem:[%s4746_s1 + $0x4f4] ss:$8 sps:$4 sm:$0xff]   ;;  %v3396_v40 = vld [vmem:[%s4746_s1 + $0x2f0] ss:$8 sps:$4 sm:$0xff]  }
  0x2d   : > { %1835 = vmatprep.subr.bf16.mxu0 %v3364_v41  ;;  %v3397_v41 = vld [vmem:[%s4746_s1 + $0x4f0] ss:$8 sps:$4 sm:$0xff]  }
  0x2f   : > { %792 = vmatpush1.bf16.msra.mxu1 %v3366_v42  ;;  %v389_v42 = vor.u32 %v388_v32, %v384_v31  ;;  %v1314_v31 = vld [vmem:[%s3898_s10 + $0x8] sm:$0xcc] }
  0x30   : > { %1836 = vmatpush1.bf16.msra.mxu0 %v3367_v43  ;;  %793 = vmatprep.subr.bf16.mxu1 %v3368_v44  ;;  %v393_v43 = vrot.slane %v391_v33, 1  ;;  %v1426_v44 = vor.u32 %v1425_v35, %v1422_v34  ;;  %v3455_v35 = vld [vmem:[%s4746_s1 + $0x380] ss:$8 sps:$4 sm:$0xff]  }
  0x31   : > { %1837 = vmatprep.subr.bf16.mxu0 %v3370_v45  ;;  %v1434_v45 = vor.u32 %v1433_v37, %v1430_v36  ;;  %v3458_v36 = vld [vmem:[%s4746_s1 + $0x580] ss:$8 sps:$4 sm:$0xff]   ;;  %v427_v37 = vshll.u32 %v4117_v30, 16 }
  0x32   : > { %v433_v2 = vor.u32 %v431_v59, %v393_v43 }
  0x33   : > { %794 = vmatpush1.bf16.msra.mxu1 %v3372_v46  ;;  %v3402_v46 = vld [vmem:[%s4746_s1 + $0x304] ss:$8 sps:$4 sm:$0xff]   ;;  %v1435_v55 = vsel %vm1418_vm1, %v1426_v44, %v1434_v45  ;;  %v4139_v44 = vrot.slane %v427_v37, 1  ;;  %v3499_v37 = vld [vmem:[%s4746_s1 + $0x3f4] ss:$8 sps:$4 sm:$0xff]  }
  0x34   : > { %1838 = vmatpush1.bf16.msra.mxu0 %v3373_v47  ;;  %795 = vmatprep.subr.bf16.mxu1 %v3374_v51  ;;  %v3408_v47 = vld [vmem:[%s4746_s1 + $0x504] ss:$8 sps:$4 sm:$0xff]   ;;  %v3406_v51 = vld [vmem:[%s4746_s1 + $0x500] ss:$8 sps:$4 sm:$0xff]  }
  0x35   : > { %1839 = vmatprep.subr.bf16.mxu0 %v3376_v52  ;;  %v394_v52 = vsel %vm382_vm0, %v389_v42, %v393_v43  ;;  %v3463_v42 = vld [vmem:[%s4746_s1 + $0x394] ss:$8 sps:$4 sm:$0xff]  }
  0x36   : > { %v3466_v43 = vld [vmem:[%s4746_s1 + $0x594] ss:$8 sps:$4 sm:$0xff]  }
  0x37   : > { %796 = vmatpush1.bf16.msra.mxu1 %v3378_v56  ;;  %v3418_v56 = vld [vmem:[%s4746_s1 + $0x514] ss:$8 sps:$4 sm:$0xff]  }
  0x38   : > { %1840 = vmatpush1.bf16.msra.mxu0 %v3379_v62  ;;  %797 = vmatprep.subr.bf16.mxu1 %v3380_v1  ;;  %v3421_v62 = vld [vmem:[%s4746_s1 + $0x324] ss:$8 sps:$4 sm:$0xff]   ;;  %v3419_v1 = vld [vmem:[%s4746_s1 + $0x320] ss:$8 sps:$4 sm:$0xff]  }
  0x39   : > { %1841 = vmatprep.subr.bf16.mxu0 %v3382_v6  ;;  %v3425_v6 = vld [vmem:[%s4746_s1 + $0x330] ss:$8 sps:$4 sm:$0xff]  }
  0x3b   : > { %798 = vmatpush1.bf16.msra.mxu1 %v3384_v13  ;;  %v3442_v13 = vld [vmem:[%s4746_s1 + $0x554] ss:$8 sps:$4 sm:$0xff]  }
  0x3c   : > { %1842 = vmatpush1.bf16.msra.mxu0 %v3385_v18  ;;  %799 = vmatprep.subr.bf16.mxu1 %v3386_v23  ;;  %v3443_v18 = vld [vmem:[%s4746_s1 + $0x360] ss:$8 sps:$4 sm:$0xff]   ;;  %v3452_v23 = vld [vmem:[%s4746_s1 + $0x570] ss:$8 sps:$4 sm:$0xff]  }
  0x3d   : > { %1843 = vmatprep.subr.bf16.mxu0 %v3388_v24  ;;  %v4097_v24 = vld [vmem:[%s3898_s10 + $0x8] sm:$0xff] }
  0x3f   : > { %800 = vmatpush1.bf16.msra.mxu1 %v3390_v28 }
  0x40   : > { %1844 = vmatpush1.bf16.msra.mxu0 %v3391_v29  ;;  %801 = vmatprep.subr.bf16.mxu1 %v3392_v38  ;;  %v3460_v29 = vld [vmem:[%s4746_s1 + $0x584] ss:$8 sps:$4 sm:$0xff]  }
  0x41   : > { %1845 = vmatprep.subr.bf16.mxu0 %v3394_v39  ;;  %v4131_v39 = vld [vmem:[%s3898_s10 + $0x2c] ss:$16 sps:$4 sm:$0x1f]  }
  0x42   : > { %v1479_v48 = vshrl.u32 %v4131_v39, 16 }
  0x43   : > { %802 = vmatpush1.bf16.msra.mxu1 %v3396_v40 }
  0x44   : > { %1846 = vmatpush1.bf16.msra.mxu0 %v3397_v41  ;;  %822 = vmatprep.subr.bf16.mxu1 %v3402_v46 }
  0x45   : > { %1866 = vmatprep.subr.bf16.mxu0 %v3408_v47 }
  0x46   : > { %804 = vmatmul.mubr.bf16.vlgmr.msra.gmra.mrb[0].mxu1 %v394_v52  ;;  %v3464_v52 = vld [vmem:[%s4746_s1 + $0x590] ss:$8 sps:$4 sm:$0xff]  }
  0x47   : > { %1848 = vmatmul.mubr.bf16.vlgmr.msra.gmra.mrb[0].mxu0 %v1435_v55  ;;  %823 = vmatpush1.bf16.msra.mxu1 %v3400_v50  ;;  %v3461_v50 = vld [vmem:[%s4746_s1 + $0x390] ss:$8 sps:$4 sm:$0xff]  }
  0x48   : > { %1867 = vmatpush1.bf16.msra.mxu0 %v3406_v51  ;;  %824 = vmatprep.subr.bf16.mxu1 %v3415_v54  ;;  %v1482_v51 = vshll.u32 %v4131_v39, 16  ;;  %v1481_v54 = vrot.slane %v1479_v48, 2  ;;  %v3517_v48 = vld [vmem:[%s4746_s1 + $0x604] ss:$8 sps:$4 sm:$0xff]  }
  0x49   : > { %1868 = vmatprep.subr.bf16.mxu0 %v3418_v56  ;;  %813 = vmatprep.mubr.bf16.mxu1 %v436_v57  ;;  %v3469_v56 = vld [vmem:[%s4746_s1 + $0x3a4] ss:$8 sps:$4 sm:$0xff]  }
  0x4a   : > { %1857 = vmatprep.mubr.bf16.mxu0 %v1451_v25  ;;  %v4100_v25 = vld [vmem:[%s3898_s10 + $0x18] sm:$0xff]  ;;  %v3472_v57 = vld [vmem:[%s4746_s1 + $0x5a4] ss:$8 sps:$4 sm:$0xff]   ;;  %v1484_v59 = vrot.slane %v1482_v51, 3  ;;  %v3507_v51 = vld [vmem:[%s4746_s1] ss:$8 sps:$4 sm:$0xff]  }
  0x4b   : > { %825 = vmatpush1.bf16.msra.mxu1 %v3413_v58  ;;  %v4110_v28 = vcombine.high %v4097_v24, %v4100_v25  ;;  %v3022_v34 = vcombine.high %v1314_v31, %v4100_v25 }
  0x4c   : > { %1869 = vmatpush1.bf16.msra.mxu0 %v3416_v60  ;;  %826 = vmatprep.subr.bf16.mxu1 %v3421_v62  ;;  %v4157_v60 = vor.u32 %v1484_v59, %v1481_v54  ;;  %v3467_v62 = vld [vmem:[%s4746_s1 + $0x3a0] ss:$8 sps:$4 sm:$0xff]   ;;  %v3518_v59 = vld [vmem:[%s4746_s1 + $0x10] ss:$8 sps:$4 sm:$0xff]  }
  0x4d   : > { %1870 = vmatprep.subr.bf16.mxu0 %v3424_v0  ;;  %v420_v32 = vshrl.u32 %v4110_v28, 16  ;;  %v422_v33 = vshll.u32 %v4110_v28, 16  ;;  %v1471_v40 = vshrl.u32 %v3022_v34, 16  ;;  %v1474_v41 = vshll.u32 %v3022_v34, 16  ;;  %v3470_v0 = vld [vmem:[%s4746_s1 + $0x5a0] ss:$8 sps:$4 sm:$0xff]  }
  0x4e   : > { %814 = vmatmul.mubr.bf16.gmra.mrb[4].mxu1 %v433_v2  ;;  %v3478_v2 = vld [vmem:[%s4746_s1 + $0x5b4] ss:$8 sps:$4 sm:$0xff]  }
  0x4f   : > { %1858 = vmatmul.mubr.bf16.gmra.mrb[4].mxu0 %v1434_v45  ;;  %827 = vmatpush1.bf16.msra.mxu1 %v3419_v1  ;;  %v424_v38 = vrot.slane %v422_v33, 1  ;;  %v1473_v46 = vrot.slane %v1471_v40, 2  ;;  %v1476_v47 = vrot.slane %v1474_v41, 3  ;;  %v3475_v1 = vld [vmem:[%s4746_s1 + $0x3b4] ss:$8 sps:$4 sm:$0xff]  }
  0x50   : > { %1871 = vmatpush1.bf16.msra.mxu0 %v3422_v3  ;;  %828 = vmatprep.subr.bf16.mxu1 %v3427_v4  ;;  %v3473_v4 = vld [vmem:[%s4746_s1 + $0x3b0] ss:$8 sps:$4 sm:$0xff]  }
  0x51   : > { %1872 = vmatprep.subr.bf16.mxu0 %v3430_v5  ;;  %v425_v45 = vor.u32 %v424_v38, %v420_v32  ;;  %v1477_v58 = vor.u32 %v1476_v47, %v1473_v46  ;;  %v3476_v5 = vld [vmem:[%s4746_s1 + $0x5b0] ss:$8 sps:$4 sm:$0xff]   ;;  %v3502_v38 = vld [vmem:[%s4746_s1 + $0x5f4] ss:$8 sps:$4 sm:$0xff]   ;;  %v3509_v47 = vld [vmem:[%s4746_s1 + $0x4] ss:$8 sps:$4 sm:$0xff]  }
  0x52   : > { %v3497_v40 = vld [vmem:[%s4746_s1 + $0x3f0] ss:$8 sps:$4 sm:$0xff]  }
  0x53   : > { %829 = vmatpush1.bf16.msra.mxu1 %v3425_v6  ;;  %v430_v55 = vsel %vm382_vm0, %v425_v45, %v4139_v44  ;;  %v1486_v3 = vsel %vm1418_vm1, %v1477_v58, %v4157_v60  ;;  %v3481_v6 = vld [vmem:[%s4746_s1 + $0x3c4] ss:$8 sps:$4 sm:$0xff]   ;;  %v3500_v41 = vld [vmem:[%s4746_s1 + $0x5f0] ss:$8 sps:$4 sm:$0xff]  }
  0x54   : > { %1873 = vmatpush1.bf16.msra.mxu0 %v3428_v7  ;;  %830 = vmatprep.subr.bf16.mxu1 %v3433_v8  ;;  %v3484_v7 = vld [vmem:[%s4746_s1 + $0x5c4] ss:$8 sps:$4 sm:$0xff]   ;;  %v3479_v8 = vld [vmem:[%s4746_s1 + $0x3c0] ss:$8 sps:$4 sm:$0xff]  }
  0x55   : > { %1874 = vmatprep.subr.bf16.mxu0 %v3436_v9  ;;  %854 = vmatprep.mubr.bf16.mxu1 %v430_v55  ;;  %v4190_v9 = vcombine.low %v4097_v24, %v4100_v25  ;;  %v3496_v24 = vld [vmem:[%s4746_s1 + $0x5e4] ss:$8 sps:$4 sm:$0xff]  }
  0x56   : > { %1898 = vmatprep.mubr.bf16.mxu0 %v1486_v3  ;;  %v3527_v3 = vld [vmem:[%s4746_s1 + $0x620] ss:$8 sps:$4 sm:$0xff]  }
  0x57   : > { %831 = vmatpush1.bf16.msra.mxu1 %v3431_v10  ;;  %v3482_v10 = vld [vmem:[%s4746_s1 + $0x5c0] ss:$8 sps:$4 sm:$0xff]  }
  0x58   : > { %1875 = vmatpush1.bf16.msra.mxu0 %v3434_v11  ;;  %832 = vmatprep.subr.bf16.mxu1 %v3439_v12  ;;  %v3021_v11 = vcombine.low %v1314_v31, %v4100_v25  ;;  %v4197_v12 = vld [vmem:[%s3898_s10 + $0x28] ss:$16 sps:$4 sm:$0x1f]  }
  0x59   : > { %1876 = vmatprep.subr.bf16.mxu0 %v3442_v13  ;;  %v3487_v13 = vld [vmem:[%s4746_s1 + $0x3d4] ss:$8 sps:$4 sm:$0xff]  }
  0x5b   : > { %833 = vmatpush1.bf16.msra.mxu1 %v3437_v14  ;;  %v3490_v14 = vld [vmem:[%s4746_s1 + $0x5d4] ss:$8 sps:$4 sm:$0xff]  }
  0x5c   : > { %1877 = vmatpush1.bf16.msra.mxu0 %v3440_v15  ;;  %834 = vmatprep.subr.bf16.mxu1 %v3445_v16  ;;  %v3485_v15 = vld [vmem:[%s4746_s1 + $0x3d0] ss:$8 sps:$4 sm:$0xff]  }
  0x5d   : > { %1878 = vmatprep.subr.bf16.mxu0 %v3448_v17  ;;  %v3488_v16 = vld [vmem:[%s4746_s1 + $0x5d0] ss:$8 sps:$4 sm:$0xff]   ;;  %v4213_v17 = vcombine.low %v4103_v26, %v4103_v26  ;;  %v3491_v26 = vld [vmem:[%s4746_s1 + $0x3e0] ss:$8 sps:$4 sm:$0xff]  }
  0x5f   : > { %835 = vmatpush1.bf16.msra.mxu1 %v3443_v18  ;;  %v410_v18 = vshll.u32 %v4190_v9, 16  ;;  %v415_v32 = vshll.u32 %v4213_v17, 16  ;;  %v437_v58 = vshrl.u32 %v4213_v17, 16 }
  0x60   : > { %1879 = vmatpush1.bf16.msra.mxu0 %v3446_v19  ;;  %836 = vmatprep.subr.bf16.mxu1 %v3451_v20  ;;  %v1454_v19 = vshrl.u32 %v3021_v11, 16  ;;  %v1457_v20 = vshll.u32 %v3021_v11, 16 }
  0x61   : > { %1880 = vmatprep.subr.bf16.mxu0 %v3454_v21  ;;  %v1462_v21 = vshrl.u32 %v4197_v12, 16  ;;  %v412_v31 = vrot.slane %v410_v18, 1  ;;  %v3542_v18 = vld [vmem:[%s4746_s1 + $0x50] ss:$8 sps:$4 sm:$0xff]  }
  0x62   : > { %v1456_v33 = vrot.slane %v1454_v19, 2  ;;  %v1459_v34 = vrot.slane %v1457_v20, 3  ;;  %v3545_v19 = vld [vmem:[%s4746_s1 + $0x650] ss:$8 sps:$4 sm:$0xff]   ;;  %v3550_v20 = vld [vmem:[%s4746_s1 + $0x64] ss:$8 sps:$4 sm:$0xff]  }
  0x63   : > { %837 = vmatpush1.bf16.msra.mxu1 %v3449_v22  ;;  %v1465_v22 = vshll.u32 %v4197_v12, 16 }
  0x64   : > { %1881 = vmatpush1.bf16.msra.mxu0 %v3452_v23  ;;  %838 = vmatprep.subr.bf16.mxu1 %v3457_v27  ;;  %v3493_v23 = vld [vmem:[%s4746_s1 + $0x3e4] ss:$8 sps:$4 sm:$0xff]   ;;  %v3494_v27 = vld [vmem:[%s4746_s1 + $0x5e0] ss:$8 sps:$4 sm:$0xff]   ;;  %v1460_v45 = vor.u32 %v1459_v34, %v1456_v33 }
  0x65   : > { %1882 = vmatprep.subr.bf16.mxu0 %v3460_v29  ;;  %v408_v29 = vshrl.u32 %v4190_v9, 16  ;;  %v3560_v33 = vld [vmem:[%s4746_s1 + $0x80] ss:$8 sps:$4 sm:$0xff]  }
  0x66   : > { %v3563_v34 = vld [vmem:[%s4746_s1 + $0x680] ss:$8 sps:$4 sm:$0xff]  }
  0x67   : > { %839 = vmatpush1.bf16.msra.mxu1 %v3455_v35  ;;  %v1464_v35 = vrot.slane %v1462_v21, 2  ;;  %v3553_v21 = vld [vmem:[%s4746_s1 + $0x664] ss:$8 sps:$4 sm:$0xff]  }
  0x68   : > { %1883 = vmatpush1.bf16.msra.mxu0 %v3458_v36  ;;  %840 = vmatprep.subr.bf16.mxu1 %v3463_v42  ;;  %v1467_v36 = vrot.slane %v1465_v22, 3  ;;  %v413_v42 = vor.u32 %v412_v31, %v408_v29  ;;  %v3548_v22 = vld [vmem:[%s4746_s1 + $0x60] ss:$8 sps:$4 sm:$0xff]   ;;  %v3557_v29 = vld [vmem:[%s4746_s1 + $0x670] ss:$8 sps:$4 sm:$0xff]  }
  0x69   : > { %1884 = vmatprep.subr.bf16.mxu0 %v3466_v43  ;;  %v417_v43 = vrot.slane %v415_v32, 1  ;;  %v3562_v31 = vld [vmem:[%s4746_s1 + $0x84] ss:$8 sps:$4 sm:$0xff]  }
  0x6a   : > { %v1468_v46 = vor.u32 %v1467_v36, %v1464_v35  ;;  %v3565_v32 = vld [vmem:[%s4746_s1 + $0x684] ss:$8 sps:$4 sm:$0xff]   ;;  %v3568_v35 = vld [vmem:[%s4746_s1 + $0x94] ss:$8 sps:$4 sm:$0xff]  }
  0x6b   : > { %841 = vmatpush1.bf16.msra.mxu1 %v3461_v50  ;;  %v440_v50 = vshrl.u32 %v4117_v30, 16  ;;  %v418_v55 = vsel %vm382_vm0, %v413_v42, %v417_v43  ;;  %v3520_v30 = vld [vmem:[%s4746_s1 + $0x14] ss:$8 sps:$4 sm:$0xff]   ;;  %v3572_v42 = vld [vmem:[%s4746_s1 + $0xa0] ss:$8 sps:$4 sm:$0xff]  }
  0x6c   : > { %1885 = vmatpush1.bf16.msra.mxu0 %v3464_v52  ;;  %842 = vmatprep.subr.bf16.mxu1 %v3469_v56  ;;  %v3515_v52 = vld [vmem:[%s4746_s1 + $0x600] ss:$8 sps:$4 sm:$0xff]   ;;  %v1469_v54 = vsel %vm1418_vm1, %v1460_v45, %v1468_v46  ;;  %v3523_v56 = vld [vmem:[%s4746_s1 + $0x614] ss:$8 sps:$4 sm:$0xff]  }
  0x6d   : > { %1886 = vmatprep.subr.bf16.mxu0 %v3472_v57  ;;  %v442_v57 = vor.u32 %v440_v50, %v4139_v44  ;;  %v3526_v44 = vld [vmem:[%s4746_s1 + $0x24] ss:$8 sps:$4 sm:$0xff]   ;;  %v3571_v36 = vld [vmem:[%s4746_s1 + $0x694] ss:$8 sps:$4 sm:$0xff]  }
  0x6e   : > { %v3580_v45 = vld [vmem:[%s4746_s1 + $0xb4] ss:$8 sps:$4 sm:$0xff]   ;;  %v3586_v50 = vld [vmem:[%s4746_s1 + $0xc4] ss:$8 sps:$4 sm:$0xff]  }
  0x6f   : > { %843 = vmatpush1.bf16.msra.mxu1 %v3467_v62  ;;  %v3521_v62 = vld [vmem:[%s4746_s1 + $0x610] ss:$8 sps:$4 sm:$0xff]  }
  0x70   : > { %1887 = vmatpush1.bf16.msra.mxu0 %v3470_v0  ;;  %844 = vmatprep.subr.bf16.mxu1 %v3475_v1  ;;  %v3529_v0 = vld [vmem:[%s4746_s1 + $0x624] ss:$8 sps:$4 sm:$0xff]   ;;  %v439_v1 = vor.u32 %v437_v58, %v417_v43  ;;  %v3575_v43 = vld [vmem:[%s4746_s1 + $0x6a0] ss:$8 sps:$4 sm:$0xff]  }
  0x71   : > { %1888 = vmatprep.subr.bf16.mxu0 %v3478_v2  ;;  %v3524_v2 = vld [vmem:[%s4746_s1 + $0x20] ss:$8 sps:$4 sm:$0xff]   ;;  %v3598_v58 = vld [vmem:[%s4746_s1 + $0xe4] ss:$8 sps:$4 sm:$0xff]  }
  0x73   : > { %845 = vmatpush1.bf16.msra.mxu1 %v3473_v4  ;;  %v3532_v4 = vld [vmem:[%s4746_s1 + $0x34] ss:$8 sps:$4 sm:$0xff]  }
  0x74   : > { %1889 = vmatpush1.bf16.msra.mxu0 %v3476_v5  ;;  %846 = vmatprep.subr.bf16.mxu1 %v3481_v6  ;;  %v3530_v5 = vld [vmem:[%s4746_s1 + $0x30] ss:$8 sps:$4 sm:$0xff]  }
  0x75   : > { %1890 = vmatprep.subr.bf16.mxu0 %v3484_v7  ;;  %v3533_v6 = vld [vmem:[%s4746_s1 + $0x630] ss:$8 sps:$4 sm:$0xff]   ;;  %v3538_v7 = vld [vmem:[%s4746_s1 + $0x44] ss:$8 sps:$4 sm:$0xff]  }
  0x77   : > { %847 = vmatpush1.bf16.msra.mxu1 %v3479_v8  ;;  %v4302_v8 = vld [vmem:[%s3898_s10] sm:$0x88] }
  0x78   : > { %1891 = vmatpush1.bf16.msra.mxu0 %v3482_v10  ;;  %848 = vmatprep.subr.bf16.mxu1 %v3487_v13  ;;  %v3541_v10 = vld [vmem:[%s4746_s1 + $0x644] ss:$8 sps:$4 sm:$0xff]   ;;  %v3156_v11 = vcombine.high %v4302_v8, %v3914_v49  ;;  %v2005_v13 = vrot.slane %v3937_v61, 3  ;;  %v3544_v49 = vld [vmem:[%s4746_s1 + $0x54] ss:$8 sps:$4 sm:$0xff]  }
  0x79   : > { %1892 = vmatprep.subr.bf16.mxu0 %v3490_v14  ;;  %v3536_v14 = vld [vmem:[%s4746_s1 + $0x40] ss:$8 sps:$4 sm:$0xff]   ;;  %v3630_v61 = vld [vmem:[%s4746_s1 + $0x134] ss:$8 sps:$4 sm:$0xff]  }
  0x7b   : > { %849 = vmatpush1.bf16.msra.mxu1 %v3485_v15  ;;  %v3539_v15 = vld [vmem:[%s4746_s1 + $0x640] ss:$8 sps:$4 sm:$0xff]  }
  0x7c   : > { %1893 = vmatpush1.bf16.msra.mxu0 %v3488_v16  ;;  %850 = vmatprep.subr.bf16.mxu1 %v3493_v23  ;;  %v2004_v16 = vrot.slane %v3156_v11, 3  ;;  %v3551_v23 = vld [vmem:[%s4746_s1 + $0x660] ss:$8 sps:$4 sm:$0xff]  }
  0x7d   : > { %1894 = vmatprep.subr.bf16.mxu0 %v3496_v24  ;;  %v3556_v24 = vld [vmem:[%s4746_s1 + $0x74] ss:$8 sps:$4 sm:$0xff]   ;;  %v3713_v11 = vld [vmem:[%s3898_s10 + $0x20] ss:$16 sps:$4 sm:$0x1f]  }
  0x7e   : > { %v2006_v17 = vsel %vm2000_vm2, %v2004_v16, %v2005_v13  ;;  %v3610_v16 = vld [vmem:[%s4746_s1 + $0x104] ss:$8 sps:$4 sm:$0xff]  }
  0x7f   : > { %851 = vmatpush1.bf16.msra.mxu1 %v3491_v26  ;;  %v3559_v26 = vld [vmem:[%s4746_s1 + $0x674] ss:$8 sps:$4 sm:$0xff]  }
  0x80   : > { %1895 = vmatpush1.bf16.msra.mxu0 %v3494_v27  ;;  %852 = vmatprep.subr.bf16.mxu1 %v3499_v37  ;;  %v3554_v27 = vld [vmem:[%s4746_s1 + $0x70] ss:$8 sps:$4 sm:$0xff]  }
  0x81   : > { %1896 = vmatprep.subr.bf16.mxu0 %v3502_v38  ;;  %v3566_v37 = vld [vmem:[%s4746_s1 + $0x90] ss:$8 sps:$4 sm:$0xff]  }
  0x82   : > { %v3569_v38 = vld [vmem:[%s4746_s1 + $0x690] ss:$8 sps:$4 sm:$0xff]  }
  0x83   : > { %853 = vmatpush1.bf16.msra.mxu1 %v3497_v40  ;;  %v3574_v40 = vld [vmem:[%s4746_s1 + $0xa4] ss:$8 sps:$4 sm:$0xff]  }
  0x84   : > { %1897 = vmatpush1.bf16.msra.mxu0 %v3500_v41  ;;  %1211 = vmatprep.subr.bf16.mxu1 %v3509_v47  ;;  %v3577_v41 = vld [vmem:[%s4746_s1 + $0x6a4] ss:$8 sps:$4 sm:$0xff]   ;;  %v3578_v47 = vld [vmem:[%s4746_s1 + $0xb0] ss:$8 sps:$4 sm:$0xff]  }
  0x85   : > { %2341 = vmatprep.subr.bf16.mxu0 %v3517_v48  ;;  %v3581_v48 = vld [vmem:[%s4746_s1 + $0x6b0] ss:$8 sps:$4 sm:$0xff]  }
  0x86   : > { %855 = vmatmul.mubr.bf16.vlgmr.msra.gmra.mrb[0].mxu1 %v418_v55  ;;  %v3587_v55 = vld [vmem:[%s4746_s1 + $0x6c0] ss:$8 sps:$4 sm:$0xff]  }
  0x87   : > { %1899 = vmatmul.mubr.bf16.vlgmr.msra.gmra.mrb[0].mxu0 %v1469_v54  ;;  %1212 = vmatpush1.bf16.msra.mxu1 %v3507_v51  ;;  %v3589_v51 = vld [vmem:[%s4746_s1 + $0x6c4] ss:$8 sps:$4 sm:$0xff]   ;;  %v3592_v54 = vld [vmem:[%s4746_s1 + $0xd4] ss:$8 sps:$4 sm:$0xff]  }
  0x88   : > { %2342 = vmatpush1.bf16.msra.mxu0 %v3515_v52  ;;  %1213 = vmatprep.subr.bf16.mxu1 %v3520_v30  ;;  %v3584_v52 = vld [vmem:[%s4746_s1 + $0xc0] ss:$8 sps:$4 sm:$0xff]   ;;  %v3595_v30 = vld [vmem:[%s4746_s1 + $0x6d4] ss:$8 sps:$4 sm:$0xff]  }
  0x89   : > { %2343 = vmatprep.subr.bf16.mxu0 %v3523_v56  ;;  %864 = vmatprep.mubr.bf16.mxu1 %v442_v57  ;;  %v3590_v56 = vld [vmem:[%s4746_s1 + $0xd0] ss:$8 sps:$4 sm:$0xff]  }
  0x8a   : > { %1908 = vmatprep.mubr.bf16.mxu0 %v4157_v60  ;;  %v3535_v60 = vld [vmem:[%s4746_s1 + $0x634] ss:$8 sps:$4 sm:$0xff]   ;;  %v3593_v57 = vld [vmem:[%s4746_s1 + $0x6d0] ss:$8 sps:$4 sm:$0xff]  }
  0x8b   : > { %1214 = vmatpush1.bf16.msra.mxu1 %v3518_v59  ;;  %v3601_v59 = vld [vmem:[%s4746_s1 + $0x6e4] ss:$8 sps:$4 sm:$0xff]  }
  0x8c   : > { %2344 = vmatpush1.bf16.msra.mxu0 %v3521_v62  ;;  %1215 = vmatprep.subr.bf16.mxu1 %v3526_v44  ;;  %v1924_v62 = vld [vmem:[%s3898_s10 + $0x8] sm:$0x88] }
  0x8d   : > { %2345 = vmatprep.subr.bf16.mxu0 %v3529_v0  ;;  %v3596_v44 = vld [vmem:[%s4746_s1 + $0xe0] ss:$8 sps:$4 sm:$0xff]  }
  0x8e   : > { %865 = vmatmul.mubr.bf16.gmra.mrb[4].mxu1 %v439_v1  ;;  %v3599_v0 = vld [vmem:[%s4746_s1 + $0x6e0] ss:$8 sps:$4 sm:$0xff]   ;;  %v3712_v1 = vld [vmem:[%s3898_s10 + $0x10] sm:$0xff] }
  0x8f   : > { %1909 = vmatmul.mubr.bf16.gmra.mrb[4].mxu0 %v1468_v46  ;;  %1216 = vmatpush1.bf16.msra.mxu1 %v3524_v2  ;;  %v3583_v46 = vld [vmem:[%s4746_s1 + $0x6b4] ss:$8 sps:$4 sm:$0xff]   ;;  %v3155_v2 = vcombine.low %v4302_v8, %v3712_v1  ;;  %v3605_v8 = vld [vmem:[%s4746_s1 + $0x6f0] ss:$8 sps:$4 sm:$0xff]   ;;  %v3672_v1 = vld [vmem:[%s4746_s1 + $0x1a4] ss:$8 sps:$4 sm:$0xff]  }
  0x90   : > { %2346 = vmatpush1.bf16.msra.mxu0 %v3527_v3  ;;  %1217 = vmatprep.subr.bf16.mxu1 %v3532_v4  ;;  %v3157_v3 = vcombine.low %v1924_v62, %v4100_v25  ;;  %v2008_v4 = vrot.slane %v4197_v12, 3 }
  0x91   : > { %2347 = vmatprep.subr.bf16.mxu0 %v3535_v60  ;;  %1243 = vmatprep.mubr.bf16.mxu1 %v3924_v53  ;;  %v3547_v53 = vld [vmem:[%s4746_s1 + $0x654] ss:$8 sps:$4 sm:$0xff]  }
  0x92   : > { %2373 = vmatprep.mubr.bf16.mxu0 %v2006_v17  ;;  %v3604_v60 = vld [vmem:[%s4746_s1 + $0xf4] ss:$8 sps:$4 sm:$0xff]   ;;  %v3608_v17 = vld [vmem:[%s4746_s1 + $0x100] ss:$8 sps:$4 sm:$0xff]  }
  0x93   : > { %1218 = vmatpush1.bf16.msra.mxu1 %v3530_v5  ;;  %v3607_v5 = vld [vmem:[%s4746_s1 + $0x6f4] ss:$8 sps:$4 sm:$0xff]  }
  0x94   : > { %2348 = vmatpush1.bf16.msra.mxu0 %v3533_v6  ;;  %1219 = vmatprep.subr.bf16.mxu1 %v3538_v7  ;;  %v2007_v6 = vrot.slane %v3157_v3, 3  ;;  %v3602_v7 = vld [vmem:[%s4746_s1 + $0xf0] ss:$8 sps:$4 sm:$0xff]   ;;  %v3670_v3 = vld [vmem:[%s4746_s1 + $0x1a0] ss:$8 sps:$4 sm:$0xff]  }
  0x95   : > { %2349 = vmatprep.subr.bf16.mxu0 %v3541_v10  ;;  %v2001_v10 = vrot.slane %v3155_v2, 3  ;;  %v3675_v2 = vld [vmem:[%s4746_s1 + $0x7a4] ss:$8 sps:$4 sm:$0xff]  }
  0x97   : > { %1220 = vmatpush1.bf16.msra.mxu1 %v3536_v14  ;;  %v2002_v14 = vrot.slane %v3713_v11, 3  ;;  %v3687_v11 = vld [vmem:[%s4746_s1 + $0x7c4] ss:$8 sps:$4 sm:$0xff]  }
  0x98   : > { %2350 = vmatpush1.bf16.msra.mxu0 %v3539_v15  ;;  %1221 = vmatprep.subr.bf16.mxu1 %v3544_v49  ;;  %v4461_v15 = vsel %vm2000_vm2, %v2007_v6, %v2008_v4  ;;  %v3615_v49 = vld [vmem:[%s4746_s1 + $0x704] ss:$8 sps:$4 sm:$0xff]   ;;  %v3681_v6 = vld [vmem:[%s4746_s1 + $0x7b4] ss:$8 sps:$4 sm:$0xff]  }
  0x99   : > { %2351 = vmatprep.subr.bf16.mxu0 %v3547_v53  ;;  %v223_v53 = vld [vmem:[%s3898_s10 + $0x20] sm:$0x33] }
  0x9b   : > { %1222 = vmatpush1.bf16.msra.mxu1 %v3542_v18  ;;  %v3613_v18 = vld [vmem:[%s4746_s1 + $0x700] ss:$8 sps:$4 sm:$0xff]  }
  0x9c   : > { %2352 = vmatpush1.bf16.msra.mxu0 %v3545_v19  ;;  %1223 = vmatprep.subr.bf16.mxu1 %v3550_v20  ;;  %v2003_v19 = vsel %vm2000_vm2, %v2001_v10, %v2002_v14  ;;  %v3618_v20 = vld [vmem:[%s4746_s1 + $0x114] ss:$8 sps:$4 sm:$0xff]   ;;  %v3684_v10 = vld [vmem:[%s4746_s1 + $0x1c4] ss:$8 sps:$4 sm:$0xff]  }
  0x9d   : > { %2353 = vmatprep.subr.bf16.mxu0 %v3553_v21  ;;  %v3621_v21 = vld [vmem:[%s4746_s1 + $0x714] ss:$8 sps:$4 sm:$0xff]  }
  0x9f   : > { %1224 = vmatpush1.bf16.msra.mxu1 %v3548_v22  ;;  %v2888_v22 = vcombine.high %v223_v53, %v223_v53 }
  0xa0   : > { %2354 = vmatpush1.bf16.msra.mxu0 %v3551_v23  ;;  %1225 = vmatprep.subr.bf16.mxu1 %v3556_v24  ;;  %v3158_v23 = vcombine.high %v1924_v62, %v4100_v25  ;;  %v3616_v24 = vld [vmem:[%s4746_s1 + $0x110] ss:$8 sps:$4 sm:$0xff]   ;;  %v2887_v25 = vcombine.low %v223_v53, %v223_v53  ;;  %v3669_v62 = vld [vmem:[%s4746_s1 + $0x794] ss:$8 sps:$4 sm:$0xff]  }
  0xa1   : > { %2355 = vmatprep.subr.bf16.mxu0 %v3559_v26  ;;  %v3619_v26 = vld [vmem:[%s4746_s1 + $0x710] ss:$8 sps:$4 sm:$0xff]   ;;  %v3693_v53 = vld [vmem:[%s4746_s1 + $0x7d4] ss:$8 sps:$4 sm:$0xff]  }
  0xa3   : > { %1226 = vmatpush1.bf16.msra.mxu1 %v3554_v27  ;;  %v3624_v27 = vld [vmem:[%s4746_s1 + $0x124] ss:$8 sps:$4 sm:$0xff]  }
  0xa4   : > { %2356 = vmatpush1.bf16.msra.mxu0 %v3557_v29  ;;  %1227 = vmatprep.subr.bf16.mxu1 %v3562_v31  ;;  %v2010_v29 = vrot.slane %v3158_v23, 3  ;;  %v2011_v31 = vrot.slane %v4131_v39, 3  ;;  %v3704_v23 = vld [vmem:[%s4746_s1 + $0x1f4] ss:$8 sps:$4 sm:$0xff]  }
  0xa5   : > { %2357 = vmatprep.subr.bf16.mxu0 %v3565_v32  ;;  %v3622_v32 = vld [vmem:[%s4746_s1 + $0x120] ss:$8 sps:$4 sm:$0xff]  }
  0xa7   : > { %1228 = vmatpush1.bf16.msra.mxu1 %v3560_v33  ;;  %v3625_v33 = vld [vmem:[%s4746_s1 + $0x720] ss:$8 sps:$4 sm:$0xff]  }
  0xa8   : > { %2358 = vmatpush1.bf16.msra.mxu0 %v3563_v34  ;;  %1229 = vmatprep.subr.bf16.mxu1 %v3568_v35  ;;  %v2012_v34 = vsel %vm2000_vm2, %v2010_v29, %v2011_v31  ;;  %v3628_v35 = vld [vmem:[%s4746_s1 + $0x130] ss:$8 sps:$4 sm:$0xff]  }
  0xa9   : > { %2359 = vmatprep.subr.bf16.mxu0 %v3571_v36  ;;  %v3631_v36 = vld [vmem:[%s4746_s1 + $0x730] ss:$8 sps:$4 sm:$0xff]  }
  0xab   : > { %1230 = vmatpush1.bf16.msra.mxu1 %v3566_v37  ;;  %v3636_v37 = vld [vmem:[%s4746_s1 + $0x144] ss:$8 sps:$4 sm:$0xff]  }
  0xac   : > { %2360 = vmatpush1.bf16.msra.mxu0 %v3569_v38  ;;  %1231 = vmatprep.subr.bf16.mxu1 %v3574_v40  ;;  %v3639_v38 = vld [vmem:[%s4746_s1 + $0x744] ss:$8 sps:$4 sm:$0xff]   ;;  %v3634_v40 = vld [vmem:[%s4746_s1 + $0x140] ss:$8 sps:$4 sm:$0xff]  }
  0xad   : > { %2361 = vmatprep.subr.bf16.mxu0 %v3577_v41  ;;  %v3637_v41 = vld [vmem:[%s4746_s1 + $0x740] ss:$8 sps:$4 sm:$0xff]  }
  0xaf   : > { %1232 = vmatpush1.bf16.msra.mxu1 %v3572_v42  ;;  %v3642_v42 = vld [vmem:[%s4746_s1 + $0x154] ss:$8 sps:$4 sm:$0xff]  }
  0xb0   : > { %2362 = vmatpush1.bf16.msra.mxu0 %v3575_v43  ;;  %1233 = vmatprep.subr.bf16.mxu1 %v3580_v45  ;;  %v3640_v43 = vld [vmem:[%s4746_s1 + $0x150] ss:$8 sps:$4 sm:$0xff]  }
  0xb1   : > { %2363 = vmatprep.subr.bf16.mxu0 %v3583_v46  ;;  %v3643_v45 = vld [vmem:[%s4746_s1 + $0x750] ss:$8 sps:$4 sm:$0xff]   ;;  %v3648_v46 = vld [vmem:[%s4746_s1 + $0x164] ss:$8 sps:$4 sm:$0xff]  }
  0xb3   : > { %1234 = vmatpush1.bf16.msra.mxu1 %v3578_v47  ;;  %v3651_v47 = vld [vmem:[%s4746_s1 + $0x764] ss:$8 sps:$4 sm:$0xff]  }
  0xb4   : > { %2364 = vmatpush1.bf16.msra.mxu0 %v3581_v48  ;;  %1235 = vmatprep.subr.bf16.mxu1 %v3586_v50  ;;  %v3646_v48 = vld [vmem:[%s4746_s1 + $0x160] ss:$8 sps:$4 sm:$0xff]  }
  0xb5   : > { %2365 = vmatprep.subr.bf16.mxu0 %v3589_v51  ;;  %v3649_v50 = vld [vmem:[%s4746_s1 + $0x760] ss:$8 sps:$4 sm:$0xff]   ;;  %v3654_v51 = vld [vmem:[%s4746_s1 + $0x174] ss:$8 sps:$4 sm:$0xff]  }
  0xb7   : > { %1236 = vmatpush1.bf16.msra.mxu1 %v3584_v52  ;;  %v3657_v52 = vld [vmem:[%s4746_s1 + $0x774] ss:$8 sps:$4 sm:$0xff]  }
  0xb8   : > { %2366 = vmatpush1.bf16.msra.mxu0 %v3587_v55  ;;  %1237 = vmatprep.subr.bf16.mxu1 %v3592_v54  ;;  %v3652_v55 = vld [vmem:[%s4746_s1 + $0x170] ss:$8 sps:$4 sm:$0xff]  }
  0xb9   : > { %2367 = vmatprep.subr.bf16.mxu0 %v3595_v30  ;;  %v3655_v54 = vld [vmem:[%s4746_s1 + $0x770] ss:$8 sps:$4 sm:$0xff]   ;;  %v3660_v30 = vld [vmem:[%s4746_s1 + $0x184] ss:$8 sps:$4 sm:$0xff]  }
  0xbb   : > { %1238 = vmatpush1.bf16.msra.mxu1 %v3590_v56  ;;  %v3663_v56 = vld [vmem:[%s4746_s1 + $0x784] ss:$8 sps:$4 sm:$0xff]  }
  0xbc   : > { %2368 = vmatpush1.bf16.msra.mxu0 %v3593_v57  ;;  %1239 = vmatprep.subr.bf16.mxu1 %v3598_v58  ;;  %v3658_v57 = vld [vmem:[%s4746_s1 + $0x180] ss:$8 sps:$4 sm:$0xff]  }
  0xbd   : > { %2369 = vmatprep.subr.bf16.mxu0 %v3601_v59  ;;  %v3661_v58 = vld [vmem:[%s4746_s1 + $0x780] ss:$8 sps:$4 sm:$0xff]   ;;  %v3666_v59 = vld [vmem:[%s4746_s1 + $0x194] ss:$8 sps:$4 sm:$0xff]  }
  0xbf   : > { %1240 = vmatpush1.bf16.msra.mxu1 %v3596_v44  ;;  %v3664_v44 = vld [vmem:[%s4746_s1 + $0x190] ss:$8 sps:$4 sm:$0xff]  }
  0xc0   : > { %2370 = vmatpush1.bf16.msra.mxu0 %v3599_v0  ;;  %1241 = vmatprep.subr.bf16.mxu1 %v3604_v60  ;;  %v3667_v0 = vld [vmem:[%s4746_s1 + $0x790] ss:$8 sps:$4 sm:$0xff]   ;;  %v3673_v60 = vld [vmem:[%s4746_s1 + $0x7a0] ss:$8 sps:$4 sm:$0xff]  }
  0xc1   : > { %2371 = vmatprep.subr.bf16.mxu0 %v3607_v5  ;;  %v3678_v5 = vld [vmem:[%s4746_s1 + $0x1b4] ss:$8 sps:$4 sm:$0xff]  }
  0xc3   : > { %1242 = vmatpush1.bf16.msra.mxu1 %v3602_v7  ;;  %v3676_v7 = vld [vmem:[%s4746_s1 + $0x1b0] ss:$8 sps:$4 sm:$0xff]  }
  0xc4   : > { %2372 = vmatpush1.bf16.msra.mxu0 %v3605_v8  ;;  %1262 = vmatprep.subr.bf16.mxu1 %v3610_v16  ;;  %v3679_v8 = vld [vmem:[%s4746_s1 + $0x7b0] ss:$8 sps:$4 sm:$0xff]   ;;  %v3685_v16 = vld [vmem:[%s4746_s1 + $0x7c0] ss:$8 sps:$4 sm:$0xff]  }
  0xc5   : > { %2392 = vmatprep.subr.bf16.mxu0 %v3615_v49  ;;  %v3690_v49 = vld [vmem:[%s4746_s1 + $0x1d4] ss:$8 sps:$4 sm:$0xff]  }
  0xc6   : > { %1244 = vmatmul.mubr.bf16.vlgmr.msra.gmra.mrb[0].mxu1 %v3943_v63  ;;  %v3627_v63 = vld [vmem:[%s4746_s1 + $0x724] ss:$8 sps:$4 sm:$0xff]  }
  0xc7   : > { %2374 = vmatmul.mubr.bf16.vlgmr.msra.gmra.mrb[0].mxu0 %v2003_v19  ;;  %1263 = vmatpush1.bf16.msra.mxu1 %v3608_v17  ;;  %v3688_v17 = vld [vmem:[%s4746_s1 + $0x1d0] ss:$8 sps:$4 sm:$0xff]   ;;  %v3698_v19 = vld [vmem:[%s4746_s1 + $0x1e4] ss:$8 sps:$4 sm:$0xff]  }
  0xc8   : > { %2393 = vmatpush1.bf16.msra.mxu0 %v3613_v18  ;;  %1264 = vmatprep.subr.bf16.mxu1 %v3618_v20  ;;  %v3691_v18 = vld [vmem:[%s4746_s1 + $0x7d0] ss:$8 sps:$4 sm:$0xff]   ;;  %v3701_v20 = vld [vmem:[%s4746_s1 + $0x7e4] ss:$8 sps:$4 sm:$0xff]  }
  0xc9   : > { %2394 = vmatprep.subr.bf16.mxu0 %v3621_v21  ;;  %1253 = vmatprep.mubr.bf16.mxu1 %v2888_v22  ;;  %v3696_v21 = vld [vmem:[%s4746_s1 + $0x1e0] ss:$8 sps:$4 sm:$0xff]  }
  0xca   : > { %2383 = vmatprep.mubr.bf16.mxu0 %v2005_v13  ;;  %v3633_v13 = vld [vmem:[%s4746_s1 + $0x734] ss:$8 sps:$4 sm:$0xff]   ;;  %v3699_v22 = vld [vmem:[%s4746_s1 + $0x7e0] ss:$8 sps:$4 sm:$0xff]  }
  0xcb   : > { %1265 = vmatpush1.bf16.msra.mxu1 %v3616_v24  ;;  %v3707_v24 = vld [vmem:[%s4746_s1 + $0x7f4] ss:$8 sps:$4 sm:$0xff]  }
  0xcc   : > { %2395 = vmatpush1.bf16.msra.mxu0 %v3619_v26  ;;  %1266 = vmatprep.subr.bf16.mxu1 %v3624_v27  ;;  %v3702_v26 = vld [vmem:[%s4746_s1 + $0x1f0] ss:$8 sps:$4 sm:$0xff]  }
  0xcd   : > { %2396 = vmatprep.subr.bf16.mxu0 %v3627_v63  ;;  %v3705_v27 = vld [vmem:[%s4746_s1 + $0x7f0] ss:$8 sps:$4 sm:$0xff]   ;;  %v224_v63 = vld [vmem:[%s3898_s10 + $0x28] sm:$0x33]  ;;  %s3286_s10 = smul.u32 24, %s4759_s16 }
  0xce   : > { %1254 = vmatmul.mubr.bf16.gmra.mrb[4].mxu1 %v2887_v25  ;;  %v2890_v25 = vcombine.high %v224_v63, %v224_v63  ;;  %v2889_v29 = vcombine.low %v224_v63, %v224_v63 }
  0xcf   : > { %2384 = vmatmul.mubr.bf16.gmra.mrb[4].mxu0 %v2002_v14  ;;  %1267 = vmatpush1.bf16.msra.mxu1 %v3622_v32  ;;  %v3682_v14 = vld [vmem:[%s4746_s1 + $0x1c0] ss:$8 sps:$4 sm:$0xff]   ;;  %v2472_v32 = vlaneseq  ;;  %s4716_s25 = scalar_lea.vmem %s4747_s2, %s3286_s10 }
  0xd0   : > { %2397 = vmatpush1.bf16.msra.mxu0 %v3625_v33  ;;  %1268 = vmatprep.subr.bf16.mxu1 %v3630_v61 }
  0xd1   : > { %2398 = vmatprep.subr.bf16.mxu0 %v3633_v13  ;;  %1294 = vmatprep.mubr.bf16.mxu1 %v4110_v28  ;;  %v3645_v28 = vld [vmem:[%s4746_s1 + $0x754] ss:$8 sps:$4 sm:$0xff]   ;;  %v4674_v33 = vshrl.u32 %v2472_v32, 7  ;;  %vm2578_vm0 = vcmp.lt.s32.totalorder %v2472_v32, 256 }
  0xd2   : > { %2424 = vmatprep.mubr.bf16.mxu0 %v2012_v34 }
  0xd3   : > { %1269 = vmatpush1.bf16.msra.mxu1 %v3628_v35  ;;  %v2474_v61 = vadd.s32 8, %v4674_v33  ;;  %v2475_v39 = vadd.s32 16, %v4674_v33 }
  0xd4   : > { %2399 = vmatpush1.bf16.msra.mxu0 %v3631_v36  ;;  %1270 = vmatprep.subr.bf16.mxu1 %v3636_v37 }
  0xd5   : > { %2400 = vmatprep.subr.bf16.mxu0 %v3639_v38  ;;  %v4686_v35 = vmul.u32.u64.low 3435973837, %v2475_v39  ;;  %v4687_v12 = vmul.u32.u64.high 3435973837, %v2475_v39, %v4686_v35 }
  0xd7   : > { %1271 = vmatpush1.bf16.msra.mxu1 %v3634_v40  ;;  %v2504_v40 = vshrl.u32 %v4687_v12, 2 }
  0xd8   : > { %2401 = vmatpush1.bf16.msra.mxu0 %v3637_v41  ;;  %1272 = vmatprep.subr.bf16.mxu1 %v3642_v42 }
  0xd9   : > { %2402 = vmatprep.subr.bf16.mxu0 %v3645_v28  ;;  %v2505_v42 = vmul.u32 5, %v2504_v40 }
  0xdb   : > { %1273 = vmatpush1.bf16.msra.mxu1 %v3640_v43 }
  0xdc   : > { %2403 = vmatpush1.bf16.msra.mxu0 %v3643_v45  ;;  %1274 = vmatprep.subr.bf16.mxu1 %v3648_v46  ;;  %v2506_v45 = vsub.s32 %v2475_v39, %v2505_v42  ;;  %v3722_v46 = vmov 1966171168  }
  0xdd   : > { %2404 = vmatprep.subr.bf16.mxu0 %v3651_v47 }
  0xde   : > { %vm2511_vm9 = vcmp.ne.s32.totalorder %v2506_v45, 0  ;;  %vm2514_vm10 = vcmp.lt.s32.totalorder %v2506_v45, 0 }
  0xdf   : > { %1275 = vmatpush1.bf16.msra.mxu1 %v3646_v48  ;;  %vm4707_vm13 = vmand %vm2514_vm10, %vm2511_vm9 }
  0xe0   : > { %2405 = vmatpush1.bf16.msra.mxu0 %v3649_v50  ;;  %1276 = vmatprep.subr.bf16.mxu1 %v3654_v51 }
  0xe1   : > { %2406 = vmatprep.subr.bf16.mxu0 %v3657_v52 }
  0xe3   : > { %1277 = vmatpush1.bf16.msra.mxu1 %v3652_v55 }
  0xe4   : > { %2407 = vmatpush1.bf16.msra.mxu0 %v3655_v54  ;;  %1278 = vmatprep.subr.bf16.mxu1 %v3660_v30 }
  0xe5   : > { %2408 = vmatprep.subr.bf16.mxu0 %v3663_v56  ;;  %v2520_v56 = vadd.s32 5, %v2506_v45 }
  0xe7   : > { %1279 = vmatpush1.bf16.msra.mxu1 %v3658_v57 }
  0xe8   : > { %2409 = vmatpush1.bf16.msra.mxu0 %v3661_v58  ;;  %1280 = vmatprep.subr.bf16.mxu1 %v3666_v59 }
  0xe9   : > { %2410 = vmatprep.subr.bf16.mxu0 %v3669_v62 }
  0xeb   : > { %1281 = vmatpush1.bf16.msra.mxu1 %v3664_v44 }
  0xec   : > { %2411 = vmatpush1.bf16.msra.mxu0 %v3667_v0  ;;  %1282 = vmatprep.subr.bf16.mxu1 %v3672_v1 }
  0xed   : > { %2412 = vmatprep.subr.bf16.mxu0 %v3675_v2 }
  0xef   : > { %1283 = vmatpush1.bf16.msra.mxu1 %v3670_v3 }
  0xf0   : > { %2413 = vmatpush1.bf16.msra.mxu0 %v3673_v60  ;;  %1284 = vmatprep.subr.bf16.mxu1 %v3678_v5 }
  0xf1   : > { %2414 = vmatprep.subr.bf16.mxu0 %v3681_v6 }
  0xf3   : > { %1285 = vmatpush1.bf16.msra.mxu1 %v3676_v7 }
  0xf4   : > { %2415 = vmatpush1.bf16.msra.mxu0 %v3679_v8  ;;  %1286 = vmatprep.subr.bf16.mxu1 %v3684_v10  ;;  %v2523_v10 = vsel %vm4707_vm13, %v2520_v56, %v2506_v45 }
  0xf5   : > { %2416 = vmatprep.subr.bf16.mxu0 %v3687_v11  ;;  %vm2526_vm14 = vcmp.ne.s32.totalorder %v2523_v10, 4 }
  0xf7   : > { %1287 = vmatpush1.bf16.msra.mxu1 %v3682_v14 }
  0xf8   : > { %2417 = vmatpush1.bf16.msra.mxu0 %v3685_v16  ;;  %1288 = vmatprep.subr.bf16.mxu1 %v3690_v49 }
  0xf9   : > { %2418 = vmatprep.subr.bf16.mxu0 %v3693_v53 }
  0xfb   : > { %1289 = vmatpush1.bf16.msra.mxu1 %v3688_v17 }
  0xfc   : > { %2419 = vmatpush1.bf16.msra.mxu0 %v3691_v18  ;;  %1290 = vmatprep.subr.bf16.mxu1 %v3698_v19 }
  0xfd   : > { %2420 = vmatprep.subr.bf16.mxu0 %v3701_v20 }
  0xff   : > { %1291 = vmatpush1.bf16.msra.mxu1 %v3696_v21 }
 0x100   : > { %2421 = vmatpush1.bf16.msra.mxu0 %v3699_v22  ;;  %1292 = vmatprep.subr.bf16.mxu1 %v3704_v23 }
 0x101   : > { %2422 = vmatprep.subr.bf16.mxu0 %v3707_v24 }
 0x103   : > { %1293 = vmatpush1.bf16.msra.mxu1 %v3702_v26 }
 0x104   : > { %2423 = vmatpush1.bf16.msra.mxu0 %v3705_v27 }
 0x106   : > { %1295 = vmatmul.mubr.bf16.vlgmr.msra.gmra.mrb[0].mxu1 %v4190_v9  ;;  %v4678_v13 = vmul.u32.u64.low 3435973837, %v4674_v33  ;;  %v4679_v9 = vmul.u32.u64.high 3435973837, %v4674_v33, %v4678_v13 }
 0x107   : > { %2425 = vmatmul.mubr.bf16.vlgmr.msra.gmra.mrb[0].mxu0 %v4461_v15  ;;  %1304 = vmatprep.mubr.bf16.mxu1 %v2890_v25  ;;  %v4681_v15 = vmul.u32.u64.low 3435973837, %v2474_v61  ;;  %v4682_v34 = vmul.u32.u64.high 3435973837, %v2474_v61, %v4681_v15 }
 0x108   : > { %2434 = vmatprep.mubr.bf16.mxu0 %v2011_v31  ;;  %v2482_v31 = vshrl.u32 %v4679_v9, 2 }
 0x10a   : > { %v2483_v36 = vmul.u32 5, %v2482_v31 }
 0x10c   : > { %v2484_v38 = vsub.s32 %v4674_v33, %v2483_v36 }
 0x10e   : > { %1305 = vmatmul.mubr.bf16.gmra.mrb[4].mxu1 %v2889_v29  ;;  %vm2509_vm3 = vcmp.ne.s32.totalorder %v2484_v38, 0  ;;  %vm2512_vm4 = vcmp.lt.s32.totalorder %v2484_v38, 0  ;;  %v2518_v28 = vadd.s32 5, %v2484_v38 }
 0x10f   : > { %2435 = vmatmul.mubr.bf16.gmra.mrb[4].mxu0 %v2008_v4  ;;  %v2493_v4 = vshrl.u32 %v4682_v34, 2  ;;  %vm2515_vm7 = vmand %vm2512_vm4, %vm2509_vm3 }
 0x110   : > { %v2521_v47 = vsel %vm2515_vm7, %v2518_v28, %v2484_v38 }
 0x111   : > { %v2494_v37 = vmul.u32 5, %v2493_v4  ;;  %vm4699_vm11 = vcmp.ne.s32.totalorder %v2521_v47, 4  ;;  %v2562_v47 = vunpack.c.l.s4 %v3722_v46 }
 0x113   : > { %v2495_v41 = vsub.s32 %v2474_v61, %v2494_v37 }
 0x115   : > { %vm2510_vm5 = vcmp.ne.s32.totalorder %v2495_v41, 0  ;;  %vm2513_vm6 = vcmp.lt.s32.totalorder %v2495_v41, 0  ;;  %v2519_v43 = vadd.s32 5, %v2495_v41 }
 0x116   : > { %vm4692_vm8 = vmand %vm2513_vm6, %vm2510_vm5 }
 0x117   : > { %v2522_v48 = vsel %vm4692_vm8, %v2519_v43, %v2495_v41 }
 0x118   : > { %vm4703_vm12 = vcmp.ne.s32.totalorder %v2522_v48, 4 }
 0x1d9   : > { %v1296_v50 = vpop.f32.mrb[0].mxu1 }
 0x1da   : > { %v2426_v51 = vpop.f32.mrb[0].mxu0  ;;  %v1298_v54 = vpop.f32.mrb[1].mxu1 }
 0x1db   : > { %v3232_v55 = vadd.f32 %v2426_v51, %v1296_v50  ;;  %v2428_v30 = vpop.f32.mrb[1].mxu0  ;;  %v1300_v58 = vpop.f32.mrb[2].mxu1 }
 0x1dc   : > { %v3233_v57 = vadd.f32 %v2428_v30, %v1298_v54  ;;  %v2430_v59 = vpop.f32.mrb[2].mxu0  ;;  %v1302_v2 = vpop.f32.mrb[3].mxu1 }
 0x1dd   : > { %v2533_v0 = vsel %vm4699_vm11, %v3232_v55, 0.0  ;;  %v3234_v1 = vadd.f32 %v2430_v59, %v1300_v58  ;;  %v2432_v3 = vpop.f32.mrb[3].mxu0 }
 0x1de   : > { %v3229_v60 = vpack.c.bf16 %v3233_v57, %v3232_v55  ;;  %v2534_v5 = vsel %vm4699_vm11, %v3233_v57, 0.0  ;;  %v3235_v6 = vadd.f32 %v2432_v3, %v1302_v2  ;;  %v2581_v7 = vmul.f32 %v2533_v0, %v2533_v0 }
 0x1df   : > { %v2535_v8 = vsel %vm4703_vm12, %v3234_v1, 0.0  ;;  %v2582_v53 = vmul.f32 %v2534_v5, %v2534_v5  ;;  %v2563_v57 = vunpack.c.0.s8 %v2562_v47 }
 0x1e0   : > { %2469 = vst [vmem:[%s4716_s25] sm:$0xff] %v3229_v60  ;;  %v2539_v11 = vadd.f32 %v2535_v8, %v2533_v0  ;;  %v2583_v14 = vmul.f32 %v2535_v8, %v2535_v8  ;;  %v3230_v16 = vpack.c.bf16 %v3235_v6, %v3234_v1  ;;  %v2536_v49 = vsel %vm4703_vm12, %v3235_v6, 0.0 }
 0x1e1   : > { %v2549_v17 = vadd.f32 %v2536_v49, %v2534_v5  ;;  %v2584_v18 = vmul.f32 %v2536_v49, %v2536_v49  ;;  %v1306_v20 = vpop.f32.mrb[4].mxu1  ;;  %v2566_v60 = vsub.s32 %v2563_v57, %v4674_v33 }
 0x1e2   : > { %v2587_v19 = vadd.f32 %v2583_v14, %v2581_v7  ;;  %2470 = vst [vmem:[%s4716_s25 + $0x8] sm:$0xff] %v3230_v16  ;;  %v2436_v21 = vpop.f32.mrb[4].mxu0  ;;  %v1308_v24 = vpop.f32.mrb[5].mxu1 }
 0x1e3   : > { %v2596_v22 = vadd.f32 %v2584_v18, %v2582_v53  ;;  %v3236_v23 = vadd.f32 %v2436_v21, %v1306_v20  ;;  %v2438_v26 = vpop.f32.mrb[5].mxu0  ;;  %v1310_v63 = vpop.f32.mrb[6].mxu1 }
 0x1e4   : > { %v3237_v27 = vadd.f32 %v2438_v26, %v1308_v24  ;;  %v2440_v25 = vpop.f32.mrb[6].mxu0  ;;  %v1311_v61 = vpop.f32.mrb[7].mxu1 }
 0x1e5   : > { %v2537_v29 = vsel %vm2526_vm14, %v3236_v23, 0.0  ;;  %v2441_v13 = vpop.f32.mrb[7].mxu0 }
 0x1e6   : > { %v2541_v9 = vsel %vm2540_vm15, %v2537_v29, 0.0  ;;  %v2585_v15 = vmul.f32 %v2537_v29, %v2537_v29  ;;  %v3231_v34 = vpack.c.bf16 %v3237_v27, %v3236_v23  ;;  %v2538_v39 = vsel %vm2526_vm14, %v3237_v27, 0.0 }
 0x1e7   : > { %v2542_v31 = vadd.f32 %v2541_v9, %v2539_v11  ;;  %v2550_v35 = vsel %vm2540_vm15, %v2538_v39, 0.0  ;;  %v2586_v12 = vmul.f32 %v2538_v39, %v2538_v39 }
 0x1e8   : > { %v2588_v4 = vsel %vm2540_vm15, %v2585_v15, 0.0  ;;  %2471 = vst [vmem:[%s4716_s25 + $0x10] sm:$0x33] %v3231_v34  ;;  %v2551_v36 = vadd.f32 %v2550_v35, %v2549_v17 }
 0x1e9   : > { %v2543_v37 = vrot.slane %v2542_v31, 4  ;;  %v2589_v38 = vadd.f32 %v2588_v4, %v2587_v19  ;;  %v2597_v40 = vsel %vm2540_vm15, %v2586_v12, 0.0 }
 0x1ea   : > { %v2552_v41 = vrot.slane %v2551_v36, 4  ;;  %v2598_v42 = vadd.f32 %v2597_v40, %v2596_v22 }
 0x1eb   : > { %v2544_v28 = vadd.f32 %v2543_v37, %v2542_v31  ;;  %v2590_v43 = vrot.slane %v2589_v38, 4 }
 0x1ec   : > { %v2553_v45 = vadd.f32 %v2552_v41, %v2551_v36  ;;  %v2599_v48 = vrot.slane %v2598_v42, 4 }
 0x1ed   : > { %v2545_v50 = vrot.slane %v2544_v28, 2  ;;  %v2591_v51 = vadd.f32 %v2590_v43, %v2589_v38 }
 0x1ee   : > { %v2554_v52 = vrot.slane %v2553_v45, 2  ;;  %v2600_v55 = vadd.f32 %v2599_v48, %v2598_v42 }
 0x1ef   : > { %v2546_v54 = vadd.f32 %v2545_v50, %v2544_v28  ;;  %v2592_v30 = vrot.slane %v2591_v51, 2 }
 0x1f0   : > { %v2555_v56 = vadd.f32 %v2554_v52, %v2553_v45  ;;  %v2601_v58 = vrot.slane %v2600_v55, 2 }
 0x1f1   : > { %v2547_v59 = vrot.slane %v2546_v54, 1  ;;  %v2593_v62 = vadd.f32 %v2592_v30, %v2591_v51 }
 0x1f2   : > { %v2556_v44 = vrot.slane %v2555_v56, 1  ;;  %v2602_v0 = vadd.f32 %v2601_v58, %v2600_v55 }
 0x1f3   : > { %v2548_v1 = vadd.f32 %v2547_v59, %v2546_v54  ;;  %v2594_v2 = vrot.slane %v2593_v62, 1 }
 0x1f4   : > { %v2557_v3 = vadd.f32 %v2556_v44, %v2555_v56  ;;  %v2603_v5 = vrot.slane %v2602_v0, 1 }
 0x1f5   : > { %v2595_v6 = vadd.f32 %v2594_v2, %v2593_v62 }
 0x1f6   : > { %v2560_v7 = vcombine.low %v2548_v1, %v2557_v3  ;;  %v2604_v8 = vadd.f32 %v2603_v5, %v2602_v0 }
 0x1f8   : > { %v2567_v10 = vrot.slane %v2560_v7, %v2566_v60  ;;  %v2607_v11 = vcombine.low %v2595_v6, %v2604_v8 }
 0x1fa   : > { %v2574_v14 = vrot.slane %v2567_v10, %v2566_v60  ;;  %v2614_v16 = vrot.slane %v2607_v11, %v2566_v60 }
 0x1fc   : > { %2580 = vst.msk [vmem:[%s214_s29] sm:$0x3] %vm2578_vm0, %v2574_v14  ;;  %v2621_v33 = vrot.slane %v2614_v16, %v2566_v60 }
 0x1fe   : > { %2623 = vst.msk [vmem:[%s218_s6] sm:$0x3] %vm2578_vm0, %v2621_v33 }
 0x1ff PF: > { %s15_s15 = sadd.s32 1, %s3720_s15  }
 0x200   : > { %p12_p4 = scmp.ge.s32.totalorder %s15_s15, 4  }
 0x202   :  { %14 = sbr.rel (!%p12_p4) target bundleno = 1 (0x1), region = 85 }

</bundles_post_ra>
